<compile_context>
chip_gen: v7x
topology: tpu7x:2x2x1
jax: 0.10.0
libtpu: 0.0.40
codegen_flags: <defaults>
</compile_context>

<pallas_src>
import math

import jax
import jax.numpy as jnp
from jax import lax
from jax.experimental import pallas as pl
from jax.experimental.pallas import tpu as pltpu

# ----- small but module-consistent dims (d_model=512 matches FFN(in_shape=512))
B, S = 2, 8
VOCAB = 64
D = 512
H = 4
DH = D // H          # 128 (lane-aligned head dim)
INTER = 1024
FFN_HIDDEN = 256

NEG_INF = -1e9


# --------------------------------------------------------------------------
# Single fused Pallas kernel: entire forward, VMEM resident.
# --------------------------------------------------------------------------
def _fused_forward_kernel(
        x_ref, mask_ref,
        ln1_g_ref, ln1_b_ref, w_qkv_ref, b_qkv_ref, w_o_ref, b_o_ref,
        ln2_g_ref, ln2_b_ref, w_up_ref, b_up_ref, w_down_ref, b_down_ref,
        lnf_g_ref, lnf_b_ref, fw1_ref, fb1_ref, fw2_ref, fb2_ref,
        out_ref, emb_ref,
        ctx_ref):
    """x_ref: (B*S, D) f32 embedded tokens; mask_ref: (B, S) f32 attention mask."""

    def ln(v, g_ref, b_ref):
        # f32 elementwise math (v5e has no bf16 VPU/EUP path).
        mu = jnp.mean(v, axis=-1, keepdims=True)
        var = jnp.mean(jnp.square(v - mu), axis=-1, keepdims=True)
        return (v - mu) * lax.rsqrt(var + 1e-5) * g_ref[...] + b_ref[...]

    def mm(a_f32, w_ref, b_ref):
        # bf16 operands on the MXU, f32 accumulation.
        y = jnp.dot(a_f32.astype(jnp.bfloat16), w_ref[...],
                    preferred_element_type=jnp.float32)
        return y + b_ref[...]

    x = x_ref[...].astype(jnp.float32)                               # (B*S, D)

    # ---------------- attention block (pre-LN) ----------------------------
    h1 = ln(x, ln1_g_ref, ln1_b_ref)
    qkv = mm(h1, w_qkv_ref, b_qkv_ref)                               # (B*S, 3D) f32

    scale = 1.0 / math.sqrt(DH)
    for b in range(B):                                               # B=2, H=4: static unroll
        mrow = mask_ref[pl.ds(b, 1), :]                              # (1, S)
        bias_b = jnp.where(mrow > 0.0, 0.0, NEG_INF)                 # additive key bias
        for h in range(H):
            q = qkv[b * S:(b + 1) * S, h * DH:(h + 1) * DH]                     # (S, DH)
            k = qkv[b * S:(b + 1) * S, D + h * DH:D + (h + 1) * DH]             # (S, DH)
            v = qkv[b * S:(b + 1) * S, 2 * D + h * DH:2 * D + (h + 1) * DH]     # (S, DH)
            s = lax.dot_general(q.astype(jnp.bfloat16), k.astype(jnp.bfloat16),
                                (((1,), (1,)), ((), ())),
                                preferred_element_type=jnp.float32)  # (S, S)
            s = s * scale + bias_b
            s = s - jnp.max(s, axis=-1, keepdims=True)
            p = jnp.exp(s)
            p = p * pl.reciprocal(jnp.sum(p, axis=-1, keepdims=True), approx=True)
            ctx = jnp.dot(p.astype(jnp.bfloat16), v.astype(jnp.bfloat16),
                          preferred_element_type=jnp.float32)        # (S, DH)
            # Write straight back into (B*S, D) layout -> no wrapper transpose.
            ctx_ref[pl.ds(b * S, S), pl.ds(h * DH, DH)] = ctx

    x = x + mm(ctx_ref[...], w_o_ref, b_o_ref)                       # out-proj + residual

    # ---------------- MLP block (pre-LN) ----------------------------------
    h2 = ln(x, ln2_g_ref, ln2_b_ref)
    up = jax.nn.gelu(mm(h2, w_up_ref, b_up_ref))                     # (B*S, INTER)
    x = x + mm(up, w_down_ref, b_down_ref)                           # residual

    # ---------------- final LN + unmasked mean pool ------------------------
    # Reference does torch.mean(embedding, dim=1): plain (unmasked) mean.
    hidden = ln(x, lnf_g_ref, lnf_b_ref)                             # (B*S, D)
    rows = [jnp.mean(hidden[b * S:(b + 1) * S, :], axis=0, keepdims=True)
            for b in range(B)]
    emb = jnp.concatenate(rows, axis=0)                              # (B, D)

    # ---------------- FFN head: Linear -> ReLU -> Linear -------------------
    z = jnp.maximum(mm(emb, fw1_ref, fb1_ref), 0.0)                  # (B, FFN_HIDDEN)
    out = mm(z, fw2_ref, fb2_ref)                                    # (B, 1)

    out_ref[...] = out.astype(out_ref.dtype)
    emb_ref[...] = emb.astype(emb_ref.dtype)


def _full_spec(shape):
    nd = len(shape)
    return pl.BlockSpec(shape, lambda i, _nd=nd: (0,) * _nd)


def combined_model_forward(params, input_ids, attention_mask):
    p = params
    # Synthetic stand-in for the pretrained nucleotide transformer backbone.
    # TODO(synk): real HF checkpoint weights / rotary embeddings / 12-layer
    # stack cannot be loaded in-script; one synthetic pre-LN layer stands in.
    x = p["tok_emb"][input_ids].reshape(B * S, D)        # token-embedding gather (glue)
    mask_f = attention_mask.astype(jnp.float32)          # (B, S)

    args = (x, mask_f,
            p["ln1_g"], p["ln1_b"], p["w_qkv"], p["b_qkv"], p["w_o"], p["b_o"],
            p["ln2_g"], p["ln2_b"], p["w_up"], p["b_up"], p["w_down"], p["b_down"],
            p["lnf_g"], p["lnf_b"], p["ffn_w1"], p["ffn_b1"], p["ffn_w2"], p["ffn_b2"])

    out, emb = pl.pallas_call(
        _fused_forward_kernel,
        out_shape=(jax.ShapeDtypeStruct((B, 1), jnp.float32),
                   jax.ShapeDtypeStruct((B, D), jnp.float32)),
        grid=(1,),
        in_specs=[_full_spec(a.shape) for a in args],
        out_specs=(_full_spec((B, 1)), _full_spec((B, D))),
        scratch_shapes=[pltpu.VMEM((B * S, D), jnp.float32)],        # context slab
        compiler_params=pltpu.CompilerParams(
            dimension_semantics=("arbitrary",)),
    )(*args)
    return out, emb


# --------------------------------------------------------------------------
# Parameters (deterministic, synthetic). Matmul weights stored in bf16.
# --------------------------------------------------------------------------
def init_params(key):
    ks = jax.random.split(key, 7)
    sc = 0.02

    def nrm(k, shp, dt=jnp.float32):
        return (sc * jax.random.normal(k, shp, jnp.float32)).astype(dt)

    ones = lambda shp: jnp.ones(shp, jnp.float32)
    zeros = lambda shp: jnp.zeros(shp, jnp.float32)
    return dict(
        tok_emb=nrm(ks[0], (VOCAB, D)),
        ln1_g=ones((1, D)), ln1_b=zeros((1, D)),
        w_qkv=nrm(ks[1], (D, 3 * D), jnp.bfloat16), b_qkv=zeros((1, 3 * D)),
        w_o=nrm(ks[2], (D, D), jnp.bfloat16), b_o=zeros((1, D)),
        ln2_g=ones((1, D)), ln2_b=zeros((1, D)),
        w_up=nrm(ks[3], (D, INTER), jnp.bfloat16), b_up=zeros((1, INTER)),
        w_down=nrm(ks[4], (INTER, D), jnp.bfloat16), b_down=zeros((1, D)),
        lnf_g=ones((1, D)), lnf_b=zeros((1, D)),
        ffn_w1=nrm(ks[5], (D, FFN_HIDDEN), jnp.bfloat16), ffn_b1=zeros((1, FFN_HIDDEN)),
        ffn_w2=nrm(ks[6], (FFN_HIDDEN, 1), jnp.bfloat16), ffn_b2=zeros((1, 1)),
    )


if __name__ == "__main__":
    key = jax.random.PRNGKey(0)
    pkey, ikey = jax.random.split(key)
    params = init_params(pkey)

    input_ids = jax.random.randint(ikey, (B, S), 0, VOCAB, dtype=jnp.int32)
    attention_mask = jnp.array([[1] * S, [1] * (S - 2) + [0] * 2], dtype=jnp.int32)

    fwd = jax.jit(combined_model_forward)
    out, emb = fwd(params, input_ids, attention_mask)
    jax.block_until_ready((out, emb))

    assert out.shape == (B, 1), out.shape
    assert emb.shape == (B, D), emb.shape
    assert jnp.all(jnp.isfinite(out)) and jnp.all(jnp.isfinite(emb))
    print("KERNEL_OK")
</pallas_src>

<mosaic_0001>
module attributes {stable_mosaic.version = 11 : i64} {
  func.func @_fused_forward_kernel(%arg0: i32, %arg1: memref<16x512xf32, #tpu.memory_space<vmem>>, %arg2: memref<2x8xf32, #tpu.memory_space<vmem>>, %arg3: memref<1x512xf32, #tpu.memory_space<vmem>>, %arg4: memref<1x512xf32, #tpu.memory_space<vmem>>, %arg5: memref<512x1536xbf16, #tpu.memory_space<vmem>>, %arg6: memref<1x1536xf32, #tpu.memory_space<vmem>>, %arg7: memref<512x512xbf16, #tpu.memory_space<vmem>>, %arg8: memref<1x512xf32, #tpu.memory_space<vmem>>, %arg9: memref<1x512xf32, #tpu.memory_space<vmem>>, %arg10: memref<1x512xf32, #tpu.memory_space<vmem>>, %arg11: memref<512x1024xbf16, #tpu.memory_space<vmem>>, %arg12: memref<1x1024xf32, #tpu.memory_space<vmem>>, %arg13: memref<1024x512xbf16, #tpu.memory_space<vmem>>, %arg14: memref<1x512xf32, #tpu.memory_space<vmem>>, %arg15: memref<1x512xf32, #tpu.memory_space<vmem>>, %arg16: memref<1x512xf32, #tpu.memory_space<vmem>>, %arg17: memref<512x256xbf16, #tpu.memory_space<vmem>>, %arg18: memref<1x256xf32, #tpu.memory_space<vmem>>, %arg19: memref<256x1xbf16, #tpu.memory_space<vmem>>, %arg20: memref<1x1xf32, #tpu.memory_space<vmem>>, %arg21: memref<2x1xf32, #tpu.memory_space<vmem>>, %arg22: memref<2x512xf32, #tpu.memory_space<vmem>>, %arg23: memref<16x512xf32, #tpu.memory_space<vmem>>) attributes {dimension_semantics = [#tpu.dimension_semantics<arbitrary>], iteration_bounds = array<i64: 1>, scalar_prefetch = 0 : i64, scratch_operands = 1 : i64, tpu.core_type = #tpu.core_type<tc>, window_params = [{pipeline_mode = #tpu.pipeline_mode<synchronous>, transform_indices = @transform_0, window_bounds = array<i64: 16, 512>}, {pipeline_mode = #tpu.pipeline_mode<synchronous>, transform_indices = @transform_1, window_bounds = array<i64: 2, 8>}, {pipeline_mode = #tpu.pipeline_mode<synchronous>, transform_indices = @transform_2, window_bounds = array<i64: 1, 512>}, {pipeline_mode = #tpu.pipeline_mode<synchronous>, transform_indices = @transform_3, window_bounds = array<i64: 1, 512>}, {pipeline_mode = #tpu.pipeline_mode<synchronous>, transform_indices = @transform_4, window_bounds = array<i64: 512, 1536>}, {pipeline_mode = #tpu.pipeline_mode<synchronous>, transform_indices = @transform_5, window_bounds = array<i64: 1, 1536>}, {pipeline_mode = #tpu.pipeline_mode<synchronous>, transform_indices = @transform_6, window_bounds = array<i64: 512, 512>}, {pipeline_mode = #tpu.pipeline_mode<synchronous>, transform_indices = @transform_7, window_bounds = array<i64: 1, 512>}, {pipeline_mode = #tpu.pipeline_mode<synchronous>, transform_indices = @transform_8, window_bounds = array<i64: 1, 512>}, {pipeline_mode = #tpu.pipeline_mode<synchronous>, transform_indices = @transform_9, window_bounds = array<i64: 1, 512>}, {pipeline_mode = #tpu.pipeline_mode<synchronous>, transform_indices = @transform_10, window_bounds = array<i64: 512, 1024>}, {pipeline_mode = #tpu.pipeline_mode<synchronous>, transform_indices = @transform_11, window_bounds = array<i64: 1, 1024>}, {pipeline_mode = #tpu.pipeline_mode<synchronous>, transform_indices = @transform_12, window_bounds = array<i64: 1024, 512>}, {pipeline_mode = #tpu.pipeline_mode<synchronous>, transform_indices = @transform_13, window_bounds = array<i64: 1, 512>}, {pipeline_mode = #tpu.pipeline_mode<synchronous>, transform_indices = @transform_14, window_bounds = array<i64: 1, 512>}, {pipeline_mode = #tpu.pipeline_mode<synchronous>, transform_indices = @transform_15, window_bounds = array<i64: 1, 512>}, {pipeline_mode = #tpu.pipeline_mode<synchronous>, transform_indices = @transform_16, window_bounds = array<i64: 512, 256>}, {pipeline_mode = #tpu.pipeline_mode<synchronous>, transform_indices = @transform_17, window_bounds = array<i64: 1, 256>}, {pipeline_mode = #tpu.pipeline_mode<synchronous>, transform_indices = @transform_18, window_bounds = array<i64: 256, 1>}, {pipeline_mode = #tpu.pipeline_mode<synchronous>, transform_indices = @transform_19, window_bounds = array<i64: 1, 1>}, {pipeline_mode = #tpu.pipeline_mode<synchronous>, transform_indices = @transform_20, window_bounds = array<i64: 2, 1>}, {pipeline_mode = #tpu.pipeline_mode<synchronous>, transform_indices = @transform_21, window_bounds = array<i64: 2, 512>}]} {
    %c0 = arith.constant 0 : index
    %c0_0 = arith.constant 0 : index
    %0 = vector.load %arg1[%c0, %c0_0] : memref<16x512xf32, #tpu.memory_space<vmem>>, vector<16x512xf32>
    %cst = arith.constant dense<0.000000e+00> : vector<16xf32>
    %1 = vector.multi_reduction <add>, %0, %cst [1] : vector<16x512xf32> to vector<16xf32>
    %2 = vector.shape_cast %1 : vector<16xf32> to vector<16x1xf32>
    %cst_1 = arith.constant 5.120000e+02 : f32
    %3 = vector.broadcast %cst_1 : f32 to vector<16x1xf32>
    %4 = arith.divf %2, %3 : vector<16x1xf32>
    %5 = vector.broadcast %4 : vector<16x1xf32> to vector<16x512xf32>
    %6 = arith.subf %0, %5 : vector<16x512xf32>
    %7 = arith.mulf %6, %6 : vector<16x512xf32>
    %cst_2 = arith.constant dense<0.000000e+00> : vector<16xf32>
    %8 = vector.multi_reduction <add>, %7, %cst_2 [1] : vector<16x512xf32> to vector<16xf32>
    %9 = vector.shape_cast %8 : vector<16xf32> to vector<16x1xf32>
    %cst_3 = arith.constant 5.120000e+02 : f32
    %10 = vector.broadcast %cst_3 : f32 to vector<16x1xf32>
    %11 = arith.divf %9, %10 : vector<16x1xf32>
    %12 = vector.broadcast %4 : vector<16x1xf32> to vector<16x512xf32>
    %13 = arith.subf %0, %12 : vector<16x512xf32>
    %cst_4 = arith.constant 9.99999974E-6 : f32
    %14 = vector.broadcast %cst_4 : f32 to vector<16x1xf32>
    %15 = arith.addf %11, %14 : vector<16x1xf32>
    %16 = math.rsqrt %15 : vector<16x1xf32>
    %17 = vector.broadcast %16 : vector<16x1xf32> to vector<16x512xf32>
    %18 = arith.mulf %13, %17 : vector<16x512xf32>
    %c0_5 = arith.constant 0 : index
    %c0_6 = arith.constant 0 : index
    %19 = vector.load %arg3[%c0_5, %c0_6] : memref<1x512xf32, #tpu.memory_space<vmem>>, vector<1x512xf32>
    %20 = vector.broadcast %19 : vector<1x512xf32> to vector<16x512xf32>
    %21 = arith.mulf %18, %20 : vector<16x512xf32>
    %c0_7 = arith.constant 0 : index
    %c0_8 = arith.constant 0 : index
    %22 = vector.load %arg4[%c0_7, %c0_8] : memref<1x512xf32, #tpu.memory_space<vmem>>, vector<1x512xf32>
    %23 = vector.broadcast %22 : vector<1x512xf32> to vector<16x512xf32>
    %24 = arith.addf %21, %23 : vector<16x512xf32>
    %25 = arith.truncf %24 : vector<16x512xf32> to vector<16x512xbf16>
    %c0_9 = arith.constant 0 : index
    %c0_10 = arith.constant 0 : index
    %26 = vector.load %arg5[%c0_9, %c0_10] : memref<512x1536xbf16, #tpu.memory_space<vmem>>, vector<512x1536xbf16>
    %cst_11 = arith.constant dense<0.000000e+00> : vector<16x1536xf32>
    %27 = tpu.matmul %25, %26, %cst_11 {dimension_numbers = #tpu.dot_dimension_numbers<[1], [0], [0], [1], [0, 0, 1, 1], [], []>} : vector<16x512xbf16>, vector<512x1536xbf16>, vector<16x1536xf32> -> vector<16x1536xf32>
    %c0_12 = arith.constant 0 : index
    %c0_13 = arith.constant 0 : index
    %28 = vector.load %arg6[%c0_12, %c0_13] : memref<1x1536xf32, #tpu.memory_space<vmem>>, vector<1x1536xf32>
    %29 = vector.broadcast %28 : vector<1x1536xf32> to vector<16x1536xf32>
    %30 = arith.addf %27, %29 : vector<16x1536xf32>
    %c0_14 = arith.constant 0 : index
    %c0_15 = arith.constant 0 : index
    %31 = vector.load %arg2[%c0_14, %c0_15] : memref<2x8xf32, #tpu.memory_space<vmem>>, vector<1x8xf32>
    %cst_16 = arith.constant 0.000000e+00 : f32
    %32 = vector.broadcast %cst_16 : f32 to vector<1x8xf32>
    %33 = arith.cmpf ogt, %31, %32 : vector<1x8xf32>
    %cst_17 = arith.constant 0.000000e+00 : f32
    %cst_18 = arith.constant -1.000000e+09 : f32
    %34 = vector.broadcast %cst_17 : f32 to vector<1x8xf32>
    %35 = vector.broadcast %cst_18 : f32 to vector<1x8xf32>
    %36 = arith.select %33, %34, %35 : vector<1x8xi1>, vector<1x8xf32>
    %37 = vector.extract_strided_slice %30 {offsets = [0, 0], sizes = [8, 128], strides = [1, 1]} : vector<16x1536xf32> to vector<8x128xf32>
    %38 = vector.extract_strided_slice %30 {offsets = [0, 512], sizes = [8, 128], strides = [1, 1]} : vector<16x1536xf32> to vector<8x128xf32>
    %39 = vector.extract_strided_slice %30 {offsets = [0, 1024], sizes = [8, 128], strides = [1, 1]} : vector<16x1536xf32> to vector<8x128xf32>
    %40 = arith.truncf %37 : vector<8x128xf32> to vector<8x128xbf16>
    %41 = arith.truncf %38 : vector<8x128xf32> to vector<8x128xbf16>
    %cst_19 = arith.constant dense<0.000000e+00> : vector<8x8xf32>
    %42 = tpu.matmul %40, %41, %cst_19 {dimension_numbers = #tpu.dot_dimension_numbers<[1], [1], [0], [0], [0, 0, 1, 0], [], []>} : vector<8x128xbf16>, vector<8x128xbf16>, vector<8x8xf32> -> vector<8x8xf32>
    %cst_20 = arith.constant 0.0883883461 : f32
    %43 = vector.broadcast %cst_20 : f32 to vector<8x8xf32>
    %44 = arith.mulf %42, %43 : vector<8x8xf32>
    %45 = vector.broadcast %36 : vector<1x8xf32> to vector<8x8xf32>
    %46 = arith.addf %44, %45 : vector<8x8xf32>
    %cst_21 = arith.constant dense<0xFF800000> : vector<8xf32>
    %47 = vector.multi_reduction <maximumf>, %46, %cst_21 [1] : vector<8x8xf32> to vector<8xf32>
    %48 = vector.shape_cast %47 : vector<8xf32> to vector<8x1xf32>
    %49 = vector.broadcast %48 : vector<8x1xf32> to vector<8x8xf32>
    %50 = arith.subf %46, %49 : vector<8x8xf32>
    %51 = math.exp %50 : vector<8x8xf32>
    %cst_22 = arith.constant dense<0.000000e+00> : vector<8xf32>
    %52 = vector.multi_reduction <add>, %51, %cst_22 [1] : vector<8x8xf32> to vector<8xf32>
    %53 = vector.shape_cast %52 : vector<8xf32> to vector<8x1xf32>
    %54 = tpu.reciprocal %53 {approx = true} : vector<8x1xf32> -> vector<8x1xf32>
    %55 = vector.broadcast %54 : vector<8x1xf32> to vector<8x8xf32>
    %56 = arith.mulf %51, %55 : vector<8x8xf32>
    %57 = arith.truncf %56 : vector<8x8xf32> to vector<8x8xbf16>
    %58 = arith.truncf %39 : vector<8x128xf32> to vector<8x128xbf16>
    %cst_23 = arith.constant dense<0.000000e+00> : vector<8x128xf32>
    %59 = tpu.matmul %57, %58, %cst_23 {dimension_numbers = #tpu.dot_dimension_numbers<[1], [0], [0], [1], [0, 0, 1, 1], [], []>} : vector<8x8xbf16>, vector<8x128xbf16>, vector<8x128xf32> -> vector<8x128xf32>
    %c0_24 = arith.constant 0 : index
    %c0_25 = arith.constant 0 : index
    %60 = vector.load %arg23[%c0_24, %c0_25] : memref<16x512xf32, #tpu.memory_space<vmem>>, vector<8x128xf32>
    tpu.vector_store %arg23[%c0_24, %c0_25], %59 {strides = array<i32>} : memref<16x512xf32, #tpu.memory_space<vmem>>, vector<8x128xf32>,
    %61 = vector.extract_strided_slice %30 {offsets = [0, 128], sizes = [8, 128], strides = [1, 1]} : vector<16x1536xf32> to vector<8x128xf32>
    %62 = vector.extract_strided_slice %30 {offsets = [0, 640], sizes = [8, 128], strides = [1, 1]} : vector<16x1536xf32> to vector<8x128xf32>
    %63 = vector.extract_strided_slice %30 {offsets = [0, 1152], sizes = [8, 128], strides = [1, 1]} : vector<16x1536xf32> to vector<8x128xf32>
    %64 = arith.truncf %61 : vector<8x128xf32> to vector<8x128xbf16>
    %65 = arith.truncf %62 : vector<8x128xf32> to vector<8x128xbf16>
    %cst_26 = arith.constant dense<0.000000e+00> : vector<8x8xf32>
    %66 = tpu.matmul %64, %65, %cst_26 {dimension_numbers = #tpu.dot_dimension_numbers<[1], [1], [0], [0], [0, 0, 1, 0], [], []>} : vector<8x128xbf16>, vector<8x128xbf16>, vector<8x8xf32> -> vector<8x8xf32>
    %cst_27 = arith.constant 0.0883883461 : f32
    %67 = vector.broadcast %cst_27 : f32 to vector<8x8xf32>
    %68 = arith.mulf %66, %67 : vector<8x8xf32>
    %69 = vector.broadcast %36 : vector<1x8xf32> to vector<8x8xf32>
    %70 = arith.addf %68, %69 : vector<8x8xf32>
    %cst_28 = arith.constant dense<0xFF800000> : vector<8xf32>
    %71 = vector.multi_reduction <maximumf>, %70, %cst_28 [1] : vector<8x8xf32> to vector<8xf32>
    %72 = vector.shape_cast %71 : vector<8xf32> to vector<8x1xf32>
    %73 = vector.broadcast %72 : vector<8x1xf32> to vector<8x8xf32>
    %74 = arith.subf %70, %73 : vector<8x8xf32>
    %75 = math.exp %74 : vector<8x8xf32>
    %cst_29 = arith.constant dense<0.000000e+00> : vector<8xf32>
    %76 = vector.multi_reduction <add>, %75, %cst_29 [1] : vector<8x8xf32> to vector<8xf32>
    %77 = vector.shape_cast %76 : vector<8xf32> to vector<8x1xf32>
    %78 = tpu.reciprocal %77 {approx = true} : vector<8x1xf32> -> vector<8x1xf32>
    %79 = vector.broadcast %78 : vector<8x1xf32> to vector<8x8xf32>
    %80 = arith.mulf %75, %79 : vector<8x8xf32>
    %81 = arith.truncf %80 : vector<8x8xf32> to vector<8x8xbf16>
    %82 = arith.truncf %63 : vector<8x128xf32> to vector<8x128xbf16>
    %cst_30 = arith.constant dense<0.000000e+00> : vector<8x128xf32>
    %83 = tpu.matmul %81, %82, %cst_30 {dimension_numbers = #tpu.dot_dimension_numbers<[1], [0], [0], [1], [0, 0, 1, 1], [], []>} : vector<8x8xbf16>, vector<8x128xbf16>, vector<8x128xf32> -> vector<8x128xf32>
    %c0_31 = arith.constant 0 : index
    %c128 = arith.constant 128 : index
    %84 = vector.load %arg23[%c0_31, %c128] : memref<16x512xf32, #tpu.memory_space<vmem>>, vector<8x128xf32>
    tpu.vector_store %arg23[%c0_31, %c128], %83 {strides = array<i32>} : memref<16x512xf32, #tpu.memory_space<vmem>>, vector<8x128xf32>,
    %85 = vector.extract_strided_slice %30 {offsets = [0, 256], sizes = [8, 128], strides = [1, 1]} : vector<16x1536xf32> to vector<8x128xf32>
    %86 = vector.extract_strided_slice %30 {offsets = [0, 768], sizes = [8, 128], strides = [1, 1]} : vector<16x1536xf32> to vector<8x128xf32>
    %87 = vector.extract_strided_slice %30 {offsets = [0, 1280], sizes = [8, 128], strides = [1, 1]} : vector<16x1536xf32> to vector<8x128xf32>
    %88 = arith.truncf %85 : vector<8x128xf32> to vector<8x128xbf16>
    %89 = arith.truncf %86 : vector<8x128xf32> to vector<8x128xbf16>
    %cst_32 = arith.constant dense<0.000000e+00> : vector<8x8xf32>
    %90 = tpu.matmul %88, %89, %cst_32 {dimension_numbers = #tpu.dot_dimension_numbers<[1], [1], [0], [0], [0, 0, 1, 0], [], []>} : vector<8x128xbf16>, vector<8x128xbf16>, vector<8x8xf32> -> vector<8x8xf32>
    %cst_33 = arith.constant 0.0883883461 : f32
    %91 = vector.broadcast %cst_33 : f32 to vector<8x8xf32>
    %92 = arith.mulf %90, %91 : vector<8x8xf32>
    %93 = vector.broadcast %36 : vector<1x8xf32> to vector<8x8xf32>
    %94 = arith.addf %92, %93 : vector<8x8xf32>
    %cst_34 = arith.constant dense<0xFF800000> : vector<8xf32>
    %95 = vector.multi_reduction <maximumf>, %94, %cst_34 [1] : vector<8x8xf32> to vector<8xf32>
    %96 = vector.shape_cast %95 : vector<8xf32> to vector<8x1xf32>
    %97 = vector.broadcast %96 : vector<8x1xf32> to vector<8x8xf32>
    %98 = arith.subf %94, %97 : vector<8x8xf32>
    %99 = math.exp %98 : vector<8x8xf32>
    %cst_35 = arith.constant dense<0.000000e+00> : vector<8xf32>
    %100 = vector.multi_reduction <add>, %99, %cst_35 [1] : vector<8x8xf32> to vector<8xf32>
    %101 = vector.shape_cast %100 : vector<8xf32> to vector<8x1xf32>
    %102 = tpu.reciprocal %101 {approx = true} : vector<8x1xf32> -> vector<8x1xf32>
    %103 = vector.broadcast %102 : vector<8x1xf32> to vector<8x8xf32>
    %104 = arith.mulf %99, %103 : vector<8x8xf32>
    %105 = arith.truncf %104 : vector<8x8xf32> to vector<8x8xbf16>
    %106 = arith.truncf %87 : vector<8x128xf32> to vector<8x128xbf16>
    %cst_36 = arith.constant dense<0.000000e+00> : vector<8x128xf32>
    %107 = tpu.matmul %105, %106, %cst_36 {dimension_numbers = #tpu.dot_dimension_numbers<[1], [0], [0], [1], [0, 0, 1, 1], [], []>} : vector<8x8xbf16>, vector<8x128xbf16>, vector<8x128xf32> -> vector<8x128xf32>
    %c0_37 = arith.constant 0 : index
    %c256 = arith.constant 256 : index
    %108 = vector.load %arg23[%c0_37, %c256] : memref<16x512xf32, #tpu.memory_space<vmem>>, vector<8x128xf32>
    tpu.vector_store %arg23[%c0_37, %c256], %107 {strides = array<i32>} : memref<16x512xf32, #tpu.memory_space<vmem>>, vector<8x128xf32>,
    %109 = vector.extract_strided_slice %30 {offsets = [0, 384], sizes = [8, 128], strides = [1, 1]} : vector<16x1536xf32> to vector<8x128xf32>
    %110 = vector.extract_strided_slice %30 {offsets = [0, 896], sizes = [8, 128], strides = [1, 1]} : vector<16x1536xf32> to vector<8x128xf32>
    %111 = vector.extract_strided_slice %30 {offsets = [0, 1408], sizes = [8, 128], strides = [1, 1]} : vector<16x1536xf32> to vector<8x128xf32>
    %112 = arith.truncf %109 : vector<8x128xf32> to vector<8x128xbf16>
    %113 = arith.truncf %110 : vector<8x128xf32> to vector<8x128xbf16>
    %cst_38 = arith.constant dense<0.000000e+00> : vector<8x8xf32>
    %114 = tpu.matmul %112, %113, %cst_38 {dimension_numbers = #tpu.dot_dimension_numbers<[1], [1], [0], [0], [0, 0, 1, 0], [], []>} : vector<8x128xbf16>, vector<8x128xbf16>, vector<8x8xf32> -> vector<8x8xf32>
    %cst_39 = arith.constant 0.0883883461 : f32
    %115 = vector.broadcast %cst_39 : f32 to vector<8x8xf32>
    %116 = arith.mulf %114, %115 : vector<8x8xf32>
    %117 = vector.broadcast %36 : vector<1x8xf32> to vector<8x8xf32>
    %118 = arith.addf %116, %117 : vector<8x8xf32>
    %cst_40 = arith.constant dense<0xFF800000> : vector<8xf32>
    %119 = vector.multi_reduction <maximumf>, %118, %cst_40 [1] : vector<8x8xf32> to vector<8xf32>
    %120 = vector.shape_cast %119 : vector<8xf32> to vector<8x1xf32>
    %121 = vector.broadcast %120 : vector<8x1xf32> to vector<8x8xf32>
    %122 = arith.subf %118, %121 : vector<8x8xf32>
    %123 = math.exp %122 : vector<8x8xf32>
    %cst_41 = arith.constant dense<0.000000e+00> : vector<8xf32>
    %124 = vector.multi_reduction <add>, %123, %cst_41 [1] : vector<8x8xf32> to vector<8xf32>
    %125 = vector.shape_cast %124 : vector<8xf32> to vector<8x1xf32>
    %126 = tpu.reciprocal %125 {approx = true} : vector<8x1xf32> -> vector<8x1xf32>
    %127 = vector.broadcast %126 : vector<8x1xf32> to vector<8x8xf32>
    %128 = arith.mulf %123, %127 : vector<8x8xf32>
    %129 = arith.truncf %128 : vector<8x8xf32> to vector<8x8xbf16>
    %130 = arith.truncf %111 : vector<8x128xf32> to vector<8x128xbf16>
    %cst_42 = arith.constant dense<0.000000e+00> : vector<8x128xf32>
    %131 = tpu.matmul %129, %130, %cst_42 {dimension_numbers = #tpu.dot_dimension_numbers<[1], [0], [0], [1], [0, 0, 1, 1], [], []>} : vector<8x8xbf16>, vector<8x128xbf16>, vector<8x128xf32> -> vector<8x128xf32>
    %c0_43 = arith.constant 0 : index
    %c384 = arith.constant 384 : index
    %132 = vector.load %arg23[%c0_43, %c384] : memref<16x512xf32, #tpu.memory_space<vmem>>, vector<8x128xf32>
    tpu.vector_store %arg23[%c0_43, %c384], %131 {strides = array<i32>} : memref<16x512xf32, #tpu.memory_space<vmem>>, vector<8x128xf32>,
    %c1 = arith.constant 1 : index
    %c0_44 = arith.constant 0 : index
    %133 = vector.load %arg2[%c1, %c0_44] : memref<2x8xf32, #tpu.memory_space<vmem>>, vector<1x8xf32>
    %cst_45 = arith.constant 0.000000e+00 : f32
    %134 = vector.broadcast %cst_45 : f32 to vector<1x8xf32>
    %135 = arith.cmpf ogt, %133, %134 : vector<1x8xf32>
    %cst_46 = arith.constant 0.000000e+00 : f32
    %cst_47 = arith.constant -1.000000e+09 : f32
    %136 = vector.broadcast %cst_46 : f32 to vector<1x8xf32>
    %137 = vector.broadcast %cst_47 : f32 to vector<1x8xf32>
    %138 = arith.select %135, %136, %137 : vector<1x8xi1>, vector<1x8xf32>
    %139 = vector.extract_strided_slice %30 {offsets = [8, 0], sizes = [8, 128], strides = [1, 1]} : vector<16x1536xf32> to vector<8x128xf32>
    %140 = vector.extract_strided_slice %30 {offsets = [8, 512], sizes = [8, 128], strides = [1, 1]} : vector<16x1536xf32> to vector<8x128xf32>
    %141 = vector.extract_strided_slice %30 {offsets = [8, 1024], sizes = [8, 128], strides = [1, 1]} : vector<16x1536xf32> to vector<8x128xf32>
    %142 = arith.truncf %139 : vector<8x128xf32> to vector<8x128xbf16>
    %143 = arith.truncf %140 : vector<8x128xf32> to vector<8x128xbf16>
    %cst_48 = arith.constant dense<0.000000e+00> : vector<8x8xf32>
    %144 = tpu.matmul %142, %143, %cst_48 {dimension_numbers = #tpu.dot_dimension_numbers<[1], [1], [0], [0], [0, 0, 1, 0], [], []>} : vector<8x128xbf16>, vector<8x128xbf16>, vector<8x8xf32> -> vector<8x8xf32>
    %cst_49 = arith.constant 0.0883883461 : f32
    %145 = vector.broadcast %cst_49 : f32 to vector<8x8xf32>
    %146 = arith.mulf %144, %145 : vector<8x8xf32>
    %147 = vector.broadcast %138 : vector<1x8xf32> to vector<8x8xf32>
    %148 = arith.addf %146, %147 : vector<8x8xf32>
    %cst_50 = arith.constant dense<0xFF800000> : vector<8xf32>
    %149 = vector.multi_reduction <maximumf>, %148, %cst_50 [1] : vector<8x8xf32> to vector<8xf32>
    %150 = vector.shape_cast %149 : vector<8xf32> to vector<8x1xf32>
    %151 = vector.broadcast %150 : vector<8x1xf32> to vector<8x8xf32>
    %152 = arith.subf %148, %151 : vector<8x8xf32>
    %153 = math.exp %152 : vector<8x8xf32>
    %cst_51 = arith.constant dense<0.000000e+00> : vector<8xf32>
    %154 = vector.multi_reduction <add>, %153, %cst_51 [1] : vector<8x8xf32> to vector<8xf32>
    %155 = vector.shape_cast %154 : vector<8xf32> to vector<8x1xf32>
    %156 = tpu.reciprocal %155 {approx = true} : vector<8x1xf32> -> vector<8x1xf32>
    %157 = vector.broadcast %156 : vector<8x1xf32> to vector<8x8xf32>
    %158 = arith.mulf %153, %157 : vector<8x8xf32>
    %159 = arith.truncf %158 : vector<8x8xf32> to vector<8x8xbf16>
    %160 = arith.truncf %141 : vector<8x128xf32> to vector<8x128xbf16>
    %cst_52 = arith.constant dense<0.000000e+00> : vector<8x128xf32>
    %161 = tpu.matmul %159, %160, %cst_52 {dimension_numbers = #tpu.dot_dimension_numbers<[1], [0], [0], [1], [0, 0, 1, 1], [], []>} : vector<8x8xbf16>, vector<8x128xbf16>, vector<8x128xf32> -> vector<8x128xf32>
    %c8 = arith.constant 8 : index
    %c0_53 = arith.constant 0 : index
    %162 = vector.load %arg23[%c8, %c0_53] : memref<16x512xf32, #tpu.memory_space<vmem>>, vector<8x128xf32>
    tpu.vector_store %arg23[%c8, %c0_53], %161 {strides = array<i32>} : memref<16x512xf32, #tpu.memory_space<vmem>>, vector<8x128xf32>,
    %163 = vector.extract_strided_slice %30 {offsets = [8, 128], sizes = [8, 128], strides = [1, 1]} : vector<16x1536xf32> to vector<8x128xf32>
    %164 = vector.extract_strided_slice %30 {offsets = [8, 640], sizes = [8, 128], strides = [1, 1]} : vector<16x1536xf32> to vector<8x128xf32>
    %165 = vector.extract_strided_slice %30 {offsets = [8, 1152], sizes = [8, 128], strides = [1, 1]} : vector<16x1536xf32> to vector<8x128xf32>
    %166 = arith.truncf %163 : vector<8x128xf32> to vector<8x128xbf16>
    %167 = arith.truncf %164 : vector<8x128xf32> to vector<8x128xbf16>
    %cst_54 = arith.constant dense<0.000000e+00> : vector<8x8xf32>
    %168 = tpu.matmul %166, %167, %cst_54 {dimension_numbers = #tpu.dot_dimension_numbers<[1], [1], [0], [0], [0, 0, 1, 0], [], []>} : vector<8x128xbf16>, vector<8x128xbf16>, vector<8x8xf32> -> vector<8x8xf32>
    %cst_55 = arith.constant 0.0883883461 : f32
    %169 = vector.broadcast %cst_55 : f32 to vector<8x8xf32>
    %170 = arith.mulf %168, %169 : vector<8x8xf32>
    %171 = vector.broadcast %138 : vector<1x8xf32> to vector<8x8xf32>
    %172 = arith.addf %170, %171 : vector<8x8xf32>
    %cst_56 = arith.constant dense<0xFF800000> : vector<8xf32>
    %173 = vector.multi_reduction <maximumf>, %172, %cst_56 [1] : vector<8x8xf32> to vector<8xf32>
    %174 = vector.shape_cast %173 : vector<8xf32> to vector<8x1xf32>
    %175 = vector.broadcast %174 : vector<8x1xf32> to vector<8x8xf32>
    %176 = arith.subf %172, %175 : vector<8x8xf32>
    %177 = math.exp %176 : vector<8x8xf32>
    %cst_57 = arith.constant dense<0.000000e+00> : vector<8xf32>
    %178 = vector.multi_reduction <add>, %177, %cst_57 [1] : vector<8x8xf32> to vector<8xf32>
    %179 = vector.shape_cast %178 : vector<8xf32> to vector<8x1xf32>
    %180 = tpu.reciprocal %179 {approx = true} : vector<8x1xf32> -> vector<8x1xf32>
    %181 = vector.broadcast %180 : vector<8x1xf32> to vector<8x8xf32>
    %182 = arith.mulf %177, %181 : vector<8x8xf32>
    %183 = arith.truncf %182 : vector<8x8xf32> to vector<8x8xbf16>
    %184 = arith.truncf %165 : vector<8x128xf32> to vector<8x128xbf16>
    %cst_58 = arith.constant dense<0.000000e+00> : vector<8x128xf32>
    %185 = tpu.matmul %183, %184, %cst_58 {dimension_numbers = #tpu.dot_dimension_numbers<[1], [0], [0], [1], [0, 0, 1, 1], [], []>} : vector<8x8xbf16>, vector<8x128xbf16>, vector<8x128xf32> -> vector<8x128xf32>
    %c8_59 = arith.constant 8 : index
    %c128_60 = arith.constant 128 : index
    %186 = vector.load %arg23[%c8_59, %c128_60] : memref<16x512xf32, #tpu.memory_space<vmem>>, vector<8x128xf32>
    tpu.vector_store %arg23[%c8_59, %c128_60], %185 {strides = array<i32>} : memref<16x512xf32, #tpu.memory_space<vmem>>, vector<8x128xf32>,
    %187 = vector.extract_strided_slice %30 {offsets = [8, 256], sizes = [8, 128], strides = [1, 1]} : vector<16x1536xf32> to vector<8x128xf32>
    %188 = vector.extract_strided_slice %30 {offsets = [8, 768], sizes = [8, 128], strides = [1, 1]} : vector<16x1536xf32> to vector<8x128xf32>
    %189 = vector.extract_strided_slice %30 {offsets = [8, 1280], sizes = [8, 128], strides = [1, 1]} : vector<16x1536xf32> to vector<8x128xf32>
    %190 = arith.truncf %187 : vector<8x128xf32> to vector<8x128xbf16>
    %191 = arith.truncf %188 : vector<8x128xf32> to vector<8x128xbf16>
    %cst_61 = arith.constant dense<0.000000e+00> : vector<8x8xf32>
    %192 = tpu.matmul %190, %191, %cst_61 {dimension_numbers = #tpu.dot_dimension_numbers<[1], [1], [0], [0], [0, 0, 1, 0], [], []>} : vector<8x128xbf16>, vector<8x128xbf16>, vector<8x8xf32> -> vector<8x8xf32>
    %cst_62 = arith.constant 0.0883883461 : f32
    %193 = vector.broadcast %cst_62 : f32 to vector<8x8xf32>
    %194 = arith.mulf %192, %193 : vector<8x8xf32>
    %195 = vector.broadcast %138 : vector<1x8xf32> to vector<8x8xf32>
    %196 = arith.addf %194, %195 : vector<8x8xf32>
    %cst_63 = arith.constant dense<0xFF800000> : vector<8xf32>
    %197 = vector.multi_reduction <maximumf>, %196, %cst_63 [1] : vector<8x8xf32> to vector<8xf32>
    %198 = vector.shape_cast %197 : vector<8xf32> to vector<8x1xf32>
    %199 = vector.broadcast %198 : vector<8x1xf32> to vector<8x8xf32>
    %200 = arith.subf %196, %199 : vector<8x8xf32>
    %201 = math.exp %200 : vector<8x8xf32>
    %cst_64 = arith.constant dense<0.000000e+00> : vector<8xf32>
    %202 = vector.multi_reduction <add>, %201, %cst_64 [1] : vector<8x8xf32> to vector<8xf32>
    %203 = vector.shape_cast %202 : vector<8xf32> to vector<8x1xf32>
    %204 = tpu.reciprocal %203 {approx = true} : vector<8x1xf32> -> vector<8x1xf32>
    %205 = vector.broadcast %204 : vector<8x1xf32> to vector<8x8xf32>
    %206 = arith.mulf %201, %205 : vector<8x8xf32>
    %207 = arith.truncf %206 : vector<8x8xf32> to vector<8x8xbf16>
    %208 = arith.truncf %189 : vector<8x128xf32> to vector<8x128xbf16>
    %cst_65 = arith.constant dense<0.000000e+00> : vector<8x128xf32>
    %209 = tpu.matmul %207, %208, %cst_65 {dimension_numbers = #tpu.dot_dimension_numbers<[1], [0], [0], [1], [0, 0, 1, 1], [], []>} : vector<8x8xbf16>, vector<8x128xbf16>, vector<8x128xf32> -> vector<8x128xf32>
    %c8_66 = arith.constant 8 : index
    %c256_67 = arith.constant 256 : index
    %210 = vector.load %arg23[%c8_66, %c256_67] : memref<16x512xf32, #tpu.memory_space<vmem>>, vector<8x128xf32>
    tpu.vector_store %arg23[%c8_66, %c256_67], %209 {strides = array<i32>} : memref<16x512xf32, #tpu.memory_space<vmem>>, vector<8x128xf32>,
    %211 = vector.extract_strided_slice %30 {offsets = [8, 384], sizes = [8, 128], strides = [1, 1]} : vector<16x1536xf32> to vector<8x128xf32>
    %212 = vector.extract_strided_slice %30 {offsets = [8, 896], sizes = [8, 128], strides = [1, 1]} : vector<16x1536xf32> to vector<8x128xf32>
    %213 = vector.extract_strided_slice %30 {offsets = [8, 1408], sizes = [8, 128], strides = [1, 1]} : vector<16x1536xf32> to vector<8x128xf32>
    %214 = arith.truncf %211 : vector<8x128xf32> to vector<8x128xbf16>
    %215 = arith.truncf %212 : vector<8x128xf32> to vector<8x128xbf16>
    %cst_68 = arith.constant dense<0.000000e+00> : vector<8x8xf32>
    %216 = tpu.matmul %214, %215, %cst_68 {dimension_numbers = #tpu.dot_dimension_numbers<[1], [1], [0], [0], [0, 0, 1, 0], [], []>} : vector<8x128xbf16>, vector<8x128xbf16>, vector<8x8xf32> -> vector<8x8xf32>
    %cst_69 = arith.constant 0.0883883461 : f32
    %217 = vector.broadcast %cst_69 : f32 to vector<8x8xf32>
    %218 = arith.mulf %216, %217 : vector<8x8xf32>
    %219 = vector.broadcast %138 : vector<1x8xf32> to vector<8x8xf32>
    %220 = arith.addf %218, %219 : vector<8x8xf32>
    %cst_70 = arith.constant dense<0xFF800000> : vector<8xf32>
    %221 = vector.multi_reduction <maximumf>, %220, %cst_70 [1] : vector<8x8xf32> to vector<8xf32>
    %222 = vector.shape_cast %221 : vector<8xf32> to vector<8x1xf32>
    %223 = vector.broadcast %222 : vector<8x1xf32> to vector<8x8xf32>
    %224 = arith.subf %220, %223 : vector<8x8xf32>
    %225 = math.exp %224 : vector<8x8xf32>
    %cst_71 = arith.constant dense<0.000000e+00> : vector<8xf32>
    %226 = vector.multi_reduction <add>, %225, %cst_71 [1] : vector<8x8xf32> to vector<8xf32>
    %227 = vector.shape_cast %226 : vector<8xf32> to vector<8x1xf32>
    %228 = tpu.reciprocal %227 {approx = true} : vector<8x1xf32> -> vector<8x1xf32>
    %229 = vector.broadcast %228 : vector<8x1xf32> to vector<8x8xf32>
    %230 = arith.mulf %225, %229 : vector<8x8xf32>
    %231 = arith.truncf %230 : vector<8x8xf32> to vector<8x8xbf16>
    %232 = arith.truncf %213 : vector<8x128xf32> to vector<8x128xbf16>
    %cst_72 = arith.constant dense<0.000000e+00> : vector<8x128xf32>
    %233 = tpu.matmul %231, %232, %cst_72 {dimension_numbers = #tpu.dot_dimension_numbers<[1], [0], [0], [1], [0, 0, 1, 1], [], []>} : vector<8x8xbf16>, vector<8x128xbf16>, vector<8x128xf32> -> vector<8x128xf32>
    %c8_73 = arith.constant 8 : index
    %c384_74 = arith.constant 384 : index
    %234 = vector.load %arg23[%c8_73, %c384_74] : memref<16x512xf32, #tpu.memory_space<vmem>>, vector<8x128xf32>
    tpu.vector_store %arg23[%c8_73, %c384_74], %233 {strides = array<i32>} : memref<16x512xf32, #tpu.memory_space<vmem>>, vector<8x128xf32>,
    %c0_75 = arith.constant 0 : index
    %c0_76 = arith.constant 0 : index
    %235 = vector.load %arg23[%c0_75, %c0_76] : memref<16x512xf32, #tpu.memory_space<vmem>>, vector<16x512xf32>
    %236 = arith.truncf %235 : vector<16x512xf32> to vector<16x512xbf16>
    %c0_77 = arith.constant 0 : index
    %c0_78 = arith.constant 0 : index
    %237 = vector.load %arg7[%c0_77, %c0_78] : memref<512x512xbf16, #tpu.memory_space<vmem>>, vector<512x512xbf16>
    %cst_79 = arith.constant dense<0.000000e+00> : vector<16x512xf32>
    %238 = tpu.matmul %236, %237, %cst_79 {dimension_numbers = #tpu.dot_dimension_numbers<[1], [0], [0], [1], [0, 0, 1, 1], [], []>} : vector<16x512xbf16>, vector<512x512xbf16>, vector<16x512xf32> -> vector<16x512xf32>
    %c0_80 = arith.constant 0 : index
    %c0_81 = arith.constant 0 : index
    %239 = vector.load %arg8[%c0_80, %c0_81] : memref<1x512xf32, #tpu.memory_space<vmem>>, vector<1x512xf32>
    %240 = vector.broadcast %239 : vector<1x512xf32> to vector<16x512xf32>
    %241 = arith.addf %238, %240 : vector<16x512xf32>
    %242 = arith.addf %0, %241 : vector<16x512xf32>
    %cst_82 = arith.constant dense<0.000000e+00> : vector<16xf32>
    %243 = vector.multi_reduction <add>, %242, %cst_82 [1] : vector<16x512xf32> to vector<16xf32>
    %244 = vector.shape_cast %243 : vector<16xf32> to vector<16x1xf32>
    %cst_83 = arith.constant 5.120000e+02 : f32
    %245 = vector.broadcast %cst_83 : f32 to vector<16x1xf32>
    %246 = arith.divf %244, %245 : vector<16x1xf32>
    %247 = vector.broadcast %246 : vector<16x1xf32> to vector<16x512xf32>
    %248 = arith.subf %242, %247 : vector<16x512xf32>
    %249 = arith.mulf %248, %248 : vector<16x512xf32>
    %cst_84 = arith.constant dense<0.000000e+00> : vector<16xf32>
    %250 = vector.multi_reduction <add>, %249, %cst_84 [1] : vector<16x512xf32> to vector<16xf32>
    %251 = vector.shape_cast %250 : vector<16xf32> to vector<16x1xf32>
    %cst_85 = arith.constant 5.120000e+02 : f32
    %252 = vector.broadcast %cst_85 : f32 to vector<16x1xf32>
    %253 = arith.divf %251, %252 : vector<16x1xf32>
    %254 = vector.broadcast %246 : vector<16x1xf32> to vector<16x512xf32>
    %255 = arith.subf %242, %254 : vector<16x512xf32>
    %cst_86 = arith.constant 9.99999974E-6 : f32
    %256 = vector.broadcast %cst_86 : f32 to vector<16x1xf32>
    %257 = arith.addf %253, %256 : vector<16x1xf32>
    %258 = math.rsqrt %257 : vector<16x1xf32>
    %259 = vector.broadcast %258 : vector<16x1xf32> to vector<16x512xf32>
    %260 = arith.mulf %255, %259 : vector<16x512xf32>
    %c0_87 = arith.constant 0 : index
    %c0_88 = arith.constant 0 : index
    %261 = vector.load %arg9[%c0_87, %c0_88] : memref<1x512xf32, #tpu.memory_space<vmem>>, vector<1x512xf32>
    %262 = vector.broadcast %261 : vector<1x512xf32> to vector<16x512xf32>
    %263 = arith.mulf %260, %262 : vector<16x512xf32>
    %c0_89 = arith.constant 0 : index
    %c0_90 = arith.constant 0 : index
    %264 = vector.load %arg10[%c0_89, %c0_90] : memref<1x512xf32, #tpu.memory_space<vmem>>, vector<1x512xf32>
    %265 = vector.broadcast %264 : vector<1x512xf32> to vector<16x512xf32>
    %266 = arith.addf %263, %265 : vector<16x512xf32>
    %267 = arith.truncf %266 : vector<16x512xf32> to vector<16x512xbf16>
    %c0_91 = arith.constant 0 : index
    %c0_92 = arith.constant 0 : index
    %268 = vector.load %arg11[%c0_91, %c0_92] : memref<512x1024xbf16, #tpu.memory_space<vmem>>, vector<512x1024xbf16>
    %cst_93 = arith.constant dense<0.000000e+00> : vector<16x1024xf32>
    %269 = tpu.matmul %267, %268, %cst_93 {dimension_numbers = #tpu.dot_dimension_numbers<[1], [0], [0], [1], [0, 0, 1, 1], [], []>} : vector<16x512xbf16>, vector<512x1024xbf16>, vector<16x1024xf32> -> vector<16x1024xf32>
    %c0_94 = arith.constant 0 : index
    %c0_95 = arith.constant 0 : index
    %270 = vector.load %arg12[%c0_94, %c0_95] : memref<1x1024xf32, #tpu.memory_space<vmem>>, vector<1x1024xf32>
    %271 = vector.broadcast %270 : vector<1x1024xf32> to vector<16x1024xf32>
    %272 = arith.addf %269, %271 : vector<16x1024xf32>
    %273 = arith.mulf %272, %272 : vector<16x1024xf32>
    %274 = arith.mulf %272, %273 : vector<16x1024xf32>
    %cst_96 = arith.constant 4.471500e-02 : f32
    %275 = vector.broadcast %cst_96 : f32 to vector<16x1024xf32>
    %276 = arith.mulf %275, %274 : vector<16x1024xf32>
    %277 = arith.addf %272, %276 : vector<16x1024xf32>
    %cst_97 = arith.constant 0.797884583 : f32
    %278 = vector.broadcast %cst_97 : f32 to vector<16x1024xf32>
    %279 = arith.mulf %278, %277 : vector<16x1024xf32>
    %280 = math.tanh %279 : vector<16x1024xf32>
    %cst_98 = arith.constant 1.000000e+00 : f32
    %281 = vector.broadcast %cst_98 : f32 to vector<16x1024xf32>
    %282 = arith.addf %281, %280 : vector<16x1024xf32>
    %cst_99 = arith.constant 5.000000e-01 : f32
    %283 = vector.broadcast %cst_99 : f32 to vector<16x1024xf32>
    %284 = arith.mulf %283, %282 : vector<16x1024xf32>
    %285 = arith.mulf %272, %284 : vector<16x1024xf32>
    %286 = arith.truncf %285 : vector<16x1024xf32> to vector<16x1024xbf16>
    %c0_100 = arith.constant 0 : index
    %c0_101 = arith.constant 0 : index
    %287 = vector.load %arg13[%c0_100, %c0_101] : memref<1024x512xbf16, #tpu.memory_space<vmem>>, vector<1024x512xbf16>
    %cst_102 = arith.constant dense<0.000000e+00> : vector<16x512xf32>
    %288 = tpu.matmul %286, %287, %cst_102 {dimension_numbers = #tpu.dot_dimension_numbers<[1], [0], [0], [1], [0, 0, 1, 1], [], []>} : vector<16x1024xbf16>, vector<1024x512xbf16>, vector<16x512xf32> -> vector<16x512xf32>
    %c0_103 = arith.constant 0 : index
    %c0_104 = arith.constant 0 : index
    %289 = vector.load %arg14[%c0_103, %c0_104] : memref<1x512xf32, #tpu.memory_space<vmem>>, vector<1x512xf32>
    %290 = vector.broadcast %289 : vector<1x512xf32> to vector<16x512xf32>
    %291 = arith.addf %288, %290 : vector<16x512xf32>
    %292 = arith.addf %242, %291 : vector<16x512xf32>
    %cst_105 = arith.constant dense<0.000000e+00> : vector<16xf32>
    %293 = vector.multi_reduction <add>, %292, %cst_105 [1] : vector<16x512xf32> to vector<16xf32>
    %294 = vector.shape_cast %293 : vector<16xf32> to vector<16x1xf32>
    %cst_106 = arith.constant 5.120000e+02 : f32
    %295 = vector.broadcast %cst_106 : f32 to vector<16x1xf32>
    %296 = arith.divf %294, %295 : vector<16x1xf32>
    %297 = vector.broadcast %296 : vector<16x1xf32> to vector<16x512xf32>
    %298 = arith.subf %292, %297 : vector<16x512xf32>
    %299 = arith.mulf %298, %298 : vector<16x512xf32>
    %cst_107 = arith.constant dense<0.000000e+00> : vector<16xf32>
    %300 = vector.multi_reduction <add>, %299, %cst_107 [1] : vector<16x512xf32> to vector<16xf32>
    %301 = vector.shape_cast %300 : vector<16xf32> to vector<16x1xf32>
    %cst_108 = arith.constant 5.120000e+02 : f32
    %302 = vector.broadcast %cst_108 : f32 to vector<16x1xf32>
    %303 = arith.divf %301, %302 : vector<16x1xf32>
    %304 = vector.broadcast %296 : vector<16x1xf32> to vector<16x512xf32>
    %305 = arith.subf %292, %304 : vector<16x512xf32>
    %cst_109 = arith.constant 9.99999974E-6 : f32
    %306 = vector.broadcast %cst_109 : f32 to vector<16x1xf32>
    %307 = arith.addf %303, %306 : vector<16x1xf32>
    %308 = math.rsqrt %307 : vector<16x1xf32>
    %309 = vector.broadcast %308 : vector<16x1xf32> to vector<16x512xf32>
    %310 = arith.mulf %305, %309 : vector<16x512xf32>
    %c0_110 = arith.constant 0 : index
    %c0_111 = arith.constant 0 : index
    %311 = vector.load %arg15[%c0_110, %c0_111] : memref<1x512xf32, #tpu.memory_space<vmem>>, vector<1x512xf32>
    %312 = vector.broadcast %311 : vector<1x512xf32> to vector<16x512xf32>
    %313 = arith.mulf %310, %312 : vector<16x512xf32>
    %c0_112 = arith.constant 0 : index
    %c0_113 = arith.constant 0 : index
    %314 = vector.load %arg16[%c0_112, %c0_113] : memref<1x512xf32, #tpu.memory_space<vmem>>, vector<1x512xf32>
    %315 = vector.broadcast %314 : vector<1x512xf32> to vector<16x512xf32>
    %316 = arith.addf %313, %315 : vector<16x512xf32>
    %317 = vector.extract_strided_slice %316 {offsets = [0, 0], sizes = [8, 512], strides = [1, 1]} : vector<16x512xf32> to vector<8x512xf32>
    %cst_114 = arith.constant dense<0.000000e+00> : vector<512xf32>
    %318 = vector.multi_reduction <add>, %317, %cst_114 [0] : vector<8x512xf32> to vector<512xf32>
    %319 = vector.shape_cast %318 : vector<512xf32> to vector<1x512xf32>
    %cst_115 = arith.constant 8.000000e+00 : f32
    %320 = vector.broadcast %cst_115 : f32 to vector<1x512xf32>
    %321 = arith.divf %319, %320 : vector<1x512xf32>
    %322 = vector.extract_strided_slice %316 {offsets = [8, 0], sizes = [8, 512], strides = [1, 1]} : vector<16x512xf32> to vector<8x512xf32>
    %cst_116 = arith.constant dense<0.000000e+00> : vector<512xf32>
    %323 = vector.multi_reduction <add>, %322, %cst_116 [0] : vector<8x512xf32> to vector<512xf32>
    %324 = vector.shape_cast %323 : vector<512xf32> to vector<1x512xf32>
    %cst_117 = arith.constant 8.000000e+00 : f32
    %325 = vector.broadcast %cst_117 : f32 to vector<1x512xf32>
    %326 = arith.divf %324, %325 : vector<1x512xf32>
    %327 = tpu.concatenate %321, %326 in 0 : vector<1x512xf32>, vector<1x512xf32> -> vector<2x512xf32>
    %328 = arith.truncf %327 : vector<2x512xf32> to vector<2x512xbf16>
    %c0_118 = arith.constant 0 : index
    %c0_119 = arith.constant 0 : index
    %329 = vector.load %arg17[%c0_118, %c0_119] : memref<512x256xbf16, #tpu.memory_space<vmem>>, vector<512x256xbf16>
    %cst_120 = arith.constant dense<0.000000e+00> : vector<2x256xf32>
    %330 = tpu.matmul %328, %329, %cst_120 {dimension_numbers = #tpu.dot_dimension_numbers<[1], [0], [0], [1], [0, 0, 1, 1], [], []>} : vector<2x512xbf16>, vector<512x256xbf16>, vector<2x256xf32> -> vector<2x256xf32>
    %c0_121 = arith.constant 0 : index
    %c0_122 = arith.constant 0 : index
    %331 = vector.load %arg18[%c0_121, %c0_122] : memref<1x256xf32, #tpu.memory_space<vmem>>, vector<1x256xf32>
    %332 = vector.broadcast %331 : vector<1x256xf32> to vector<2x256xf32>
    %333 = arith.addf %330, %332 : vector<2x256xf32>
    %cst_123 = arith.constant 0.000000e+00 : f32
    %334 = vector.broadcast %cst_123 : f32 to vector<2x256xf32>
    %335 = arith.maximumf %333, %334 : vector<2x256xf32>
    %336 = arith.truncf %335 : vector<2x256xf32> to vector<2x256xbf16>
    %c0_124 = arith.constant 0 : index
    %c0_125 = arith.constant 0 : index
    %337 = vector.load %arg19[%c0_124, %c0_125] : memref<256x1xbf16, #tpu.memory_space<vmem>>, vector<256x1xbf16>
    %cst_126 = arith.constant dense<0.000000e+00> : vector<2x1xf32>
    %338 = tpu.matmul %336, %337, %cst_126 {dimension_numbers = #tpu.dot_dimension_numbers<[1], [0], [0], [1], [0, 0, 1, 1], [], []>} : vector<2x256xbf16>, vector<256x1xbf16>, vector<2x1xf32> -> vector<2x1xf32>
    %c0_127 = arith.constant 0 : index
    %c0_128 = arith.constant 0 : index
    %339 = vector.load %arg20[%c0_127, %c0_128] : memref<1x1xf32, #tpu.memory_space<vmem>>, vector<1x1xf32>
    %340 = vector.broadcast %339 : vector<1x1xf32> to vector<2x1xf32>
    %341 = arith.addf %338, %340 : vector<2x1xf32>
    %c0_129 = arith.constant 0 : index
    %c0_130 = arith.constant 0 : index
    %342 = vector.load %arg21[%c0_129, %c0_130] : memref<2x1xf32, #tpu.memory_space<vmem>>, vector<2x1xf32>
    tpu.vector_store %arg21[%c0_129, %c0_130], %341 {strides = array<i32>} : memref<2x1xf32, #tpu.memory_space<vmem>>, vector<2x1xf32>,
    %c0_131 = arith.constant 0 : index
    %c0_132 = arith.constant 0 : index
    %343 = vector.load %arg22[%c0_131, %c0_132] : memref<2x512xf32, #tpu.memory_space<vmem>>, vector<2x512xf32>
    tpu.vector_store %arg22[%c0_131, %c0_132], %327 {strides = array<i32>} : memref<2x512xf32, #tpu.memory_space<vmem>>, vector<2x512xf32>,
    return
  }
  func.func @transform_0(%arg0: i32) -> (i32, i32) {
    %c0_i32 = arith.constant 0 : i32
    %c0_i32_0 = arith.constant 0 : i32
    %c0_i32_1 = arith.constant 0 : i32
    return %c0_i32, %c0_i32_0 : i32, i32
  }
  func.func @transform_1(%arg0: i32) -> (i32, i32) {
    %c0_i32 = arith.constant 0 : i32
    %c0_i32_0 = arith.constant 0 : i32
    %c0_i32_1 = arith.constant 0 : i32
    return %c0_i32, %c0_i32_0 : i32, i32
  }
  func.func @transform_2(%arg0: i32) -> (i32, i32) {
    %c0_i32 = arith.constant 0 : i32
    %c0_i32_0 = arith.constant 0 : i32
    %c0_i32_1 = arith.constant 0 : i32
    return %c0_i32, %c0_i32_0 : i32, i32
  }
  func.func @transform_3(%arg0: i32) -> (i32, i32) {
    %c0_i32 = arith.constant 0 : i32
    %c0_i32_0 = arith.constant 0 : i32
    %c0_i32_1 = arith.constant 0 : i32
    return %c0_i32, %c0_i32_0 : i32, i32
  }
  func.func @transform_4(%arg0: i32) -> (i32, i32) {
    %c0_i32 = arith.constant 0 : i32
    %c0_i32_0 = arith.constant 0 : i32
    %c0_i32_1 = arith.constant 0 : i32
    return %c0_i32, %c0_i32_0 : i32, i32
  }
  func.func @transform_5(%arg0: i32) -> (i32, i32) {
    %c0_i32 = arith.constant 0 : i32
    %c0_i32_0 = arith.constant 0 : i32
    %c0_i32_1 = arith.constant 0 : i32
    return %c0_i32, %c0_i32_0 : i32, i32
  }
  func.func @transform_6(%arg0: i32) -> (i32, i32) {
    %c0_i32 = arith.constant 0 : i32
    %c0_i32_0 = arith.constant 0 : i32
    %c0_i32_1 = arith.constant 0 : i32
    return %c0_i32, %c0_i32_0 : i32, i32
  }
  func.func @transform_7(%arg0: i32) -> (i32, i32) {
    %c0_i32 = arith.constant 0 : i32
    %c0_i32_0 = arith.constant 0 : i32
    %c0_i32_1 = arith.constant 0 : i32
    return %c0_i32, %c0_i32_0 : i32, i32
  }
  func.func @transform_8(%arg0: i32) -> (i32, i32) {
    %c0_i32 = arith.constant 0 : i32
    %c0_i32_0 = arith.constant 0 : i32
    %c0_i32_1 = arith.constant 0 : i32
    return %c0_i32, %c0_i32_0 : i32, i32
  }
  func.func @transform_9(%arg0: i32) -> (i32, i32) {
    %c0_i32 = arith.constant 0 : i32
    %c0_i32_0 = arith.constant 0 : i32
    %c0_i32_1 = arith.constant 0 : i32
    return %c0_i32, %c0_i32_0 : i32, i32
  }
  func.func @transform_10(%arg0: i32) -> (i32, i32) {
    %c0_i32 = arith.constant 0 : i32
    %c0_i32_0 = arith.constant 0 : i32
    %c0_i32_1 = arith.constant 0 : i32
    return %c0_i32, %c0_i32_0 : i32, i32
  }
  func.func @transform_11(%arg0: i32) -> (i32, i32) {
    %c0_i32 = arith.constant 0 : i32
    %c0_i32_0 = arith.constant 0 : i32
    %c0_i32_1 = arith.constant 0 : i32
    return %c0_i32, %c0_i32_0 : i32, i32
  }
  func.func @transform_12(%arg0: i32) -> (i32, i32) {
    %c0_i32 = arith.constant 0 : i32
    %c0_i32_0 = arith.constant 0 : i32
    %c0_i32_1 = arith.constant 0 : i32
    return %c0_i32, %c0_i32_0 : i32, i32
  }
  func.func @transform_13(%arg0: i32) -> (i32, i32) {
    %c0_i32 = arith.constant 0 : i32
    %c0_i32_0 = arith.constant 0 : i32
    %c0_i32_1 = arith.constant 0 : i32
    return %c0_i32, %c0_i32_0 : i32, i32
  }
  func.func @transform_14(%arg0: i32) -> (i32, i32) {
    %c0_i32 = arith.constant 0 : i32
    %c0_i32_0 = arith.constant 0 : i32
    %c0_i32_1 = arith.constant 0 : i32
    return %c0_i32, %c0_i32_0 : i32, i32
  }
  func.func @transform_15(%arg0: i32) -> (i32, i32) {
    %c0_i32 = arith.constant 0 : i32
    %c0_i32_0 = arith.constant 0 : i32
    %c0_i32_1 = arith.constant 0 : i32
    return %c0_i32, %c0_i32_0 : i32, i32
  }
  func.func @transform_16(%arg0: i32) -> (i32, i32) {
    %c0_i32 = arith.constant 0 : i32
    %c0_i32_0 = arith.constant 0 : i32
    %c0_i32_1 = arith.constant 0 : i32
    return %c0_i32, %c0_i32_0 : i32, i32
  }
  func.func @transform_17(%arg0: i32) -> (i32, i32) {
    %c0_i32 = arith.constant 0 : i32
    %c0_i32_0 = arith.constant 0 : i32
    %c0_i32_1 = arith.constant 0 : i32
    return %c0_i32, %c0_i32_0 : i32, i32
  }
  func.func @transform_18(%arg0: i32) -> (i32, i32) {
    %c0_i32 = arith.constant 0 : i32
    %c0_i32_0 = arith.constant 0 : i32
    %c0_i32_1 = arith.constant 0 : i32
    return %c0_i32, %c0_i32_0 : i32, i32
  }
  func.func @transform_19(%arg0: i32) -> (i32, i32) {
    %c0_i32 = arith.constant 0 : i32
    %c0_i32_0 = arith.constant 0 : i32
    %c0_i32_1 = arith.constant 0 : i32
    return %c0_i32, %c0_i32_0 : i32, i32
  }
  func.func @transform_20(%arg0: i32) -> (i32, i32) {
    %c0_i32 = arith.constant 0 : i32
    %c0_i32_0 = arith.constant 0 : i32
    %c0_i32_1 = arith.constant 0 : i32
    return %c0_i32, %c0_i32_0 : i32, i32
  }
  func.func @transform_21(%arg0: i32) -> (i32, i32) {
    %c0_i32 = arith.constant 0 : i32
    %c0_i32_0 = arith.constant 0 : i32
    %c0_i32_1 = arith.constant 0 : i32
    return %c0_i32, %c0_i32_0 : i32, i32
  }
}

</mosaic_0001>

<bundles_post_ra>
// kernel: combined_model_forward.1
= control target key start
LH: loop header
LB: loop body
LE: loop exit
PB: predicated region body
PF: predicated region fallthrough
CT: control target
= control target key end

     0   :  { %s14430_s0 = inlined_call_operand.vmem [shape: f32[16,512], index: 0, kind: input, shape index: {}]   ;;  %s14431_s1 = inlined_call_operand.vmem [shape: f32[2,8], index: 1, kind: input, shape index: {}]   ;;  %s14432_s2 = inlined_call_operand.hbm [shape: f32[1,512], index: 2, kind: input, shape index: {}]   ;;  %s14433_s3 = inlined_call_operand.hbm [shape: f32[1,512], index: 3, kind: input, shape index: {}]   ;;  %s14434_s4 = inlined_call_operand.hbm [shape: bf16[512,1536], index: 4, kind: input, shape index: {}]   ;;  %s14435_s5 = inlined_call_operand.hbm [shape: f32[1,1536], index: 5, kind: input, shape index: {}]   ;;  %s14436_s6 = inlined_call_operand.hbm [shape: bf16[512,512], index: 6, kind: input, shape index: {}]   ;;  %s14437_s7 = inlined_call_operand.hbm [shape: f32[1,512], index: 7, kind: input, shape index: {}]   ;;  %s14438_s8 = inlined_call_operand.hbm [shape: f32[1,512], index: 8, kind: input, shape index: {}]   ;;  %s14439_s9 = inlined_call_operand.hbm [shape: f32[1,512], index: 9, kind: input, shape index: {}]   ;;  %s14440_s10 = inlined_call_operand.hbm [shape: bf16[512,1024], index: 10, kind: input, shape index: {}]   ;;  %s14441_s11 = inlined_call_operand.hbm [shape: f32[1,1024], index: 11, kind: input, shape index: {}]   ;;  %s14442_s12 = inlined_call_operand.hbm [shape: bf16[1024,512], index: 12, kind: input, shape index: {}]   ;;  %s14443_s13 = inlined_call_operand.hbm [shape: f32[1,512], index: 13, kind: input, shape index: {}]   ;;  %s14444_s14 = inlined_call_operand.hbm [shape: f32[1,512], index: 14, kind: input, shape index: {}]   ;;  %s14445_s15 = inlined_call_operand.hbm [shape: f32[1,512], index: 15, kind: input, shape index: {}]   ;;  %s14446_s16 = inlined_call_operand.hbm [shape: bf16[512,256], index: 16, kind: input, shape index: {}]   ;;  %s14447_s17 = inlined_call_operand.hbm [shape: f32[1,256], index: 17, kind: input, shape index: {}]   ;;  %s14448_s18 = inlined_call_operand.vmem [shape: bf16[256,1], index: 18, kind: input, shape index: {}]   ;;  %s14449_s19 = inlined_call_operand.<no memory space> [shape: f32[1,1], index: 19, kind: input, shape index: {}]   ;;  %s14450_s20 = inlined_call_operand.vmem [shape: f32[2,1], index: 20, kind: output, shape index: {0}]   ;;  %s14451_s21 = inlined_call_operand.hbm [shape: f32[2,512], index: 21, kind: output, shape index: {1}]  }
   0x1   :  { %14458 = sst [smem:[#allocation41_spill]] %s14430_s0  ;;  %v27_v0 = vstv %s14449_s19 }
   0x2   :  { %14459 = sst [smem:[#allocation42_spill]] %s14431_s1  ;;  %28 = vst [vmem:[#allocation3] sm:$0x1] %v27_v0 }
   0x3   :  { %14460 = sst [smem:[#allocation43_spill]] %s14432_s2 }
   0x4   :  { %14461 = sst [smem:[#allocation44_spill]] %s14433_s3 }
   0x5   :  { %14462 = sst [smem:[#allocation45_spill]] %s14434_s4 }
   0x6   :  { %14463 = sst [smem:[#allocation46_spill]] %s14435_s5 }
   0x7   :  { %29 = vsyncpa [#allocation5], 0 }
   0x8   :  { %30 = vsyncpa [#allocation8], 0 }
   0x9   :  { %31 = vsyncpa [#allocation11], 0 }
   0xa   :  { %32 = vsyncpa [#allocation14], 0 }
   0xb   :  { %33 = vsyncpa [#allocation17], 0 }
   0xc   :  { %34 = vsyncpa [#allocation20], 0 }
   0xd   :  { %35 = vsyncpa [#allocation23], 0 }
   0xe   :  { %36 = vsyncpa [#allocation26], 0 }
   0xf   :  { %37 = vsyncpa [#allocation29], 0 }
  0x10   :  { %38 = vsyncpa [#allocation6], 0  ;;  %s13264_s26 = smov [#allocation7]   ;;  %s13265_s3 = smov [#allocation10]  }
  0x11   :  { %s59_s27 = sshll.u32 %s13264_s26, 4  ;;  %s81_s28 = sshll.u32 %s13265_s3, 4  ;;  %s60_s27 = int_to_ptr.vmem [resolvable:$true] %s59_s27  ;;  %s82_s28 = int_to_ptr.vmem [resolvable:$true] %s81_s28 }
  0x12   :  { %s14464_s19 = sld [smem:[#allocation44_spill]] }
  0x18   :  { %s12870_s4 = scalar_lea.hbm %s14464_s19, 64 }
  0x19   :  { %p12871_p0 = scmp.ne.s32.totalorder %s14464_s19, %s12870_s4  ;;  %p12874_p1 = scmp.lt.u32.totalorder %s12870_s4, %s14464_s19 }
  0x1b   :  { %p12876_p2 = pnand %p12874_p1, %p12871_p0 }
  0x1d   :  { %12879 = shalt.err (!%p12876_p2)
}
  0x1e   :  { %s12880_s1 = scalar_lea.vmem %s60_s27, 64  ;;  %p12885_p4 = scmp.lt.s32.totalorder %s60_s27, %s60_s27 }
  0x1f   :  { %p12881_p3 = scmp.ne.s32.totalorder %s60_s27, %s12880_s1  ;;  %p12886_p5 = scmp.lt.s32.totalorder %s12880_s1, %s12880_s1 }
  0x21   :  { %p12887_p6 = por %p12886_p5, %p12885_p4 }
  0x23   :  { %p12888_p7 = pnand %p12887_p6, %p12881_p3 }
  0x25   :  { %12891 = shalt.err (!%p12888_p7)
}
  0x26   :  { %62 = dma.hbm_to_vmem [thread:$0]  %s14464_s19, 64, %s60_s27, [#allocation8]  }
  0x27   :  { %s14465_s3 = sld [smem:[#allocation46_spill]] }
  0x2d   :  { %s12892_s29 = scalar_lea.hbm %s14465_s3, 192 }
  0x2e   :  { %p12893_p8 = scmp.ne.s32.totalorder %s14465_s3, %s12892_s29  ;;  %p12896_p9 = scmp.lt.u32.totalorder %s12892_s29, %s14465_s3 }
  0x30   :  { %p12898_p10 = pnand %p12896_p9, %p12893_p8 }
  0x32   :  { %12901 = shalt.err (!%p12898_p10)
}
  0x33   :  { %s12902_s22 = scalar_lea.vmem %s82_s28, 192  ;;  %p12907_p12 = scmp.lt.s32.totalorder %s82_s28, %s82_s28 }
  0x34   :  { %p12903_p11 = scmp.ne.s32.totalorder %s82_s28, %s12902_s22  ;;  %p12908_p13 = scmp.lt.s32.totalorder %s12902_s22, %s12902_s22 }
  0x36   :  { %p12909_p0 = por %p12908_p13, %p12907_p12 }
  0x38   :  { %p12910_p1 = pnand %p12909_p0, %p12903_p11 }
  0x3a   :  { %12913 = shalt.err (!%p12910_p1)
}
  0x3b   :  { %84 = dma.hbm_to_vmem [thread:$0]  %s14465_s3, 192, %s82_s28, [#allocation11]  }
  0x3c   :  { %s13266_s23 = smov [#allocation13]   ;;  %s13267_s24 = smov [#allocation16]  }
  0x3d   :  { %s103_s1 = sshll.u32 %s13266_s23, 4  ;;  %s123_s2 = sshll.u32 %s13267_s24, 4  ;;  %s104_s1 = int_to_ptr.vmem [resolvable:$true] %s103_s1  ;;  %s124_s2 = int_to_ptr.vmem [resolvable:$true] %s123_s2 }
  0x3e   :  { %s12914_s29 = scalar_lea.hbm %s14437_s7, 64 }
  0x3f   :  { %p12915_p2 = scmp.ne.s32.totalorder %s14437_s7, %s12914_s29  ;;  %p12918_p3 = scmp.lt.u32.totalorder %s12914_s29, %s14437_s7 }
  0x41   :  { %p12920_p4 = pnand %p12918_p3, %p12915_p2 }
  0x43   :  { %12923 = shalt.err (!%p12920_p4)
}
  0x44   :  { %s12924_s28 = scalar_lea.vmem %s104_s1, 64  ;;  %p12929_p6 = scmp.lt.s32.totalorder %s104_s1, %s104_s1 }
  0x45   :  { %p12925_p5 = scmp.ne.s32.totalorder %s104_s1, %s12924_s28  ;;  %p12930_p7 = scmp.lt.s32.totalorder %s12924_s28, %s12924_s28 }
  0x47   :  { %p12931_p8 = por %p12930_p7, %p12929_p6 }
  0x49   :  { %p12932_p9 = pnand %p12931_p8, %p12925_p5 }
  0x4b   :  { %12935 = shalt.err (!%p12932_p9)
}
  0x4c   :  { %106 = dma.hbm_to_vmem [thread:$0]  %s14437_s7, 64, %s104_s1, [#allocation14]  }
  0x4d   :  { %s12936_s23 = scalar_lea.hbm %s14439_s9, 64 }
  0x4e   :  { %p12937_p10 = scmp.ne.s32.totalorder %s14439_s9, %s12936_s23  ;;  %p12940_p11 = scmp.lt.u32.totalorder %s12936_s23, %s14439_s9 }
  0x50   :  { %p12942_p12 = pnand %p12940_p11, %p12937_p10 }
  0x52   :  { %12945 = shalt.err (!%p12942_p12)
}
  0x53   :  { %s12946_s0 = scalar_lea.vmem %s124_s2, 64  ;;  %p12951_p0 = scmp.lt.s32.totalorder %s124_s2, %s124_s2 }
  0x54   :  { %p12947_p13 = scmp.ne.s32.totalorder %s124_s2, %s12946_s0  ;;  %p12952_p1 = scmp.lt.s32.totalorder %s12946_s0, %s12946_s0 }
  0x56   :  { %p12953_p2 = por %p12952_p1, %p12951_p0 }
  0x58   :  { %p12954_p3 = pnand %p12953_p2, %p12947_p13 }
  0x5a   :  { %12957 = shalt.err (!%p12954_p3)
}
  0x5b   :  { %126 = dma.hbm_to_vmem [thread:$0]  %s14439_s9, 64, %s124_s2, [#allocation17]  }
  0x5c   :  { %s13268_s30 = smov [#allocation19]   ;;  %s13269_s5 = smov [#allocation22]  }
  0x5d   :  { %s145_s4 = sshll.u32 %s13268_s30, 4  ;;  %s167_s28 = sshll.u32 %s13269_s5, 4  ;;  %s146_s4 = int_to_ptr.vmem [resolvable:$true] %s145_s4  ;;  %s168_s28 = int_to_ptr.vmem [resolvable:$true] %s167_s28 }
  0x5e   :  { %s12958_s27 = scalar_lea.hbm %s14441_s11, 128 }
  0x5f   :  { %p12959_p4 = scmp.ne.s32.totalorder %s14441_s11, %s12958_s27  ;;  %p12962_p5 = scmp.lt.u32.totalorder %s12958_s27, %s14441_s11 }
  0x61   :  { %p12964_p6 = pnand %p12962_p5, %p12959_p4 }
  0x63   :  { %12967 = shalt.err (!%p12964_p6)
}
  0x64   :  { %s12968_s9 = scalar_lea.vmem %s146_s4, 128  ;;  %p12973_p8 = scmp.lt.s32.totalorder %s146_s4, %s146_s4 }
  0x65   :  { %p12969_p7 = scmp.ne.s32.totalorder %s146_s4, %s12968_s9  ;;  %p12974_p9 = scmp.lt.s32.totalorder %s12968_s9, %s12968_s9 }
  0x67   :  { %p12975_p10 = por %p12974_p9, %p12973_p8 }
  0x69   :  { %p12976_p11 = pnand %p12975_p10, %p12969_p7 }
  0x6b   :  { %12979 = shalt.err (!%p12976_p11)
}
  0x6c   :  { %148 = dma.hbm_to_vmem [thread:$0]  %s14441_s11, 128, %s146_s4, [#allocation20]  }
  0x6d   :  { %s12980_s7 = scalar_lea.hbm %s14443_s13, 64 }
  0x6e   :  { %p12981_p12 = scmp.ne.s32.totalorder %s14443_s13, %s12980_s7  ;;  %p12984_p13 = scmp.lt.u32.totalorder %s12980_s7, %s14443_s13 }
  0x70   :  { %p12986_p0 = pnand %p12984_p13, %p12981_p12 }
  0x72   :  { %12989 = shalt.err (!%p12986_p0)
}
  0x73   :  { %s12990_s22 = scalar_lea.vmem %s168_s28, 64  ;;  %p12995_p2 = scmp.lt.s32.totalorder %s168_s28, %s168_s28 }
  0x74   :  { %p12991_p1 = scmp.ne.s32.totalorder %s168_s28, %s12990_s22  ;;  %p12996_p3 = scmp.lt.s32.totalorder %s12990_s22, %s12990_s22 }
  0x76   :  { %p12997_p4 = por %p12996_p3, %p12995_p2 }
  0x78   :  { %p12998_p5 = pnand %p12997_p4, %p12991_p1 }
  0x7a   :  { %13001 = shalt.err (!%p12998_p5)
}
  0x7b   :  { %170 = dma.hbm_to_vmem [thread:$0]  %s14443_s13, 64, %s168_s28, [#allocation23]  }
  0x7c   :  { %s13270_s27 = smov [#allocation25]   ;;  %s13271_s23 = smov [#allocation4]  }
  0x7d   :  { %s187_s19 = sshll.u32 %s13270_s27, 4  ;;  %s49_s24 = sshll.u32 %s13271_s23, 4  ;;  %s188_s19 = int_to_ptr.vmem [resolvable:$true] %s187_s19  ;;  %s50_s24 = int_to_ptr.vmem [resolvable:$true] %s49_s24 }
  0x7e   :  { %s13002_s2 = scalar_lea.hbm %s14445_s15, 64 }
  0x7f   :  { %p13003_p6 = scmp.ne.s32.totalorder %s14445_s15, %s13002_s2  ;;  %p13006_p7 = scmp.lt.u32.totalorder %s13002_s2, %s14445_s15 }
  0x81   :  { %p13008_p8 = pnand %p13006_p7, %p13003_p6 }
  0x83   :  { %13011 = shalt.err (!%p13008_p8)
}
  0x84   :  { %s13012_s13 = scalar_lea.vmem %s188_s19, 64  ;;  %p13017_p10 = scmp.lt.s32.totalorder %s188_s19, %s188_s19 }
  0x85   :  { %p13013_p9 = scmp.ne.s32.totalorder %s188_s19, %s13012_s13  ;;  %p13018_p11 = scmp.lt.s32.totalorder %s13012_s13, %s13012_s13 }
  0x87   :  { %p13019_p12 = por %p13018_p11, %p13017_p10 }
  0x89   :  { %p13020_p13 = pnand %p13019_p12, %p13013_p9 }
  0x8b   :  { %13023 = shalt.err (!%p13020_p13)
}
  0x8c   :  { %190 = dma.hbm_to_vmem [thread:$0]  %s14445_s15, 64, %s188_s19, [#allocation26]  }
  0x8d   :  { %s14466_s3 = sld [smem:[#allocation43_spill]] }
  0x93   :  { %s13024_s22 = scalar_lea.hbm %s14466_s3, 64 }
  0x94   :  { %p13025_p0 = scmp.ne.s32.totalorder %s14466_s3, %s13024_s22  ;;  %p13028_p1 = scmp.lt.u32.totalorder %s13024_s22, %s14466_s3 }
  0x96   :  { %p13030_p2 = pnand %p13028_p1, %p13025_p0 }
  0x98   :  { %13033 = shalt.err (!%p13030_p2)
}
  0x99   :  { %s13034_s25 = scalar_lea.vmem %s50_s24, 64  ;;  %p13039_p4 = scmp.lt.s32.totalorder %s50_s24, %s50_s24 }
  0x9a   :  { %p13035_p3 = scmp.ne.s32.totalorder %s50_s24, %s13034_s25  ;;  %p13040_p5 = scmp.lt.s32.totalorder %s13034_s25, %s13034_s25 }
  0x9c   :  { %p13041_p6 = por %p13040_p5, %p13039_p4 }
  0x9e   :  { %p13042_p7 = pnand %p13041_p6, %p13035_p3 }
  0xa0   :  { %13045 = shalt.err (!%p13042_p7)
}
  0xa1   :  { %52 = dma.hbm_to_vmem [thread:$0]  %s14466_s3, 64, %s50_s24, [#allocation5]  }
  0xa2   :  { %s13272_s9 = smov [#allocation9]   ;;  %s14467_s0 = sld [smem:[#allocation45_spill]] }
  0xa3   :  { %s68_s2 = sshll.u32 %s13272_s9, 4  ;;  %s69_s2 = int_to_ptr.vmem [resolvable:$true] %s68_s2 }
  0xa8   :  { %s13046_s7 = scalar_lea.hbm %s14467_s0, 49152 }
  0xa9   :  { %p13047_p8 = scmp.ne.s32.totalorder %s14467_s0, %s13046_s7  ;;  %p13050_p9 = scmp.lt.u32.totalorder %s13046_s7, %s14467_s0 }
  0xab   :  { %p13052_p10 = pnand %p13050_p9, %p13047_p8 }
  0xad   :  { %13055 = shalt.err (!%p13052_p10)
}
  0xae   :  { %s13056_s5 = scalar_lea.vmem %s69_s2, 49152  ;;  %p13061_p12 = scmp.lt.s32.totalorder %s69_s2, %s69_s2 }
  0xaf   :  { %p13057_p11 = scmp.ne.s32.totalorder %s69_s2, %s13056_s5  ;;  %p13062_p13 = scmp.lt.s32.totalorder %s13056_s5, %s13056_s5 }
  0xb1   :  { %p13063_p0 = por %p13062_p13, %p13061_p12 }
  0xb3   :  { %p13064_p1 = pnand %p13063_p0, %p13057_p11 }
  0xb5   :  { %13067 = shalt.err (!%p13064_p1)
}
  0xb6   :  { %s13273_s24 = smov 768   ;;  %s13274_s3 = smov 48  }
  0xb7   :  { %74 = dma.hbm_to_vmem [thread:$0]  %s14467_s0, 49152, %s69_s2, [#allocation8], %s13273_s24, %s13273_s24, %s13274_s3  }
  0xb8   :  { %s13275_s4 = smov [#allocation12]   ;;  %s13068_s15 = scalar_lea.hbm %s14436_s6, 16384 }
  0xb9   :  { %s90_s27 = sshll.u32 %s13275_s4, 4  ;;  %p13069_p2 = scmp.ne.s32.totalorder %s14436_s6, %s13068_s15  ;;  %s91_s27 = int_to_ptr.vmem [resolvable:$true] %s90_s27 }
  0xba   :  { %p13072_p3 = scmp.lt.u32.totalorder %s13068_s15, %s14436_s6 }
  0xbc   :  { %p13074_p4 = pnand %p13072_p3, %p13069_p2 }
  0xbe   :  { %13077 = shalt.err (!%p13074_p4)
}
  0xbf   :  { %s13078_s7 = scalar_lea.vmem %s91_s27, 16384  ;;  %p13083_p6 = scmp.lt.s32.totalorder %s91_s27, %s91_s27 }
  0xc0   :  { %p13079_p5 = scmp.ne.s32.totalorder %s91_s27, %s13078_s7  ;;  %p13084_p7 = scmp.lt.s32.totalorder %s13078_s7, %s13078_s7 }
  0xc2   :  { %p13085_p8 = por %p13084_p7, %p13083_p6 }
  0xc4   :  { %p13086_p9 = pnand %p13085_p8, %p13079_p5 }
  0xc6   :  { %13089 = shalt.err (!%p13086_p9)
}
  0xc7   :  { %s13276_s2 = smov 256   ;;  %s13277_s0 = smov 16  }
  0xc8   :  { %96 = dma.hbm_to_vmem [thread:$0]  %s14436_s6, 16384, %s91_s27, [#allocation11], %s13276_s2, %s13276_s2, %s13277_s0  }
  0xc9   :  { %s13278_s1 = smov [#allocation15]   ;;  %s13279_s5 = smov [#allocation18]  }
  0xca   :  { %s113_s30 = sshll.u32 %s13278_s1, 4  ;;  %s132_s24 = sshll.u32 %s13279_s5, 4  ;;  %s114_s30 = int_to_ptr.vmem [resolvable:$true] %s113_s30  ;;  %s13529_s24 = int_to_ptr.vmem [resolvable:$true] %s132_s24 }
  0xcb   :  { %s13090_s11 = scalar_lea.hbm %s14438_s8, 64 }
  0xcc   :  { %p13091_p10 = scmp.ne.s32.totalorder %s14438_s8, %s13090_s11  ;;  %p13094_p11 = scmp.lt.u32.totalorder %s13090_s11, %s14438_s8 }
  0xce   :  { %p13096_p12 = pnand %p13094_p11, %p13091_p10 }
  0xd0   :  { %13099 = shalt.err (!%p13096_p12)
}
  0xd1   :  { %s13100_s6 = scalar_lea.vmem %s114_s30, 64  ;;  %p13105_p0 = scmp.lt.s32.totalorder %s114_s30, %s114_s30 }
  0xd2   :  { %p13101_p13 = scmp.ne.s32.totalorder %s114_s30, %s13100_s6  ;;  %p13106_p1 = scmp.lt.s32.totalorder %s13100_s6, %s13100_s6 }
  0xd4   :  { %p13107_p2 = por %p13106_p1, %p13105_p0 }
  0xd6   :  { %p13108_p3 = pnand %p13107_p2, %p13101_p13 }
  0xd8   :  { %13111 = shalt.err (!%p13108_p3)
}
  0xd9   :  { %116 = dma.hbm_to_vmem [thread:$0]  %s14438_s8, 64, %s114_s30, [#allocation14]  }
  0xda   :  { %s13112_s29 = scalar_lea.hbm %s14440_s10, 32768 }
  0xdb   :  { %p13113_p4 = scmp.ne.s32.totalorder %s14440_s10, %s13112_s29  ;;  %p13116_p5 = scmp.lt.u32.totalorder %s13112_s29, %s14440_s10 }
  0xdd   :  { %p13118_p6 = pnand %p13116_p5, %p13113_p4 }
  0xdf   :  { %13121 = shalt.err (!%p13118_p6)
}
  0xe0   :  { %s13122_s5 = scalar_lea.vmem %s13529_s24, 32768  ;;  %p13127_p8 = scmp.lt.s32.totalorder %s13529_s24, %s13529_s24 }
  0xe1   :  { %p13123_p7 = scmp.ne.s32.totalorder %s13529_s24, %s13122_s5  ;;  %p13128_p9 = scmp.lt.s32.totalorder %s13122_s5, %s13122_s5 }
  0xe3   :  { %p13129_p10 = por %p13128_p9, %p13127_p8 }
  0xe5   :  { %p13130_p11 = pnand %p13129_p10, %p13123_p7 }
  0xe7   :  { %13133 = shalt.err (!%p13130_p11)
}
  0xe8   :  { %s13280_s8 = smov 512   ;;  %s13281_s30 = smov 32  }
  0xe9   :  { %138 = dma.hbm_to_vmem [thread:$0]  %s14440_s10, 32768, %s13529_s24, [#allocation17], %s13280_s8, %s13280_s8, %s13281_s30  }
  0xea   :  { %s13282_s11 = smov [#allocation21]   ;;  %s13283_s23 = smov [#allocation24]  }
  0xeb   :  { %s154_s4 = sshll.u32 %s13282_s11, 4  ;;  %s177_s25 = sshll.u32 %s13283_s23, 4  ;;  %s155_s4 = int_to_ptr.vmem [resolvable:$true] %s154_s4  ;;  %s178_s25 = int_to_ptr.vmem [resolvable:$true] %s177_s25 }
  0xec   :  { %s13134_s27 = scalar_lea.hbm %s14442_s12, 32768 }
  0xed   :  { %p13135_p12 = scmp.ne.s32.totalorder %s14442_s12, %s13134_s27  ;;  %p13138_p13 = scmp.lt.u32.totalorder %s13134_s27, %s14442_s12 }
  0xef   :  { %p13140_p0 = pnand %p13138_p13, %p13135_p12 }
  0xf1   :  { %13143 = shalt.err (!%p13140_p0)
}
  0xf2   :  { %s13144_s10 = scalar_lea.vmem %s155_s4, 32768  ;;  %p13149_p2 = scmp.lt.s32.totalorder %s155_s4, %s155_s4 }
  0xf3   :  { %p13145_p1 = scmp.ne.s32.totalorder %s155_s4, %s13144_s10  ;;  %p13150_p3 = scmp.lt.s32.totalorder %s13144_s10, %s13144_s10 }
  0xf5   :  { %p13151_p4 = por %p13150_p3, %p13149_p2 }
  0xf7   :  { %p13152_p5 = pnand %p13151_p4, %p13145_p1 }
  0xf9   :  { %13155 = shalt.err (!%p13152_p5)
}
  0xfa   :  { %160 = dma.hbm_to_vmem [thread:$0]  %s14442_s12, 32768, %s155_s4, [#allocation20], %s13276_s2, %s13276_s2, %s13277_s0  }
  0xfb   :  { %s13156_s1 = scalar_lea.hbm %s14444_s14, 64 }
  0xfc   :  { %p13157_p6 = scmp.ne.s32.totalorder %s14444_s14, %s13156_s1  ;;  %p13160_p7 = scmp.lt.u32.totalorder %s13156_s1, %s14444_s14 }
  0xfe   :  { %p13162_p8 = pnand %p13160_p7, %p13157_p6 }
 0x100   :  { %13165 = shalt.err (!%p13162_p8)
}
 0x101   :  { %s13166_s22 = scalar_lea.vmem %s178_s25, 64  ;;  %p13171_p10 = scmp.lt.s32.totalorder %s178_s25, %s178_s25 }
 0x102   :  { %p13167_p9 = scmp.ne.s32.totalorder %s178_s25, %s13166_s22  ;;  %p13172_p11 = scmp.lt.s32.totalorder %s13166_s22, %s13166_s22 }
 0x104   :  { %p13173_p12 = por %p13172_p11, %p13171_p10 }
 0x106   :  { %p13174_p13 = pnand %p13173_p12, %p13167_p9 }
 0x108   :  { %13177 = shalt.err (!%p13174_p13)
}
 0x109   :  { %180 = dma.hbm_to_vmem [thread:$0]  %s14444_s14, 64, %s178_s25, [#allocation23]  }
 0x10a   :  { %s13284_s0 = smov [#allocation27]   ;;  %s13178_s15 = scalar_lea.hbm %s14446_s16, 8192 }
 0x10b   :  { %s196_s11 = sshll.u32 %s13284_s0, 4  ;;  %p13179_p0 = scmp.ne.s32.totalorder %s14446_s16, %s13178_s15  ;;  %s197_s11 = int_to_ptr.vmem [resolvable:$true] %s196_s11 }
 0x10c   :  { %p13182_p1 = scmp.lt.u32.totalorder %s13178_s15, %s14446_s16 }
 0x10e   :  { %p13184_p2 = pnand %p13182_p1, %p13179_p0 }
 0x110   :  { %13187 = shalt.err (!%p13184_p2)
}
 0x111   :  { %s13188_s26 = scalar_lea.vmem %s197_s11, 8192  ;;  %p13193_p4 = scmp.lt.s32.totalorder %s197_s11, %s197_s11 }
 0x112   :  { %p13189_p3 = scmp.ne.s32.totalorder %s197_s11, %s13188_s26  ;;  %p13194_p5 = scmp.lt.s32.totalorder %s13188_s26, %s13188_s26 }
 0x114   :  { %p13195_p6 = por %p13194_p5, %p13193_p4 }
 0x116   :  { %p13196_p7 = pnand %p13195_p6, %p13189_p3 }
 0x118   :  { %13199 = shalt.err (!%p13196_p7)
}
 0x119   :  { %s13285_s14 = smov 128   ;;  %s13286_s25 = smov 8  }
 0x11a   :  { %202 = dma.hbm_to_vmem [thread:$0]  %s14446_s16, 8192, %s197_s11, [#allocation26], %s13285_s14, %s13285_s14, %s13286_s25  }
 0x11b   :  { %s13287_s24 = smov [#allocation28]   ;;  %s13200_s1 = scalar_lea.hbm %s14447_s17, 32 }
 0x11c   :  { %s209_s7 = sshll.u32 %s13287_s24, 4  ;;  %p13201_p8 = scmp.ne.s32.totalorder %s14447_s17, %s13200_s1  ;;  %s210_s7 = int_to_ptr.vmem [resolvable:$true] %s209_s7 }
 0x11d   :  { %p13204_p9 = scmp.lt.u32.totalorder %s13200_s1, %s14447_s17 }
 0x11f   :  { %p13206_p10 = pnand %p13204_p9, %p13201_p8 }
 0x121   :  { %13209 = shalt.err (!%p13206_p10)
}
 0x122   :  { %s13210_s22 = scalar_lea.vmem %s210_s7, 32  ;;  %p13215_p12 = scmp.lt.s32.totalorder %s210_s7, %s210_s7 }
 0x123   :  { %p13211_p11 = scmp.ne.s32.totalorder %s210_s7, %s13210_s22  ;;  %p13216_p13 = scmp.lt.s32.totalorder %s13210_s22, %s13210_s22 }
 0x125   :  { %p13217_p0 = por %p13216_p13, %p13215_p12 }
 0x127   :  { %p13218_p1 = pnand %p13217_p0, %p13211_p11 }
 0x129   :  { %13221 = shalt.err (!%p13218_p1)
}
 0x12a   :  { %212 = dma.hbm_to_vmem [thread:$0]  %s14447_s17, 32, %s210_s7, [#allocation29]  }
 0x12b   :  { %13244 = dma.done.wait [#allocation5], 64  }
 0x12c   :  { %13245 = vsyncadd [#allocation5], 4294967232 }
 0x12d   :  { %13246 = dma.done.wait [#allocation8], 49216  }
 0x12e   :  { %13247 = vsyncadd [#allocation8], 4294918080 }
 0x12f   :  { %13248 = dma.done.wait [#allocation11], 16576  }
 0x130   :  { %13249 = vsyncadd [#allocation11], 4294950720 }
 0x131   :  { %13250 = dma.done.wait [#allocation14], 128  }
 0x132   :  { %13251 = vsyncadd [#allocation14], 4294967168 }
 0x133   :  { %13252 = dma.done.wait [#allocation17], 32832  }
 0x134   :  { %13253 = vsyncadd [#allocation17], 4294934464 }
 0x135   :  { %13254 = dma.done.wait [#allocation20], 32896  }
 0x136   :  { %13255 = vsyncadd [#allocation20], 4294934400 }
 0x137   :  { %13256 = dma.done.wait [#allocation23], 128  }
 0x138   :  { %13257 = vsyncadd [#allocation23], 4294967168 }
 0x139   :  { %13258 = dma.done.wait [#allocation26], 8256  }
 0x13a   :  { %13259 = vsyncadd [#allocation26], 4294959040 }
 0x13b   :  { %13260 = dma.done.wait [#allocation29], 32  }
 0x13c   :  { %13261 = vsyncadd [#allocation29], 4294967264  ;;  %s14468_s0 = sld [smem:[#allocation41_spill]]  ;;  %v11518_v15 = vld [vmem:[#allocation9 + $0x4] ss:$48 sps:$4 sm:$0xff]   ;;  %vm13289_vm0 = vmmov 0  }
 0x13d   :  { %v11520_v16 = vld [vmem:[#allocation9 + $0x604] ss:$48 sps:$4 sm:$0xff]   ;;  %v11522_v17 = vld [vmem:[#allocation9] ss:$48 sps:$4 sm:$0xff]   ;;  %2759 = vmatprep.subr.bf16.mxu1 %v11518_v15  ;;  %vm3343_vm1 = vcmask 1043456   ;;  %s14469_s12 = sld [smem:[#allocation42_spill]] }
 0x13e   :  { %v11523_v18 = vld [vmem:[#allocation9 + $0x600] ss:$48 sps:$4 sm:$0xff]   ;;  %v11524_v19 = vld [vmem:[#allocation9 + $0x64] ss:$48 sps:$4 sm:$0xff]   ;;  %2802 = vmatprep.subr.bf16.mxu0 %v11520_v16  ;;  %2760 = vmatpush1.bf16.msra.mxu1 %v11522_v17  ;;  %vm3326_vm3 = vcmask 64512   ;;  %vm9374_vm5 = vcmask 1040384  }
 0x13f   :  { %v11526_v20 = vld [vmem:[#allocation9 + $0x664] ss:$48 sps:$4 sm:$0xff]   ;;  %2803 = vmatpush1.bf16.msra.mxu0 %v11523_v18  ;;  %v11528_v21 = vld [vmem:[#allocation9 + $0x60] ss:$48 sps:$4 sm:$0xff]   ;;  %2761 = vmatprep.subr.bf16.mxu1 %v11524_v19 }
 0x140   :  { %v11529_v22 = vld [vmem:[#allocation9 + $0x660] ss:$48 sps:$4 sm:$0xff]   ;;  %2804 = vmatprep.subr.bf16.mxu0 %v11526_v20  ;;  %v11530_v23 = vld [vmem:[#allocation9 + $0xc4] ss:$48 sps:$4 sm:$0xff]  }
 0x141   :  { %v11532_v24 = vld [vmem:[#allocation9 + $0x6c4] ss:$48 sps:$4 sm:$0xff]   ;;  %v11534_v25 = vld [vmem:[#allocation9 + $0xc0] ss:$48 sps:$4 sm:$0xff]  }
 0x142   :  { %v13614_v1 = vld [vmem:[%s14468_s0] sm:$0xff]  ;;  %v13619_v2 = vld [vmem:[%s14468_s0 + $0x8] sm:$0xff]  ;;  %v13624_v3 = vld [vmem:[%s14468_s0 + $0x10] sm:$0xff]  ;;  %2762 = vmatpush1.bf16.msra.mxu1 %v11528_v21 }
 0x143   :  { %v13629_v4 = vld [vmem:[%s14468_s0 + $0x18] sm:$0xff]  ;;  %v274_v5 = vadd.f32 %v13619_v2, %v13614_v1  ;;  %v270_v6 = vld [vmem:[%s14468_s0 + $0x20] sm:$0xff]  ;;  %v271_v7 = vld [vmem:[%s14468_s0 + $0x28] sm:$0xff]  ;;  %2805 = vmatpush1.bf16.msra.mxu0 %v11529_v22  ;;  %2763 = vmatprep.subr.bf16.mxu1 %v11530_v23 }
 0x144   :  { %v272_v8 = vld [vmem:[%s14468_s0 + $0x30] sm:$0xff]  ;;  %v273_v9 = vld [vmem:[%s14468_s0 + $0x38] sm:$0xff]  ;;  %v279_v10 = vadd.f32 %v271_v7, %v270_v6  ;;  %2806 = vmatprep.subr.bf16.mxu0 %v11532_v24  ;;  %v12858_v0 = vld [vmem:[%s14468_s0 + $0x20] sm:$0xff] }
 0x145   :  { %v275_v11 = vadd.f32 %v274_v5, %v13624_v3  ;;  %v11535_v26 = vld [vmem:[#allocation9 + $0x6c0] ss:$48 sps:$4 sm:$0xff]   ;;  %v11536_v27 = vld [vmem:[#allocation9 + $0x124] ss:$48 sps:$4 sm:$0xff]  }
 0x146   :  { %v280_v12 = vadd.f32 %v279_v10, %v272_v8  ;;  %v11538_v28 = vld [vmem:[#allocation9 + $0x724] ss:$48 sps:$4 sm:$0xff]   ;;  %2764 = vmatpush1.bf16.msra.mxu1 %v11534_v25  ;;  %v11540_v29 = vld [vmem:[#allocation9 + $0x120] ss:$48 sps:$4 sm:$0xff]  }
 0x147   :  { %v276_v13 = vadd.f32 %v275_v11, %v13629_v4  ;;  %2807 = vmatpush1.bf16.msra.mxu0 %v11535_v26  ;;  %v11541_v30 = vld [vmem:[#allocation9 + $0x720] ss:$48 sps:$4 sm:$0xff]   ;;  %2765 = vmatprep.subr.bf16.mxu1 %v11536_v27  ;;  %v11542_v31 = vld [vmem:[#allocation9 + $0x184] ss:$48 sps:$4 sm:$0xff]  }
 0x148   :  { %v281_v14 = vadd.f32 %v280_v12, %v273_v9  ;;  %2808 = vmatprep.subr.bf16.mxu0 %v11538_v28  ;;  %v11544_v32 = vld [vmem:[#allocation9 + $0x784] ss:$48 sps:$4 sm:$0xff]   ;;  %v11546_v33 = vld [vmem:[#allocation9 + $0x180] ss:$48 sps:$4 sm:$0xff]  }
 0x149   :  { %277 = vadd.xlane.f32.xlu0 %v276_v13  ;;  %v11547_v34 = vld [vmem:[#allocation9 + $0x780] ss:$48 sps:$4 sm:$0xff]   ;;  %v11548_v35 = vld [vmem:[#allocation9 + $0x1e4] ss:$48 sps:$4 sm:$0xff]  }
 0x14a   :  { %v11550_v36 = vld [vmem:[#allocation9 + $0x7e4] ss:$48 sps:$4 sm:$0xff]   ;;  %2766 = vmatpush1.bf16.msra.mxu1 %v11540_v29  ;;  %v11552_v37 = vld [vmem:[#allocation9 + $0x1e0] ss:$48 sps:$4 sm:$0xff]  }
 0x14b   :  { %2809 = vmatpush1.bf16.msra.mxu0 %v11541_v30  ;;  %2767 = vmatprep.subr.bf16.mxu1 %v11542_v31  ;;  %v11553_v38 = vld [vmem:[#allocation9 + $0x7e0] ss:$48 sps:$4 sm:$0xff]   ;;  %v11554_v39 = vld [vmem:[#allocation9 + $0x244] ss:$48 sps:$4 sm:$0xff]  }
 0x14c   :  { %2810 = vmatprep.subr.bf16.mxu0 %v11544_v32  ;;  %v11556_v40 = vld [vmem:[#allocation9 + $0x844] ss:$48 sps:$4 sm:$0xff]   ;;  %v11558_v41 = vld [vmem:[#allocation9 + $0x240] ss:$48 sps:$4 sm:$0xff]  }
 0x14d   :  { %282 = vadd.xlane.f32.xlu0 %v281_v14  ;;  %v11559_v42 = vld [vmem:[#allocation9 + $0x840] ss:$48 sps:$4 sm:$0xff]   ;;  %v11560_v43 = vld [vmem:[#allocation9 + $0x2a4] ss:$48 sps:$4 sm:$0xff]  }
 0x14e   :  { %2768 = vmatpush1.bf16.msra.mxu1 %v11546_v33  ;;  %v11562_v44 = vld [vmem:[#allocation9 + $0x8a4] ss:$48 sps:$4 sm:$0xff]   ;;  %v11564_v45 = vld [vmem:[#allocation9 + $0x2a0] ss:$48 sps:$4 sm:$0xff]  }
 0x14f   :  { %2811 = vmatpush1.bf16.msra.mxu0 %v11547_v34  ;;  %2769 = vmatprep.subr.bf16.mxu1 %v11548_v35  ;;  %v11565_v46 = vld [vmem:[#allocation9 + $0x8a0] ss:$48 sps:$4 sm:$0xff]   ;;  %v11566_v47 = vld [vmem:[#allocation9 + $0x304] ss:$48 sps:$4 sm:$0xff]  }
 0x150   :  { %2812 = vmatprep.subr.bf16.mxu0 %v11550_v36  ;;  %v11568_v48 = vld [vmem:[#allocation9 + $0x904] ss:$48 sps:$4 sm:$0xff]   ;;  %v11570_v49 = vld [vmem:[#allocation9 + $0x300] ss:$48 sps:$4 sm:$0xff]  }
 0x151   :  { %v11571_v50 = vld [vmem:[#allocation9 + $0x900] ss:$48 sps:$4 sm:$0xff]   ;;  %v11572_v51 = vld [vmem:[#allocation9 + $0x364] ss:$48 sps:$4 sm:$0xff]  }
 0x152   :  { %2770 = vmatpush1.bf16.msra.mxu1 %v11552_v37  ;;  %v11574_v52 = vld [vmem:[#allocation9 + $0x964] ss:$48 sps:$4 sm:$0xff]   ;;  %v11576_v19 = vld [vmem:[#allocation9 + $0x360] ss:$48 sps:$4 sm:$0xff]  }
 0x153   :  { %2813 = vmatpush1.bf16.msra.mxu0 %v11553_v38  ;;  %2771 = vmatprep.subr.bf16.mxu1 %v11554_v39  ;;  %v12860_v5 = vld [vmem:[%s14468_s0 + $0x30] sm:$0xff]  ;;  %v12861_v9 = vld [vmem:[%s14468_s0 + $0x38] sm:$0xff] }
 0x154   :  { %2814 = vmatprep.subr.bf16.mxu0 %v11556_v40  ;;  %v11577_v20 = vld [vmem:[#allocation9 + $0x960] ss:$48 sps:$4 sm:$0xff]   ;;  %v11578_v21 = vld [vmem:[#allocation9 + $0x3c4] ss:$48 sps:$4 sm:$0xff]  }
 0x155   :  { %v11580_v22 = vld [vmem:[#allocation9 + $0x9c4] ss:$48 sps:$4 sm:$0xff]   ;;  %v11582_v23 = vld [vmem:[#allocation9 + $0x3c0] ss:$48 sps:$4 sm:$0xff]  }
 0x156   :  { %2772 = vmatpush1.bf16.msra.mxu1 %v11558_v41  ;;  %v11583_v24 = vld [vmem:[#allocation9 + $0x9c0] ss:$48 sps:$4 sm:$0xff]   ;;  %v11584_v25 = vld [vmem:[#allocation9 + $0x424] ss:$48 sps:$4 sm:$0xff]  }
 0x157   :  { %2815 = vmatpush1.bf16.msra.mxu0 %v11559_v42  ;;  %2773 = vmatprep.subr.bf16.mxu1 %v11560_v43  ;;  %v11586_v26 = vld [vmem:[#allocation9 + $0xa24] ss:$48 sps:$4 sm:$0xff]   ;;  %v11588_v27 = vld [vmem:[#allocation9 + $0x420] ss:$48 sps:$4 sm:$0xff]  }
 0x158   :  { %2816 = vmatprep.subr.bf16.mxu0 %v11562_v44  ;;  %v11589_v28 = vld [vmem:[#allocation9 + $0xa20] ss:$48 sps:$4 sm:$0xff]   ;;  %v11590_v29 = vld [vmem:[#allocation9 + $0x484] ss:$48 sps:$4 sm:$0xff]  }
 0x159   :  { %v11592_v30 = vld [vmem:[#allocation9 + $0xa84] ss:$48 sps:$4 sm:$0xff]   ;;  %v11594_v31 = vld [vmem:[#allocation9 + $0x480] ss:$48 sps:$4 sm:$0xff]  }
 0x15a   :  { %2774 = vmatpush1.bf16.msra.mxu1 %v11564_v45  ;;  %v11595_v32 = vld [vmem:[#allocation9 + $0xa80] ss:$48 sps:$4 sm:$0xff]   ;;  %v11596_v33 = vld [vmem:[#allocation9 + $0x4e4] ss:$48 sps:$4 sm:$0xff]   ;;  %v11616_v45 = vld [vmem:[#allocation9 + $0xc] ss:$48 sps:$4 sm:$0xff]  }
 0x15b   :  { %2817 = vmatpush1.bf16.msra.mxu0 %v11565_v46  ;;  %2775 = vmatprep.subr.bf16.mxu1 %v11566_v47  ;;  %v11598_v34 = vld [vmem:[#allocation9 + $0xae4] ss:$48 sps:$4 sm:$0xff]   ;;  %v11600_v35 = vld [vmem:[#allocation9 + $0x4e0] ss:$48 sps:$4 sm:$0xff]  }
 0x15c   :  { %2818 = vmatprep.subr.bf16.mxu0 %v11568_v48  ;;  %v11601_v36 = vld [vmem:[#allocation9 + $0xae0] ss:$48 sps:$4 sm:$0xff]   ;;  %v11602_v37 = vld [vmem:[#allocation9 + $0x544] ss:$48 sps:$4 sm:$0xff]  }
 0x15d   :  { %v11604_v38 = vld [vmem:[#allocation9 + $0xb44] ss:$48 sps:$4 sm:$0xff]   ;;  %v11606_v39 = vld [vmem:[#allocation9 + $0x540] ss:$48 sps:$4 sm:$0xff]  }
 0x15e   :  { %2776 = vmatpush1.bf16.msra.mxu1 %v11570_v49  ;;  %v11607_v40 = vld [vmem:[#allocation9 + $0xb40] ss:$48 sps:$4 sm:$0xff]   ;;  %v11608_v41 = vld [vmem:[#allocation9 + $0x5a4] ss:$48 sps:$4 sm:$0xff]  }
 0x15f   :  { %2819 = vmatpush1.bf16.msra.mxu0 %v11571_v50  ;;  %2777 = vmatprep.subr.bf16.mxu1 %v11572_v51  ;;  %v11610_v42 = vld [vmem:[#allocation9 + $0xba4] ss:$48 sps:$4 sm:$0xff]   ;;  %v11612_v43 = vld [vmem:[#allocation9 + $0x5a0] ss:$48 sps:$4 sm:$0xff]   ;;  %v329_v51 = vlaneseq }
 0x160   :  { %2820 = vmatprep.subr.bf16.mxu0 %v11574_v52  ;;  %v11613_v44 = vld [vmem:[#allocation9 + $0xba0] ss:$48 sps:$4 sm:$0xff]   ;;  %v11619_v46 = vld [vmem:[#allocation9 + $0x14] ss:$48 sps:$4 sm:$0xff]  }
 0x162   :  { %2778 = vmatpush1.bf16.msra.mxu1 %v11576_v19 }
 0x163   :  { %2821 = vmatpush1.bf16.msra.mxu0 %v11577_v20  ;;  %2779 = vmatprep.subr.bf16.mxu1 %v11578_v21 }
 0x164   :  { %2822 = vmatprep.subr.bf16.mxu0 %v11580_v22 }
 0x166   :  { %2780 = vmatpush1.bf16.msra.mxu1 %v11582_v23 }
 0x167   :  { %2823 = vmatpush1.bf16.msra.mxu0 %v11583_v24  ;;  %2781 = vmatprep.subr.bf16.mxu1 %v11584_v25 }
 0x168   :  { %2824 = vmatprep.subr.bf16.mxu0 %v11586_v26 }
 0x16a   :  { %2782 = vmatpush1.bf16.msra.mxu1 %v11588_v27 }
 0x16b   :  { %2825 = vmatpush1.bf16.msra.mxu0 %v11589_v28  ;;  %2783 = vmatprep.subr.bf16.mxu1 %v11590_v29 }
 0x16c   :  { %2826 = vmatprep.subr.bf16.mxu0 %v11592_v30 }
 0x16e   :  { %2784 = vmatpush1.bf16.msra.mxu1 %v11594_v31  ;;  %v11614_v31 = vld [vmem:[#allocation9 + $0x8] ss:$48 sps:$4 sm:$0xff]  }
 0x16f   :  { %2827 = vmatpush1.bf16.msra.mxu0 %v11595_v32  ;;  %2785 = vmatprep.subr.bf16.mxu1 %v11596_v33 }
 0x170   :  { %2828 = vmatprep.subr.bf16.mxu0 %v11598_v34 }
 0x172   :  { %2786 = vmatpush1.bf16.msra.mxu1 %v11600_v35 }
 0x173   :  { %2829 = vmatpush1.bf16.msra.mxu0 %v11601_v36  ;;  %2787 = vmatprep.subr.bf16.mxu1 %v11602_v37 }
 0x174   :  { %2830 = vmatprep.subr.bf16.mxu0 %v11604_v38  ;;  %v11620_v38 = vld [vmem:[#allocation9 + $0x68] ss:$48 sps:$4 sm:$0xff]  }
 0x176   :  { %2788 = vmatpush1.bf16.msra.mxu1 %v11606_v39  ;;  %v11623_v39 = vld [vmem:[#allocation9 + $0x70] ss:$48 sps:$4 sm:$0xff]  }
 0x177   :  { %2831 = vmatpush1.bf16.msra.mxu0 %v11607_v40  ;;  %2789 = vmatprep.subr.bf16.mxu1 %v11608_v41  ;;  %v11625_v40 = vld [vmem:[#allocation9 + $0x74] ss:$48 sps:$4 sm:$0xff]   ;;  %v11628_v41 = vld [vmem:[#allocation9 + $0xcc] ss:$48 sps:$4 sm:$0xff]  }
 0x178   :  { %2832 = vmatprep.subr.bf16.mxu0 %v11610_v42  ;;  %v11631_v42 = vld [vmem:[#allocation9 + $0xd4] ss:$48 sps:$4 sm:$0xff]  }
 0x17a   :  { %2790 = vmatpush1.bf16.msra.mxu1 %v11612_v43  ;;  %v11626_v43 = vld [vmem:[#allocation9 + $0xc8] ss:$48 sps:$4 sm:$0xff]  }
 0x17b   :  { %2833 = vmatpush1.bf16.msra.mxu0 %v11613_v44  ;;  %2845 = vmatprep.subr.bf16.mxu1 %v11616_v45  ;;  %v11629_v44 = vld [vmem:[#allocation9 + $0xd0] ss:$48 sps:$4 sm:$0xff]   ;;  %v11634_v45 = vld [vmem:[#allocation9 + $0x12c] ss:$48 sps:$4 sm:$0xff]  }
 0x17c   :  { %2931 = vmatprep.subr.bf16.mxu0 %v11619_v46  ;;  %v11637_v46 = vld [vmem:[#allocation9 + $0x134] ss:$48 sps:$4 sm:$0xff]  }
 0x1d6   :  { %v278_v53 = vpop.xlane.xlu0 %277 }
 0x1d7   :  { %v285_v54 = vmul.f32 0.001953125, %v278_v53 }
 0x1d9   :  { %v13648_v55 = vsub.f32 %v13614_v1, %v285_v54  ;;  %v13651_v56 = vsub.f32 %v13619_v2, %v285_v54  ;;  %v13654_v57 = vsub.f32 %v13624_v3, %v285_v54  ;;  %v13657_v59 = vsub.f32 %v13629_v4, %v285_v54  ;;  %v12859_v2 = vld [vmem:[%s14468_s0 + $0x28] sm:$0xff] }
 0x1da   :  { %v283_v58 = vpop.xlane.xlu0 %282  ;;  %v13695_v54 = vshrl.u32 %v329_v51, 7  ;;  %v11638_v51 = vld [vmem:[#allocation9 + $0x188] ss:$48 sps:$4 sm:$0xff]  }
 0x1db   :  { %v286_v60 = vmul.f32 0.001953125, %v283_v58  ;;  %v295_v61 = vmul.f32 %v13648_v55, %v13648_v55  ;;  %v296_v62 = vmul.f32 %v13651_v56, %v13651_v56  ;;  %v297_v63 = vmul.f32 %v13654_v57, %v13654_v57  ;;  %v327_v58 = vld [vmem:[#allocation4] sm:$0xf] }
 0x1dc   :  { %v298_v7 = vmul.f32 %v13657_v59, %v13657_v59 }
 0x1dd   :  { %v13668_v1 = vsub.f32 %v12858_v0, %v286_v60  ;;  %v13673_v3 = vsub.f32 %v12859_v2, %v286_v60  ;;  %v303_v4 = vadd.f32 %v296_v62, %v295_v61  ;;  %v13678_v6 = vsub.f32 %v12860_v5, %v286_v60  ;;  %v357_v5 = vld [vmem:[#allocation7] sm:$0xf] }
 0x1de   :  { %v13685_v10 = vsub.f32 %v12861_v9, %v286_v60  ;;  %v13698_v60 = vsub.s32 1, %v13695_v54  ;;  %v13701_v61 = vsub.s32 3, %v13695_v54  ;;  %v13704_v62 = vsub.s32 0, %v13695_v54 }
 0x1df   :  { %v304_v8 = vadd.f32 %v303_v4, %v297_v63  ;;  %v299_v11 = vmul.f32 %v13668_v1, %v13668_v1  ;;  %v300_v12 = vmul.f32 %v13673_v3, %v13673_v3  ;;  %v301_v14 = vmul.f32 %v13678_v6, %v13678_v6 }
 0x1e0   :  { %v302_v16 = vmul.f32 %v13685_v10, %v13685_v10  ;;  %v13707_v63 = vsub.s32 2, %v13695_v54  ;;  %v336_v4 = vrot.slane %v327_v58, %v13698_v60 }
 0x1e1   :  { %v305_v13 = vadd.f32 %v304_v8, %v298_v7  ;;  %v308_v15 = vadd.f32 %v300_v12, %v299_v11  ;;  %v344_v8 = vrot.slane %v327_v58, %v13701_v61  ;;  %v332_v11 = vrot.slane %v327_v58, %v13704_v62 }
 0x1e3   :  { %306 = vadd.xlane.f32.xlu1 %v305_v13  ;;  %v309_v17 = vadd.f32 %v308_v15, %v301_v14  ;;  %v340_v13 = vrot.slane %v327_v58, %v13707_v63  ;;  %v366_v15 = vrot.slane %v357_v5, %v13698_v60  ;;  %v11649_v58 = vld [vmem:[#allocation9 + $0x1f4] ss:$48 sps:$4 sm:$0xff]  }
 0x1e5   :  { %v310_v18 = vadd.f32 %v309_v17, %v302_v16  ;;  %v362_v16 = vrot.slane %v357_v5, %v13704_v62  ;;  %v370_v17 = vrot.slane %v357_v5, %v13707_v63 }
 0x1e7   :  { %311 = vadd.xlane.f32.xlu1 %v310_v18 }
 0x270   :  { %v307_v47 = vpop.xlane.xlu1 %306 }
 0x271   :  { %v313_v48 = vmul.f32 0.001953125, %v307_v47  ;;  %v11632_v47 = vld [vmem:[#allocation9 + $0x128] ss:$48 sps:$4 sm:$0xff]  }
 0x273   :  { %v315_v49 = vadd.f32 1e-05, %v313_v48  ;;  %v11635_v48 = vld [vmem:[#allocation9 + $0x130] ss:$48 sps:$4 sm:$0xff]  }
 0x274   :  { %v312_v50 = vpop.xlane.xlu1 %311 }
 0x275   :  { %12782 = vrsqrt.f32 %v315_v49  ;;  %v314_v52 = vmul.f32 0.001953125, %v312_v50  ;;  %v11640_v49 = vld [vmem:[#allocation9 + $0x18c] ss:$48 sps:$4 sm:$0xff]   ;;  %v11643_v50 = vld [vmem:[#allocation9 + $0x194] ss:$48 sps:$4 sm:$0xff]  }
 0x277   :  { %v316_v53 = vadd.f32 1e-05, %v314_v52  ;;  %v11641_v52 = vld [vmem:[#allocation9 + $0x190] ss:$48 sps:$4 sm:$0xff]  }
 0x279   :  { %12784 = vrsqrt.f32 %v316_v53  ;;  %v11646_v53 = vld [vmem:[#allocation9 + $0x1ec] ss:$48 sps:$4 sm:$0xff]  }
 0x27f   :  { %v12783_v0 = vpop.eup %12782 }
 0x280   :  { %v320_v2 = vmul.f32 %v12783_v0, %v13651_v56  ;;  %v322_v7 = vmul.f32 %v12783_v0, %v13657_v59  ;;  %v319_v9 = vmul.f32 %v12783_v0, %v13648_v55  ;;  %v321_v12 = vmul.f32 %v12783_v0, %v13654_v57  ;;  %v11644_v0 = vld [vmem:[#allocation9 + $0x1e8] ss:$48 sps:$4 sm:$0xff]  }
 0x281   :  { %v374_v56 = vrot.slane %v357_v5, %v13701_v61  ;;  %v11655_v5 = vld [vmem:[#allocation9 + $0x254] ss:$48 sps:$4 sm:$0xff]  }
 0x282   :  { %v350_v18 = vmul.f32 %v336_v4, %v320_v2  ;;  %v352_v19 = vmul.f32 %v344_v8, %v322_v7  ;;  %v349_v57 = vmul.f32 %v332_v11, %v319_v9  ;;  %v351_v22 = vmul.f32 %v340_v13, %v321_v12  ;;  %v11647_v2 = vld [vmem:[#allocation9 + $0x1f0] ss:$48 sps:$4 sm:$0xff]   ;;  %v11650_v7 = vld [vmem:[#allocation9 + $0x248] ss:$48 sps:$4 sm:$0xff]   ;;  %v11658_v9 = vld [vmem:[#allocation9 + $0x2ac] ss:$48 sps:$4 sm:$0xff]  }
 0x283   :  { %v12785_v14 = vpop.eup %12784  ;;  %v11656_v12 = vld [vmem:[#allocation9 + $0x2a8] ss:$48 sps:$4 sm:$0xff]  }
 0x284   :  { %v324_v59 = vmul.f32 %v12785_v14, %v13673_v3  ;;  %v326_v55 = vmul.f32 %v12785_v14, %v13685_v10  ;;  %v323_v20 = vmul.f32 %v12785_v14, %v13668_v1  ;;  %v325_v21 = vmul.f32 %v12785_v14, %v13678_v6  ;;  %v11617_v3 = vld [vmem:[#allocation9 + $0x10] ss:$48 sps:$4 sm:$0xff]   ;;  %v11622_v6 = vld [vmem:[#allocation9 + $0x6c] ss:$48 sps:$4 sm:$0xff]  }
 0x285   :  { %v380_v27 = vadd.f32 %v366_v15, %v350_v18  ;;  %v382_v29 = vadd.f32 %v374_v56, %v352_v19  ;;  %v379_v32 = vadd.f32 %v362_v16, %v349_v57  ;;  %v381_v10 = vadd.f32 %v370_v17, %v351_v22  ;;  %v11664_v14 = vld [vmem:[#allocation9 + $0x30c] ss:$48 sps:$4 sm:$0xff]   ;;  %v11668_v18 = vld [vmem:[#allocation9 + $0x368] ss:$48 sps:$4 sm:$0xff]  }
 0x286   :  { %v354_v23 = vmul.f32 %v336_v4, %v324_v59  ;;  %v356_v24 = vmul.f32 %v344_v8, %v326_v55  ;;  %v353_v25 = vmul.f32 %v332_v11, %v323_v20  ;;  %v355_v26 = vmul.f32 %v340_v13, %v325_v21  ;;  %v11652_v4 = vld [vmem:[#allocation9 + $0x24c] ss:$48 sps:$4 sm:$0xff]   ;;  %v11653_v8 = vld [vmem:[#allocation9 + $0x250] ss:$48 sps:$4 sm:$0xff]   ;;  %v11661_v11 = vld [vmem:[#allocation9 + $0x2b4] ss:$48 sps:$4 sm:$0xff]  }
 0x287   :  { %v11659_v13 = vld [vmem:[#allocation9 + $0x2b0] ss:$48 sps:$4 sm:$0xff]   ;;  %v11673_v59 = vld [vmem:[#allocation9 + $0x374] ss:$48 sps:$4 sm:$0xff]   ;;  %v11676_v19 = vld [vmem:[#allocation9 + $0x3cc] ss:$48 sps:$4 sm:$0xff]  }
 0x288   :  { %v384_v28 = vadd.f32 %v366_v15, %v354_v23  ;;  %v386_v30 = vadd.f32 %v374_v56, %v356_v24  ;;  %v383_v33 = vadd.f32 %v362_v16, %v353_v25  ;;  %v385_v34 = vadd.f32 %v370_v17, %v355_v26  ;;  %v11667_v15 = vld [vmem:[#allocation9 + $0x314] ss:$48 sps:$4 sm:$0xff]   ;;  %v11662_v56 = vld [vmem:[#allocation9 + $0x308] ss:$48 sps:$4 sm:$0xff]   ;;  %v11665_v16 = vld [vmem:[#allocation9 + $0x310] ss:$48 sps:$4 sm:$0xff]  }
 0x289   :  { %v11670_v17 = vld [vmem:[#allocation9 + $0x36c] ss:$48 sps:$4 sm:$0xff]   ;;  %v11671_v55 = vld [vmem:[#allocation9 + $0x370] ss:$48 sps:$4 sm:$0xff]   ;;  %v11679_v20 = vld [vmem:[#allocation9 + $0x3d4] ss:$48 sps:$4 sm:$0xff]  }
 0x28a   :  { %v13725_v35 = vpack.c.bf16 %v384_v28, %v380_v27  ;;  %v13727_v1 = vpack.c.bf16 %v386_v30, %v382_v29  ;;  %v13729_v36 = vpack.c.bf16 %v383_v33, %v379_v32  ;;  %v13731_v37 = vpack.c.bf16 %v385_v34, %v381_v10  ;;  %v11674_v57 = vld [vmem:[#allocation9 + $0x3c8] ss:$48 sps:$4 sm:$0xff]   ;;  %v11677_v21 = vld [vmem:[#allocation9 + $0x3d0] ss:$48 sps:$4 sm:$0xff]   ;;  %v11682_v22 = vld [vmem:[#allocation9 + $0x42c] ss:$48 sps:$4 sm:$0xff]  }
 0x28b   :  { %v11685_v23 = vld [vmem:[#allocation9 + $0x434] ss:$48 sps:$4 sm:$0xff]   ;;  %v11680_v24 = vld [vmem:[#allocation9 + $0x428] ss:$48 sps:$4 sm:$0xff]   ;;  %v11683_v25 = vld [vmem:[#allocation9 + $0x430] ss:$48 sps:$4 sm:$0xff]  }
 0x28c   :  { %2791 = vmatprep.mubr.bf16.mxu1 %v13725_v35  ;;  %2834 = vmatprep.mubr.bf16.mxu0 %v13727_v1  ;;  %v11688_v26 = vld [vmem:[#allocation9 + $0x48c] ss:$48 sps:$4 sm:$0xff]   ;;  %v11691_v27 = vld [vmem:[#allocation9 + $0x494] ss:$48 sps:$4 sm:$0xff]   ;;  %v11686_v28 = vld [vmem:[#allocation9 + $0x488] ss:$48 sps:$4 sm:$0xff]  }
 0x28d   :  { %2792 = vmatmul.mubr.bf16.vlgmr.msra.gmra.mrb[0].mxu1 %v13729_v36  ;;  %2835 = vmatmul.mubr.bf16.vlgmr.msra.gmra.mrb[0].mxu0 %v13731_v37  ;;  %v11689_v29 = vld [vmem:[#allocation9 + $0x490] ss:$48 sps:$4 sm:$0xff]   ;;  %v11694_v30 = vld [vmem:[#allocation9 + $0x4ec] ss:$48 sps:$4 sm:$0xff]   ;;  %v11703_v10 = vld [vmem:[#allocation9 + $0x554] ss:$48 sps:$4 sm:$0xff]  }
 0x28e   :  { %2846 = vmatpush1.bf16.msra.mxu1 %v11614_v31  ;;  %2932 = vmatpush1.bf16.msra.mxu0 %v11617_v3  ;;  %v11697_v31 = vld [vmem:[#allocation9 + $0x4f4] ss:$48 sps:$4 sm:$0xff]   ;;  %v11692_v3 = vld [vmem:[#allocation9 + $0x4e8] ss:$48 sps:$4 sm:$0xff]   ;;  %v11695_v32 = vld [vmem:[#allocation9 + $0x4f0] ss:$48 sps:$4 sm:$0xff]  }
 0x28f   :  { %2877 = vmatprep.mubr.bf16.mxu1 %v13725_v35  ;;  %2963 = vmatprep.mubr.bf16.mxu0 %v13725_v35  ;;  %v11700_v33 = vld [vmem:[#allocation9 + $0x54c] ss:$48 sps:$4 sm:$0xff]   ;;  %v11698_v34 = vld [vmem:[#allocation9 + $0x548] ss:$48 sps:$4 sm:$0xff]  }
 0x290   :  { %2847 = vmatprep.subr.bf16.mxu1 %v11622_v6  ;;  %2933 = vmatprep.subr.bf16.mxu0 %v11625_v40  ;;  %v11701_v6 = vld [vmem:[#allocation9 + $0x550] ss:$48 sps:$4 sm:$0xff]   ;;  %v11704_v40 = vld [vmem:[#allocation9 + $0x5a8] ss:$48 sps:$4 sm:$0xff]  }
 0x292   :  { %2848 = vmatpush1.bf16.msra.mxu1 %v11620_v38  ;;  %2934 = vmatpush1.bf16.msra.mxu0 %v11623_v39  ;;  %v11706_v38 = vld [vmem:[#allocation9 + $0x5ac] ss:$48 sps:$4 sm:$0xff]   ;;  %v11709_v39 = vld [vmem:[#allocation9 + $0x5b4] ss:$48 sps:$4 sm:$0xff]  }
 0x293   :  { %2849 = vmatprep.subr.bf16.mxu1 %v11628_v41  ;;  %2935 = vmatprep.subr.bf16.mxu0 %v11631_v42  ;;  %v11707_v41 = vld [vmem:[#allocation9 + $0x5b0] ss:$48 sps:$4 sm:$0xff]   ;;  %v11712_v42 = vld [vmem:[#allocation9 + $0x60c] ss:$48 sps:$4 sm:$0xff]  }
 0x296   :  { %2850 = vmatpush1.bf16.msra.mxu1 %v11626_v43  ;;  %2936 = vmatpush1.bf16.msra.mxu0 %v11629_v44  ;;  %v11715_v43 = vld [vmem:[#allocation9 + $0x614] ss:$48 sps:$4 sm:$0xff]   ;;  %v11710_v44 = vld [vmem:[#allocation9 + $0x608] ss:$48 sps:$4 sm:$0xff]  }
 0x297   :  { %2851 = vmatprep.subr.bf16.mxu1 %v11634_v45  ;;  %2937 = vmatprep.subr.bf16.mxu0 %v11637_v46  ;;  %v11713_v45 = vld [vmem:[#allocation9 + $0x610] ss:$48 sps:$4 sm:$0xff]   ;;  %v11718_v46 = vld [vmem:[#allocation9 + $0x66c] ss:$48 sps:$4 sm:$0xff]  }
 0x29a   :  { %2852 = vmatpush1.bf16.msra.mxu1 %v11632_v47  ;;  %2938 = vmatpush1.bf16.msra.mxu0 %v11635_v48  ;;  %v11721_v47 = vld [vmem:[#allocation9 + $0x674] ss:$48 sps:$4 sm:$0xff]   ;;  %v11716_v48 = vld [vmem:[#allocation9 + $0x668] ss:$48 sps:$4 sm:$0xff]  }
 0x29b   :  { %2853 = vmatprep.subr.bf16.mxu1 %v11640_v49  ;;  %2939 = vmatprep.subr.bf16.mxu0 %v11643_v50  ;;  %v11719_v49 = vld [vmem:[#allocation9 + $0x670] ss:$48 sps:$4 sm:$0xff]   ;;  %v11724_v50 = vld [vmem:[#allocation9 + $0x6cc] ss:$48 sps:$4 sm:$0xff]  }
 0x29e   :  { %2854 = vmatpush1.bf16.msra.mxu1 %v11638_v51  ;;  %2940 = vmatpush1.bf16.msra.mxu0 %v11641_v52  ;;  %v11727_v51 = vld [vmem:[#allocation9 + $0x6d4] ss:$48 sps:$4 sm:$0xff]   ;;  %v11722_v52 = vld [vmem:[#allocation9 + $0x6c8] ss:$48 sps:$4 sm:$0xff]  }
 0x29f   :  { %2855 = vmatprep.subr.bf16.mxu1 %v11646_v53  ;;  %2941 = vmatprep.subr.bf16.mxu0 %v11649_v58  ;;  %v11725_v53 = vld [vmem:[#allocation9 + $0x6d0] ss:$48 sps:$4 sm:$0xff]   ;;  %v11730_v58 = vld [vmem:[#allocation9 + $0x72c] ss:$48 sps:$4 sm:$0xff]  }
 0x2a2   :  { %2856 = vmatpush1.bf16.msra.mxu1 %v11644_v0  ;;  %2942 = vmatpush1.bf16.msra.mxu0 %v11647_v2  ;;  %v11733_v0 = vld [vmem:[#allocation9 + $0x734] ss:$48 sps:$4 sm:$0xff]   ;;  %v11728_v2 = vld [vmem:[#allocation9 + $0x728] ss:$48 sps:$4 sm:$0xff]  }
 0x2a3   :  { %2857 = vmatprep.subr.bf16.mxu1 %v11652_v4  ;;  %2943 = vmatprep.subr.bf16.mxu0 %v11655_v5  ;;  %v11731_v4 = vld [vmem:[#allocation9 + $0x730] ss:$48 sps:$4 sm:$0xff]   ;;  %v11736_v5 = vld [vmem:[#allocation9 + $0x78c] ss:$48 sps:$4 sm:$0xff]  }
 0x2a6   :  { %2858 = vmatpush1.bf16.msra.mxu1 %v11650_v7  ;;  %2944 = vmatpush1.bf16.msra.mxu0 %v11653_v8  ;;  %v11739_v7 = vld [vmem:[#allocation9 + $0x794] ss:$48 sps:$4 sm:$0xff]   ;;  %v11734_v8 = vld [vmem:[#allocation9 + $0x788] ss:$48 sps:$4 sm:$0xff]  }
 0x2a7   :  { %2859 = vmatprep.subr.bf16.mxu1 %v11658_v9  ;;  %2945 = vmatprep.subr.bf16.mxu0 %v11661_v11  ;;  %v11737_v9 = vld [vmem:[#allocation9 + $0x790] ss:$48 sps:$4 sm:$0xff]   ;;  %v11742_v11 = vld [vmem:[#allocation9 + $0x7ec] ss:$48 sps:$4 sm:$0xff]  }
 0x2aa   :  { %2860 = vmatpush1.bf16.msra.mxu1 %v11656_v12  ;;  %2946 = vmatpush1.bf16.msra.mxu0 %v11659_v13  ;;  %v11745_v12 = vld [vmem:[#allocation9 + $0x7f4] ss:$48 sps:$4 sm:$0xff]   ;;  %v11740_v13 = vld [vmem:[#allocation9 + $0x7e8] ss:$48 sps:$4 sm:$0xff]  }
 0x2ab   :  { %2861 = vmatprep.subr.bf16.mxu1 %v11664_v14  ;;  %2947 = vmatprep.subr.bf16.mxu0 %v11667_v15  ;;  %v11743_v14 = vld [vmem:[#allocation9 + $0x7f0] ss:$48 sps:$4 sm:$0xff]   ;;  %v11748_v15 = vld [vmem:[#allocation9 + $0x84c] ss:$48 sps:$4 sm:$0xff]  }
 0x2ae   :  { %2862 = vmatpush1.bf16.msra.mxu1 %v11662_v56  ;;  %2948 = vmatpush1.bf16.msra.mxu0 %v11665_v16  ;;  %v11751_v56 = vld [vmem:[#allocation9 + $0x854] ss:$48 sps:$4 sm:$0xff]   ;;  %v11746_v16 = vld [vmem:[#allocation9 + $0x848] ss:$48 sps:$4 sm:$0xff]  }
 0x2af   :  { %2863 = vmatprep.subr.bf16.mxu1 %v11670_v17  ;;  %2949 = vmatprep.subr.bf16.mxu0 %v11673_v59  ;;  %v11749_v17 = vld [vmem:[#allocation9 + $0x850] ss:$48 sps:$4 sm:$0xff]   ;;  %v11754_v59 = vld [vmem:[#allocation9 + $0x8ac] ss:$48 sps:$4 sm:$0xff]  }
 0x2b2   :  { %2864 = vmatpush1.bf16.msra.mxu1 %v11668_v18  ;;  %2950 = vmatpush1.bf16.msra.mxu0 %v11671_v55  ;;  %v11757_v18 = vld [vmem:[#allocation9 + $0x8b4] ss:$48 sps:$4 sm:$0xff]   ;;  %v11752_v55 = vld [vmem:[#allocation9 + $0x8a8] ss:$48 sps:$4 sm:$0xff]  }
 0x2b3   :  { %2865 = vmatprep.subr.bf16.mxu1 %v11676_v19  ;;  %2951 = vmatprep.subr.bf16.mxu0 %v11679_v20  ;;  %v11755_v19 = vld [vmem:[#allocation9 + $0x8b0] ss:$48 sps:$4 sm:$0xff]   ;;  %v11760_v20 = vld [vmem:[#allocation9 + $0x90c] ss:$48 sps:$4 sm:$0xff]  }
 0x2b6   :  { %2866 = vmatpush1.bf16.msra.mxu1 %v11674_v57  ;;  %2952 = vmatpush1.bf16.msra.mxu0 %v11677_v21  ;;  %v11763_v57 = vld [vmem:[#allocation9 + $0x914] ss:$48 sps:$4 sm:$0xff]   ;;  %v11758_v21 = vld [vmem:[#allocation9 + $0x908] ss:$48 sps:$4 sm:$0xff]  }
 0x2b7   :  { %2867 = vmatprep.subr.bf16.mxu1 %v11682_v22  ;;  %2953 = vmatprep.subr.bf16.mxu0 %v11685_v23  ;;  %v11761_v22 = vld [vmem:[#allocation9 + $0x910] ss:$48 sps:$4 sm:$0xff]   ;;  %v11766_v23 = vld [vmem:[#allocation9 + $0x96c] ss:$48 sps:$4 sm:$0xff]  }
 0x2ba   :  { %2868 = vmatpush1.bf16.msra.mxu1 %v11680_v24  ;;  %2954 = vmatpush1.bf16.msra.mxu0 %v11683_v25  ;;  %v11769_v24 = vld [vmem:[#allocation9 + $0x974] ss:$48 sps:$4 sm:$0xff]   ;;  %v11764_v25 = vld [vmem:[#allocation9 + $0x968] ss:$48 sps:$4 sm:$0xff]  }
 0x2bb   :  { %2869 = vmatprep.subr.bf16.mxu1 %v11688_v26  ;;  %2955 = vmatprep.subr.bf16.mxu0 %v11691_v27  ;;  %v11767_v26 = vld [vmem:[#allocation9 + $0x970] ss:$48 sps:$4 sm:$0xff]   ;;  %v11772_v27 = vld [vmem:[#allocation9 + $0x9cc] ss:$48 sps:$4 sm:$0xff]  }
 0x2be   :  { %2870 = vmatpush1.bf16.msra.mxu1 %v11686_v28  ;;  %2956 = vmatpush1.bf16.msra.mxu0 %v11689_v29  ;;  %v11775_v28 = vld [vmem:[#allocation9 + $0x9d4] ss:$48 sps:$4 sm:$0xff]   ;;  %v11770_v29 = vld [vmem:[#allocation9 + $0x9c8] ss:$48 sps:$4 sm:$0xff]  }
 0x2bf   :  { %2871 = vmatprep.subr.bf16.mxu1 %v11694_v30  ;;  %2957 = vmatprep.subr.bf16.mxu0 %v11697_v31  ;;  %v11773_v30 = vld [vmem:[#allocation9 + $0x9d0] ss:$48 sps:$4 sm:$0xff]   ;;  %v11778_v31 = vld [vmem:[#allocation9 + $0xa2c] ss:$48 sps:$4 sm:$0xff]  }
 0x2c2   :  { %2872 = vmatpush1.bf16.msra.mxu1 %v11692_v3  ;;  %2958 = vmatpush1.bf16.msra.mxu0 %v11695_v32  ;;  %v11781_v3 = vld [vmem:[#allocation9 + $0xa34] ss:$48 sps:$4 sm:$0xff]   ;;  %v11776_v32 = vld [vmem:[#allocation9 + $0xa28] ss:$48 sps:$4 sm:$0xff]  }
 0x2c3   :  { %2873 = vmatprep.subr.bf16.mxu1 %v11700_v33  ;;  %2959 = vmatprep.subr.bf16.mxu0 %v11703_v10  ;;  %v11779_v33 = vld [vmem:[#allocation9 + $0xa30] ss:$48 sps:$4 sm:$0xff]   ;;  %v11784_v10 = vld [vmem:[#allocation9 + $0xa8c] ss:$48 sps:$4 sm:$0xff]  }
 0x2c6   :  { %2874 = vmatpush1.bf16.msra.mxu1 %v11698_v34  ;;  %2960 = vmatpush1.bf16.msra.mxu0 %v11701_v6  ;;  %v11787_v34 = vld [vmem:[#allocation9 + $0xa94] ss:$48 sps:$4 sm:$0xff]   ;;  %v11782_v6 = vld [vmem:[#allocation9 + $0xa88] ss:$48 sps:$4 sm:$0xff]  }
 0x2c7   :  { %2875 = vmatprep.subr.bf16.mxu1 %v11706_v38  ;;  %2961 = vmatprep.subr.bf16.mxu0 %v11709_v39  ;;  %v11785_v38 = vld [vmem:[#allocation9 + $0xa90] ss:$48 sps:$4 sm:$0xff]   ;;  %v11790_v39 = vld [vmem:[#allocation9 + $0xaec] ss:$48 sps:$4 sm:$0xff]  }
 0x2ca   :  { %2876 = vmatpush1.bf16.msra.mxu1 %v11704_v40  ;;  %2962 = vmatpush1.bf16.msra.mxu0 %v11707_v41  ;;  %v11793_v40 = vld [vmem:[#allocation9 + $0xaf4] ss:$48 sps:$4 sm:$0xff]   ;;  %v11788_v41 = vld [vmem:[#allocation9 + $0xae8] ss:$48 sps:$4 sm:$0xff]  }
 0x2cb   :  { %2888 = vmatprep.subr.bf16.mxu1 %v11712_v42  ;;  %2974 = vmatprep.subr.bf16.mxu0 %v11715_v43  ;;  %v11791_v42 = vld [vmem:[#allocation9 + $0xaf0] ss:$48 sps:$4 sm:$0xff]   ;;  %v11796_v43 = vld [vmem:[#allocation9 + $0xb4c] ss:$48 sps:$4 sm:$0xff]  }
 0x2cd   :  { %2878 = vmatmul.mubr.bf16.vlgmr.msra.gmra.mrb[4].mxu1 %v13729_v36  ;;  %2964 = vmatmul.mubr.bf16.vlgmr.msra.gmra.mrb[4].mxu0 %v13729_v36 }
 0x2ce   :  { %2889 = vmatpush1.bf16.msra.mxu1 %v11710_v44  ;;  %2920 = vmatprep.mubr.bf16.mxu1 %v13727_v1  ;;  %v11799_v44 = vld [vmem:[#allocation9 + $0xb54] ss:$48 sps:$4 sm:$0xff]  }
 0x2cf   :  { %2975 = vmatpush1.bf16.msra.mxu0 %v11713_v45  ;;  %3006 = vmatprep.mubr.bf16.mxu0 %v13727_v1  ;;  %v11794_v45 = vld [vmem:[#allocation9 + $0xb48] ss:$48 sps:$4 sm:$0xff]  }
 0x2d0   :  { %2890 = vmatprep.subr.bf16.mxu1 %v11718_v46  ;;  %2976 = vmatprep.subr.bf16.mxu0 %v11721_v47  ;;  %v11797_v46 = vld [vmem:[#allocation9 + $0xb50] ss:$48 sps:$4 sm:$0xff]   ;;  %v11802_v47 = vld [vmem:[#allocation9 + $0xbac] ss:$48 sps:$4 sm:$0xff]  }
 0x2d2   :  { %2891 = vmatpush1.bf16.msra.mxu1 %v11716_v48  ;;  %v11805_v48 = vld [vmem:[#allocation9 + $0xbb4] ss:$48 sps:$4 sm:$0xff]  }
 0x2d3   :  { %2977 = vmatpush1.bf16.msra.mxu0 %v11719_v49  ;;  %2892 = vmatprep.subr.bf16.mxu1 %v11724_v50  ;;  %v11800_v49 = vld [vmem:[#allocation9 + $0xba8] ss:$48 sps:$4 sm:$0xff]   ;;  %v11803_v50 = vld [vmem:[#allocation9 + $0xbb0] ss:$48 sps:$4 sm:$0xff]  }
 0x2d4   :  { %2978 = vmatprep.subr.bf16.mxu0 %v11727_v51  ;;  %v11808_v51 = vld [vmem:[#allocation9 + $0x1c] ss:$48 sps:$4 sm:$0xff]  }
 0x2d6   :  { %2893 = vmatpush1.bf16.msra.mxu1 %v11722_v52  ;;  %v11811_v52 = vld [vmem:[#allocation9 + $0x24] ss:$48 sps:$4 sm:$0xff]  }
 0x2d7   :  { %2979 = vmatpush1.bf16.msra.mxu0 %v11725_v53  ;;  %2894 = vmatprep.subr.bf16.mxu1 %v11730_v58  ;;  %v11806_v53 = vld [vmem:[#allocation9 + $0x18] ss:$48 sps:$4 sm:$0xff]   ;;  %v11809_v58 = vld [vmem:[#allocation9 + $0x20] ss:$48 sps:$4 sm:$0xff]  }
 0x2d8   :  { %2980 = vmatprep.subr.bf16.mxu0 %v11733_v0  ;;  %v11814_v0 = vld [vmem:[#allocation9 + $0x7c] ss:$48 sps:$4 sm:$0xff]  }
 0x2da   :  { %2895 = vmatpush1.bf16.msra.mxu1 %v11728_v2  ;;  %v11817_v2 = vld [vmem:[#allocation9 + $0x84] ss:$48 sps:$4 sm:$0xff]  }
 0x2db   :  { %2981 = vmatpush1.bf16.msra.mxu0 %v11731_v4  ;;  %2896 = vmatprep.subr.bf16.mxu1 %v11736_v5  ;;  %v11812_v4 = vld [vmem:[#allocation9 + $0x78] ss:$48 sps:$4 sm:$0xff]   ;;  %v11815_v5 = vld [vmem:[#allocation9 + $0x80] ss:$48 sps:$4 sm:$0xff]  }
 0x2dc   :  { %2982 = vmatprep.subr.bf16.mxu0 %v11739_v7  ;;  %v11820_v7 = vld [vmem:[#allocation9 + $0xdc] ss:$48 sps:$4 sm:$0xff]  }
 0x2de   :  { %2897 = vmatpush1.bf16.msra.mxu1 %v11734_v8  ;;  %v11823_v8 = vld [vmem:[#allocation9 + $0xe4] ss:$48 sps:$4 sm:$0xff]  }
 0x2df   :  { %2983 = vmatpush1.bf16.msra.mxu0 %v11737_v9  ;;  %2898 = vmatprep.subr.bf16.mxu1 %v11742_v11  ;;  %v11818_v9 = vld [vmem:[#allocation9 + $0xd8] ss:$48 sps:$4 sm:$0xff]   ;;  %v11821_v11 = vld [vmem:[#allocation9 + $0xe0] ss:$48 sps:$4 sm:$0xff]  }
 0x2e0   :  { %2984 = vmatprep.subr.bf16.mxu0 %v11745_v12  ;;  %v11826_v12 = vld [vmem:[#allocation9 + $0x13c] ss:$48 sps:$4 sm:$0xff]  }
 0x2e2   :  { %2899 = vmatpush1.bf16.msra.mxu1 %v11740_v13  ;;  %v11829_v13 = vld [vmem:[#allocation9 + $0x144] ss:$48 sps:$4 sm:$0xff]  }
 0x2e3   :  { %2985 = vmatpush1.bf16.msra.mxu0 %v11743_v14  ;;  %2900 = vmatprep.subr.bf16.mxu1 %v11748_v15  ;;  %v11824_v14 = vld [vmem:[#allocation9 + $0x138] ss:$48 sps:$4 sm:$0xff]   ;;  %v11827_v15 = vld [vmem:[#allocation9 + $0x140] ss:$48 sps:$4 sm:$0xff]  }
 0x2e4   :  { %2986 = vmatprep.subr.bf16.mxu0 %v11751_v56  ;;  %v11832_v56 = vld [vmem:[#allocation9 + $0x19c] ss:$48 sps:$4 sm:$0xff]  }
 0x2e6   :  { %2901 = vmatpush1.bf16.msra.mxu1 %v11746_v16  ;;  %v11835_v16 = vld [vmem:[#allocation9 + $0x1a4] ss:$48 sps:$4 sm:$0xff]  }
 0x2e7   :  { %2987 = vmatpush1.bf16.msra.mxu0 %v11749_v17  ;;  %2902 = vmatprep.subr.bf16.mxu1 %v11754_v59  ;;  %v11830_v17 = vld [vmem:[#allocation9 + $0x198] ss:$48 sps:$4 sm:$0xff]   ;;  %v11833_v59 = vld [vmem:[#allocation9 + $0x1a0] ss:$48 sps:$4 sm:$0xff]  }
 0x2e8   :  { %2988 = vmatprep.subr.bf16.mxu0 %v11757_v18  ;;  %v11838_v18 = vld [vmem:[#allocation9 + $0x1fc] ss:$48 sps:$4 sm:$0xff]  }
 0x2ea   :  { %2903 = vmatpush1.bf16.msra.mxu1 %v11752_v55  ;;  %v11841_v55 = vld [vmem:[#allocation9 + $0x204] ss:$48 sps:$4 sm:$0xff]  }
 0x2eb   :  { %2989 = vmatpush1.bf16.msra.mxu0 %v11755_v19  ;;  %2904 = vmatprep.subr.bf16.mxu1 %v11760_v20  ;;  %v11836_v19 = vld [vmem:[#allocation9 + $0x1f8] ss:$48 sps:$4 sm:$0xff]   ;;  %v11839_v20 = vld [vmem:[#allocation9 + $0x200] ss:$48 sps:$4 sm:$0xff]  }
 0x2ec   :  { %2990 = vmatprep.subr.bf16.mxu0 %v11763_v57  ;;  %v11844_v57 = vld [vmem:[#allocation9 + $0x25c] ss:$48 sps:$4 sm:$0xff]  }
 0x2ee   :  { %2905 = vmatpush1.bf16.msra.mxu1 %v11758_v21  ;;  %v11847_v21 = vld [vmem:[#allocation9 + $0x264] ss:$48 sps:$4 sm:$0xff]  }
 0x2ef   :  { %2991 = vmatpush1.bf16.msra.mxu0 %v11761_v22  ;;  %2906 = vmatprep.subr.bf16.mxu1 %v11766_v23  ;;  %v11842_v22 = vld [vmem:[#allocation9 + $0x258] ss:$48 sps:$4 sm:$0xff]   ;;  %v11845_v23 = vld [vmem:[#allocation9 + $0x260] ss:$48 sps:$4 sm:$0xff]  }
 0x2f0   :  { %2992 = vmatprep.subr.bf16.mxu0 %v11769_v24  ;;  %v11850_v24 = vld [vmem:[#allocation9 + $0x2bc] ss:$48 sps:$4 sm:$0xff]  }
 0x2f2   :  { %2907 = vmatpush1.bf16.msra.mxu1 %v11764_v25  ;;  %v11853_v25 = vld [vmem:[#allocation9 + $0x2c4] ss:$48 sps:$4 sm:$0xff]  }
 0x2f3   :  { %2993 = vmatpush1.bf16.msra.mxu0 %v11767_v26  ;;  %2908 = vmatprep.subr.bf16.mxu1 %v11772_v27  ;;  %v11848_v26 = vld [vmem:[#allocation9 + $0x2b8] ss:$48 sps:$4 sm:$0xff]   ;;  %v11851_v27 = vld [vmem:[#allocation9 + $0x2c0] ss:$48 sps:$4 sm:$0xff]  }
 0x2f4   :  { %2994 = vmatprep.subr.bf16.mxu0 %v11775_v28  ;;  %v11856_v28 = vld [vmem:[#allocation9 + $0x31c] ss:$48 sps:$4 sm:$0xff]  }
 0x2f6   :  { %2909 = vmatpush1.bf16.msra.mxu1 %v11770_v29  ;;  %v11859_v29 = vld [vmem:[#allocation9 + $0x324] ss:$48 sps:$4 sm:$0xff]  }
 0x2f7   :  { %2995 = vmatpush1.bf16.msra.mxu0 %v11773_v30  ;;  %2910 = vmatprep.subr.bf16.mxu1 %v11778_v31  ;;  %v11854_v30 = vld [vmem:[#allocation9 + $0x318] ss:$48 sps:$4 sm:$0xff]   ;;  %v11857_v31 = vld [vmem:[#allocation9 + $0x320] ss:$48 sps:$4 sm:$0xff]  }
 0x2f8   :  { %2996 = vmatprep.subr.bf16.mxu0 %v11781_v3  ;;  %v11862_v3 = vld [vmem:[#allocation9 + $0x37c] ss:$48 sps:$4 sm:$0xff]  }
 0x2fa   :  { %2911 = vmatpush1.bf16.msra.mxu1 %v11776_v32  ;;  %v11865_v32 = vld [vmem:[#allocation9 + $0x384] ss:$48 sps:$4 sm:$0xff]  }
 0x2fb   :  { %2997 = vmatpush1.bf16.msra.mxu0 %v11779_v33  ;;  %2912 = vmatprep.subr.bf16.mxu1 %v11784_v10  ;;  %v11860_v33 = vld [vmem:[#allocation9 + $0x378] ss:$48 sps:$4 sm:$0xff]   ;;  %v11863_v10 = vld [vmem:[#allocation9 + $0x380] ss:$48 sps:$4 sm:$0xff]  }
 0x2fc   :  { %2998 = vmatprep.subr.bf16.mxu0 %v11787_v34  ;;  %v11868_v34 = vld [vmem:[#allocation9 + $0x3dc] ss:$48 sps:$4 sm:$0xff]  }
 0x2fe   :  { %2913 = vmatpush1.bf16.msra.mxu1 %v11782_v6  ;;  %v11871_v6 = vld [vmem:[#allocation9 + $0x3e4] ss:$48 sps:$4 sm:$0xff]  }
 0x2ff   :  { %2999 = vmatpush1.bf16.msra.mxu0 %v11785_v38  ;;  %2914 = vmatprep.subr.bf16.mxu1 %v11790_v39  ;;  %v11866_v38 = vld [vmem:[#allocation9 + $0x3d8] ss:$48 sps:$4 sm:$0xff]   ;;  %v11869_v39 = vld [vmem:[#allocation9 + $0x3e0] ss:$48 sps:$4 sm:$0xff]  }
 0x300   :  { %3000 = vmatprep.subr.bf16.mxu0 %v11793_v40  ;;  %v11874_v40 = vld [vmem:[#allocation9 + $0x43c] ss:$48 sps:$4 sm:$0xff]  }
 0x302   :  { %2915 = vmatpush1.bf16.msra.mxu1 %v11788_v41  ;;  %v11877_v41 = vld [vmem:[#allocation9 + $0x444] ss:$48 sps:$4 sm:$0xff]  }
 0x303   :  { %3001 = vmatpush1.bf16.msra.mxu0 %v11791_v42  ;;  %2916 = vmatprep.subr.bf16.mxu1 %v11796_v43  ;;  %v11872_v42 = vld [vmem:[#allocation9 + $0x438] ss:$48 sps:$4 sm:$0xff]   ;;  %v11875_v43 = vld [vmem:[#allocation9 + $0x440] ss:$48 sps:$4 sm:$0xff]  }
 0x304   :  { %3002 = vmatprep.subr.bf16.mxu0 %v11799_v44  ;;  %v11880_v44 = vld [vmem:[#allocation9 + $0x49c] ss:$48 sps:$4 sm:$0xff]  }
 0x306   :  { %2917 = vmatpush1.bf16.msra.mxu1 %v11794_v45  ;;  %v11883_v45 = vld [vmem:[#allocation9 + $0x4a4] ss:$48 sps:$4 sm:$0xff]  }
 0x307   :  { %3003 = vmatpush1.bf16.msra.mxu0 %v11797_v46  ;;  %2918 = vmatprep.subr.bf16.mxu1 %v11802_v47  ;;  %v11878_v46 = vld [vmem:[#allocation9 + $0x498] ss:$48 sps:$4 sm:$0xff]   ;;  %v11881_v47 = vld [vmem:[#allocation9 + $0x4a0] ss:$48 sps:$4 sm:$0xff]  }
 0x308   :  { %3004 = vmatprep.subr.bf16.mxu0 %v11805_v48  ;;  %v11886_v48 = vld [vmem:[#allocation9 + $0x4fc] ss:$48 sps:$4 sm:$0xff]  }
 0x30a   :  { %2919 = vmatpush1.bf16.msra.mxu1 %v11800_v49  ;;  %v11889_v49 = vld [vmem:[#allocation9 + $0x504] ss:$48 sps:$4 sm:$0xff]  }
 0x30b   :  { %3005 = vmatpush1.bf16.msra.mxu0 %v11803_v50  ;;  %3017 = vmatprep.subr.bf16.mxu1 %v11808_v51  ;;  %v11884_v50 = vld [vmem:[#allocation9 + $0x4f8] ss:$48 sps:$4 sm:$0xff]   ;;  %v11887_v51 = vld [vmem:[#allocation9 + $0x500] ss:$48 sps:$4 sm:$0xff]  }
 0x30c   :  { %3103 = vmatprep.subr.bf16.mxu0 %v11811_v52  ;;  %v11892_v52 = vld [vmem:[#allocation9 + $0x55c] ss:$48 sps:$4 sm:$0xff]  }
 0x30d   :  { %2921 = vmatmul.mubr.bf16.vlgmr.msra.gmra.mrb[4].mxu1 %v13731_v37 }
 0x30e   :  { %3007 = vmatmul.mubr.bf16.vlgmr.msra.gmra.mrb[4].mxu0 %v13731_v37  ;;  %3018 = vmatpush1.bf16.msra.mxu1 %v11806_v53  ;;  %v11895_v53 = vld [vmem:[#allocation9 + $0x564] ss:$48 sps:$4 sm:$0xff]  }
 0x30f   :  { %3049 = vmatprep.mubr.bf16.mxu1 %v13725_v35  ;;  %3104 = vmatpush1.bf16.msra.mxu0 %v11809_v58  ;;  %v11890_v58 = vld [vmem:[#allocation9 + $0x558] ss:$48 sps:$4 sm:$0xff]  }
 0x310   :  { %3135 = vmatprep.mubr.bf16.mxu0 %v13725_v35  ;;  %3019 = vmatprep.subr.bf16.mxu1 %v11814_v0  ;;  %v11893_v0 = vld [vmem:[#allocation9 + $0x560] ss:$48 sps:$4 sm:$0xff]  }
 0x311   :  { %3105 = vmatprep.subr.bf16.mxu0 %v11817_v2  ;;  %v11898_v2 = vld [vmem:[#allocation9 + $0x5bc] ss:$48 sps:$4 sm:$0xff]  }
 0x312   :  { %3020 = vmatpush1.bf16.msra.mxu1 %v11812_v4  ;;  %v11901_v4 = vld [vmem:[#allocation9 + $0x5c4] ss:$48 sps:$4 sm:$0xff]  }
 0x313   :  { %3106 = vmatpush1.bf16.msra.mxu0 %v11815_v5  ;;  %3021 = vmatprep.subr.bf16.mxu1 %v11820_v7  ;;  %v11896_v5 = vld [vmem:[#allocation9 + $0x5b8] ss:$48 sps:$4 sm:$0xff]   ;;  %v11899_v7 = vld [vmem:[#allocation9 + $0x5c0] ss:$48 sps:$4 sm:$0xff]  }
 0x314   :  { %3107 = vmatprep.subr.bf16.mxu0 %v11823_v8  ;;  %v11904_v8 = vld [vmem:[#allocation9 + $0x61c] ss:$48 sps:$4 sm:$0xff]  }
 0x316   :  { %3022 = vmatpush1.bf16.msra.mxu1 %v11818_v9  ;;  %v11907_v9 = vld [vmem:[#allocation9 + $0x624] ss:$48 sps:$4 sm:$0xff]  }
 0x317   :  { %3108 = vmatpush1.bf16.msra.mxu0 %v11821_v11  ;;  %3023 = vmatprep.subr.bf16.mxu1 %v11826_v12  ;;  %v11902_v11 = vld [vmem:[#allocation9 + $0x618] ss:$48 sps:$4 sm:$0xff]   ;;  %v11905_v12 = vld [vmem:[#allocation9 + $0x620] ss:$48 sps:$4 sm:$0xff]  }
 0x318   :  { %3109 = vmatprep.subr.bf16.mxu0 %v11829_v13  ;;  %v11910_v13 = vld [vmem:[#allocation9 + $0x67c] ss:$48 sps:$4 sm:$0xff]  }
 0x31a   :  { %3024 = vmatpush1.bf16.msra.mxu1 %v11824_v14  ;;  %v11913_v14 = vld [vmem:[#allocation9 + $0x684] ss:$48 sps:$4 sm:$0xff]  }
 0x31b   :  { %3110 = vmatpush1.bf16.msra.mxu0 %v11827_v15  ;;  %3025 = vmatprep.subr.bf16.mxu1 %v11832_v56  ;;  %v11908_v15 = vld [vmem:[#allocation9 + $0x678] ss:$48 sps:$4 sm:$0xff]   ;;  %v11911_v56 = vld [vmem:[#allocation9 + $0x680] ss:$48 sps:$4 sm:$0xff]  }
 0x31c   :  { %3111 = vmatprep.subr.bf16.mxu0 %v11835_v16  ;;  %v11916_v16 = vld [vmem:[#allocation9 + $0x6dc] ss:$48 sps:$4 sm:$0xff]  }
 0x31e   :  { %3026 = vmatpush1.bf16.msra.mxu1 %v11830_v17  ;;  %v11919_v17 = vld [vmem:[#allocation9 + $0x6e4] ss:$48 sps:$4 sm:$0xff]  }
 0x31f   :  { %3112 = vmatpush1.bf16.msra.mxu0 %v11833_v59  ;;  %3027 = vmatprep.subr.bf16.mxu1 %v11838_v18  ;;  %v11914_v59 = vld [vmem:[#allocation9 + $0x6d8] ss:$48 sps:$4 sm:$0xff]   ;;  %v11917_v18 = vld [vmem:[#allocation9 + $0x6e0] ss:$48 sps:$4 sm:$0xff]  }
 0x320   :  { %3113 = vmatprep.subr.bf16.mxu0 %v11841_v55  ;;  %v11922_v55 = vld [vmem:[#allocation9 + $0x73c] ss:$48 sps:$4 sm:$0xff]  }
 0x322   :  { %3028 = vmatpush1.bf16.msra.mxu1 %v11836_v19  ;;  %v11925_v19 = vld [vmem:[#allocation9 + $0x744] ss:$48 sps:$4 sm:$0xff]  }
 0x323   :  { %3114 = vmatpush1.bf16.msra.mxu0 %v11839_v20  ;;  %3029 = vmatprep.subr.bf16.mxu1 %v11844_v57  ;;  %v11920_v20 = vld [vmem:[#allocation9 + $0x738] ss:$48 sps:$4 sm:$0xff]   ;;  %v11923_v57 = vld [vmem:[#allocation9 + $0x740] ss:$48 sps:$4 sm:$0xff]  }
 0x324   :  { %3115 = vmatprep.subr.bf16.mxu0 %v11847_v21  ;;  %v11928_v21 = vld [vmem:[#allocation9 + $0x79c] ss:$48 sps:$4 sm:$0xff]  }
 0x326   :  { %3030 = vmatpush1.bf16.msra.mxu1 %v11842_v22  ;;  %v11931_v22 = vld [vmem:[#allocation9 + $0x7a4] ss:$48 sps:$4 sm:$0xff]  }
 0x327   :  { %3116 = vmatpush1.bf16.msra.mxu0 %v11845_v23  ;;  %3031 = vmatprep.subr.bf16.mxu1 %v11850_v24  ;;  %v11926_v23 = vld [vmem:[#allocation9 + $0x798] ss:$48 sps:$4 sm:$0xff]   ;;  %v13751_v24 = vld [vmem:[#allocation10] sm:$0xff] }
 0x328   :  { %3117 = vmatprep.subr.bf16.mxu0 %v11853_v25  ;;  %v11929_v25 = vld [vmem:[#allocation9 + $0x7a0] ss:$48 sps:$4 sm:$0xff]  }
 0x32a   :  { %3032 = vmatpush1.bf16.msra.mxu1 %v11848_v26  ;;  %v11934_v26 = vld [vmem:[#allocation9 + $0x7fc] ss:$48 sps:$4 sm:$0xff]  }
 0x32b   :  { %3118 = vmatpush1.bf16.msra.mxu0 %v11851_v27  ;;  %3033 = vmatprep.subr.bf16.mxu1 %v11856_v28  ;;  %v11937_v27 = vld [vmem:[#allocation9 + $0x804] ss:$48 sps:$4 sm:$0xff]   ;;  %v782_v28 = vrot.slane %v13751_v24, %v13704_v62 }
 0x32c   :  { %3119 = vmatprep.subr.bf16.mxu0 %v11859_v29  ;;  %v11932_v29 = vld [vmem:[#allocation9 + $0x7f8] ss:$48 sps:$4 sm:$0xff]  }
 0x32e   :  { %3034 = vmatpush1.bf16.msra.mxu1 %v11854_v30  ;;  %v786_v30 = vrot.slane %v13751_v24, %v13698_v60 }
 0x32f   :  { %3120 = vmatpush1.bf16.msra.mxu0 %v11857_v31  ;;  %3035 = vmatprep.subr.bf16.mxu1 %v11862_v3  ;;  %v11935_v31 = vld [vmem:[#allocation9 + $0x800] ss:$48 sps:$4 sm:$0xff]   ;;  %v11940_v3 = vld [vmem:[#allocation9 + $0x85c] ss:$48 sps:$4 sm:$0xff]  }
 0x330   :  { %3121 = vmatprep.subr.bf16.mxu0 %v11865_v32 }
 0x332   :  { %3036 = vmatpush1.bf16.msra.mxu1 %v11860_v33 }
 0x333   :  { %3122 = vmatpush1.bf16.msra.mxu0 %v11863_v10  ;;  %3037 = vmatprep.subr.bf16.mxu1 %v11868_v34  ;;  %v11943_v10 = vld [vmem:[#allocation9 + $0x864] ss:$48 sps:$4 sm:$0xff]  }
 0x334   :  { %3123 = vmatprep.subr.bf16.mxu0 %v11871_v6 }
 0x336   :  { %3038 = vmatpush1.bf16.msra.mxu1 %v11866_v38 }
 0x337   :  { %3124 = vmatpush1.bf16.msra.mxu0 %v11869_v39  ;;  %3039 = vmatprep.subr.bf16.mxu1 %v11874_v40 }
 0x338   :  { %3125 = vmatprep.subr.bf16.mxu0 %v11877_v41 }
 0x33a   :  { %3040 = vmatpush1.bf16.msra.mxu1 %v11872_v42  ;;  %v11938_v42 = vld [vmem:[#allocation9 + $0x858] ss:$48 sps:$4 sm:$0xff]  }
 0x33b   :  { %3126 = vmatpush1.bf16.msra.mxu0 %v11875_v43  ;;  %3041 = vmatprep.subr.bf16.mxu1 %v11880_v44 }
 0x33c   :  { %3127 = vmatprep.subr.bf16.mxu0 %v11883_v45 }
 0x33e   :  { %3042 = vmatpush1.bf16.msra.mxu1 %v11878_v46 }
 0x33f   :  { %3128 = vmatpush1.bf16.msra.mxu0 %v11881_v47  ;;  %3043 = vmatprep.subr.bf16.mxu1 %v11886_v48  ;;  %v11941_v47 = vld [vmem:[#allocation9 + $0x860] ss:$48 sps:$4 sm:$0xff]   ;;  %v11946_v48 = vld [vmem:[#allocation9 + $0x8bc] ss:$48 sps:$4 sm:$0xff]  }
 0x340   :  { %3129 = vmatprep.subr.bf16.mxu0 %v11889_v49 }
 0x342   :  { %3044 = vmatpush1.bf16.msra.mxu1 %v11884_v50 }
 0x343   :  { %3130 = vmatpush1.bf16.msra.mxu0 %v11887_v51  ;;  %3045 = vmatprep.subr.bf16.mxu1 %v11892_v52  ;;  %v11949_v51 = vld [vmem:[#allocation9 + $0x8c4] ss:$48 sps:$4 sm:$0xff]  }
 0x344   :  { %3131 = vmatprep.subr.bf16.mxu0 %v11895_v53 }
 0x346   :  { %3046 = vmatpush1.bf16.msra.mxu1 %v11890_v58  ;;  %v11944_v58 = vld [vmem:[#allocation9 + $0x8b8] ss:$48 sps:$4 sm:$0xff]  }
 0x347   :  { %3132 = vmatpush1.bf16.msra.mxu0 %v11893_v0  ;;  %3047 = vmatprep.subr.bf16.mxu1 %v11898_v2  ;;  %v11947_v0 = vld [vmem:[#allocation9 + $0x8c0] ss:$48 sps:$4 sm:$0xff]   ;;  %v11952_v2 = vld [vmem:[#allocation9 + $0x91c] ss:$48 sps:$4 sm:$0xff]  }
 0x348   :  { %3133 = vmatprep.subr.bf16.mxu0 %v11901_v4  ;;  %v11955_v4 = vld [vmem:[#allocation9 + $0x924] ss:$48 sps:$4 sm:$0xff]  }
 0x34a   :  { %3048 = vmatpush1.bf16.msra.mxu1 %v11896_v5  ;;  %v11950_v5 = vld [vmem:[#allocation9 + $0x918] ss:$48 sps:$4 sm:$0xff]  }
 0x34b   :  { %3134 = vmatpush1.bf16.msra.mxu0 %v11899_v7  ;;  %3060 = vmatprep.subr.bf16.mxu1 %v11904_v8  ;;  %v11953_v7 = vld [vmem:[#allocation9 + $0x920] ss:$48 sps:$4 sm:$0xff]   ;;  %v11958_v8 = vld [vmem:[#allocation9 + $0x97c] ss:$48 sps:$4 sm:$0xff]  }
 0x34c   :  { %3146 = vmatprep.subr.bf16.mxu0 %v11907_v9  ;;  %v11961_v9 = vld [vmem:[#allocation9 + $0x984] ss:$48 sps:$4 sm:$0xff]  }
 0x34d   :  { %3050 = vmatmul.mubr.bf16.vlgmr.msra.gmra.mrb[8].mxu1 %v13729_v36 }
 0x34e   :  { %3136 = vmatmul.mubr.bf16.vlgmr.msra.gmra.mrb[8].mxu0 %v13729_v36  ;;  %3061 = vmatpush1.bf16.msra.mxu1 %v11902_v11  ;;  %v11956_v11 = vld [vmem:[#allocation9 + $0x978] ss:$48 sps:$4 sm:$0xff]  }
 0x34f   :  { %3092 = vmatprep.mubr.bf16.mxu1 %v13727_v1  ;;  %3147 = vmatpush1.bf16.msra.mxu0 %v11905_v12  ;;  %v11959_v12 = vld [vmem:[#allocation9 + $0x980] ss:$48 sps:$4 sm:$0xff]  }
 0x350   :  { %3178 = vmatprep.mubr.bf16.mxu0 %v13727_v1  ;;  %3062 = vmatprep.subr.bf16.mxu1 %v11910_v13  ;;  %v11964_v13 = vld [vmem:[#allocation9 + $0x9dc] ss:$48 sps:$4 sm:$0xff]  }
 0x351   :  { %3148 = vmatprep.subr.bf16.mxu0 %v11913_v14  ;;  %v11967_v14 = vld [vmem:[#allocation9 + $0x9e4] ss:$48 sps:$4 sm:$0xff]  }
 0x352   :  { %3063 = vmatpush1.bf16.msra.mxu1 %v11908_v15  ;;  %v11962_v15 = vld [vmem:[#allocation9 + $0x9d8] ss:$48 sps:$4 sm:$0xff]  }
 0x353   :  { %3149 = vmatpush1.bf16.msra.mxu0 %v11911_v56  ;;  %3064 = vmatprep.subr.bf16.mxu1 %v11916_v16  ;;  %v11965_v56 = vld [vmem:[#allocation9 + $0x9e0] ss:$48 sps:$4 sm:$0xff]   ;;  %v11970_v16 = vld [vmem:[#allocation9 + $0xa3c] ss:$48 sps:$4 sm:$0xff]  }
 0x354   :  { %3150 = vmatprep.subr.bf16.mxu0 %v11919_v17  ;;  %v11973_v17 = vld [vmem:[#allocation9 + $0xa44] ss:$48 sps:$4 sm:$0xff]  }
 0x356   :  { %3065 = vmatpush1.bf16.msra.mxu1 %v11914_v59  ;;  %v11968_v59 = vld [vmem:[#allocation9 + $0xa38] ss:$48 sps:$4 sm:$0xff]  }
 0x357   :  { %3151 = vmatpush1.bf16.msra.mxu0 %v11917_v18  ;;  %3066 = vmatprep.subr.bf16.mxu1 %v11922_v55  ;;  %v11971_v18 = vld [vmem:[#allocation9 + $0xa40] ss:$48 sps:$4 sm:$0xff]   ;;  %v11976_v55 = vld [vmem:[#allocation9 + $0xa9c] ss:$48 sps:$4 sm:$0xff]  }
 0x358   :  { %3152 = vmatprep.subr.bf16.mxu0 %v11925_v19  ;;  %v11979_v19 = vld [vmem:[#allocation9 + $0xaa4] ss:$48 sps:$4 sm:$0xff]  }
 0x35a   :  { %3067 = vmatpush1.bf16.msra.mxu1 %v11920_v20  ;;  %v11974_v20 = vld [vmem:[#allocation9 + $0xa98] ss:$48 sps:$4 sm:$0xff]  }
 0x35b   :  { %3153 = vmatpush1.bf16.msra.mxu0 %v11923_v57  ;;  %3068 = vmatprep.subr.bf16.mxu1 %v11928_v21  ;;  %v11977_v57 = vld [vmem:[#allocation9 + $0xaa0] ss:$48 sps:$4 sm:$0xff]   ;;  %v11982_v21 = vld [vmem:[#allocation9 + $0xafc] ss:$48 sps:$4 sm:$0xff]  }
 0x35c   :  { %3154 = vmatprep.subr.bf16.mxu0 %v11931_v22  ;;  %v11985_v22 = vld [vmem:[#allocation9 + $0xb04] ss:$48 sps:$4 sm:$0xff]  }
 0x35e   :  { %3069 = vmatpush1.bf16.msra.mxu1 %v11926_v23  ;;  %v11980_v23 = vld [vmem:[#allocation9 + $0xaf8] ss:$48 sps:$4 sm:$0xff]  }
 0x35f   :  { %3155 = vmatpush1.bf16.msra.mxu0 %v11929_v25  ;;  %3070 = vmatprep.subr.bf16.mxu1 %v11934_v26  ;;  %v11983_v25 = vld [vmem:[#allocation9 + $0xb00] ss:$48 sps:$4 sm:$0xff]   ;;  %v11988_v26 = vld [vmem:[#allocation9 + $0xb5c] ss:$48 sps:$4 sm:$0xff]  }
 0x360   :  { %v2793_v32 = vpop.f32.mrb[0].mxu1  ;;  %v2836_v33 = vpop.f32.mrb[0].mxu0  ;;  %3156 = vmatprep.subr.bf16.mxu0 %v11937_v27  ;;  %v11991_v27 = vld [vmem:[#allocation9 + $0xb64] ss:$48 sps:$4 sm:$0xff]  }
 0x361   :  { %v2794_v34 = vadd.f32 %v2793_v32, %v782_v28  ;;  %v2795_v6 = vpop.f32.mrb[1].mxu1  ;;  %v2838_v38 = vpop.f32.mrb[1].mxu0  ;;  %v11995_v32 = vld [vmem:[#allocation9 + $0xbc0] ss:$48 sps:$4 sm:$0xff]  }
 0x362   :  { %v2796_v39 = vadd.f32 %v2795_v6, %v786_v30  ;;  %3071 = vmatpush1.bf16.msra.mxu1 %v11932_v29  ;;  %v2797_v40 = vpop.f32.mrb[2].mxu1  ;;  %v2840_v41 = vpop.f32.mrb[2].mxu0  ;;  %v11989_v29 = vld [vmem:[#allocation9 + $0xb60] ss:$48 sps:$4 sm:$0xff]   ;;  %v13288_v6 = vmov 0.0  }
 0x363   :  { %v13757_v43 = vadd.f32 %v2836_v33, %v2794_v34  ;;  %3157 = vmatpush1.bf16.msra.mxu0 %v11935_v31  ;;  %v2798_v44 = vadd.f32 %v2797_v40, %v782_v28  ;;  %v2799_v45 = vpop.f32.mrb[3].mxu1  ;;  %v2842_v46 = vpop.f32.mrb[3].mxu0  ;;  %3072 = vmatprep.subr.bf16.mxu1 %v11940_v3  ;;  %v11986_v28 = vld [vmem:[#allocation9 + $0xb58] ss:$48 sps:$4 sm:$0xff]   ;;  %v11997_v31 = vld [vmem:[#allocation9 + $0xbc4] ss:$48 sps:$4 sm:$0xff]  }
 0x364   :  { %v13759_v49 = vadd.f32 %v2838_v38, %v2796_v39  ;;  %v2800_v50 = vadd.f32 %v2799_v45, %v786_v30  ;;  %3158 = vmatprep.subr.bf16.mxu0 %v11943_v10  ;;  %v11994_v30 = vld [vmem:[#allocation9 + $0xbbc] ss:$48 sps:$4 sm:$0xff]   ;;  %v11992_v3 = vld [vmem:[#allocation9 + $0xbb8] ss:$48 sps:$4 sm:$0xff]  }
 0x365   :  { %v13761_v52 = vadd.f32 %v2840_v41, %v2798_v44  ;;  %v12000_v33 = vld [vmem:[#allocation9 + $0x2c] ss:$48 sps:$4 sm:$0xff]   ;;  %v11998_v10 = vld [vmem:[#allocation9 + $0x28] ss:$48 sps:$4 sm:$0xff]  }
 0x366   :  { %v13763_v53 = vadd.f32 %v2842_v46, %v2800_v50  ;;  %3073 = vmatpush1.bf16.msra.mxu1 %v11938_v42  ;;  %v12003_v34 = vld [vmem:[#allocation9 + $0x8c] ss:$48 sps:$4 sm:$0xff]   ;;  %v12001_v38 = vld [vmem:[#allocation9 + $0x88] ss:$48 sps:$4 sm:$0xff]  }
 0x367   :  { %3159 = vmatpush1.bf16.msra.mxu0 %v11941_v47  ;;  %3074 = vmatprep.subr.bf16.mxu1 %v11946_v48  ;;  %v12006_v39 = vld [vmem:[#allocation9 + $0xec] ss:$48 sps:$4 sm:$0xff]   ;;  %v12004_v40 = vld [vmem:[#allocation9 + $0xe8] ss:$48 sps:$4 sm:$0xff]  }
 0x368   :  { %3160 = vmatprep.subr.bf16.mxu0 %v11949_v51  ;;  %v12009_v41 = vld [vmem:[#allocation9 + $0x14c] ss:$48 sps:$4 sm:$0xff]   ;;  %v12007_v42 = vld [vmem:[#allocation9 + $0x148] ss:$48 sps:$4 sm:$0xff]  }
 0x369   :  { %v12012_v44 = vld [vmem:[#allocation9 + $0x1ac] ss:$48 sps:$4 sm:$0xff]   ;;  %v12010_v45 = vld [vmem:[#allocation9 + $0x1a8] ss:$48 sps:$4 sm:$0xff]  }
 0x36a   :  { %3075 = vmatpush1.bf16.msra.mxu1 %v11944_v58  ;;  %v12015_v46 = vld [vmem:[#allocation9 + $0x20c] ss:$48 sps:$4 sm:$0xff]   ;;  %v12016_v48 = vld [vmem:[#allocation9 + $0x268] ss:$48 sps:$4 sm:$0xff]  }
 0x36b   :  { %3161 = vmatpush1.bf16.msra.mxu0 %v11947_v0  ;;  %3076 = vmatprep.subr.bf16.mxu1 %v11952_v2  ;;  %v12018_v47 = vld [vmem:[#allocation9 + $0x26c] ss:$48 sps:$4 sm:$0xff]   ;;  %v12019_v51 = vld [vmem:[#allocation9 + $0x2c8] ss:$48 sps:$4 sm:$0xff]  }
 0x36c   :  { %3162 = vmatprep.subr.bf16.mxu0 %v11955_v4  ;;  %v12021_v50 = vld [vmem:[#allocation9 + $0x2cc] ss:$48 sps:$4 sm:$0xff]   ;;  %v12022_v0 = vld [vmem:[#allocation9 + $0x328] ss:$48 sps:$4 sm:$0xff]  }
 0x36d   :  { %v12024_v58 = vld [vmem:[#allocation9 + $0x32c] ss:$48 sps:$4 sm:$0xff]   ;;  %v12025_v4 = vld [vmem:[#allocation9 + $0x388] ss:$48 sps:$4 sm:$0xff]  }
 0x36e   :  { %3077 = vmatpush1.bf16.msra.mxu1 %v11950_v5  ;;  %v12027_v2 = vld [vmem:[#allocation9 + $0x38c] ss:$48 sps:$4 sm:$0xff]  }
 0x36f   :  { %3163 = vmatpush1.bf16.msra.mxu0 %v11953_v7  ;;  %3078 = vmatprep.subr.bf16.mxu1 %v11958_v8  ;;  %v12030_v5 = vld [vmem:[#allocation9 + $0x3ec] ss:$48 sps:$4 sm:$0xff]   ;;  %v12028_v7 = vld [vmem:[#allocation9 + $0x3e8] ss:$48 sps:$4 sm:$0xff]  }
 0x370   :  { %3164 = vmatprep.subr.bf16.mxu0 %v11961_v9  ;;  %v12033_v8 = vld [vmem:[#allocation9 + $0x44c] ss:$48 sps:$4 sm:$0xff]   ;;  %v12031_v9 = vld [vmem:[#allocation9 + $0x448] ss:$48 sps:$4 sm:$0xff]  }
 0x372   :  { %3079 = vmatpush1.bf16.msra.mxu1 %v11956_v11  ;;  %v12036_v11 = vld [vmem:[#allocation9 + $0x4ac] ss:$48 sps:$4 sm:$0xff]  }
 0x373   :  { %3165 = vmatpush1.bf16.msra.mxu0 %v11959_v12  ;;  %3080 = vmatprep.subr.bf16.mxu1 %v11964_v13  ;;  %v12034_v12 = vld [vmem:[#allocation9 + $0x4a8] ss:$48 sps:$4 sm:$0xff]   ;;  %v12039_v13 = vld [vmem:[#allocation9 + $0x50c] ss:$48 sps:$4 sm:$0xff]  }
 0x374   :  { %3166 = vmatprep.subr.bf16.mxu0 %v11967_v14  ;;  %v12037_v14 = vld [vmem:[#allocation9 + $0x508] ss:$48 sps:$4 sm:$0xff]  }
 0x376   :  { %3081 = vmatpush1.bf16.msra.mxu1 %v11962_v15  ;;  %v12042_v15 = vld [vmem:[#allocation9 + $0x56c] ss:$48 sps:$4 sm:$0xff]  }
 0x377   :  { %3167 = vmatpush1.bf16.msra.mxu0 %v11965_v56  ;;  %3082 = vmatprep.subr.bf16.mxu1 %v11970_v16  ;;  %v12040_v56 = vld [vmem:[#allocation9 + $0x568] ss:$48 sps:$4 sm:$0xff]   ;;  %v12045_v16 = vld [vmem:[#allocation9 + $0x5cc] ss:$48 sps:$4 sm:$0xff]  }
 0x378   :  { %3168 = vmatprep.subr.bf16.mxu0 %v11973_v17  ;;  %v12043_v17 = vld [vmem:[#allocation9 + $0x5c8] ss:$48 sps:$4 sm:$0xff]  }
 0x37a   :  { %3083 = vmatpush1.bf16.msra.mxu1 %v11968_v59  ;;  %v12048_v59 = vld [vmem:[#allocation9 + $0x62c] ss:$48 sps:$4 sm:$0xff]  }
 0x37b   :  { %3169 = vmatpush1.bf16.msra.mxu0 %v11971_v18  ;;  %3084 = vmatprep.subr.bf16.mxu1 %v11976_v55  ;;  %v12046_v18 = vld [vmem:[#allocation9 + $0x628] ss:$48 sps:$4 sm:$0xff]   ;;  %v12051_v55 = vld [vmem:[#allocation9 + $0x68c] ss:$48 sps:$4 sm:$0xff]  }
 0x37c   :  { %3170 = vmatprep.subr.bf16.mxu0 %v11979_v19  ;;  %v12049_v19 = vld [vmem:[#allocation9 + $0x688] ss:$48 sps:$4 sm:$0xff]  }
 0x37e   :  { %3085 = vmatpush1.bf16.msra.mxu1 %v11974_v20  ;;  %v12054_v20 = vld [vmem:[#allocation9 + $0x6ec] ss:$48 sps:$4 sm:$0xff]  }
 0x37f   :  { %3171 = vmatpush1.bf16.msra.mxu0 %v11977_v57  ;;  %3086 = vmatprep.subr.bf16.mxu1 %v11982_v21  ;;  %v12052_v57 = vld [vmem:[#allocation9 + $0x6e8] ss:$48 sps:$4 sm:$0xff]   ;;  %v12057_v21 = vld [vmem:[#allocation9 + $0x74c] ss:$48 sps:$4 sm:$0xff]  }
 0x380   :  { %3172 = vmatprep.subr.bf16.mxu0 %v11985_v22  ;;  %v12055_v22 = vld [vmem:[#allocation9 + $0x748] ss:$48 sps:$4 sm:$0xff]  }
 0x382   :  { %3087 = vmatpush1.bf16.msra.mxu1 %v11980_v23  ;;  %v12060_v23 = vld [vmem:[#allocation9 + $0x7ac] ss:$48 sps:$4 sm:$0xff]  }
 0x383   :  { %3173 = vmatpush1.bf16.msra.mxu0 %v11983_v25  ;;  %3088 = vmatprep.subr.bf16.mxu1 %v11988_v26  ;;  %v12058_v25 = vld [vmem:[#allocation9 + $0x7a8] ss:$48 sps:$4 sm:$0xff]   ;;  %v797_v26 = vsub.s32 4, %v13695_v54 }
 0x384   :  { %3174 = vmatprep.subr.bf16.mxu0 %v11991_v27  ;;  %v12061_v27 = vld [vmem:[#allocation9 + $0x808] ss:$48 sps:$4 sm:$0xff]  }
 0x386   :  { %3089 = vmatpush1.bf16.msra.mxu1 %v11986_v28  ;;  %v801_v28 = vsub.s32 5, %v13695_v54 }
 0x387   :  { %3175 = vmatpush1.bf16.msra.mxu0 %v11989_v29  ;;  %3090 = vmatprep.subr.bf16.mxu1 %v11994_v30  ;;  %v12066_v29 = vld [vmem:[#allocation9 + $0x86c] ss:$48 sps:$4 sm:$0xff]  }
 0x388   :  { %3176 = vmatprep.subr.bf16.mxu0 %v11997_v31 }
 0x38a   :  { %3091 = vmatpush1.bf16.msra.mxu1 %v11992_v3 }
 0x38b   :  { %3177 = vmatpush1.bf16.msra.mxu0 %v11995_v32  ;;  %3189 = vmatprep.subr.bf16.mxu1 %v12000_v33 }
 0x38c   :  { %11259 = vmatprep.subr.bf16.mxu0 %v13288_v6 }
 0x38d   :  { %3093 = vmatmul.mubr.bf16.vlgmr.msra.gmra.mrb[8].mxu1 %v13731_v37 }
 0x38e   :  { %3179 = vmatmul.mubr.bf16.vlgmr.msra.gmra.mrb[8].mxu0 %v13731_v37  ;;  %3190 = vmatpush1.bf16.msra.mxu1 %v11998_v10 }
 0x38f   :  { %3221 = vmatprep.mubr.bf16.mxu1 %v13725_v35  ;;  %3191 = vmatprep.subr.bf16.mxu1 %v12003_v34  ;;  %v12013_v35 = vld [vmem:[#allocation9 + $0x208] ss:$48 sps:$4 sm:$0xff]  }
 0x390   :  { %11261 = vmatprep.mubr.msk.bf16.mxu0 %vm13289_vm0, %v13288_v6  ;;  %v12064_v34 = vld [vmem:[#allocation9 + $0x868] ss:$48 sps:$4 sm:$0xff]  }
 0x392   :  { %3192 = vmatpush1.bf16.msra.mxu1 %v12001_v38  ;;  %v13789_v38 = vrot.slane %v13751_v24, %v801_v28 }
 0x393   :  { %3193 = vmatprep.subr.bf16.mxu1 %v12006_v39 }
 0x396   :  { %3194 = vmatpush1.bf16.msra.mxu1 %v12004_v40 }
 0x397   :  { %3195 = vmatprep.subr.bf16.mxu1 %v12009_v41  ;;  %v12069_v41 = vld [vmem:[#allocation9 + $0x8cc] ss:$48 sps:$4 sm:$0xff]  }
 0x39a   :  { %3196 = vmatpush1.bf16.msra.mxu1 %v12007_v42 }
 0x39b   :  { %3197 = vmatprep.subr.bf16.mxu1 %v12012_v44 }
 0x39e   :  { %3198 = vmatpush1.bf16.msra.mxu1 %v12010_v45 }
 0x39f   :  { %3199 = vmatprep.subr.bf16.mxu1 %v12015_v46 }
 0x3a2   :  { %3200 = vmatpush1.bf16.msra.mxu1 %v12013_v35  ;;  %v12067_v35 = vld [vmem:[#allocation9 + $0x8c8] ss:$48 sps:$4 sm:$0xff]  }
 0x3a3   :  { %3201 = vmatprep.subr.bf16.mxu1 %v12018_v47  ;;  %v12072_v47 = vld [vmem:[#allocation9 + $0x92c] ss:$48 sps:$4 sm:$0xff]  }
 0x3a6   :  { %3202 = vmatpush1.bf16.msra.mxu1 %v12016_v48  ;;  %v12070_v48 = vld [vmem:[#allocation9 + $0x928] ss:$48 sps:$4 sm:$0xff]  }
 0x3a7   :  { %3203 = vmatprep.subr.bf16.mxu1 %v12021_v50  ;;  %v3278_v50 = vpack.c.bf16 %v13757_v43, %v13757_v43  ;;  %v12082_v43 = vld [vmem:[#allocation9 + $0xaa8] ss:$48 sps:$4 sm:$0xff]  }
 0x3aa   :  { %3204 = vmatpush1.bf16.msra.mxu1 %v12019_v51  ;;  %v12075_v51 = vld [vmem:[#allocation9 + $0x98c] ss:$48 sps:$4 sm:$0xff]  }
 0x3ab   :  { %3205 = vmatprep.subr.bf16.mxu1 %v12024_v58  ;;  %v12073_v58 = vld [vmem:[#allocation9 + $0x988] ss:$48 sps:$4 sm:$0xff]  }
 0x3ae   :  { %3206 = vmatpush1.bf16.msra.mxu1 %v12022_v0  ;;  %v12078_v0 = vld [vmem:[#allocation9 + $0x9ec] ss:$48 sps:$4 sm:$0xff]  }
 0x3af   :  { %3207 = vmatprep.subr.bf16.mxu1 %v12027_v2  ;;  %v12076_v2 = vld [vmem:[#allocation9 + $0x9e8] ss:$48 sps:$4 sm:$0xff]  }
 0x3b2   :  { %3208 = vmatpush1.bf16.msra.mxu1 %v12025_v4  ;;  %v12081_v4 = vld [vmem:[#allocation9 + $0xa4c] ss:$48 sps:$4 sm:$0xff]  }
 0x3b3   :  { %3209 = vmatprep.subr.bf16.mxu1 %v12030_v5  ;;  %v12079_v5 = vld [vmem:[#allocation9 + $0xa48] ss:$48 sps:$4 sm:$0xff]  }
 0x3b6   :  { %3210 = vmatpush1.bf16.msra.mxu1 %v12028_v7  ;;  %v12084_v7 = vld [vmem:[#allocation9 + $0xaac] ss:$48 sps:$4 sm:$0xff]  }
 0x3b7   :  { %3211 = vmatprep.subr.bf16.mxu1 %v12033_v8  ;;  %v12087_v8 = vld [vmem:[#allocation9 + $0xb0c] ss:$48 sps:$4 sm:$0xff]  }
 0x3ba   :  { %3212 = vmatpush1.bf16.msra.mxu1 %v12031_v9  ;;  %v12085_v9 = vld [vmem:[#allocation9 + $0xb08] ss:$48 sps:$4 sm:$0xff]  }
 0x3bb   :  { %3213 = vmatprep.subr.bf16.mxu1 %v12036_v11  ;;  %v12090_v11 = vld [vmem:[#allocation9 + $0xb6c] ss:$48 sps:$4 sm:$0xff]  }
 0x3be   :  { %3214 = vmatpush1.bf16.msra.mxu1 %v12034_v12  ;;  %v12088_v12 = vld [vmem:[#allocation9 + $0xb68] ss:$48 sps:$4 sm:$0xff]  }
 0x3bf   :  { %3215 = vmatprep.subr.bf16.mxu1 %v12039_v13  ;;  %v12093_v13 = vld [vmem:[#allocation9 + $0xbcc] ss:$48 sps:$4 sm:$0xff]  }
 0x3c2   :  { %3216 = vmatpush1.bf16.msra.mxu1 %v12037_v14  ;;  %v12091_v14 = vld [vmem:[#allocation9 + $0xbc8] ss:$48 sps:$4 sm:$0xff]  }
 0x3c3   :  { %3217 = vmatprep.subr.bf16.mxu1 %v12042_v15  ;;  %v13807_v15 = vld [vmem:[#allocation10 + $0x8] sm:$0xf] }
 0x3c6   :  { %3218 = vmatpush1.bf16.msra.mxu1 %v12040_v56  ;;  %v814_v56 = vrot.slane %v13807_v15, %v13704_v62 }
 0x3c7   :  { %3219 = vmatprep.subr.bf16.mxu1 %v12045_v16 }
 0x3ca   :  { %3220 = vmatpush1.bf16.msra.mxu1 %v12043_v17 }
 0x3cb   :  { %3232 = vmatprep.subr.bf16.mxu1 %v12048_v59 }
 0x3cd   :  { %3222 = vmatmul.mubr.bf16.vlgmr.msra.gmra.mrb[12].mxu1 %v13729_v36  ;;  %v12063_v36 = vld [vmem:[#allocation9 + $0x80c] ss:$48 sps:$4 sm:$0xff]  }
 0x3ce   :  { %3233 = vmatpush1.bf16.msra.mxu1 %v12046_v18  ;;  %3264 = vmatprep.mubr.bf16.mxu1 %v13727_v1  ;;  %v798_v1 = vrot.slane %v13751_v24, %v797_v26 }
 0x3cf   :  { %3234 = vmatprep.subr.bf16.mxu1 %v12051_v55 }
 0x3d2   :  { %3235 = vmatpush1.bf16.msra.mxu1 %v12049_v19 }
 0x3d3   :  { %3236 = vmatprep.subr.bf16.mxu1 %v12054_v20 }
 0x3d6   :  { %3237 = vmatpush1.bf16.msra.mxu1 %v12052_v57 }
 0x3d7   :  { %3238 = vmatprep.subr.bf16.mxu1 %v12057_v21 }
 0x3da   :  { %3239 = vmatpush1.bf16.msra.mxu1 %v12055_v22 }
 0x3db   :  { %3240 = vmatprep.subr.bf16.mxu1 %v12060_v23 }
 0x3de   :  { %3241 = vmatpush1.bf16.msra.mxu1 %v12058_v25 }
 0x3df   :  { %3242 = vmatprep.subr.bf16.mxu1 %v12063_v36 }
 0x3e0   :  { %v13778_v30 = vpop.f32.mrb[4].mxu1 }
 0x3e1   :  { %v3008_v31 = vpop.f32.mrb[4].mxu0  ;;  %v13780_v3 = vpop.f32.mrb[5].mxu1 }
 0x3e2   :  { %v11367_v32 = vadd.f32 %v3008_v31, %v798_v1  ;;  %v13782_v33 = vpop.f32.mrb[5].mxu0  ;;  %v13784_v10 = vpop.f32.mrb[6].mxu1  ;;  %3243 = vmatpush1.bf16.msra.mxu1 %v12061_v27  ;;  %v13290_v27 = vmov -1e+09  }
 0x3e3   :  { %v3012_v39 = vpop.f32.mrb[6].mxu0  ;;  %v13791_v40 = vpop.f32.mrb[7].mxu1  ;;  %3244 = vmatprep.subr.bf16.mxu1 %v12066_v29 }
 0x3e4   :  { %v3279_v42 = vpack.c.bf16 %v11367_v32, %v11367_v32  ;;  %v13793_v44 = vadd.f32 %v3012_v39, %v798_v1  ;;  %v3014_v45 = vpop.f32.mrb[7].mxu0  ;;  %v3275_v1 = vld [vmem:[%s14469_s12] sm:$0x1] }
 0x3e5   :  { %v13796_v46 = vadd.f32 %v3014_v45, %v13789_v38  ;;  %vm3276_vm2 = vcmp.gt.f32.partialorder %v3275_v1, 0.0 }
 0x3e6   :  { %11260 = vmatpush3.bf16.xpose.msra.mxu0 %v3279_v42  ;;  %3245 = vmatpush1.bf16.msra.mxu1 %v12064_v34  ;;  %v3277_v29 = vsel %vm3276_vm2, 0.0, %v13290_v27 }
 0x3e7   :  { %3246 = vmatprep.subr.bf16.mxu1 %v12069_v41  ;;  %11265 = vmatprep.subr.bf16.mxu0 %v13288_v6  ;;  %v13832_v31 = vrot.slane %v3277_v29, %v13704_v62 }
 0x3ea   :  { %3247 = vmatpush1.bf16.msra.mxu1 %v12067_v35 }
 0x3eb   :  { %3248 = vmatprep.subr.bf16.mxu1 %v12072_v47  ;;  %v822_v47 = vrot.slane %v13807_v15, %v13707_v63 }
 0x3ed   :  { %11262 = vmatmul.mubr.bf16.vlgmr.msra.gmra.mrb[12].mxu0 %v3278_v50 }
 0x3ee   :  { %3249 = vmatpush1.bf16.msra.mxu1 %v12070_v48  ;;  %11267 = vmatprep.mubr.msk.bf16.mxu0 %vm13289_vm0, %v13288_v6 }
 0x3ef   :  { %3250 = vmatprep.subr.bf16.mxu1 %v12075_v51 }
 0x3f2   :  { %3251 = vmatpush1.bf16.msra.mxu1 %v12073_v58 }
 0x3f3   :  { %3252 = vmatprep.subr.bf16.mxu1 %v12078_v0 }
 0x3f6   :  { %3253 = vmatpush1.bf16.msra.mxu1 %v12076_v2 }
 0x3f7   :  { %3254 = vmatprep.subr.bf16.mxu1 %v12081_v4 }
 0x3fa   :  { %3255 = vmatpush1.bf16.msra.mxu1 %v12079_v5 }
 0x3fb   :  { %3256 = vmatprep.subr.bf16.mxu1 %v12084_v7 }
 0x3fe   :  { %3257 = vmatpush1.bf16.msra.mxu1 %v12082_v43 }
 0x3ff   :  { %3258 = vmatprep.subr.bf16.mxu1 %v12087_v8 }
 0x402   :  { %3259 = vmatpush1.bf16.msra.mxu1 %v12085_v9 }
 0x403   :  { %3260 = vmatprep.subr.bf16.mxu1 %v12090_v11 }
 0x406   :  { %3261 = vmatpush1.bf16.msra.mxu1 %v12088_v12 }
 0x407   :  { %3262 = vmatprep.subr.bf16.mxu1 %v12093_v13 }
 0x40a   :  { %3263 = vmatpush1.bf16.msra.mxu1 %v12091_v14  ;;  %v11368_v14 = vadd.f32 %v13782_v33, %v13789_v38 }
 0x40b   :  { %11289 = vmatprep.subr.bf16.mxu1 %v13288_v6 }
 0x40d   :  { %3265 = vmatmul.mubr.bf16.vlgmr.msra.gmra.mrb[12].mxu1 %v13731_v37  ;;  %v818_v37 = vrot.slane %v13807_v15, %v13698_v60 }
 0x40e   :  { %11291 = vmatprep.mubr.msk.bf16.mxu1 %vm13289_vm0, %v13288_v6 }
 0x460   :  { %v13811_v16 = vpop.f32.mrb[8].mxu1 }
 0x461   :  { %v3180_v17 = vpop.f32.mrb[8].mxu0  ;;  %v13813_v59 = vpop.f32.mrb[9].mxu1 }
 0x462   :  { %v11375_v18 = vadd.f32 %v3180_v17, %v814_v56  ;;  %v3182_v55 = vpop.f32.mrb[9].mxu0  ;;  %v13815_v19 = vpop.f32.mrb[10].mxu1 }
 0x463   :  { %v3184_v20 = vpop.f32.mrb[10].mxu0  ;;  %v13819_v57 = vpop.f32.mrb[11].mxu1 }
 0x464   :  { %v3339_v21 = vpack.c.bf16 %v11375_v18, %v11375_v18  ;;  %v13821_v22 = vadd.f32 %v3184_v20, %v814_v56  ;;  %v3186_v23 = vpop.f32.mrb[11].mxu0  ;;  %v3389_v18 = vpack.c.bf16 %v11368_v14, %v11368_v14  ;;  %v11376_v20 = vadd.f32 %v3182_v55, %v818_v37 }
 0x465   :  { %v13823_v25 = vadd.f32 %v3186_v23, %v818_v37  ;;  %v3388_v23 = vpack.c.bf16 %v13759_v49, %v13759_v49 }
 0x466   :  { %v3345_v36 = vsel %vm3343_vm1, %v3339_v21, 0  ;;  %v3444_v21 = vpack.c.bf16 %v11376_v20, %v11376_v20 }
 0x467   :  { %11266 = vmatpush3.bf16.msra.mxu0 %v3345_v36 }
 0x468   :  { %11271 = vmatprep.subr.bf16.mxu0 %v13288_v6  ;;  %v3449_v36 = vsel %vm3343_vm1, %v3444_v21, 0 }
 0x4c0   :  { %v3314_v32 = vpop.f32.mrb[12].mxu0 }
 0x4c1   :  { %v3320_v34 = vmul.f32 0.088388346, %v3314_v32  ;;  %v11263_v39 = vpop.f32.mrb[13].mxu0 }
 0x4c2   :  { %v3317_v41 = vpop.f32.mrb[14].mxu0 }
 0x4c3   :  { %v11264_v42 = vpop.f32.mrb[15].mxu0  ;;  %v3325_v45 = vadd.f32 %v13832_v31, %v3320_v34 }
 0x4c5   :  { %v3327_v35 = vsel %vm3326_vm3, %v3325_v45, -inf }
 0x4c6   :  { %3328 = vmax.xlane.f32.xlu0 %v3327_v35 }
 0x4e0   :  { %v3266_v48 = vpop.f32.mrb[12].mxu1 }
 0x4e1   :  { %v11379_v50 = vadd.f32 %v3266_v48, %v822_v47  ;;  %v13838_v51 = vpop.f32.mrb[13].mxu1 }
 0x4e2   :  { %v3270_v58 = vpop.f32.mrb[14].mxu1 }
 0x4e3   :  { %v3548_v0 = vpack.c.bf16 %v11379_v50, %v11379_v50  ;;  %v13840_v2 = vadd.f32 %v3270_v58, %v822_v47  ;;  %v13842_v4 = vpop.f32.mrb[15].mxu1  ;;  %v805_v58 = vsub.s32 6, %v13695_v54 }
 0x4e5   :  { %v3553_v5 = vsel %vm3343_vm1, %v3548_v0, 0  ;;  %v806_v0 = vrot.slane %v13751_v24, %v805_v58 }
 0x4e6   :  { %11290 = vmatpush3.bf16.msra.mxu1 %v3553_v5 }
 0x4e7   :  { %11301 = vmatprep.subr.bf16.mxu1 %v13288_v6 }
 0x553   :  { %v3329_v7 = vpop.xlane.xlu0 %3328 }
 0x554   :  { %v3330_v43 = vsub.f32 %v3325_v45, %v3329_v7  ;;  %v11371_v7 = vadd.f32 %v13811_v16, %v806_v0 }
 0x556   :  { %v3331_v8 = vmul.f32 1.442695, %v3330_v43  ;;  %v809_v43 = vsub.s32 7, %v13695_v54 }
 0x558   :  { %12786 = vpow2.f32 %v3331_v8 }
 0x562   :  { %v12787_v9 = vpop.eup %12786 }
 0x563   :  { %v3333_v11 = vsel %vm3326_vm3, %v12787_v9, 0.0 }
 0x564   :  { %3334 = vadd.xlane.f32.xlu1 %v3333_v11 }
 0x5f1   :  { %v3335_v12 = vpop.xlane.xlu1 %3334 }
 0x5f2   :  { %12788 = vrcp.f32 %v3335_v12  ;;  %v3493_v12 = vpack.c.bf16 %v11371_v7, %v11371_v7 }
 0x5fc   :  { %v12789_v13 = vpop.eup %12788 }
 0x5fd   :  { %v3337_v56 = vmul.f32 %v12789_v13, %v12787_v9  ;;  %v790_v9 = vrot.slane %v13751_v24, %v13707_v63  ;;  %v810_v13 = vrot.slane %v13751_v24, %v809_v43 }
 0x5ff   :  { %v3338_v17 = vpack.c.bf16 %v3337_v56, %v3337_v56  ;;  %v11363_v16 = vadd.f32 %v13778_v30, %v790_v9  ;;  %v11372_v14 = vadd.f32 %v13813_v59, %v810_v13  ;;  %v3704_v30 = vpack.c.bf16 %v13793_v44, %v13793_v44 }
 0x600   :  { %v3812_v59 = vpack.c.bf16 %v13796_v46, %v13796_v46  ;;  %v3811_v44 = vpack.c.bf16 %v13763_v53, %v13763_v53  ;;  %v11374_v46 = vadd.f32 %v13819_v57, %v810_v13 }
 0x601   :  { %11268 = vmatmul.mubr.msk.bf16.vlgmr.msra.gmra.mrb[16].mxu0 %vm3326_vm3, %v3338_v17  ;;  %v3492_v56 = vpack.c.bf16 %v11363_v16, %v11363_v16  ;;  %v794_v17 = vrot.slane %v13751_v24, %v13701_v61  ;;  %v3703_v24 = vpack.c.bf16 %v13761_v52, %v13761_v52  ;;  %v11365_v52 = vadd.f32 %v13784_v10, %v790_v9 }
 0x602   :  { %11272 = vmatpush3.bf16.xpose.msra.mxu0 %v3389_v18  ;;  %11273 = vmatprep.mubr.msk.bf16.mxu0 %vm13289_vm0, %v13288_v6  ;;  %v3597_v18 = vpack.c.bf16 %v11372_v14, %v11372_v14 }
 0x603   :  { %11277 = vmatprep.subr.bf16.mxu0 %v13288_v6  ;;  %v11364_v20 = vadd.f32 %v13780_v3, %v794_v17  ;;  %v11373_v3 = vadd.f32 %v13815_v19, %v806_v0  ;;  %v11366_v53 = vadd.f32 %v13791_v40, %v794_v17  ;;  %v3700_v40 = vld [vmem:[%s14469_s12 + $0x1] sm:$0x1] }
 0x604   :  { %vm3701_vm4 = vcmp.gt.f32.partialorder %v3700_v40, 0.0 }
 0x605   :  { %v3596_v21 = vpack.c.bf16 %v11364_v20, %v11364_v20  ;;  %v4019_v19 = vpack.c.bf16 %v11366_v53, %v11366_v53  ;;  %v3702_v0 = vsel %vm3701_vm4, 0.0, %v13290_v27 }
 0x606   :  { %v3749_v7 = vrot.slane %v3702_v0, %v13704_v62 }
 0x609   :  { %11274 = vmatmul.mubr.bf16.vlgmr.msra.gmra.mrb[20].mxu0 %v3388_v23  ;;  %v3916_v23 = vpack.c.bf16 %v11373_v3, %v11373_v3 }
 0x60a   :  { %11278 = vmatpush3.bf16.msra.mxu0 %v3449_v36  ;;  %11279 = vmatprep.mubr.msk.bf16.mxu0 %vm13289_vm0, %v13288_v6  ;;  %v3915_v36 = vpack.c.bf16 %v11365_v52, %v11365_v52 }
 0x60b   :  { %11283 = vmatprep.subr.bf16.mxu0 %v13288_v6 }
 0x6d4   :  { %v13859_v33 = vpop.f32.mrb[16].mxu0 }
 0x6d5   :  { %v11269_v38 = vpop.f32.mrb[17].mxu0 }
 0x6d6   :  { %v3384_v55 = vpop.f32.mrb[18].mxu0  ;;  %v4020_v38 = vpack.c.bf16 %v11374_v46, %v11374_v46 }
 0x6d7   :  { %v11270_v37 = vpop.f32.mrb[19].mxu0 }
 0x6dc   :  { %v3424_v1 = vpop.f32.mrb[20].mxu0 }
 0x6dd   :  { %v3430_v29 = vmul.f32 0.088388346, %v3424_v1  ;;  %v11275_v32 = vpop.f32.mrb[21].mxu0 }
 0x6de   :  { %v3427_v34 = vpop.f32.mrb[22].mxu0 }
 0x6df   :  { %v11276_v39 = vpop.f32.mrb[23].mxu0  ;;  %v3431_v49 = vadd.f32 %v3430_v29, %v13832_v31 }
 0x6e1   :  { %v3432_v41 = vsel %vm3326_vm3, %v3431_v49, -inf }
 0x6e2   :  { %3433 = vmax.xlane.f32.xlu0 %v3432_v41 }
 0x76f   :  { %v3434_v42 = vpop.xlane.xlu0 %3433 }
 0x770   :  { %v3435_v45 = vsub.f32 %v3431_v49, %v3434_v42 }
 0x772   :  { %v3436_v35 = vmul.f32 1.442695, %v3435_v45 }
 0x774   :  { %12790 = vpow2.f32 %v3436_v35 }
 0x77e   :  { %v12791_v47 = vpop.eup %12790 }
 0x77f   :  { %v3438_v48 = vsel %vm3326_vm3, %v12791_v47, 0.0 }
 0x780   :  { %3439 = vadd.xlane.f32.xlu1 %v3438_v48 }
 0x80d   :  { %v3440_v50 = vpop.xlane.xlu1 %3439 }
 0x80e   :  { %12792 = vrcp.f32 %v3440_v50 }
 0x818   :  { %v12793_v5 = vpop.eup %12792 }
 0x819   :  { %v3442_v8 = vmul.f32 %v12793_v5, %v12791_v47 }
 0x81b   :  { %v3443_v11 = vpack.c.bf16 %v3442_v8, %v3442_v8 }
 0x81d   :  { %11280 = vmatmul.mubr.msk.bf16.vlgmr.msra.gmra.mrb[24].mxu0 %vm3326_vm3, %v3443_v11 }
 0x81e   :  { %11284 = vmatpush3.bf16.xpose.msra.mxu0 %v3493_v12  ;;  %11285 = vmatprep.mubr.msk.bf16.mxu0 %vm13289_vm0, %v13288_v6 }
 0x81f   :  { %11295 = vmatprep.subr.bf16.mxu0 %v13288_v6 }
 0x825   :  { %11286 = vmatmul.mubr.bf16.vlgmr.msra.gmra.mrb[28].mxu0 %v3492_v56 }
 0x826   :  { %11296 = vmatpush3.bf16.xpose.msra.mxu0 %v3597_v18  ;;  %11297 = vmatprep.mubr.msk.bf16.mxu0 %vm13289_vm0, %v13288_v6 }
 0x827   :  { %11307 = vmatprep.subr.bf16.mxu0 %v13288_v6 }
 0x82d   :  { %11298 = vmatmul.mubr.bf16.vlgmr.msra.gmra.mrb[32].mxu0 %v3596_v21 }
 0x82e   :  { %11308 = vmatpush3.bf16.xpose.msra.mxu0 %v3704_v30  ;;  %11309 = vmatprep.mubr.msk.bf16.mxu0 %vm13289_vm0, %v13288_v6 }
 0x82f   :  { %11319 = vmatprep.subr.bf16.mxu0 %v13288_v6 }
 0x835   :  { %11310 = vmatmul.mubr.bf16.vlgmr.msra.gmra.mrb[36].mxu0 %v3703_v24 }
 0x836   :  { %11320 = vmatpush3.bf16.xpose.msra.mxu0 %v3812_v59  ;;  %11321 = vmatprep.mubr.msk.bf16.mxu0 %vm13289_vm0, %v13288_v6 }
 0x837   :  { %11331 = vmatprep.subr.bf16.mxu0 %v13288_v6 }
 0x83d   :  { %11322 = vmatmul.mubr.bf16.vlgmr.msra.gmra.mrb[40].mxu0 %v3811_v44 }
 0x83e   :  { %11332 = vmatpush3.bf16.xpose.msra.mxu0 %v3916_v23  ;;  %11333 = vmatprep.mubr.msk.bf16.mxu0 %vm13289_vm0, %v13288_v6 }
 0x83f   :  { %11343 = vmatprep.subr.bf16.mxu0 %v13288_v6 }
 0x845   :  { %11334 = vmatmul.mubr.bf16.vlgmr.msra.gmra.mrb[44].mxu0 %v3915_v36 }
 0x846   :  { %11344 = vmatpush3.bf16.xpose.msra.mxu0 %v4020_v38  ;;  %11345 = vmatprep.mubr.msk.bf16.mxu0 %vm13289_vm0, %v13288_v6 }
 0x84d   :  { %11346 = vmatmul.mubr.bf16.vlgmr.msra.gmra.mrb[48].mxu0 %v4019_v19 }
 0x8f0   :  { %v13910_v55 = vpop.f32.mrb[24].mxu0 }
 0x8f1   :  { %v11281_v37 = vpop.f32.mrb[25].mxu0 }
 0x8f2   :  { %v3488_v1 = vpop.f32.mrb[26].mxu0 }
 0x8f3   :  { %v11282_v10 = vpop.f32.mrb[27].mxu0 }
 0x8f8   :  { %v3528_v29 = vpop.f32.mrb[28].mxu0 }
 0x8f9   :  { %v3534_v32 = vmul.f32 0.088388346, %v3528_v29  ;;  %v11287_v34 = vpop.f32.mrb[29].mxu0 }
 0x8fa   :  { %v3531_v57 = vpop.f32.mrb[30].mxu0 }
 0x8fb   :  { %v11288_v39 = vpop.f32.mrb[31].mxu0  ;;  %v3535_v49 = vadd.f32 %v3534_v32, %v13832_v31 }
 0x8fd   :  { %v3536_v41 = vsel %vm3326_vm3, %v3535_v49, -inf }
 0x8fe   :  { %3537 = vmax.xlane.f32.xlu0 %v3536_v41 }
 0x900   :  { %v3632_v42 = vpop.f32.mrb[32].mxu0 }
 0x901   :  { %v3638_v45 = vmul.f32 0.088388346, %v3632_v42  ;;  %v11299_v35 = vpop.f32.mrb[33].mxu0 }
 0x902   :  { %v3635_v47 = vpop.f32.mrb[34].mxu0 }
 0x903   :  { %v11300_v48 = vpop.f32.mrb[35].mxu0  ;;  %v3639_v50 = vadd.f32 %v3638_v45, %v13832_v31 }
 0x905   :  { %v3640_v5 = vsel %vm3326_vm3, %v3639_v50, -inf }
 0x906   :  { %3641 = vmax.xlane.f32.xlu1 %v3640_v5 }
 0x908   :  { %v3739_v8 = vpop.f32.mrb[36].mxu0 }
 0x909   :  { %v3745_v9 = vmul.f32 0.088388346, %v3739_v8  ;;  %v11311_v11 = vpop.f32.mrb[37].mxu0 }
 0x90a   :  { %v3742_v12 = vpop.f32.mrb[38].mxu0 }
 0x90b   :  { %v11312_v13 = vpop.f32.mrb[39].mxu0  ;;  %v3750_v16 = vadd.f32 %v3749_v7, %v3745_v9 }
 0x90d   :  { %v3751_v14 = vsel %vm3326_vm3, %v3750_v16, -inf }
 0x90e   :  { %3752 = vmax.xlane.f32.xlu0 %v3751_v14 }
 0x910   :  { %v3847_v56 = vpop.f32.mrb[40].mxu0 }
 0x911   :  { %v3853_v17 = vmul.f32 0.088388346, %v3847_v56  ;;  %v11323_v18 = vpop.f32.mrb[41].mxu0 }
 0x912   :  { %v3850_v31 = vpop.f32.mrb[42].mxu0 }
 0x913   :  { %v11324_v20 = vpop.f32.mrb[43].mxu0  ;;  %v3854_v27 = vadd.f32 %v3853_v17, %v3749_v7 }
 0x915   :  { %v3855_v21 = vsel %vm3326_vm3, %v3854_v27, -inf }
 0x916   :  { %3856 = vmax.xlane.f32.xlu1 %v3855_v21  ;;  %v12096_v21 = vld [vmem:[#allocation12 + $0x4] ss:$16 sps:$4 sm:$0xff]  }
 0x917   :  { %4925 = vmatprep.subr.bf16.mxu0 %v12096_v21 }
 0x918   :  { %v3951_v30 = vpop.f32.mrb[44].mxu0 }
 0x919   :  { %v3957_v24 = vmul.f32 0.088388346, %v3951_v30  ;;  %v11335_v59 = vpop.f32.mrb[45].mxu0  ;;  %v12102_v30 = vld [vmem:[#allocation12 + $0x24] ss:$16 sps:$4 sm:$0xff]  }
 0x91a   :  { %v3954_v3 = vpop.f32.mrb[46].mxu0  ;;  %v12108_v59 = vld [vmem:[#allocation12 + $0x44] ss:$16 sps:$4 sm:$0xff]  }
 0x91b   :  { %v11336_v44 = vpop.f32.mrb[47].mxu0  ;;  %v3958_v23 = vadd.f32 %v3957_v24, %v3749_v7  ;;  %v12100_v24 = vld [vmem:[#allocation12 + $0x20] ss:$16 sps:$4 sm:$0xff]  }
 0x91c   :  { %v12106_v3 = vld [vmem:[#allocation12 + $0x40] ss:$16 sps:$4 sm:$0xff]   ;;  %v12114_v44 = vld [vmem:[#allocation12 + $0x64] ss:$16 sps:$4 sm:$0xff]  }
 0x91d   :  { %v3959_v52 = vsel %vm3326_vm3, %v3958_v23, -inf }
 0x91e   :  { %3960 = vmax.xlane.f32.xlu0 %v3959_v52  ;;  %v12120_v52 = vld [vmem:[#allocation12 + $0x84] ss:$16 sps:$4 sm:$0xff]  }
 0x920   :  { %v4055_v46 = vpop.f32.mrb[48].mxu0 }
 0x921   :  { %v4061_v36 = vmul.f32 0.088388346, %v4055_v46  ;;  %v11347_v38 = vpop.f32.mrb[49].mxu0  ;;  %v12118_v46 = vld [vmem:[#allocation12 + $0x80] ss:$16 sps:$4 sm:$0xff]  }
 0x922   :  { %v4058_v53 = vpop.f32.mrb[50].mxu0  ;;  %v12124_v38 = vld [vmem:[#allocation12 + $0xa0] ss:$16 sps:$4 sm:$0xff]  }
 0x923   :  { %v11348_v19 = vpop.f32.mrb[51].mxu0  ;;  %v4062_v37 = vadd.f32 %v4061_v36, %v3749_v7  ;;  %v12126_v36 = vld [vmem:[#allocation12 + $0xa4] ss:$16 sps:$4 sm:$0xff]  }
 0x924   :  { %v12132_v53 = vld [vmem:[#allocation12 + $0xc4] ss:$16 sps:$4 sm:$0xff]   ;;  %v12130_v19 = vld [vmem:[#allocation12 + $0xc0] ss:$16 sps:$4 sm:$0xff]  }
 0x925   :  { %v4063_v1 = vsel %vm3326_vm3, %v4062_v37, -inf }
 0x926   :  { %4064 = vmax.xlane.f32.xlu1 %v4063_v1  ;;  %v12136_v1 = vld [vmem:[#allocation12 + $0xe0] ss:$16 sps:$4 sm:$0xff]  }
 0x98b   :  { %v3538_v10 = vpop.xlane.xlu0 %3537 }
 0x98c   :  { %v3539_v29 = vsub.f32 %v3535_v49, %v3538_v10  ;;  %v12144_v10 = vld [vmem:[#allocation12 + $0x104] ss:$16 sps:$4 sm:$0xff]  }
 0x98e   :  { %v3540_v32 = vmul.f32 1.442695, %v3539_v29  ;;  %v12142_v29 = vld [vmem:[#allocation12 + $0x100] ss:$16 sps:$4 sm:$0xff]  }
 0x990   :  { %12794 = vpow2.f32 %v3540_v32  ;;  %v12150_v32 = vld [vmem:[#allocation12 + $0x124] ss:$16 sps:$4 sm:$0xff]  }
 0x993   :  { %v3642_v34 = vpop.xlane.xlu1 %3641 }
 0x994   :  { %v3643_v57 = vsub.f32 %v3639_v50, %v3642_v34  ;;  %v12148_v34 = vld [vmem:[#allocation12 + $0x120] ss:$16 sps:$4 sm:$0xff]  }
 0x996   :  { %v3644_v39 = vmul.f32 1.442695, %v3643_v57 }
 0x998   :  { %12796 = vpow2.f32 %v3644_v39  ;;  %v826_v39 = vrot.slane %v13807_v15, %v13701_v61 }
 0x99a   :  { %v13925_v41 = vpop.eup %12794 }
 0x99b   :  { %v3753_v40 = vpop.xlane.xlu0 %3752  ;;  %v3542_v42 = vsel %vm3326_vm3, %v13925_v41, 0.0 }
 0x99c   :  { %v3754_v45 = vsub.f32 %v3750_v16, %v3753_v40  ;;  %3543 = vadd.xlane.f32.xlu0 %v3542_v42  ;;  %v11380_v40 = vadd.f32 %v13838_v51, %v826_v39  ;;  %v3763_v51 = vpack.c.bf16 %v13821_v22, %v13821_v22 }
 0x99e   :  { %v3755_v35 = vmul.f32 1.442695, %v3754_v45 }
 0x9a0   :  { %12798 = vpow2.f32 %v3755_v35  ;;  %v3652_v35 = vpack.c.bf16 %v11380_v40, %v11380_v40  ;;  %v12153_v40 = vld [vmem:[#allocation12 + $0x12c] ss:$16 sps:$4 sm:$0xff]  }
 0x9a2   :  { %v13929_v47 = vpop.eup %12796 }
 0x9a3   :  { %v3857_v48 = vpop.xlane.xlu1 %3856  ;;  %v3646_v49 = vsel %vm3326_vm3, %v13929_v47, 0.0 }
 0x9a4   :  { %v3858_v0 = vsub.f32 %v3854_v27, %v3857_v48  ;;  %3647 = vadd.xlane.f32.xlu1 %v3646_v49  ;;  %v12094_v27 = vld [vmem:[#allocation12] ss:$16 sps:$4 sm:$0xff]  }
 0x9a5   :  { %4926 = vmatpush1.bf16.msra.mxu0 %v12094_v27  ;;  %v11382_v27 = vadd.f32 %v13842_v4, %v826_v39  ;;  %v12145_v39 = vld [vmem:[#allocation12 + $0x108] ss:$16 sps:$4 sm:$0xff]  }
 0x9a6   :  { %v3859_v50 = vmul.f32 1.442695, %v3858_v0  ;;  %4927 = vmatprep.subr.bf16.mxu0 %v12102_v30  ;;  %v3657_v0 = vsel %vm3343_vm1, %v3652_v35, 0  ;;  %v12159_v35 = vld [vmem:[#allocation12 + $0x14c] ss:$16 sps:$4 sm:$0xff]  }
 0x9a8   :  { %12800 = vpow2.f32 %v3859_v50 }
 0x9a9   :  { %4928 = vmatpush1.bf16.msra.mxu0 %v12100_v24  ;;  %v4075_v24 = vpack.c.bf16 %v11382_v27, %v11382_v27  ;;  %v12187_v27 = vld [vmem:[#allocation12 + $0x1e8] ss:$16 sps:$4 sm:$0xff]  }
 0x9aa   :  { %v13933_v5 = vpop.eup %12798  ;;  %4929 = vmatprep.subr.bf16.mxu0 %v12108_v59  ;;  %v12099_v59 = vld [vmem:[#allocation12 + $0xc] ss:$16 sps:$4 sm:$0xff]  }
 0x9ab   :  { %v3961_v7 = vpop.xlane.xlu0 %3960  ;;  %v3757_v8 = vsel %vm3326_vm3, %v13933_v5, 0.0 }
 0x9ac   :  { %v3962_v9 = vsub.f32 %v3958_v23, %v3961_v7  ;;  %3758 = vadd.xlane.f32.xlu0 %v3757_v8  ;;  %v12112_v23 = vld [vmem:[#allocation12 + $0x60] ss:$16 sps:$4 sm:$0xff]   ;;  %v3768_v8 = vsel %vm3343_vm1, %v3763_v51, 0  ;;  %v12163_v51 = vld [vmem:[#allocation12 + $0x168] ss:$16 sps:$4 sm:$0xff]  }
 0x9ad   :  { %4930 = vmatpush1.bf16.msra.mxu0 %v12106_v3  ;;  %v4080_v3 = vsel %vm3343_vm1, %v4075_v24, 0 }
 0x9ae   :  { %v3963_v11 = vmul.f32 1.442695, %v3962_v9  ;;  %4931 = vmatprep.subr.bf16.mxu0 %v12114_v44 }
 0x9b0   :  { %12802 = vpow2.f32 %v3963_v11 }
 0x9b1   :  { %4932 = vmatpush1.bf16.msra.mxu0 %v12112_v23  ;;  %v12097_v23 = vld [vmem:[#allocation12 + $0x8] ss:$16 sps:$4 sm:$0xff]  }
 0x9b2   :  { %v13937_v12 = vpop.eup %12800  ;;  %4933 = vmatprep.subr.bf16.mxu0 %v12120_v52 }
 0x9b3   :  { %v4065_v13 = vpop.xlane.xlu1 %4064  ;;  %v3861_v16 = vsel %vm3326_vm3, %v13937_v12, 0.0 }
 0x9b4   :  { %v4066_v14 = vsub.f32 %v4062_v37, %v4065_v13  ;;  %3862 = vadd.xlane.f32.xlu1 %v3861_v16  ;;  %v12138_v37 = vld [vmem:[#allocation12 + $0xe4] ss:$16 sps:$4 sm:$0xff]   ;;  %v3867_v13 = vpack.c.bf16 %v13823_v25, %v13823_v25 }
 0x9b5   :  { %4934 = vmatpush1.bf16.msra.mxu0 %v12118_v46  ;;  %v12105_v46 = vld [vmem:[#allocation12 + $0x2c] ss:$16 sps:$4 sm:$0xff]  }
 0x9b6   :  { %v4067_v56 = vmul.f32 1.442695, %v4066_v14  ;;  %4935 = vmatprep.subr.bf16.mxu0 %v12126_v36  ;;  %v3872_v16 = vsel %vm3343_vm1, %v3867_v13, 0  ;;  %v12111_v36 = vld [vmem:[#allocation12 + $0x4c] ss:$16 sps:$4 sm:$0xff]  }
 0x9b7   :  { %v12177_v13 = vld [vmem:[#allocation12 + $0x1ac] ss:$16 sps:$4 sm:$0xff]  }
 0x9b8   :  { %12804 = vpow2.f32 %v4067_v56 }
 0x9b9   :  { %4936 = vmatpush1.bf16.msra.mxu0 %v12124_v38  ;;  %v12109_v38 = vld [vmem:[#allocation12 + $0x48] ss:$16 sps:$4 sm:$0xff]  }
 0x9ba   :  { %v13941_v17 = vpop.eup %12802  ;;  %4937 = vmatprep.subr.bf16.mxu0 %v12132_v53  ;;  %v12117_v53 = vld [vmem:[#allocation12 + $0x6c] ss:$16 sps:$4 sm:$0xff]  }
 0x9bb   :  { %v3965_v18 = vsel %vm3326_vm3, %v13941_v17, 0.0 }
 0x9bc   :  { %3966 = vadd.xlane.f32.xlu0 %v3965_v18  ;;  %v3971_v18 = vpack.c.bf16 %v13840_v2, %v13840_v2 }
 0x9bd   :  { %4938 = vmatpush1.bf16.msra.mxu0 %v12130_v19  ;;  %v12115_v19 = vld [vmem:[#allocation12 + $0x68] ss:$16 sps:$4 sm:$0xff]  }
 0x9be   :  { %4939 = vmatprep.subr.bf16.mxu0 %v12138_v37  ;;  %v12121_v37 = vld [vmem:[#allocation12 + $0x88] ss:$16 sps:$4 sm:$0xff]  }
 0x9c1   :  { %4940 = vmatpush1.bf16.msra.mxu0 %v12136_v1  ;;  %v12127_v1 = vld [vmem:[#allocation12 + $0xa8] ss:$16 sps:$4 sm:$0xff]  }
 0x9c2   :  { %v13945_v31 = vpop.eup %12804  ;;  %4941 = vmatprep.subr.bf16.mxu0 %v12144_v10  ;;  %v12135_v10 = vld [vmem:[#allocation12 + $0xcc] ss:$16 sps:$4 sm:$0xff]  }
 0x9c3   :  { %v4069_v20 = vsel %vm3326_vm3, %v13945_v31, 0.0 }
 0x9c4   :  { %4070 = vadd.xlane.f32.xlu1 %v4069_v20  ;;  %v3976_v20 = vsel %vm3343_vm1, %v3971_v18, 0  ;;  %v12181_v18 = vld [vmem:[#allocation12 + $0x1c8] ss:$16 sps:$4 sm:$0xff]  }
 0x9c5   :  { %4942 = vmatpush1.bf16.msra.mxu0 %v12142_v29  ;;  %v12133_v29 = vld [vmem:[#allocation12 + $0xc8] ss:$16 sps:$4 sm:$0xff]  }
 0x9c6   :  { %4943 = vmatprep.subr.bf16.mxu0 %v12150_v32  ;;  %v12141_v32 = vld [vmem:[#allocation12 + $0xec] ss:$16 sps:$4 sm:$0xff]  }
 0x9c9   :  { %4944 = vmatpush1.bf16.msra.mxu0 %v12148_v34  ;;  %v12139_v34 = vld [vmem:[#allocation12 + $0xe8] ss:$16 sps:$4 sm:$0xff]  }
 0xa29   :  { %v3544_v57 = vpop.xlane.xlu0 %3543 }
 0xa2a   :  { %12806 = vrcp.f32 %v3544_v57  ;;  %v12147_v57 = vld [vmem:[#allocation12 + $0x10c] ss:$16 sps:$4 sm:$0xff]  }
 0xa31   :  { %v3648_v42 = vpop.xlane.xlu1 %3647 }
 0xa32   :  { %12808 = vrcp.f32 %v3648_v42  ;;  %v12151_v42 = vld [vmem:[#allocation12 + $0x128] ss:$16 sps:$4 sm:$0xff]  }
 0xa34   :  { %v12807_v45 = vpop.eup %12806 }
 0xa35   :  { %v3546_v48 = vmul.f32 %v12807_v45, %v13925_v41  ;;  %v12156_v45 = vld [vmem:[#allocation12 + $0x144] ss:$16 sps:$4 sm:$0xff]  }
 0xa36   :  { %4945 = vmatprep.subr.bf16.mxu0 %v12156_v45  ;;  %v12202_v45 = vld [vmem:[#allocation12 + $0x240] ss:$16 sps:$4 sm:$0xff]  }
 0xa37   :  { %v3547_v49 = vpack.c.bf16 %v3546_v48, %v3546_v48  ;;  %v12154_v48 = vld [vmem:[#allocation12 + $0x140] ss:$16 sps:$4 sm:$0xff]  }
 0xa38   :  { %4946 = vmatpush1.bf16.msra.mxu0 %v12154_v48 }
 0xa39   :  { %11292 = vmatmul.mubr.msk.bf16.vlgmr.msra.gmra.mrb[16].mxu1 %vm3326_vm3, %v3547_v49  ;;  %v3759_v50 = vpop.xlane.xlu0 %3758  ;;  %v12157_v49 = vld [vmem:[#allocation12 + $0x148] ss:$16 sps:$4 sm:$0xff]  }
 0xa3a   :  { %11302 = vmatpush3.bf16.msra.mxu1 %v3657_v0  ;;  %12810 = vrcp.f32 %v3759_v50  ;;  %11303 = vmatprep.mubr.msk.bf16.mxu1 %vm13289_vm0, %v13288_v6  ;;  %v12162_v0 = vld [vmem:[#allocation12 + $0x164] ss:$16 sps:$4 sm:$0xff]   ;;  %v12165_v50 = vld [vmem:[#allocation12 + $0x16c] ss:$16 sps:$4 sm:$0xff]  }
 0xa3b   :  { %11313 = vmatprep.subr.bf16.mxu1 %v13288_v6  ;;  %4947 = vmatprep.subr.bf16.mxu0 %v12162_v0  ;;  %v12213_v0 = vld [vmem:[#allocation12 + $0x26c] ss:$16 sps:$4 sm:$0xff]  }
 0xa3c   :  { %v12809_v15 = vpop.eup %12808 }
 0xa3d   :  { %v3650_v7 = vmul.f32 %v12809_v15, %v13929_v47  ;;  %v12160_v15 = vld [vmem:[#allocation12 + $0x160] ss:$16 sps:$4 sm:$0xff]  }
 0xa3e   :  { %4948 = vmatpush1.bf16.msra.mxu0 %v12160_v15  ;;  %v12208_v15 = vld [vmem:[#allocation12 + $0x260] ss:$16 sps:$4 sm:$0xff]  }
 0xa3f   :  { %v3651_v41 = vpack.c.bf16 %v3650_v7, %v3650_v7  ;;  %v12168_v7 = vld [vmem:[#allocation12 + $0x184] ss:$16 sps:$4 sm:$0xff]  }
 0xa40   :  { %4949 = vmatprep.subr.bf16.mxu0 %v12168_v7  ;;  %v12216_v7 = vld [vmem:[#allocation12 + $0x284] ss:$16 sps:$4 sm:$0xff]  }
 0xa41   :  { %11304 = vmatmul.mubr.msk.bf16.vlgmr.msra.gmra.mrb[20].mxu1 %vm3326_vm3, %v3651_v41  ;;  %v3863_v9 = vpop.xlane.xlu1 %3862  ;;  %v12171_v41 = vld [vmem:[#allocation12 + $0x18c] ss:$16 sps:$4 sm:$0xff]  }
 0xa42   :  { %11314 = vmatpush3.bf16.msra.mxu1 %v3768_v8  ;;  %12812 = vrcp.f32 %v3863_v9  ;;  %11315 = vmatprep.mubr.msk.bf16.mxu1 %vm13289_vm0, %v13288_v6  ;;  %v12166_v8 = vld [vmem:[#allocation12 + $0x180] ss:$16 sps:$4 sm:$0xff]   ;;  %v12169_v9 = vld [vmem:[#allocation12 + $0x188] ss:$16 sps:$4 sm:$0xff]  }
 0xa43   :  { %11325 = vmatprep.subr.bf16.mxu1 %v13288_v6  ;;  %4950 = vmatpush1.bf16.msra.mxu0 %v12166_v8 }
 0xa44   :  { %v12811_v11 = vpop.eup %12810 }
 0xa45   :  { %v3761_v22 = vmul.f32 %v12811_v11, %v13933_v5  ;;  %v12174_v11 = vld [vmem:[#allocation12 + $0x1a4] ss:$16 sps:$4 sm:$0xff]  }
 0xa46   :  { %4951 = vmatprep.subr.bf16.mxu0 %v12174_v11 }
 0xa47   :  { %v3762_v47 = vpack.c.bf16 %v3761_v22, %v3761_v22  ;;  %v12172_v22 = vld [vmem:[#allocation12 + $0x1a0] ss:$16 sps:$4 sm:$0xff]  }
 0xa48   :  { %4952 = vmatpush1.bf16.msra.mxu0 %v12172_v22  ;;  %v12217_v22 = vld [vmem:[#allocation12 + $0x288] ss:$16 sps:$4 sm:$0xff]  }
 0xa49   :  { %v3967_v14 = vpop.xlane.xlu0 %3966  ;;  %11316 = vmatmul.mubr.msk.bf16.vlgmr.msra.gmra.mrb[24].mxu1 %vm3326_vm3, %v3762_v47  ;;  %v12175_v47 = vld [vmem:[#allocation12 + $0x1a8] ss:$16 sps:$4 sm:$0xff]  }
 0xa4a   :  { %12814 = vrcp.f32 %v3967_v14  ;;  %11326 = vmatpush3.bf16.msra.mxu1 %v3872_v16  ;;  %11327 = vmatprep.mubr.msk.bf16.mxu1 %vm13289_vm0, %v13288_v6  ;;  %v12180_v16 = vld [vmem:[#allocation12 + $0x1c4] ss:$16 sps:$4 sm:$0xff]   ;;  %v12183_v14 = vld [vmem:[#allocation12 + $0x1cc] ss:$16 sps:$4 sm:$0xff]  }
 0xa4b   :  { %11337 = vmatprep.subr.bf16.mxu1 %v13288_v6  ;;  %4953 = vmatprep.subr.bf16.mxu0 %v12180_v16  ;;  %v12222_v16 = vld [vmem:[#allocation12 + $0x2a4] ss:$16 sps:$4 sm:$0xff]  }
 0xa4c   :  { %v12813_v56 = vpop.eup %12812 }
 0xa4d   :  { %v3865_v25 = vmul.f32 %v12813_v56, %v13937_v12  ;;  %v12178_v56 = vld [vmem:[#allocation12 + $0x1c0] ss:$16 sps:$4 sm:$0xff]  }
 0xa4e   :  { %4954 = vmatpush1.bf16.msra.mxu0 %v12178_v56 }
 0xa4f   :  { %v3866_v5 = vpack.c.bf16 %v3865_v25, %v3865_v25  ;;  %v12186_v25 = vld [vmem:[#allocation12 + $0x1e4] ss:$16 sps:$4 sm:$0xff]  }
 0xa50   :  { %4955 = vmatprep.subr.bf16.mxu0 %v12186_v25  ;;  %v12223_v25 = vld [vmem:[#allocation12 + $0x2a8] ss:$16 sps:$4 sm:$0xff]  }
 0xa51   :  { %11328 = vmatmul.mubr.msk.bf16.vlgmr.msra.gmra.mrb[28].mxu1 %vm3326_vm3, %v3866_v5  ;;  %v4071_v21 = vpop.xlane.xlu1 %4070  ;;  %v12189_v5 = vld [vmem:[#allocation12 + $0x1ec] ss:$16 sps:$4 sm:$0xff]  }
 0xa52   :  { %11338 = vmatpush3.bf16.msra.mxu1 %v3976_v20  ;;  %12816 = vrcp.f32 %v4071_v21  ;;  %11339 = vmatprep.mubr.msk.bf16.mxu1 %vm13289_vm0, %v13288_v6  ;;  %v12184_v20 = vld [vmem:[#allocation12 + $0x1e0] ss:$16 sps:$4 sm:$0xff]   ;;  %v12192_v21 = vld [vmem:[#allocation12 + $0x204] ss:$16 sps:$4 sm:$0xff]  }
 0xa53   :  { %11349 = vmatprep.subr.bf16.mxu1 %v13288_v6  ;;  %4956 = vmatpush1.bf16.msra.mxu0 %v12184_v20  ;;  %v12231_v20 = vld [vmem:[#allocation12 + $0x2cc] ss:$16 sps:$4 sm:$0xff]  }
 0xa54   :  { %v12815_v30 = vpop.eup %12814  ;;  %4968 = vmatprep.subr.bf16.mxu0 %v12192_v21  ;;  %v12229_v21 = vld [vmem:[#allocation12 + $0x2c8] ss:$16 sps:$4 sm:$0xff]  }
 0xa55   :  { %v3969_v2 = vmul.f32 %v12815_v30, %v13941_v17  ;;  %v12103_v17 = vld [vmem:[#allocation12 + $0x28] ss:$16 sps:$4 sm:$0xff]   ;;  %v12195_v30 = vld [vmem:[#allocation12 + $0x20c] ss:$16 sps:$4 sm:$0xff]  }
 0xa57   :  { %v3970_v12 = vpack.c.bf16 %v3969_v2, %v3969_v2 }
 0xa59   :  { %11340 = vmatmul.mubr.msk.bf16.vlgmr.msra.gmra.mrb[32].mxu1 %vm3326_vm3, %v3970_v12 }
 0xa5a   :  { %11350 = vmatpush3.bf16.msra.mxu1 %v4080_v3  ;;  %11351 = vmatprep.mubr.msk.bf16.mxu1 %vm13289_vm0, %v13288_v6  ;;  %v12123_v6 = vld [vmem:[#allocation12 + $0x8c] ss:$16 sps:$4 sm:$0xff]  }
 0xa5b   :  { %5011 = vmatprep.subr.bf16.mxu1 %v12099_v59 }
 0xa5c   :  { %v12817_v4 = vpop.eup %12816 }
 0xa5d   :  { %v4073_v44 = vmul.f32 %v12817_v4, %v13945_v31  ;;  %v12129_v31 = vld [vmem:[#allocation12 + $0xac] ss:$16 sps:$4 sm:$0xff]  }
 0xa5f   :  { %v4074_v52 = vpack.c.bf16 %v4073_v44, %v4073_v44 }
 0xa61   :  { %11352 = vmatmul.mubr.msk.bf16.vlgmr.msra.gmra.mrb[36].mxu1 %vm3326_vm3, %v4074_v52 }
 0xa62   :  { %5012 = vmatpush1.bf16.msra.mxu1 %v12097_v23 }
 0xa63   :  { %5013 = vmatprep.subr.bf16.mxu1 %v12105_v46 }
 0xa66   :  { %5014 = vmatpush1.bf16.msra.mxu1 %v12103_v17 }
 0xa67   :  { %5015 = vmatprep.subr.bf16.mxu1 %v12111_v36 }
 0xa6a   :  { %5016 = vmatpush1.bf16.msra.mxu1 %v12109_v38 }
 0xa6b   :  { %5017 = vmatprep.subr.bf16.mxu1 %v12117_v53 }
 0xa6e   :  { %5018 = vmatpush1.bf16.msra.mxu1 %v12115_v19 }
 0xa6f   :  { %5019 = vmatprep.subr.bf16.mxu1 %v12123_v6 }
 0xa72   :  { %5020 = vmatpush1.bf16.msra.mxu1 %v12121_v37  ;;  %v12190_v37 = vld [vmem:[#allocation12 + $0x200] ss:$16 sps:$4 sm:$0xff]  }
 0xa73   :  { %5021 = vmatprep.subr.bf16.mxu1 %v12129_v31  ;;  %v12193_v31 = vld [vmem:[#allocation12 + $0x208] ss:$16 sps:$4 sm:$0xff]  }
 0xa76   :  { %5022 = vmatpush1.bf16.msra.mxu1 %v12127_v1 }
 0xa77   :  { %5023 = vmatprep.subr.bf16.mxu1 %v12135_v10  ;;  %v12198_v10 = vld [vmem:[#allocation12 + $0x224] ss:$16 sps:$4 sm:$0xff]  }
 0xa7a   :  { %5024 = vmatpush1.bf16.msra.mxu1 %v12133_v29  ;;  %v12201_v29 = vld [vmem:[#allocation12 + $0x22c] ss:$16 sps:$4 sm:$0xff]  }
 0xa7b   :  { %5025 = vmatprep.subr.bf16.mxu1 %v12141_v32 }
 0xa7e   :  { %5026 = vmatpush1.bf16.msra.mxu1 %v12139_v34  ;;  %v12199_v34 = vld [vmem:[#allocation12 + $0x228] ss:$16 sps:$4 sm:$0xff]  }
 0xa7f   :  { %5027 = vmatprep.subr.bf16.mxu1 %v12147_v57  ;;  %v12204_v57 = vld [vmem:[#allocation12 + $0x244] ss:$16 sps:$4 sm:$0xff]  }
 0xa82   :  { %5028 = vmatpush1.bf16.msra.mxu1 %v12145_v39  ;;  %v12207_v39 = vld [vmem:[#allocation12 + $0x24c] ss:$16 sps:$4 sm:$0xff]  }
 0xa83   :  { %5029 = vmatprep.subr.bf16.mxu1 %v12153_v40 }
 0xa86   :  { %5030 = vmatpush1.bf16.msra.mxu1 %v12151_v42 }
 0xa87   :  { %5031 = vmatprep.subr.bf16.mxu1 %v12159_v35  ;;  %v12205_v35 = vld [vmem:[#allocation12 + $0x248] ss:$16 sps:$4 sm:$0xff]  }
 0xa8a   :  { %5032 = vmatpush1.bf16.msra.mxu1 %v12157_v49  ;;  %v12210_v49 = vld [vmem:[#allocation12 + $0x264] ss:$16 sps:$4 sm:$0xff]  }
 0xa8b   :  { %5033 = vmatprep.subr.bf16.mxu1 %v12165_v50 }
 0xa8e   :  { %5034 = vmatpush1.bf16.msra.mxu1 %v12163_v51  ;;  %v12211_v51 = vld [vmem:[#allocation12 + $0x268] ss:$16 sps:$4 sm:$0xff]  }
 0xa8f   :  { %5035 = vmatprep.subr.bf16.mxu1 %v12171_v41  ;;  %v12219_v41 = vld [vmem:[#allocation12 + $0x28c] ss:$16 sps:$4 sm:$0xff]  }
 0xa92   :  { %5036 = vmatpush1.bf16.msra.mxu1 %v12169_v9 }
 0xa93   :  { %5037 = vmatprep.subr.bf16.mxu1 %v12177_v13  ;;  %v12214_v13 = vld [vmem:[#allocation12 + $0x280] ss:$16 sps:$4 sm:$0xff]  }
 0xa96   :  { %5038 = vmatpush1.bf16.msra.mxu1 %v12175_v47 }
 0xa97   :  { %5039 = vmatprep.subr.bf16.mxu1 %v12183_v14  ;;  %v12225_v14 = vld [vmem:[#allocation12 + $0x2ac] ss:$16 sps:$4 sm:$0xff]  }
 0xa9a   :  { %5040 = vmatpush1.bf16.msra.mxu1 %v12181_v18  ;;  %v12220_v18 = vld [vmem:[#allocation12 + $0x2a0] ss:$16 sps:$4 sm:$0xff]  }
 0xa9b   :  { %5041 = vmatprep.subr.bf16.mxu1 %v12189_v5  ;;  %v12228_v5 = vld [vmem:[#allocation12 + $0x2c4] ss:$16 sps:$4 sm:$0xff]  }
 0xa9e   :  { %5042 = vmatpush1.bf16.msra.mxu1 %v12187_v27  ;;  %v12226_v27 = vld [vmem:[#allocation12 + $0x2c0] ss:$16 sps:$4 sm:$0xff]  }
 0xa9f   :  { %5054 = vmatprep.subr.bf16.mxu1 %v12195_v30  ;;  %v12234_v30 = vld [vmem:[#allocation12 + $0x2e4] ss:$16 sps:$4 sm:$0xff]  }
 0xb0c   :  { %v3589_v24 = vpop.f32.mrb[16].mxu1 }
 0xb0d   :  { %v11293_v2 = vpop.f32.mrb[17].mxu1 }
 0xb0e   :  { %v3592_v12 = vpop.f32.mrb[18].mxu1  ;;  %v12232_v2 = vld [vmem:[#allocation12 + $0x2e0] ss:$16 sps:$4 sm:$0xff]  }
 0xb0f   :  { %v11294_v59 = vpop.f32.mrb[19].mxu1  ;;  %v12235_v12 = vld [vmem:[#allocation12 + $0x2e8] ss:$16 sps:$4 sm:$0xff]  }
 0xb10   :  { %v12240_v59 = vld [vmem:[#allocation12 + $0x304] ss:$16 sps:$4 sm:$0xff]  }
 0xb14   :  { %v3693_v3 = vpop.f32.mrb[20].mxu1 }
 0xb15   :  { %v11305_v4 = vpop.f32.mrb[21].mxu1 }
 0xb16   :  { %v3696_v44 = vpop.f32.mrb[22].mxu1  ;;  %v12238_v4 = vld [vmem:[#allocation12 + $0x300] ss:$16 sps:$4 sm:$0xff]  }
 0xb17   :  { %v11306_v23 = vpop.f32.mrb[23].mxu1  ;;  %v12241_v44 = vld [vmem:[#allocation12 + $0x308] ss:$16 sps:$4 sm:$0xff]  }
 0xb18   :  { %v12246_v23 = vld [vmem:[#allocation12 + $0x324] ss:$16 sps:$4 sm:$0xff]  }
 0xb1c   :  { %v3804_v52 = vpop.f32.mrb[24].mxu1 }
 0xb1d   :  { %v4131_v46 = vpack.c.bf16 %v3804_v52, %v13859_v33  ;;  %v11317_v17 = vpop.f32.mrb[25].mxu1  ;;  %v12196_v33 = vld [vmem:[#allocation12 + $0x220] ss:$16 sps:$4 sm:$0xff]   ;;  %v12249_v52 = vld [vmem:[#allocation12 + $0x32c] ss:$16 sps:$4 sm:$0xff]  }
 0xb1e   :  { %v3807_v36 = vpop.f32.mrb[26].mxu1  ;;  %v12247_v17 = vld [vmem:[#allocation12 + $0x328] ss:$16 sps:$4 sm:$0xff]  }
 0xb1f   :  { %v11318_v38 = vpop.f32.mrb[27].mxu1  ;;  %v12252_v36 = vld [vmem:[#allocation12 + $0x344] ss:$16 sps:$4 sm:$0xff]  }
 0xb20   :  { %v12255_v38 = vld [vmem:[#allocation12 + $0x34c] ss:$16 sps:$4 sm:$0xff]  }
 0xb24   :  { %v3908_v53 = vpop.f32.mrb[28].mxu1 }
 0xb25   :  { %v4132_v19 = vpack.c.bf16 %v3908_v53, %v13910_v55  ;;  %v11329_v6 = vpop.f32.mrb[29].mxu1  ;;  %v12250_v53 = vld [vmem:[#allocation12 + $0x340] ss:$16 sps:$4 sm:$0xff]  }
 0xb26   :  { %v3911_v1 = vpop.f32.mrb[30].mxu1  ;;  %v12258_v6 = vld [vmem:[#allocation12 + $0x364] ss:$16 sps:$4 sm:$0xff]  }
 0xb27   :  { %v11330_v32 = vpop.f32.mrb[31].mxu1  ;;  %4957 = vmatprep.mubr.bf16.mxu0 %v4132_v19  ;;  %5043 = vmatprep.mubr.bf16.mxu1 %v4132_v19  ;;  %v12253_v19 = vld [vmem:[#allocation12 + $0x348] ss:$16 sps:$4 sm:$0xff]  }
 0xb28   :  { %4958 = vmatmul.mubr.bf16.vlgmr.msra.gmra.mrb[52].mxu0 %v4131_v46  ;;  %5044 = vmatmul.mubr.bf16.vlgmr.msra.gmra.mrb[40].mxu1 %v4131_v46  ;;  %v12244_v46 = vld [vmem:[#allocation12 + $0x320] ss:$16 sps:$4 sm:$0xff]   ;;  %v12259_v1 = vld [vmem:[#allocation12 + $0x368] ss:$16 sps:$4 sm:$0xff]  }
 0xb29   :  { %4969 = vmatpush1.bf16.msra.mxu0 %v12190_v37  ;;  %5055 = vmatpush1.bf16.msra.mxu1 %v12193_v31  ;;  %v12261_v37 = vld [vmem:[#allocation12 + $0x36c] ss:$16 sps:$4 sm:$0xff]   ;;  %v12256_v31 = vld [vmem:[#allocation12 + $0x360] ss:$16 sps:$4 sm:$0xff]  }
 0xb2a   :  { %4970 = vmatprep.subr.bf16.mxu0 %v12198_v10  ;;  %5056 = vmatprep.subr.bf16.mxu1 %v12201_v29  ;;  %v12264_v10 = vld [vmem:[#allocation12 + $0x384] ss:$16 sps:$4 sm:$0xff]   ;;  %v12267_v29 = vld [vmem:[#allocation12 + $0x38c] ss:$16 sps:$4 sm:$0xff]   ;;  %v12262_v32 = vld [vmem:[#allocation12 + $0x380] ss:$16 sps:$4 sm:$0xff]  }
 0xb2c   :  { %v4012_v55 = vpop.f32.mrb[32].mxu1 }
 0xb2d   :  { %v13992_v40 = vpack.c.bf16 %v4012_v55, %v3589_v24  ;;  %4971 = vmatpush1.bf16.msra.mxu0 %v12196_v33  ;;  %5057 = vmatpush1.bf16.msra.mxu1 %v12199_v34  ;;  %v11341_v42 = vpop.f32.mrb[33].mxu1  ;;  %v12237_v24 = vld [vmem:[#allocation12 + $0x2ec] ss:$16 sps:$4 sm:$0xff]   ;;  %v12265_v33 = vld [vmem:[#allocation12 + $0x388] ss:$16 sps:$4 sm:$0xff]  }
 0xb2e   :  { %v4015_v48 = vpop.f32.mrb[34].mxu1  ;;  %4972 = vmatprep.subr.bf16.mxu0 %v12204_v57  ;;  %5058 = vmatprep.subr.bf16.mxu1 %v12207_v39  ;;  %v12270_v34 = vld [vmem:[#allocation12 + $0x3a4] ss:$16 sps:$4 sm:$0xff]   ;;  %v12273_v57 = vld [vmem:[#allocation12 + $0x3ac] ss:$16 sps:$4 sm:$0xff]  }
 0xb2f   :  { %v11342_v50 = vpop.f32.mrb[35].mxu1  ;;  %v12268_v39 = vld [vmem:[#allocation12 + $0x3a0] ss:$16 sps:$4 sm:$0xff]   ;;  %v12271_v55 = vld [vmem:[#allocation12 + $0x3a8] ss:$16 sps:$4 sm:$0xff]  }
 0xb30   :  { %v12276_v42 = vld [vmem:[#allocation12 + $0x3c4] ss:$16 sps:$4 sm:$0xff]   ;;  %v12277_v48 = vld [vmem:[#allocation12 + $0x3c8] ss:$16 sps:$4 sm:$0xff]   ;;  %v12280_v50 = vld [vmem:[#allocation12 + $0x3e0] ss:$16 sps:$4 sm:$0xff]  }
 0xb31   :  { %4973 = vmatpush1.bf16.msra.mxu0 %v12202_v45  ;;  %5059 = vmatpush1.bf16.msra.mxu1 %v12205_v35  ;;  %v12279_v45 = vld [vmem:[#allocation12 + $0x3cc] ss:$16 sps:$4 sm:$0xff]   ;;  %v12274_v35 = vld [vmem:[#allocation12 + $0x3c0] ss:$16 sps:$4 sm:$0xff]  }
 0xb32   :  { %4974 = vmatprep.subr.bf16.mxu0 %v12210_v49  ;;  %5060 = vmatprep.subr.bf16.mxu1 %v12213_v0  ;;  %v12282_v49 = vld [vmem:[#allocation12 + $0x3e4] ss:$16 sps:$4 sm:$0xff]   ;;  %v12285_v0 = vld [vmem:[#allocation12 + $0x3ec] ss:$16 sps:$4 sm:$0xff]  }
 0xb34   :  { %v4116_v8 = vpop.f32.mrb[36].mxu1 }
 0xb35   :  { %v4134_v9 = vpack.c.bf16 %v4116_v8, %v3693_v3  ;;  %4975 = vmatpush1.bf16.msra.mxu0 %v12208_v15  ;;  %5061 = vmatpush1.bf16.msra.mxu1 %v12211_v51  ;;  %v11353_v11 = vpop.f32.mrb[37].mxu1  ;;  %v12243_v3 = vld [vmem:[#allocation12 + $0x30c] ss:$16 sps:$4 sm:$0xff]   ;;  %v12283_v15 = vld [vmem:[#allocation12 + $0x3e8] ss:$16 sps:$4 sm:$0xff]  }
 0xb36   :  { %v4119_v47 = vpop.f32.mrb[38].mxu1  ;;  %4976 = vmatprep.subr.bf16.mxu0 %v12216_v7  ;;  %5062 = vmatprep.subr.bf16.mxu1 %v12219_v41  ;;  %v4263_v51 = vld [vmem:[#allocation13] sm:$0xf] }
 0xb37   :  { %v11354_v56 = vpop.f32.mrb[39].mxu1  ;;  %5000 = vmatprep.mubr.bf16.mxu0 %v4134_v9  ;;  %5086 = vmatprep.mubr.bf16.mxu1 %v4134_v9  ;;  %v4268_v7 = vrot.slane %v4263_v51, %v13704_v62  ;;  %v4276_v41 = vrot.slane %v4263_v51, %v13707_v63  ;;  %v4272_v8 = vrot.slane %v4263_v51, %v13698_v60 }
 0xb39   :  { %4977 = vmatpush1.bf16.msra.mxu0 %v12214_v13  ;;  %5063 = vmatpush1.bf16.msra.mxu1 %v12217_v22  ;;  %v4280_v13 = vrot.slane %v4263_v51, %v13701_v61  ;;  %v5234_v51 = vld [vmem:[#allocation18 + $0x68] sm:$0xff] }
 0xb3a   :  { %4978 = vmatprep.subr.bf16.mxu0 %v12222_v16  ;;  %5064 = vmatprep.subr.bf16.mxu1 %v12225_v14 }
 0xb3d   :  { %4979 = vmatpush1.bf16.msra.mxu0 %v12220_v18  ;;  %5065 = vmatpush1.bf16.msra.mxu1 %v12223_v25 }
 0xb3e   :  { %4980 = vmatprep.subr.bf16.mxu0 %v12228_v5  ;;  %5066 = vmatprep.subr.bf16.mxu1 %v12231_v20 }
 0xb41   :  { %4981 = vmatpush1.bf16.msra.mxu0 %v12226_v27  ;;  %5067 = vmatpush1.bf16.msra.mxu1 %v12229_v21 }
 0xb42   :  { %4982 = vmatprep.subr.bf16.mxu0 %v12234_v30  ;;  %5068 = vmatprep.subr.bf16.mxu1 %v12237_v24  ;;  %v12863_v30 = vld [vmem:[%s14468_s0 + $0x8] sm:$0xff] }
 0xb45   :  { %4983 = vmatpush1.bf16.msra.mxu0 %v12232_v2  ;;  %5069 = vmatpush1.bf16.msra.mxu1 %v12235_v12 }
 0xb46   :  { %4984 = vmatprep.subr.bf16.mxu0 %v12240_v59  ;;  %5070 = vmatprep.subr.bf16.mxu1 %v12243_v3  ;;  %v12864_v3 = vld [vmem:[%s14468_s0 + $0x20] sm:$0xff] }
 0xb49   :  { %4985 = vmatpush1.bf16.msra.mxu0 %v12238_v4  ;;  %5071 = vmatpush1.bf16.msra.mxu1 %v12241_v44  ;;  %v12865_v44 = vld [vmem:[%s14468_s0 + $0x10] sm:$0xff] }
 0xb4a   :  { %4986 = vmatprep.subr.bf16.mxu0 %v12246_v23  ;;  %5072 = vmatprep.subr.bf16.mxu1 %v12249_v52  ;;  %v12866_v52 = vld [vmem:[%s14468_s0 + $0x28] sm:$0xff] }
 0xb4d   :  { %4987 = vmatpush1.bf16.msra.mxu0 %v12244_v46  ;;  %5073 = vmatpush1.bf16.msra.mxu1 %v12247_v17 }
 0xb4e   :  { %4988 = vmatprep.subr.bf16.mxu0 %v12252_v36  ;;  %5074 = vmatprep.subr.bf16.mxu1 %v12255_v38  ;;  %v12867_v38 = vld [vmem:[%s14468_s0 + $0x18] sm:$0xff] }
 0xb51   :  { %4989 = vmatpush1.bf16.msra.mxu0 %v12250_v53  ;;  %5075 = vmatpush1.bf16.msra.mxu1 %v12253_v19  ;;  %v12868_v19 = vld [vmem:[%s14468_s0 + $0x30] sm:$0xff] }
 0xb52   :  { %4990 = vmatprep.subr.bf16.mxu0 %v12258_v6  ;;  %5076 = vmatprep.subr.bf16.mxu1 %v12261_v37 }
 0xb55   :  { %4991 = vmatpush1.bf16.msra.mxu0 %v12256_v31  ;;  %5077 = vmatpush1.bf16.msra.mxu1 %v12259_v1  ;;  %v12869_v1 = vld [vmem:[%s14468_s0 + $0x38] sm:$0xff] }
 0xb56   :  { %4992 = vmatprep.subr.bf16.mxu0 %v12264_v10  ;;  %5078 = vmatprep.subr.bf16.mxu1 %v12267_v29 }
 0xb59   :  { %4993 = vmatpush1.bf16.msra.mxu0 %v12262_v32  ;;  %5079 = vmatpush1.bf16.msra.mxu1 %v12265_v33 }
 0xb5a   :  { %4994 = vmatprep.subr.bf16.mxu0 %v12270_v34  ;;  %5080 = vmatprep.subr.bf16.mxu1 %v12273_v57  ;;  %v5221_v34 = vld [vmem:[#allocation18] sm:$0xff] }
 0xb5b   :  { %v5225_v57 = vld [vmem:[#allocation18 + $0x20] sm:$0xff] }
 0xb5d   :  { %4995 = vmatpush1.bf16.msra.mxu0 %v12268_v39  ;;  %5081 = vmatpush1.bf16.msra.mxu1 %v12271_v55  ;;  %v5222_v39 = vld [vmem:[#allocation18 + $0x8] sm:$0xff]  ;;  %v10612_v55 = vcombine.low %v5221_v34, %v5225_v57 }
 0xb5e   :  { %4996 = vmatprep.subr.bf16.mxu0 %v12276_v42  ;;  %5082 = vmatprep.subr.bf16.mxu1 %v12279_v45  ;;  %v10613_v42 = vcombine.high %v5221_v34, %v5225_v57  ;;  %v5226_v45 = vld [vmem:[#allocation18 + $0x28] sm:$0xff]  ;;  %v5273_v34 = vld [vmem:[#allocation18 + $0x1a0] sm:$0xff] }
 0xb5f   :  { %v5270_v57 = vld [vmem:[#allocation18 + $0x188] sm:$0xff] }
 0xb61   :  { %4997 = vmatpush1.bf16.msra.mxu0 %v12274_v35  ;;  %5083 = vmatpush1.bf16.msra.mxu1 %v12277_v48  ;;  %v5229_v35 = vld [vmem:[#allocation18 + $0x40] sm:$0xff] }
 0xb62   :  { %4998 = vmatprep.subr.bf16.mxu0 %v12282_v49  ;;  %5084 = vmatprep.subr.bf16.mxu1 %v12285_v0  ;;  %v5233_v48 = vld [vmem:[#allocation18 + $0x60] sm:$0xff]  ;;  %v10614_v49 = vcombine.low %v5222_v39, %v5226_v45  ;;  %v10615_v0 = vcombine.high %v5222_v39, %v5226_v45  ;;  %v5274_v39 = vld [vmem:[#allocation18 + $0x1a8] sm:$0xff] }
 0xb65   :  { %4999 = vmatpush1.bf16.msra.mxu0 %v12280_v50  ;;  %5085 = vmatpush1.bf16.msra.mxu1 %v12283_v15  ;;  %v10621_v50 = vcombine.high %v5229_v35, %v5233_v48  ;;  %v5230_v15 = vld [vmem:[#allocation18 + $0x48] sm:$0xff] }
 0xb66   :  { %6799 = vmatprep.subr.bf16.mxu0 %v10613_v42  ;;  %6885 = vmatprep.subr.bf16.mxu1 %v10615_v0  ;;  %v5278_v0 = vld [vmem:[#allocation18 + $0x1c8] sm:$0xff] }
 0xb68   :  { %5001 = vmatmul.mubr.bf16.vlgmr.msra.gmra.mrb[52].mxu0 %v13992_v40  ;;  %5087 = vmatmul.mubr.bf16.vlgmr.msra.gmra.mrb[40].mxu1 %v13992_v40  ;;  %v12862_v40 = vld [vmem:[%s14468_s0] sm:$0xff] }
 0xb69   :  { %6800 = vmatpush1.bf16.msra.mxu0 %v10612_v55  ;;  %6886 = vmatpush1.bf16.msra.mxu1 %v10614_v49  ;;  %v5281_v49 = vld [vmem:[#allocation18 + $0x1e0] sm:$0xff] }
 0xb6a   :  { %6801 = vmatprep.subr.bf16.mxu0 %v10621_v50  ;;  %v5282_v50 = vld [vmem:[#allocation18 + $0x1e8] sm:$0xff] }
 0xc3b   :  { %v5002_v9 = vpop.f32.mrb[52].mxu0  ;;  %v5088_v11 = vpop.f32.mrb[40].mxu1 }
 0xc3c   :  { %v11383_v22 = vadd.f32 %v5002_v9, %v4268_v7  ;;  %v5004_v47 = vpop.f32.mrb[53].mxu0  ;;  %v5090_v16 = vpop.f32.mrb[41].mxu1  ;;  %v11387_v14 = vadd.f32 %v5088_v11, %v4276_v41  ;;  %v5238_v9 = vld [vmem:[#allocation18 + $0x88] sm:$0xff] }
 0xc3d   :  { %v11384_v56 = vadd.f32 %v5004_v47, %v4272_v8  ;;  %v5006_v18 = vpop.f32.mrb[54].mxu0  ;;  %v5092_v25 = vpop.f32.mrb[42].mxu1  ;;  %v11388_v2 = vadd.f32 %v5090_v16, %v4280_v13  ;;  %v5242_v11 = vld [vmem:[#allocation18 + $0xa8] sm:$0xff] }
 0xc3e   :  { %v14003_v5 = vadd.f32 %v12862_v40, %v11383_v22  ;;  %v11385_v20 = vadd.f32 %v5006_v18, %v4268_v7  ;;  %v5008_v27 = vpop.f32.mrb[55].mxu0  ;;  %v5094_v21 = vpop.f32.mrb[43].mxu1  ;;  %v11389_v12 = vadd.f32 %v5092_v25, %v4276_v41  ;;  %v14018_v23 = vadd.f32 %v12865_v44, %v11387_v14  ;;  %v5237_v7 = vld [vmem:[#allocation18 + $0x80] sm:$0xff]  ;;  %v5246_v18 = vld [vmem:[#allocation18 + $0xc8] sm:$0xff] }
 0xc3f   :  { %v14008_v24 = vadd.f32 %v12863_v30, %v11384_v56  ;;  %v11386_v59 = vadd.f32 %v5008_v27, %v4272_v8  ;;  %v11390_v17 = vadd.f32 %v5094_v21, %v4280_v13  ;;  %v14030_v53 = vadd.f32 %v12867_v38, %v11388_v2  ;;  %v5241_v8 = vld [vmem:[#allocation18 + $0xa0] sm:$0xff]  ;;  %v5250_v25 = vld [vmem:[#allocation18 + $0xe8] sm:$0xff] }
 0xc40   :  { %v14013_v4 = vadd.f32 %v12864_v3, %v11385_v20  ;;  %v14035_v6 = vadd.f32 %v12868_v19, %v11389_v12  ;;  %v10623_v41 = vcombine.high %v5230_v15, %v5234_v51  ;;  %v10620_v13 = vcombine.low %v5229_v35, %v5233_v48  ;;  %v5245_v14 = vld [vmem:[#allocation18 + $0xc0] sm:$0xff]  ;;  %v5254_v12 = vld [vmem:[#allocation18 + $0x108] sm:$0xff] }
 0xc41   :  { %v14023_v46 = vadd.f32 %v12866_v52, %v11386_v59  ;;  %v5105_v36 = vadd.f32 %v14008_v24, %v14003_v5  ;;  %v14043_v10 = vadd.f32 %v12869_v1, %v11390_v17  ;;  %v10622_v22 = vcombine.low %v5230_v15, %v5234_v51  ;;  %v5249_v56 = vld [vmem:[#allocation18 + $0xe0] sm:$0xff]  ;;  %v5258_v59 = vld [vmem:[#allocation18 + $0x128] sm:$0xff] }
 0xc42   :  { %v10629_v47 = vcombine.high %v5237_v7, %v5241_v8  ;;  %6887 = vmatprep.subr.bf16.mxu1 %v10623_v41  ;;  %v10631_v16 = vcombine.high %v5238_v9, %v5242_v11  ;;  %6802 = vmatpush1.bf16.msra.mxu0 %v10620_v13  ;;  %v10628_v40 = vcombine.low %v5237_v7, %v5241_v8  ;;  %v5253_v30 = vld [vmem:[#allocation18 + $0x100] sm:$0xff]  ;;  %v5262_v19 = vld [vmem:[#allocation18 + $0x148] sm:$0xff] }
 0xc43   :  { %v5106_v37 = vadd.f32 %v5105_v36, %v14018_v23  ;;  %v5110_v31 = vadd.f32 %v14023_v46, %v14013_v4  ;;  %6888 = vmatpush1.bf16.msra.mxu1 %v10622_v22  ;;  %v10630_v20 = vcombine.low %v5238_v9, %v5242_v11  ;;  %v10637_v27 = vcombine.high %v5245_v14, %v5249_v56  ;;  %v5257_v2 = vld [vmem:[#allocation18 + $0x120] sm:$0xff]  ;;  %v5286_v11 = vld [vmem:[#allocation18 + $0x208] sm:$0xff] }
 0xc44   :  { %6803 = vmatprep.subr.bf16.mxu0 %v10629_v47  ;;  %6889 = vmatprep.subr.bf16.mxu1 %v10631_v16  ;;  %v10639_v21 = vcombine.high %v5246_v18, %v5250_v25  ;;  %v10636_v3 = vcombine.low %v5245_v14, %v5249_v56  ;;  %v10638_v44 = vcombine.low %v5246_v18, %v5250_v25  ;;  %v5261_v36 = vld [vmem:[#allocation18 + $0x140] sm:$0xff]  ;;  %v5290_v13 = vld [vmem:[#allocation18 + $0x228] sm:$0xff] }
 0xc45   :  { %v5107_v29 = vadd.f32 %v5106_v37, %v14030_v53  ;;  %v5111_v32 = vadd.f32 %v5110_v31, %v14035_v6  ;;  %v10645_v52 = vcombine.high %v5253_v30, %v5257_v2  ;;  %v10647_v17 = vcombine.high %v5254_v12, %v5258_v59  ;;  %v5265_v38 = vld [vmem:[#allocation18 + $0x160] sm:$0xff]  ;;  %v5266_v37 = vld [vmem:[#allocation18 + $0x168] sm:$0xff] }
 0xc46   :  { %6804 = vmatpush1.bf16.msra.mxu0 %v10628_v40  ;;  %v10644_v31 = vcombine.low %v5253_v30, %v5257_v2  ;;  %v10646_v1 = vcombine.low %v5254_v12, %v5258_v59  ;;  %v10652_v55 = vcombine.low %v5261_v36, %v5265_v38  ;;  %v10654_v42 = vcombine.low %v5262_v19, %v5266_v37  ;;  %v5277_v48 = vld [vmem:[#allocation18 + $0x1c0] sm:$0xff]  ;;  %v5294_v25 = vld [vmem:[#allocation18 + $0x248] sm:$0xff] }
 0xc47   :  { %5108 = vadd.xlane.f32.xlu0 %v5107_v29  ;;  %v5112_v33 = vadd.f32 %v5111_v32, %v14043_v10  ;;  %6890 = vmatpush1.bf16.msra.mxu1 %v10630_v20  ;;  %v10653_v29 = vcombine.high %v5261_v36, %v5265_v38  ;;  %v10655_v32 = vcombine.high %v5262_v19, %v5266_v37  ;;  %v5285_v8 = vld [vmem:[#allocation18 + $0x200] sm:$0xff]  ;;  %v5298_v40 = vld [vmem:[#allocation18 + $0x268] sm:$0xff] }
 0xc48   :  { %6805 = vmatprep.subr.bf16.mxu0 %v10637_v27  ;;  %6891 = vmatprep.subr.bf16.mxu1 %v10639_v21  ;;  %v10663_v35 = vcombine.high %v5270_v57, %v5274_v39  ;;  %v10662_v51 = vcombine.low %v5270_v57, %v5274_v39  ;;  %v10669_v7 = vcombine.high %v5277_v48, %v5281_v49  ;;  %v5289_v9 = vld [vmem:[#allocation18 + $0x220] sm:$0xff] }
 0xc49   :  { %5113 = vadd.xlane.f32.xlu1 %v5112_v33  ;;  %v5269_v33 = vld [vmem:[#allocation18 + $0x180] sm:$0xff]  ;;  %v10671_v41 = vcombine.high %v5278_v0, %v5282_v50  ;;  %v10668_v22 = vcombine.low %v5277_v48, %v5281_v49  ;;  %v10670_v47 = vcombine.low %v5278_v0, %v5282_v50  ;;  %v10677_v16 = vcombine.high %v5285_v8, %v5289_v9 }
 0xc4a   :  { %6806 = vmatpush1.bf16.msra.mxu0 %v10636_v3  ;;  %v10661_v45 = vcombine.high %v5269_v33, %v5273_v34  ;;  %v10660_v15 = vcombine.low %v5269_v33, %v5273_v34  ;;  %v10679_v14 = vcombine.high %v5286_v11, %v5290_v13  ;;  %v5293_v56 = vld [vmem:[#allocation18 + $0x240] sm:$0xff]  ;;  %v10676_v20 = vcombine.low %v5285_v8, %v5289_v9  ;;  %v5306_v9 = vld [vmem:[#allocation18 + $0x2a8] sm:$0xff] }
 0xc4b   :  { %6892 = vmatpush1.bf16.msra.mxu1 %v10638_v44  ;;  %6807 = vmatprep.subr.bf16.mxu0 %v10645_v52  ;;  %v5297_v18 = vld [vmem:[#allocation18 + $0x260] sm:$0xff]  ;;  %v10678_v27 = vcombine.low %v5286_v11, %v5290_v13  ;;  %v10687_v30 = vcombine.high %v5294_v25, %v5298_v40  ;;  %v10686_v12 = vcombine.low %v5294_v25, %v5298_v40 }
 0xc4c   :  { %6893 = vmatprep.subr.bf16.mxu1 %v10647_v17  ;;  %v10685_v21 = vcombine.high %v5293_v56, %v5297_v18  ;;  %v10684_v2 = vcombine.low %v5293_v56, %v5297_v18  ;;  %v5314_v18 = vld [vmem:[#allocation18 + $0x2e8] sm:$0xff] }
 0xc4e   :  { %6808 = vmatpush1.bf16.msra.mxu0 %v10644_v31 }
 0xc4f   :  { %6894 = vmatpush1.bf16.msra.mxu1 %v10646_v1  ;;  %6809 = vmatprep.subr.bf16.mxu0 %v10653_v29 }
 0xc50   :  { %6895 = vmatprep.subr.bf16.mxu1 %v10655_v32 }
 0xc52   :  { %6810 = vmatpush1.bf16.msra.mxu0 %v10652_v55 }
 0xc53   :  { %6896 = vmatpush1.bf16.msra.mxu1 %v10654_v42  ;;  %6811 = vmatprep.subr.bf16.mxu0 %v10661_v45 }
 0xc54   :  { %6897 = vmatprep.subr.bf16.mxu1 %v10663_v35 }
 0xc56   :  { %6812 = vmatpush1.bf16.msra.mxu0 %v10660_v15 }
 0xc57   :  { %6898 = vmatpush1.bf16.msra.mxu1 %v10662_v51  ;;  %6813 = vmatprep.subr.bf16.mxu0 %v10669_v7  ;;  %v5301_v51 = vld [vmem:[#allocation18 + $0x280] sm:$0xff] }
 0xc58   :  { %6899 = vmatprep.subr.bf16.mxu1 %v10671_v41  ;;  %v5305_v7 = vld [vmem:[#allocation18 + $0x2a0] sm:$0xff]  ;;  %v5302_v41 = vld [vmem:[#allocation18 + $0x288] sm:$0xff] }
 0xc59   :  { %v10693_v8 = vcombine.high %v5301_v51, %v5305_v7  ;;  %v10692_v11 = vcombine.low %v5301_v51, %v5305_v7  ;;  %v10694_v13 = vcombine.low %v5302_v41, %v5306_v9  ;;  %v5345_v51 = vld [vmem:[#allocation18 + $0x3e0] sm:$0xff]  ;;  %v5342_v7 = vld [vmem:[#allocation18 + $0x3c8] sm:$0xff] }
 0xc5a   :  { %6814 = vmatpush1.bf16.msra.mxu0 %v10668_v22  ;;  %v10695_v22 = vcombine.high %v5302_v41, %v5306_v9  ;;  %v5346_v41 = vld [vmem:[#allocation18 + $0x3e8] sm:$0xff] }
 0xc5b   :  { %6900 = vmatpush1.bf16.msra.mxu1 %v10670_v47  ;;  %6815 = vmatprep.subr.bf16.mxu0 %v10677_v16  ;;  %v5309_v47 = vld [vmem:[#allocation18 + $0x2c0] sm:$0xff] }
 0xc5c   :  { %6901 = vmatprep.subr.bf16.mxu1 %v10679_v14  ;;  %v5313_v16 = vld [vmem:[#allocation18 + $0x2e0] sm:$0xff]  ;;  %v5310_v14 = vld [vmem:[#allocation18 + $0x2c8] sm:$0xff] }
 0xc5d   :  { %v10701_v56 = vcombine.high %v5309_v47, %v5313_v16  ;;  %v10700_v25 = vcombine.low %v5309_v47, %v5313_v16  ;;  %v10702_v40 = vcombine.low %v5310_v14, %v5314_v18  ;;  %v10734_v47 = vcombine.low %v5342_v7, %v5346_v41  ;;  %v14088_v16 = vld [vmem:[#allocation18 + $0x400] sm:$0xff] }
 0xc5e   :  { %6816 = vmatpush1.bf16.msra.mxu0 %v10676_v20  ;;  %v10703_v20 = vcombine.high %v5310_v14, %v5314_v18  ;;  %v14090_v14 = vld [vmem:[#allocation18 + $0x420] sm:$0xff] }
 0xc5f   :  { %6902 = vmatpush1.bf16.msra.mxu1 %v10678_v27  ;;  %6817 = vmatprep.subr.bf16.mxu0 %v10685_v21  ;;  %v5317_v27 = vld [vmem:[#allocation18 + $0x300] sm:$0xff]  ;;  %v10741_v18 = vcombine.high %v14088_v16, %v14090_v14 }
 0xc60   :  { %6903 = vmatprep.subr.bf16.mxu1 %v10687_v30  ;;  %v5321_v21 = vld [vmem:[#allocation18 + $0x320] sm:$0xff]  ;;  %v5318_v30 = vld [vmem:[#allocation18 + $0x308] sm:$0xff] }
 0xc62   :  { %6818 = vmatpush1.bf16.msra.mxu0 %v10684_v2  ;;  %v10708_v2 = vcombine.low %v5317_v27, %v5321_v21 }
 0xc63   :  { %6904 = vmatpush1.bf16.msra.mxu1 %v10686_v12  ;;  %6819 = vmatprep.subr.bf16.mxu0 %v10693_v8  ;;  %v10709_v12 = vcombine.high %v5317_v27, %v5321_v21 }
 0xc64   :  { %6905 = vmatprep.subr.bf16.mxu1 %v10695_v22 }
 0xc66   :  { %6820 = vmatpush1.bf16.msra.mxu0 %v10692_v11 }
 0xc67   :  { %6906 = vmatpush1.bf16.msra.mxu1 %v10694_v13  ;;  %6821 = vmatprep.subr.bf16.mxu0 %v10701_v56  ;;  %v10735_v13 = vcombine.high %v5342_v7, %v5346_v41  ;;  %v14092_v56 = vld [vmem:[#allocation18 + $0x408] sm:$0xff] }
 0xc68   :  { %6907 = vmatprep.subr.bf16.mxu1 %v10703_v20 }
 0xc6a   :  { %6822 = vmatpush1.bf16.msra.mxu0 %v10700_v25  ;;  %v14096_v25 = vld [vmem:[#allocation18 + $0x428] sm:$0xff] }
 0xc6b   :  { %6908 = vmatpush1.bf16.msra.mxu1 %v10702_v40  ;;  %6823 = vmatprep.subr.bf16.mxu0 %v10709_v12  ;;  %v10740_v40 = vcombine.low %v14088_v16, %v14090_v14  ;;  %v10742_v20 = vcombine.low %v14092_v56, %v14096_v25  ;;  %v10743_v27 = vcombine.high %v14092_v56, %v14096_v25 }
 0xc6e   :  { %6824 = vmatpush1.bf16.msra.mxu0 %v10708_v2 }
 0xcd4   :  { %v5109_v59 = vpop.xlane.xlu0 %5108 }
 0xcd5   :  { %v5115_v3 = vmul.f32 0.001953125, %v5109_v59  ;;  %v5322_v59 = vld [vmem:[#allocation18 + $0x328] sm:$0xff] }
 0xcd6   :  { %v5114_v44 = vpop.xlane.xlu1 %5113 }
 0xcd7   :  { %v14049_v52 = vsub.f32 %v14003_v5, %v5115_v3  ;;  %v14052_v17 = vsub.f32 %v14008_v24, %v5115_v3  ;;  %v5116_v36 = vmul.f32 0.001953125, %v5114_v44  ;;  %v14055_v38 = vsub.f32 %v14018_v23, %v5115_v3  ;;  %v5329_v44 = vld [vmem:[#allocation18 + $0x360] sm:$0xff] }
 0xcd8   :  { %v14058_v19 = vsub.f32 %v14030_v53, %v5115_v3  ;;  %v5325_v3 = vld [vmem:[#allocation18 + $0x340] sm:$0xff] }
 0xcd9   :  { %v14061_v37 = vsub.f32 %v14013_v4, %v5116_v36  ;;  %v14064_v31 = vsub.f32 %v14023_v46, %v5116_v36  ;;  %v5125_v1 = vmul.f32 %v14049_v52, %v14049_v52  ;;  %v5126_v29 = vmul.f32 %v14052_v17, %v14052_v17 }
 0xcda   :  { %v5127_v32 = vmul.f32 %v14055_v38, %v14055_v38  ;;  %v14073_v33 = vsub.f32 %v14035_v6, %v5116_v36  ;;  %v14076_v57 = vsub.f32 %v14043_v10, %v5116_v36  ;;  %v5128_v42 = vmul.f32 %v14058_v19, %v14058_v19 }
 0xcdb   :  { %v5133_v34 = vadd.f32 %v5126_v29, %v5125_v1  ;;  %v5129_v39 = vmul.f32 %v14061_v37, %v14061_v37  ;;  %v5130_v55 = vmul.f32 %v14064_v31, %v14064_v31  ;;  %v10710_v36 = vcombine.low %v5318_v30, %v5322_v59 }
 0xcdc   :  { %v5131_v35 = vmul.f32 %v14073_v33, %v14073_v33  ;;  %v5132_v0 = vmul.f32 %v14076_v57, %v14076_v57  ;;  %v10711_v1 = vcombine.high %v5318_v30, %v5322_v59  ;;  %v10717_v29 = vcombine.high %v5325_v3, %v5329_v44 }
 0xcdd   :  { %v5134_v45 = vadd.f32 %v5133_v34, %v5127_v32  ;;  %v5138_v48 = vadd.f32 %v5130_v55, %v5129_v39  ;;  %v5326_v32 = vld [vmem:[#allocation18 + $0x348] sm:$0xff]  ;;  %v5333_v55 = vld [vmem:[#allocation18 + $0x380] sm:$0xff] }
 0xcde   :  { %v5330_v34 = vld [vmem:[#allocation18 + $0x368] sm:$0xff]  ;;  %6909 = vmatprep.subr.bf16.mxu1 %v10711_v1  ;;  %6825 = vmatprep.subr.bf16.mxu0 %v10717_v29  ;;  %v5187_v1 = vld [vmem:[#allocation16] sm:$0xf] }
 0xcdf   :  { %v5135_v49 = vadd.f32 %v5134_v45, %v5128_v42  ;;  %v5139_v50 = vadd.f32 %v5138_v48, %v5131_v35  ;;  %v10719_v39 = vcombine.high %v5326_v32, %v5330_v34  ;;  %v5337_v42 = vld [vmem:[#allocation18 + $0x3a0] sm:$0xff]  ;;  %v5334_v45 = vld [vmem:[#allocation18 + $0x388] sm:$0xff]  ;;  %v10716_v48 = vcombine.low %v5325_v3, %v5329_v44  ;;  %6910 = vmatpush1.bf16.msra.mxu1 %v10710_v36  ;;  %v5157_v44 = vld [vmem:[#allocation15] sm:$0xf] }
 0xce0   :  { %v5338_v35 = vld [vmem:[#allocation18 + $0x3a8] sm:$0xff]  ;;  %v10724_v8 = vcombine.low %v5333_v55, %v5337_v42  ;;  %v5166_v36 = vrot.slane %v5157_v44, %v13698_v60  ;;  %v5162_v29 = vrot.slane %v5157_v44, %v13704_v62 }
 0xce1   :  { %5136 = vadd.xlane.f32.xlu0 %v5135_v49  ;;  %v5140_v15 = vadd.f32 %v5139_v50, %v5132_v0  ;;  %v10718_v49 = vcombine.low %v5326_v32, %v5330_v34  ;;  %v10725_v0 = vcombine.high %v5333_v55, %v5337_v42  ;;  %6911 = vmatprep.subr.bf16.mxu1 %v10719_v39 }
 0xce2   :  { %v10727_v50 = vcombine.high %v5334_v45, %v5338_v35  ;;  %6826 = vmatpush1.bf16.msra.mxu0 %v10716_v48  ;;  %v10726_v9 = vcombine.low %v5334_v45, %v5338_v35  ;;  %v5170_v34 = vrot.slane %v5157_v44, %v13707_v63  ;;  %v5174_v42 = vrot.slane %v5157_v44, %v13701_v61 }
 0xce3   :  { %5141 = vadd.xlane.f32.xlu1 %v5140_v15  ;;  %v5341_v15 = vld [vmem:[#allocation18 + $0x3c0] sm:$0xff]  ;;  %6912 = vmatpush1.bf16.msra.mxu1 %v10718_v49  ;;  %v5196_v48 = vrot.slane %v5187_v1, %v13698_v60  ;;  %v5192_v49 = vrot.slane %v5187_v1, %v13704_v62 }
 0xce4   :  { %6827 = vmatprep.subr.bf16.mxu0 %v10725_v0  ;;  %v10733_v11 = vcombine.high %v5341_v15, %v5345_v51  ;;  %6913 = vmatprep.subr.bf16.mxu1 %v10727_v50  ;;  %v10732_v22 = vcombine.low %v5341_v15, %v5345_v51  ;;  %v5200_v50 = vrot.slane %v5187_v1, %v13707_v63 }
 0xce6   :  { %6828 = vmatpush1.bf16.msra.mxu0 %v10724_v8 }
 0xce7   :  { %6914 = vmatpush1.bf16.msra.mxu1 %v10726_v9  ;;  %6829 = vmatprep.subr.bf16.mxu0 %v10733_v11  ;;  %v5204_v11 = vrot.slane %v5187_v1, %v13701_v61 }
 0xce8   :  { %6915 = vmatprep.subr.bf16.mxu1 %v10735_v13 }
 0xcea   :  { %6830 = vmatpush1.bf16.msra.mxu0 %v10732_v22 }
 0xceb   :  { %6916 = vmatpush1.bf16.msra.mxu1 %v10734_v47  ;;  %6842 = vmatprep.subr.bf16.mxu0 %v10741_v18 }
 0xcec   :  { %6928 = vmatprep.subr.bf16.mxu1 %v10743_v27 }
 0xd6e   :  { %v5137_v21 = vpop.xlane.xlu0 %5136 }
 0xd6f   :  { %v5143_v30 = vmul.f32 0.001953125, %v5137_v21 }
 0xd70   :  { %v5142_v2 = vpop.xlane.xlu1 %5141 }
 0xd71   :  { %v5145_v12 = vadd.f32 1e-05, %v5143_v30  ;;  %v5144_v59 = vmul.f32 0.001953125, %v5142_v2  ;;  %v5357_v30 = vld [vmem:[#allocation18 + $0x440] sm:$0xff] }
 0xd72   :  { %v5361_v2 = vld [vmem:[#allocation18 + $0x460] sm:$0xff] }
 0xd73   :  { %12818 = vrsqrt.f32 %v5145_v12  ;;  %v5146_v3 = vadd.f32 1e-05, %v5144_v59  ;;  %v5358_v12 = vld [vmem:[#allocation18 + $0x448] sm:$0xff] }
 0xd75   :  { %12820 = vrsqrt.f32 %v5146_v3 }
 0xd7d   :  { %v12819_v32 = vpop.eup %12818 }
 0xd7e   :  { %v5150_v39 = vmul.f32 %v12819_v32, %v14052_v17  ;;  %v5149_v55 = vmul.f32 %v12819_v32, %v14049_v52  ;;  %v5151_v45 = vmul.f32 %v12819_v32, %v14055_v38  ;;  %v5152_v0 = vmul.f32 %v12819_v32, %v14058_v19 }
 0xd7f   :  { %v12821_v35 = vpop.eup %12820 }
 0xd80   :  { %v5154_v15 = vmul.f32 %v12821_v35, %v14064_v31  ;;  %v5180_v51 = vmul.f32 %v5166_v36, %v5150_v39  ;;  %v5153_v17 = vmul.f32 %v12821_v35, %v14061_v37  ;;  %v5179_v7 = vmul.f32 %v5162_v29, %v5149_v55  ;;  %v5366_v39 = vld [vmem:[#allocation18 + $0x488] sm:$0xff] }
 0xd81   :  { %v5156_v52 = vmul.f32 %v12821_v35, %v14076_v57  ;;  %v5155_v41 = vmul.f32 %v12821_v35, %v14073_v33  ;;  %v5181_v38 = vmul.f32 %v5170_v34, %v5151_v45  ;;  %v5182_v13 = vmul.f32 %v5174_v42, %v5152_v0  ;;  %v5362_v57 = vld [vmem:[#allocation18 + $0x468] sm:$0xff]  ;;  %v5373_v0 = vld [vmem:[#allocation18 + $0x4c0] sm:$0xff] }
 0xd82   :  { %v5184_v8 = vmul.f32 %v5166_v36, %v5154_v15  ;;  %v5183_v9 = vmul.f32 %v5162_v29, %v5153_v17  ;;  %v5210_v18 = vadd.f32 %v5196_v48, %v5180_v51  ;;  %v5209_v31 = vadd.f32 %v5192_v49, %v5179_v7  ;;  %v5365_v36 = vld [vmem:[#allocation18 + $0x480] sm:$0xff]  ;;  %v5370_v55 = vld [vmem:[#allocation18 + $0x4a8] sm:$0xff] }
 0xd83   :  { %v5186_v22 = vmul.f32 %v5174_v42, %v5156_v52  ;;  %v5185_v19 = vmul.f32 %v5170_v34, %v5155_v41  ;;  %v5211_v47 = vadd.f32 %v5200_v50, %v5181_v38  ;;  %v5212_v44 = vadd.f32 %v5204_v11, %v5182_v13  ;;  %v5369_v34 = vld [vmem:[#allocation18 + $0x4a0] sm:$0xff]  ;;  %v5374_v15 = vld [vmem:[#allocation18 + $0x4c8] sm:$0xff] }
 0xd84   :  { %v5214_v27 = vadd.f32 %v5196_v48, %v5184_v8  ;;  %v5213_v21 = vadd.f32 %v5192_v49, %v5183_v9  ;;  %v10749_v29 = vcombine.high %v5357_v30, %v5361_v2  ;;  %v10751_v32 = vcombine.high %v5358_v12, %v5362_v57  ;;  %v5378_v51 = vld [vmem:[#allocation18 + $0x4e8] sm:$0xff]  ;;  %v5389_v9 = vld [vmem:[#allocation18 + $0x540] sm:$0xff] }
 0xd85   :  { %v5216_v37 = vadd.f32 %v5204_v11, %v5186_v22  ;;  %v5215_v59 = vadd.f32 %v5200_v50, %v5185_v19  ;;  %v10748_v45 = vcombine.low %v5357_v30, %v5361_v2  ;;  %v10750_v35 = vcombine.low %v5358_v12, %v5362_v57  ;;  %v5377_v50 = vld [vmem:[#allocation18 + $0x4e0] sm:$0xff]  ;;  %v5382_v17 = vld [vmem:[#allocation18 + $0x508] sm:$0xff] }
 0xd86   :  { %v14120_v33 = vpack.c.bf16 %v5214_v27, %v5210_v18  ;;  %v14122_v3 = vpack.c.bf16 %v5213_v21, %v5209_v31  ;;  %v10757_v48 = vcombine.high %v5365_v36, %v5369_v34  ;;  %v10759_v49 = vcombine.high %v5366_v39, %v5370_v55  ;;  %v5386_v7 = vld [vmem:[#allocation18 + $0x528] sm:$0xff]  ;;  %v5393_v11 = vld [vmem:[#allocation18 + $0x560] sm:$0xff] }
 0xd87   :  { %v14124_v1 = vpack.c.bf16 %v5215_v59, %v5211_v47  ;;  %v14130_v42 = vpack.c.bf16 %v5216_v37, %v5212_v44  ;;  %v10756_v16 = vcombine.low %v5365_v36, %v5369_v34  ;;  %v10758_v14 = vcombine.low %v5366_v39, %v5370_v55  ;;  %v5390_v13 = vld [vmem:[#allocation18 + $0x548] sm:$0xff]  ;;  %v5397_v31 = vld [vmem:[#allocation18 + $0x580] sm:$0xff] }
 0xd88   :  { %6831 = vmatprep.mubr.bf16.mxu0 %v14120_v33  ;;  %6917 = vmatprep.mubr.bf16.mxu1 %v14120_v33  ;;  %v10765_v56 = vcombine.high %v5373_v0, %v5377_v50  ;;  %v10767_v25 = vcombine.high %v5374_v15, %v5378_v51  ;;  %v10764_v52 = vcombine.low %v5373_v0, %v5377_v50  ;;  %v5394_v22 = vld [vmem:[#allocation18 + $0x568] sm:$0xff]  ;;  %v5401_v21 = vld [vmem:[#allocation18 + $0x5a0] sm:$0xff] }
 0xd89   :  { %6832 = vmatmul.mubr.bf16.vlgmr.msra.gmra.mrb[56].mxu0 %v14122_v3  ;;  %6918 = vmatmul.mubr.bf16.vlgmr.msra.gmra.mrb[44].mxu1 %v14122_v3  ;;  %v10766_v41 = vcombine.low %v5374_v15, %v5378_v51  ;;  %v10775_v8 = vcombine.high %v5382_v17, %v5386_v7  ;;  %v10774_v47 = vcombine.low %v5382_v17, %v5386_v7  ;;  %v5398_v30 = vld [vmem:[#allocation18 + $0x588] sm:$0xff]  ;;  %v5405_v44 = vld [vmem:[#allocation18 + $0x5c0] sm:$0xff] }
 0xd8a   :  { %6843 = vmatpush1.bf16.msra.mxu0 %v10740_v40  ;;  %6929 = vmatpush1.bf16.msra.mxu1 %v10742_v20  ;;  %v5381_v40 = vld [vmem:[#allocation18 + $0x500] sm:$0xff]  ;;  %v10781_v18 = vcombine.high %v5389_v9, %v5393_v11  ;;  %v10783_v27 = vcombine.high %v5390_v13, %v5394_v22  ;;  %v5402_v37 = vld [vmem:[#allocation18 + $0x5a8] sm:$0xff]  ;;  %v10780_v2 = vcombine.low %v5389_v9, %v5393_v11 }
 0xd8b   :  { %6874 = vmatprep.mubr.bf16.mxu0 %v14130_v42  ;;  %6960 = vmatprep.mubr.bf16.mxu1 %v14130_v42  ;;  %v5385_v20 = vld [vmem:[#allocation18 + $0x520] sm:$0xff]  ;;  %v10782_v12 = vcombine.low %v5390_v13, %v5394_v22  ;;  %v10789_v57 = vcombine.high %v5397_v31, %v5401_v21  ;;  %v10791_v59 = vcombine.high %v5398_v30, %v5402_v37  ;;  %v5418_v0 = vld [vmem:[#allocation18 + $0x628] sm:$0xff] }
 0xd8c   :  { %6844 = vmatprep.subr.bf16.mxu0 %v10749_v29  ;;  %6930 = vmatprep.subr.bf16.mxu1 %v10751_v32  ;;  %v10773_v38 = vcombine.high %v5381_v40, %v5385_v20  ;;  %v10772_v19 = vcombine.low %v5381_v40, %v5385_v20  ;;  %v5409_v36 = vld [vmem:[#allocation18 + $0x5e0] sm:$0xff]  ;;  %v5406_v29 = vld [vmem:[#allocation18 + $0x5c8] sm:$0xff]  ;;  %v10788_v34 = vcombine.low %v5397_v31, %v5401_v21 }
 0xd8d   :  { %v5410_v32 = vld [vmem:[#allocation18 + $0x5e8] sm:$0xff]  ;;  %v10790_v39 = vcombine.low %v5398_v30, %v5402_v37  ;;  %v10797_v55 = vcombine.high %v5405_v44, %v5409_v36  ;;  %v10796_v50 = vcombine.low %v5405_v44, %v5409_v36 }
 0xd8e   :  { %6845 = vmatpush1.bf16.msra.mxu0 %v10748_v45  ;;  %6931 = vmatpush1.bf16.msra.mxu1 %v10750_v35  ;;  %v10799_v45 = vcombine.high %v5406_v29, %v5410_v32  ;;  %v5413_v35 = vld [vmem:[#allocation18 + $0x600] sm:$0xff]  ;;  %v10798_v15 = vcombine.low %v5406_v29, %v5410_v32  ;;  %v5426_v40 = vld [vmem:[#allocation18 + $0x668] sm:$0xff] }
 0xd8f   :  { %6846 = vmatprep.subr.bf16.mxu0 %v10757_v48  ;;  %6932 = vmatprep.subr.bf16.mxu1 %v10759_v49  ;;  %v5417_v48 = vld [vmem:[#allocation18 + $0x620] sm:$0xff]  ;;  %v5414_v49 = vld [vmem:[#allocation18 + $0x608] sm:$0xff] }
 0xd90   :  { %v10805_v51 = vcombine.high %v5413_v35, %v5417_v48  ;;  %v10804_v20 = vcombine.low %v5413_v35, %v5417_v48  ;;  %v10806_v17 = vcombine.low %v5414_v49, %v5418_v0  ;;  %v5434_v9 = vld [vmem:[#allocation18 + $0x6a8] sm:$0xff] }
 0xd91   :  { %v5442_v31 = vld [vmem:[#allocation18 + $0x6e8] sm:$0xff] }
 0xd92   :  { %6847 = vmatpush1.bf16.msra.mxu0 %v10756_v16  ;;  %6933 = vmatpush1.bf16.msra.mxu1 %v10758_v14  ;;  %v10807_v16 = vcombine.high %v5414_v49, %v5418_v0  ;;  %v5421_v14 = vld [vmem:[#allocation18 + $0x640] sm:$0xff]  ;;  %v5450_v44 = vld [vmem:[#allocation18 + $0x728] sm:$0xff] }
 0xd93   :  { %6848 = vmatprep.subr.bf16.mxu0 %v10765_v56  ;;  %6934 = vmatprep.subr.bf16.mxu1 %v10767_v25  ;;  %v5425_v56 = vld [vmem:[#allocation18 + $0x660] sm:$0xff]  ;;  %v5422_v25 = vld [vmem:[#allocation18 + $0x648] sm:$0xff] }
 0xd94   :  { %v10813_v7 = vcombine.high %v5421_v14, %v5425_v56  ;;  %v10812_v11 = vcombine.low %v5421_v14, %v5425_v56  ;;  %v10814_v13 = vcombine.low %v5422_v25, %v5426_v40  ;;  %v5458_v35 = vld [vmem:[#allocation18 + $0x768] sm:$0xff] }
 0xd95   :  { %v5466_v14 = vld [vmem:[#allocation18 + $0x7a8] sm:$0xff] }
 0xd96   :  { %6849 = vmatpush1.bf16.msra.mxu0 %v10764_v52  ;;  %6935 = vmatpush1.bf16.msra.mxu1 %v10766_v41  ;;  %v10815_v52 = vcombine.high %v5422_v25, %v5426_v40  ;;  %v5429_v41 = vld [vmem:[#allocation18 + $0x680] sm:$0xff] }
 0xd97   :  { %6850 = vmatprep.subr.bf16.mxu0 %v10773_v38  ;;  %6936 = vmatprep.subr.bf16.mxu1 %v10775_v8  ;;  %v5433_v38 = vld [vmem:[#allocation18 + $0x6a0] sm:$0xff]  ;;  %v5430_v8 = vld [vmem:[#allocation18 + $0x688] sm:$0xff] }
 0xd98   :  { %v10821_v22 = vcombine.high %v5429_v41, %v5433_v38  ;;  %v10820_v21 = vcombine.low %v5429_v41, %v5433_v38  ;;  %v10822_v30 = vcombine.low %v5430_v8, %v5434_v9  ;;  %v5474_v41 = vld [vmem:[#allocation18 + $0x7e8] sm:$0xff] }
 0xd9a   :  { %6851 = vmatpush1.bf16.msra.mxu0 %v10772_v19  ;;  %6937 = vmatpush1.bf16.msra.mxu1 %v10774_v47  ;;  %v10823_v19 = vcombine.high %v5430_v8, %v5434_v9  ;;  %v5437_v47 = vld [vmem:[#allocation18 + $0x6c0] sm:$0xff] }
 0xd9b   :  { %6852 = vmatprep.subr.bf16.mxu0 %v10781_v18  ;;  %6938 = vmatprep.subr.bf16.mxu1 %v10783_v27  ;;  %v5441_v18 = vld [vmem:[#allocation18 + $0x6e0] sm:$0xff]  ;;  %v5438_v27 = vld [vmem:[#allocation18 + $0x6c8] sm:$0xff] }
 0xd9c   :  { %v10829_v37 = vcombine.high %v5437_v47, %v5441_v18  ;;  %v10828_v36 = vcombine.low %v5437_v47, %v5441_v18  ;;  %v10830_v29 = vcombine.low %v5438_v27, %v5442_v31  ;;  %v5228_v47 = vld [vmem:[#allocation18 + $0x38] sm:$0xff] }
 0xd9e   :  { %6853 = vmatpush1.bf16.msra.mxu0 %v10780_v2  ;;  %6939 = vmatpush1.bf16.msra.mxu1 %v10782_v12  ;;  %v10831_v2 = vcombine.high %v5438_v27, %v5442_v31  ;;  %v5445_v12 = vld [vmem:[#allocation18 + $0x700] sm:$0xff] }
 0xd9f   :  { %6854 = vmatprep.subr.bf16.mxu0 %v10789_v57  ;;  %6940 = vmatprep.subr.bf16.mxu1 %v10791_v59  ;;  %v5449_v57 = vld [vmem:[#allocation18 + $0x720] sm:$0xff]  ;;  %v5446_v59 = vld [vmem:[#allocation18 + $0x708] sm:$0xff] }
 0xda0   :  { %v10837_v32 = vcombine.high %v5445_v12, %v5449_v57  ;;  %v10836_v48 = vcombine.low %v5445_v12, %v5449_v57  ;;  %v10838_v49 = vcombine.low %v5446_v59, %v5450_v44  ;;  %v5236_v12 = vld [vmem:[#allocation18 + $0x78] sm:$0xff] }
 0xda2   :  { %6855 = vmatpush1.bf16.msra.mxu0 %v10788_v34  ;;  %6941 = vmatpush1.bf16.msra.mxu1 %v10790_v39  ;;  %v10839_v34 = vcombine.high %v5446_v59, %v5450_v44  ;;  %v5453_v39 = vld [vmem:[#allocation18 + $0x740] sm:$0xff] }
 0xda3   :  { %6856 = vmatprep.subr.bf16.mxu0 %v10797_v55  ;;  %6942 = vmatprep.subr.bf16.mxu1 %v10799_v45  ;;  %v5457_v55 = vld [vmem:[#allocation18 + $0x760] sm:$0xff]  ;;  %v5454_v45 = vld [vmem:[#allocation18 + $0x748] sm:$0xff] }
 0xda4   :  { %v10845_v0 = vcombine.high %v5453_v39, %v5457_v55  ;;  %v10844_v56 = vcombine.low %v5453_v39, %v5457_v55  ;;  %v10846_v25 = vcombine.low %v5454_v45, %v5458_v35  ;;  %v5244_v39 = vld [vmem:[#allocation18 + $0xb8] sm:$0xff] }
 0xda6   :  { %6857 = vmatpush1.bf16.msra.mxu0 %v10796_v50  ;;  %6943 = vmatpush1.bf16.msra.mxu1 %v10798_v15  ;;  %v10847_v50 = vcombine.high %v5454_v45, %v5458_v35  ;;  %v5461_v15 = vld [vmem:[#allocation18 + $0x780] sm:$0xff] }
 0xda7   :  { %6858 = vmatprep.subr.bf16.mxu0 %v10805_v51  ;;  %6944 = vmatprep.subr.bf16.mxu1 %v10807_v16  ;;  %v5465_v51 = vld [vmem:[#allocation18 + $0x7a0] sm:$0xff]  ;;  %v5462_v16 = vld [vmem:[#allocation18 + $0x788] sm:$0xff] }
 0xda8   :  { %v10853_v40 = vcombine.high %v5461_v15, %v5465_v51  ;;  %v10852_v38 = vcombine.low %v5461_v15, %v5465_v51  ;;  %v10854_v8 = vcombine.low %v5462_v16, %v5466_v14  ;;  %v5252_v15 = vld [vmem:[#allocation18 + $0xf8] sm:$0xff] }
 0xdaa   :  { %6859 = vmatpush1.bf16.msra.mxu0 %v10804_v20  ;;  %6945 = vmatpush1.bf16.msra.mxu1 %v10806_v17  ;;  %v10855_v20 = vcombine.high %v5462_v16, %v5466_v14  ;;  %v5469_v17 = vld [vmem:[#allocation18 + $0x7c0] sm:$0xff] }
 0xdab   :  { %6860 = vmatprep.subr.bf16.mxu0 %v10813_v7  ;;  %6946 = vmatprep.subr.bf16.mxu1 %v10815_v52  ;;  %v5473_v7 = vld [vmem:[#allocation18 + $0x7e0] sm:$0xff]  ;;  %v5470_v52 = vld [vmem:[#allocation18 + $0x7c8] sm:$0xff] }
 0xdac   :  { %v10861_v9 = vcombine.high %v5469_v17, %v5473_v7  ;;  %v10860_v18 = vcombine.low %v5469_v17, %v5473_v7  ;;  %v10862_v27 = vcombine.low %v5470_v52, %v5474_v41 }
 0xdae   :  { %6861 = vmatpush1.bf16.msra.mxu0 %v10812_v11  ;;  %6947 = vmatpush1.bf16.msra.mxu1 %v10814_v13  ;;  %v10863_v11 = vcombine.high %v5470_v52, %v5474_v41  ;;  %v5223_v13 = vld [vmem:[#allocation18 + $0x10] sm:$0xff] }
 0xdaf   :  { %6862 = vmatprep.subr.bf16.mxu0 %v10821_v22  ;;  %6948 = vmatprep.subr.bf16.mxu1 %v10823_v19  ;;  %v5227_v22 = vld [vmem:[#allocation18 + $0x30] sm:$0xff]  ;;  %v5224_v19 = vld [vmem:[#allocation18 + $0x18] sm:$0xff] }
 0xdb0   :  { %v10617_v31 = vcombine.high %v5223_v13, %v5227_v22  ;;  %v10616_v57 = vcombine.low %v5223_v13, %v5227_v22  ;;  %v10618_v59 = vcombine.low %v5224_v19, %v5228_v47 }
 0xdb2   :  { %6863 = vmatpush1.bf16.msra.mxu0 %v10820_v21  ;;  %6949 = vmatpush1.bf16.msra.mxu1 %v10822_v30  ;;  %v10619_v21 = vcombine.high %v5224_v19, %v5228_v47  ;;  %v5231_v30 = vld [vmem:[#allocation18 + $0x50] sm:$0xff] }
 0xdb3   :  { %6864 = vmatprep.subr.bf16.mxu0 %v10829_v37  ;;  %6950 = vmatprep.subr.bf16.mxu1 %v10831_v2  ;;  %v5235_v37 = vld [vmem:[#allocation18 + $0x70] sm:$0xff]  ;;  %v5232_v2 = vld [vmem:[#allocation18 + $0x58] sm:$0xff] }
 0xdb4   :  { %v10625_v44 = vcombine.high %v5231_v30, %v5235_v37  ;;  %v10624_v55 = vcombine.low %v5231_v30, %v5235_v37  ;;  %v10626_v45 = vcombine.low %v5232_v2, %v5236_v12 }
 0xdb6   :  { %6865 = vmatpush1.bf16.msra.mxu0 %v10828_v36  ;;  %6951 = vmatpush1.bf16.msra.mxu1 %v10830_v29  ;;  %v10627_v36 = vcombine.high %v5232_v2, %v5236_v12  ;;  %v5239_v29 = vld [vmem:[#allocation18 + $0x90] sm:$0xff] }
 0xdb7   :  { %6866 = vmatprep.subr.bf16.mxu0 %v10837_v32  ;;  %6952 = vmatprep.subr.bf16.mxu1 %v10839_v34  ;;  %v5243_v32 = vld [vmem:[#allocation18 + $0xb0] sm:$0xff]  ;;  %v5240_v34 = vld [vmem:[#allocation18 + $0x98] sm:$0xff] }
 0xdb8   :  { %v10633_v35 = vcombine.high %v5239_v29, %v5243_v32  ;;  %v10632_v51 = vcombine.low %v5239_v29, %v5243_v32  ;;  %v10634_v16 = vcombine.low %v5240_v34, %v5244_v39 }
 0xdba   :  { %6867 = vmatpush1.bf16.msra.mxu0 %v10836_v48  ;;  %6953 = vmatpush1.bf16.msra.mxu1 %v10838_v49  ;;  %v10635_v48 = vcombine.high %v5240_v34, %v5244_v39  ;;  %v5247_v49 = vld [vmem:[#allocation18 + $0xd0] sm:$0xff] }
 0xdbb   :  { %6868 = vmatprep.subr.bf16.mxu0 %v10845_v0  ;;  %6954 = vmatprep.subr.bf16.mxu1 %v10847_v50  ;;  %v5251_v0 = vld [vmem:[#allocation18 + $0xf0] sm:$0xff]  ;;  %v5248_v50 = vld [vmem:[#allocation18 + $0xd8] sm:$0xff] }
 0xdbc   :  { %v10641_v14 = vcombine.high %v5247_v49, %v5251_v0  ;;  %v10640_v17 = vcombine.low %v5247_v49, %v5251_v0  ;;  %v10642_v7 = vcombine.low %v5248_v50, %v5252_v15 }
 0xdbe   :  { %6869 = vmatpush1.bf16.msra.mxu0 %v10844_v56  ;;  %6955 = vmatpush1.bf16.msra.mxu1 %v10846_v25  ;;  %v10643_v56 = vcombine.high %v5248_v50, %v5252_v15  ;;  %v5255_v25 = vld [vmem:[#allocation18 + $0x110] sm:$0xff] }
 0xdbf   :  { %6870 = vmatprep.subr.bf16.mxu0 %v10853_v40  ;;  %6956 = vmatprep.subr.bf16.mxu1 %v10855_v20  ;;  %v5259_v40 = vld [vmem:[#allocation18 + $0x130] sm:$0xff]  ;;  %v5260_v20 = vld [vmem:[#allocation18 + $0x138] sm:$0xff] }
 0xdc0   :  { %v10649_v52 = vcombine.high %v5255_v25, %v5259_v40  ;;  %v10648_v13 = vcombine.low %v5255_v25, %v5259_v40 }
 0xdc2   :  { %6871 = vmatpush1.bf16.msra.mxu0 %v10852_v38  ;;  %6957 = vmatpush1.bf16.msra.mxu1 %v10854_v8  ;;  %v5263_v38 = vld [vmem:[#allocation18 + $0x150] sm:$0xff] }
 0xdc3   :  { %6872 = vmatprep.subr.bf16.mxu0 %v10861_v9  ;;  %6958 = vmatprep.subr.bf16.mxu1 %v10863_v11  ;;  %v5267_v8 = vld [vmem:[#allocation18 + $0x170] sm:$0xff]  ;;  %v5264_v9 = vld [vmem:[#allocation18 + $0x158] sm:$0xff] }
 0xdc4   :  { %v5268_v11 = vld [vmem:[#allocation18 + $0x178] sm:$0xff]  ;;  %v10657_v19 = vcombine.high %v5263_v38, %v5267_v8  ;;  %v10656_v30 = vcombine.low %v5263_v38, %v5267_v8 }
 0xdc5   :  { %v10659_v47 = vcombine.high %v5264_v9, %v5268_v11  ;;  %v10658_v37 = vcombine.low %v5264_v9, %v5268_v11 }
 0xdc6   :  { %6873 = vmatpush1.bf16.msra.mxu0 %v10860_v18  ;;  %6959 = vmatpush1.bf16.msra.mxu1 %v10862_v27  ;;  %v5271_v18 = vld [vmem:[#allocation18 + $0x190] sm:$0xff] }
 0xdc7   :  { %6971 = vmatprep.subr.bf16.mxu0 %v10617_v31  ;;  %7057 = vmatprep.subr.bf16.mxu1 %v10619_v21  ;;  %v5275_v27 = vld [vmem:[#allocation18 + $0x1b0] sm:$0xff]  ;;  %v5272_v31 = vld [vmem:[#allocation18 + $0x198] sm:$0xff] }
 0xdc8   :  { %v5276_v21 = vld [vmem:[#allocation18 + $0x1b8] sm:$0xff]  ;;  %v10665_v2 = vcombine.high %v5271_v18, %v5275_v27  ;;  %v10664_v29 = vcombine.low %v5271_v18, %v5275_v27 }
 0xdc9   :  { %6875 = vmatmul.mubr.bf16.vlgmr.msra.gmra.mrb[56].mxu0 %v14124_v1  ;;  %6961 = vmatmul.mubr.bf16.vlgmr.msra.gmra.mrb[44].mxu1 %v14124_v1  ;;  %v10667_v12 = vcombine.high %v5272_v31, %v5276_v21  ;;  %v10666_v32 = vcombine.low %v5272_v31, %v5276_v21 }
 0xdca   :  { %6972 = vmatpush1.bf16.msra.mxu0 %v10616_v57  ;;  %7003 = vmatprep.mubr.bf16.mxu0 %v14120_v33  ;;  %v5279_v57 = vld [vmem:[#allocation18 + $0x1d0] sm:$0xff] }
 0xdcb   :  { %7058 = vmatpush1.bf16.msra.mxu1 %v10618_v59  ;;  %7089 = vmatprep.mubr.bf16.mxu1 %v14120_v33  ;;  %v5256_v33 = vld [vmem:[#allocation18 + $0x118] sm:$0xff]  ;;  %v5283_v59 = vld [vmem:[#allocation18 + $0x1f0] sm:$0xff] }
 0xdcc   :  { %6973 = vmatprep.subr.bf16.mxu0 %v10625_v44  ;;  %7059 = vmatprep.subr.bf16.mxu1 %v10627_v36  ;;  %v10651_v41 = vcombine.high %v5256_v33, %v5260_v20  ;;  %v10650_v22 = vcombine.low %v5256_v33, %v5260_v20  ;;  %v5280_v44 = vld [vmem:[#allocation18 + $0x1d8] sm:$0xff]  ;;  %v10673_v34 = vcombine.high %v5279_v57, %v5283_v59 }
 0xdcd   :  { %v5284_v36 = vld [vmem:[#allocation18 + $0x1f8] sm:$0xff]  ;;  %v10672_v49 = vcombine.low %v5279_v57, %v5283_v59 }
 0xdce   :  { %6974 = vmatpush1.bf16.msra.mxu0 %v10624_v55  ;;  %v10675_v39 = vcombine.high %v5280_v44, %v5284_v36  ;;  %v5287_v55 = vld [vmem:[#allocation18 + $0x210] sm:$0xff]  ;;  %v10674_v0 = vcombine.low %v5280_v44, %v5284_v36 }
 0xdcf   :  { %7060 = vmatpush1.bf16.msra.mxu1 %v10626_v45  ;;  %6975 = vmatprep.subr.bf16.mxu0 %v10633_v35  ;;  %v5291_v45 = vld [vmem:[#allocation18 + $0x230] sm:$0xff]  ;;  %v5288_v35 = vld [vmem:[#allocation18 + $0x218] sm:$0xff] }
 0xdd0   :  { %7061 = vmatprep.subr.bf16.mxu1 %v10635_v48  ;;  %v5292_v48 = vld [vmem:[#allocation18 + $0x238] sm:$0xff]  ;;  %v10681_v50 = vcombine.high %v5287_v55, %v5291_v45  ;;  %v10680_v25 = vcombine.low %v5287_v55, %v5291_v45 }
 0xdd1   :  { %v10683_v15 = vcombine.high %v5288_v35, %v5292_v48  ;;  %v10682_v40 = vcombine.low %v5288_v35, %v5292_v48 }
 0xdd2   :  { %6976 = vmatpush1.bf16.msra.mxu0 %v10632_v51  ;;  %v5295_v51 = vld [vmem:[#allocation18 + $0x250] sm:$0xff] }
 0xdd3   :  { %7062 = vmatpush1.bf16.msra.mxu1 %v10634_v16  ;;  %6977 = vmatprep.subr.bf16.mxu0 %v10641_v14  ;;  %v5299_v16 = vld [vmem:[#allocation18 + $0x270] sm:$0xff]  ;;  %v5296_v14 = vld [vmem:[#allocation18 + $0x258] sm:$0xff] }
 0xdd4   :  { %7063 = vmatprep.subr.bf16.mxu1 %v10643_v56  ;;  %v5300_v56 = vld [vmem:[#allocation18 + $0x278] sm:$0xff]  ;;  %v10689_v33 = vcombine.high %v5295_v51, %v5299_v16  ;;  %v10688_v38 = vcombine.low %v5295_v51, %v5299_v16 }
 0xdd5   :  { %v10691_v20 = vcombine.high %v5296_v14, %v5300_v56  ;;  %v10690_v8 = vcombine.low %v5296_v14, %v5300_v56 }
 0xdd6   :  { %6978 = vmatpush1.bf16.msra.mxu0 %v10640_v17  ;;  %v5303_v17 = vld [vmem:[#allocation18 + $0x290] sm:$0xff] }
 0xdd7   :  { %7064 = vmatpush1.bf16.msra.mxu1 %v10642_v7  ;;  %6979 = vmatprep.subr.bf16.mxu0 %v10649_v52  ;;  %v5307_v7 = vld [vmem:[#allocation18 + $0x2b0] sm:$0xff]  ;;  %v5304_v52 = vld [vmem:[#allocation18 + $0x298] sm:$0xff] }
 0xdd8   :  { %7065 = vmatprep.subr.bf16.mxu1 %v10651_v41  ;;  %v5308_v41 = vld [vmem:[#allocation18 + $0x2b8] sm:$0xff]  ;;  %v10697_v9 = vcombine.high %v5303_v17, %v5307_v7  ;;  %v10696_v18 = vcombine.low %v5303_v17, %v5307_v7 }
 0xdd9   :  { %v10699_v11 = vcombine.high %v5304_v52, %v5308_v41  ;;  %v10698_v27 = vcombine.low %v5304_v52, %v5308_v41 }
 0xdda   :  { %6980 = vmatpush1.bf16.msra.mxu0 %v10648_v13  ;;  %v5311_v13 = vld [vmem:[#allocation18 + $0x2d0] sm:$0xff] }
 0xddb   :  { %7066 = vmatpush1.bf16.msra.mxu1 %v10650_v22  ;;  %6981 = vmatprep.subr.bf16.mxu0 %v10657_v19  ;;  %v5315_v22 = vld [vmem:[#allocation18 + $0x2f0] sm:$0xff]  ;;  %v5312_v19 = vld [vmem:[#allocation18 + $0x2d8] sm:$0xff] }
 0xddc   :  { %7067 = vmatprep.subr.bf16.mxu1 %v10659_v47  ;;  %v5316_v47 = vld [vmem:[#allocation18 + $0x2f8] sm:$0xff]  ;;  %v10705_v31 = vcombine.high %v5311_v13, %v5315_v22  ;;  %v10704_v57 = vcombine.low %v5311_v13, %v5315_v22 }
 0xddd   :  { %v10707_v21 = vcombine.high %v5312_v19, %v5316_v47  ;;  %v10706_v59 = vcombine.low %v5312_v19, %v5316_v47 }
 0xdde   :  { %6982 = vmatpush1.bf16.msra.mxu0 %v10656_v30  ;;  %v5319_v30 = vld [vmem:[#allocation18 + $0x310] sm:$0xff] }
 0xddf   :  { %7068 = vmatpush1.bf16.msra.mxu1 %v10658_v37  ;;  %6983 = vmatprep.subr.bf16.mxu0 %v10665_v2  ;;  %v5323_v37 = vld [vmem:[#allocation18 + $0x330] sm:$0xff]  ;;  %v5320_v2 = vld [vmem:[#allocation18 + $0x318] sm:$0xff] }
 0xde0   :  { %7069 = vmatprep.subr.bf16.mxu1 %v10667_v12  ;;  %v5324_v12 = vld [vmem:[#allocation18 + $0x338] sm:$0xff]  ;;  %v10713_v44 = vcombine.high %v5319_v30, %v5323_v37  ;;  %v10712_v55 = vcombine.low %v5319_v30, %v5323_v37 }
 0xde1   :  { %v10715_v36 = vcombine.high %v5320_v2, %v5324_v12  ;;  %v10714_v45 = vcombine.low %v5320_v2, %v5324_v12  ;;  %v5364_v30 = vld [vmem:[#allocation18 + $0x478] sm:$0xff]  ;;  %v5367_v12 = vld [vmem:[#allocation18 + $0x490] sm:$0xff] }
 0xde2   :  { %6984 = vmatpush1.bf16.msra.mxu0 %v10664_v29  ;;  %v5327_v29 = vld [vmem:[#allocation18 + $0x350] sm:$0xff] }
 0xde3   :  { %7070 = vmatpush1.bf16.msra.mxu1 %v10666_v32  ;;  %6985 = vmatprep.subr.bf16.mxu0 %v10673_v34  ;;  %v5331_v32 = vld [vmem:[#allocation18 + $0x370] sm:$0xff]  ;;  %v5328_v34 = vld [vmem:[#allocation18 + $0x358] sm:$0xff] }
 0xde4   :  { %7071 = vmatprep.subr.bf16.mxu1 %v10675_v39  ;;  %v5332_v39 = vld [vmem:[#allocation18 + $0x378] sm:$0xff]  ;;  %v10721_v35 = vcombine.high %v5327_v29, %v5331_v32  ;;  %v10720_v51 = vcombine.low %v5327_v29, %v5331_v32 }
 0xde5   :  { %v10723_v48 = vcombine.high %v5328_v34, %v5332_v39  ;;  %v10722_v16 = vcombine.low %v5328_v34, %v5332_v39 }
 0xde6   :  { %6986 = vmatpush1.bf16.msra.mxu0 %v10672_v49  ;;  %v5335_v49 = vld [vmem:[#allocation18 + $0x390] sm:$0xff] }
 0xde7   :  { %7072 = vmatpush1.bf16.msra.mxu1 %v10674_v0  ;;  %6987 = vmatprep.subr.bf16.mxu0 %v10681_v50  ;;  %v5339_v0 = vld [vmem:[#allocation18 + $0x3b0] sm:$0xff]  ;;  %v5336_v50 = vld [vmem:[#allocation18 + $0x398] sm:$0xff] }
 0xde8   :  { %7073 = vmatprep.subr.bf16.mxu1 %v10683_v15  ;;  %v5340_v15 = vld [vmem:[#allocation18 + $0x3b8] sm:$0xff]  ;;  %v10729_v14 = vcombine.high %v5335_v49, %v5339_v0  ;;  %v10728_v17 = vcombine.low %v5335_v49, %v5339_v0 }
 0xde9   :  { %v10731_v56 = vcombine.high %v5336_v50, %v5340_v15  ;;  %v10730_v7 = vcombine.low %v5336_v50, %v5340_v15  ;;  %v5383_v15 = vld [vmem:[#allocation18 + $0x510] sm:$0xff] }
 0xdea   :  { %6988 = vmatpush1.bf16.msra.mxu0 %v10680_v25  ;;  %v5343_v25 = vld [vmem:[#allocation18 + $0x3d0] sm:$0xff] }
 0xdeb   :  { %7074 = vmatpush1.bf16.msra.mxu1 %v10682_v40  ;;  %6989 = vmatprep.subr.bf16.mxu0 %v10689_v33  ;;  %v5347_v40 = vld [vmem:[#allocation18 + $0x3f0] sm:$0xff]  ;;  %v5344_v33 = vld [vmem:[#allocation18 + $0x3d8] sm:$0xff] }
 0xdec   :  { %7075 = vmatprep.subr.bf16.mxu1 %v10691_v20  ;;  %v5348_v20 = vld [vmem:[#allocation18 + $0x3f8] sm:$0xff]  ;;  %v10737_v52 = vcombine.high %v5343_v25, %v5347_v40  ;;  %v10736_v13 = vcombine.low %v5343_v25, %v5347_v40 }
 0xded   :  { %v10739_v41 = vcombine.high %v5344_v33, %v5348_v20  ;;  %v10738_v22 = vcombine.low %v5344_v33, %v5348_v20  ;;  %v5391_v33 = vld [vmem:[#allocation18 + $0x550] sm:$0xff] }
 0xdee   :  { %6990 = vmatpush1.bf16.msra.mxu0 %v10688_v38  ;;  %v5351_v38 = vld [vmem:[#allocation18 + $0x410] sm:$0xff] }
 0xdef   :  { %7076 = vmatpush1.bf16.msra.mxu1 %v10690_v8  ;;  %6991 = vmatprep.subr.bf16.mxu0 %v10697_v9  ;;  %v5355_v8 = vld [vmem:[#allocation18 + $0x430] sm:$0xff]  ;;  %v5352_v9 = vld [vmem:[#allocation18 + $0x418] sm:$0xff] }
 0xdf0   :  { %7077 = vmatprep.subr.bf16.mxu1 %v10699_v11  ;;  %v5356_v11 = vld [vmem:[#allocation18 + $0x438] sm:$0xff]  ;;  %v10745_v19 = vcombine.high %v5351_v38, %v5355_v8  ;;  %v5395_v20 = vld [vmem:[#allocation18 + $0x570] sm:$0xff] }
 0xdf1   :  { %v10747_v47 = vcombine.high %v5352_v9, %v5356_v11  ;;  %v10746_v37 = vcombine.low %v5352_v9, %v5356_v11  ;;  %v5399_v9 = vld [vmem:[#allocation18 + $0x590] sm:$0xff] }
 0xdf2   :  { %6992 = vmatpush1.bf16.msra.mxu0 %v10696_v18  ;;  %v5359_v18 = vld [vmem:[#allocation18 + $0x450] sm:$0xff] }
 0xdf3   :  { %7078 = vmatpush1.bf16.msra.mxu1 %v10698_v27  ;;  %6993 = vmatprep.subr.bf16.mxu0 %v10705_v31  ;;  %v5363_v27 = vld [vmem:[#allocation18 + $0x470] sm:$0xff]  ;;  %v10744_v31 = vcombine.low %v5351_v38, %v5355_v8  ;;  %v10785_v38 = vcombine.high %v5391_v33, %v5395_v20 }
 0xdf4   :  { %7079 = vmatprep.subr.bf16.mxu1 %v10707_v21  ;;  %v5360_v21 = vld [vmem:[#allocation18 + $0x458] sm:$0xff]  ;;  %v10753_v2 = vcombine.high %v5359_v18, %v5363_v27  ;;  %v10752_v29 = vcombine.low %v5359_v18, %v5363_v27  ;;  %v5403_v11 = vld [vmem:[#allocation18 + $0x5b0] sm:$0xff] }
 0xdf5   :  { %v10754_v32 = vcombine.low %v5360_v21, %v5364_v30  ;;  %v10793_v18 = vcombine.high %v5399_v9, %v5403_v11 }
 0xdf6   :  { %6994 = vmatpush1.bf16.msra.mxu0 %v10704_v57  ;;  %v5371_v57 = vld [vmem:[#allocation18 + $0x4b0] sm:$0xff] }
 0xdf7   :  { %7080 = vmatpush1.bf16.msra.mxu1 %v10706_v59  ;;  %6995 = vmatprep.subr.bf16.mxu0 %v10713_v44  ;;  %v10755_v59 = vcombine.high %v5360_v21, %v5364_v30  ;;  %v5368_v44 = vld [vmem:[#allocation18 + $0x498] sm:$0xff]  ;;  %v10761_v34 = vcombine.high %v5367_v12, %v5371_v57  ;;  %v10760_v49 = vcombine.low %v5367_v12, %v5371_v57  ;;  %v5411_v21 = vld [vmem:[#allocation18 + $0x5f0] sm:$0xff] }
 0xdf8   :  { %7081 = vmatprep.subr.bf16.mxu1 %v10715_v36  ;;  %v5372_v36 = vld [vmem:[#allocation18 + $0x4b8] sm:$0xff] }
 0xdf9   :  { %v10763_v39 = vcombine.high %v5368_v44, %v5372_v36  ;;  %v5408_v30 = vld [vmem:[#allocation18 + $0x5d8] sm:$0xff] }
 0xdfa   :  { %6996 = vmatpush1.bf16.msra.mxu0 %v10712_v55  ;;  %v5375_v55 = vld [vmem:[#allocation18 + $0x4d0] sm:$0xff] }
 0xdfb   :  { %7082 = vmatpush1.bf16.msra.mxu1 %v10714_v45  ;;  %6997 = vmatprep.subr.bf16.mxu0 %v10721_v35  ;;  %v5379_v45 = vld [vmem:[#allocation18 + $0x4f0] sm:$0xff]  ;;  %v5376_v35 = vld [vmem:[#allocation18 + $0x4d8] sm:$0xff] }
 0xdfc   :  { %7083 = vmatprep.subr.bf16.mxu1 %v10723_v48  ;;  %v5380_v48 = vld [vmem:[#allocation18 + $0x4f8] sm:$0xff]  ;;  %v10769_v0 = vcombine.high %v5375_v55, %v5379_v45 }
 0xdfd   :  { %v10771_v50 = vcombine.high %v5376_v35, %v5380_v48 }
 0xdfe   :  { %6998 = vmatpush1.bf16.msra.mxu0 %v10720_v51  ;;  %v5387_v51 = vld [vmem:[#allocation18 + $0x530] sm:$0xff] }
 0xdff   :  { %7084 = vmatpush1.bf16.msra.mxu1 %v10722_v16  ;;  %6999 = vmatprep.subr.bf16.mxu0 %v10729_v14  ;;  %v5384_v16 = vld [vmem:[#allocation18 + $0x518] sm:$0xff]  ;;  %v10777_v25 = vcombine.high %v5383_v15, %v5387_v51 }
 0xe00   :  { %7085 = vmatprep.subr.bf16.mxu1 %v10731_v56  ;;  %v5388_v14 = vld [vmem:[#allocation18 + $0x538] sm:$0xff]  ;;  %v10770_v56 = vcombine.low %v5376_v35, %v5380_v48  ;;  %v5423_v35 = vld [vmem:[#allocation18 + $0x650] sm:$0xff] }
 0xe01   :  { %v10779_v40 = vcombine.high %v5384_v16, %v5388_v14  ;;  %v5427_v48 = vld [vmem:[#allocation18 + $0x670] sm:$0xff] }
 0xe02   :  { %7000 = vmatpush1.bf16.msra.mxu0 %v10728_v17  ;;  %v5392_v17 = vld [vmem:[#allocation18 + $0x558] sm:$0xff] }
 0xe03   :  { %7086 = vmatpush1.bf16.msra.mxu1 %v10730_v7  ;;  %7001 = vmatprep.subr.bf16.mxu0 %v10737_v52  ;;  %v5396_v7 = vld [vmem:[#allocation18 + $0x578] sm:$0xff]  ;;  %v10776_v52 = vcombine.low %v5383_v15, %v5387_v51  ;;  %v10817_v15 = vcombine.high %v5423_v35, %v5427_v48 }
 0xe04   :  { %7087 = vmatprep.subr.bf16.mxu1 %v10739_v41  ;;  %v10778_v41 = vcombine.low %v5384_v16, %v5388_v14  ;;  %v10787_v8 = vcombine.high %v5392_v17, %v5396_v7  ;;  %v5431_v16 = vld [vmem:[#allocation18 + $0x690] sm:$0xff] }
 0xe05   :  { %v5435_v14 = vld [vmem:[#allocation18 + $0x6b0] sm:$0xff] }
 0xe06   :  { %7002 = vmatpush1.bf16.msra.mxu0 %v10736_v13  ;;  %v5400_v13 = vld [vmem:[#allocation18 + $0x598] sm:$0xff] }
 0xe07   :  { %7088 = vmatpush1.bf16.msra.mxu1 %v10738_v22  ;;  %7014 = vmatprep.subr.bf16.mxu0 %v10745_v19  ;;  %v5404_v22 = vld [vmem:[#allocation18 + $0x5b8] sm:$0xff]  ;;  %v10784_v19 = vcombine.low %v5391_v33, %v5395_v20  ;;  %v10825_v33 = vcombine.high %v5431_v16, %v5435_v14 }
 0xe08   :  { %7100 = vmatprep.subr.bf16.mxu1 %v10747_v47  ;;  %v10786_v47 = vcombine.low %v5392_v17, %v5396_v7  ;;  %v10795_v27 = vcombine.high %v5400_v13, %v5404_v22  ;;  %v10794_v12 = vcombine.low %v5400_v13, %v5404_v22  ;;  %v5439_v17 = vld [vmem:[#allocation18 + $0x6d0] sm:$0xff] }
 0xe09   :  { %7004 = vmatmul.mubr.bf16.vlgmr.msra.gmra.mrb[60].mxu0 %v14122_v3  ;;  %v5443_v7 = vld [vmem:[#allocation18 + $0x6f0] sm:$0xff] }
 0xe0a   :  { %7090 = vmatmul.mubr.bf16.vlgmr.msra.gmra.mrb[48].mxu1 %v14122_v3  ;;  %7015 = vmatpush1.bf16.msra.mxu0 %v10744_v31  ;;  %v10762_v3 = vcombine.low %v5368_v44, %v5372_v36  ;;  %v5407_v31 = vld [vmem:[#allocation18 + $0x5d0] sm:$0xff] }
 0xe0b   :  { %7046 = vmatprep.mubr.bf16.mxu0 %v14130_v42  ;;  %7101 = vmatpush1.bf16.msra.mxu1 %v10746_v37  ;;  %v5412_v37 = vld [vmem:[#allocation18 + $0x5f8] sm:$0xff]  ;;  %v10801_v57 = vcombine.high %v5407_v31, %v5411_v21  ;;  %v5415_v44 = vld [vmem:[#allocation18 + $0x610] sm:$0xff] }
 0xe0c   :  { %7132 = vmatprep.mubr.bf16.mxu1 %v14130_v42  ;;  %7016 = vmatprep.subr.bf16.mxu0 %v10753_v2  ;;  %v10768_v42 = vcombine.low %v5375_v55, %v5379_v45  ;;  %v10792_v2 = vcombine.low %v5399_v9, %v5403_v11  ;;  %v5419_v36 = vld [vmem:[#allocation18 + $0x630] sm:$0xff]  ;;  %v10833_v9 = vcombine.high %v5439_v17, %v5443_v7 }
 0xe0d   :  { %7102 = vmatprep.subr.bf16.mxu1 %v10755_v59  ;;  %v10803_v59 = vcombine.high %v5408_v30, %v5412_v37  ;;  %v10809_v55 = vcombine.high %v5415_v44, %v5419_v36  ;;  %v5447_v13 = vld [vmem:[#allocation18 + $0x710] sm:$0xff] }
 0xe0e   :  { %7017 = vmatpush1.bf16.msra.mxu0 %v10752_v29  ;;  %v5416_v29 = vld [vmem:[#allocation18 + $0x618] sm:$0xff]  ;;  %v5451_v22 = vld [vmem:[#allocation18 + $0x730] sm:$0xff] }
 0xe0f   :  { %7103 = vmatpush1.bf16.msra.mxu1 %v10754_v32  ;;  %7018 = vmatprep.subr.bf16.mxu0 %v10761_v34  ;;  %v5420_v32 = vld [vmem:[#allocation18 + $0x638] sm:$0xff]  ;;  %v10800_v34 = vcombine.low %v5407_v31, %v5411_v21  ;;  %v10841_v31 = vcombine.high %v5447_v13, %v5451_v22 }
 0xe10   :  { %7104 = vmatprep.subr.bf16.mxu1 %v10763_v39  ;;  %v10802_v39 = vcombine.low %v5408_v30, %v5412_v37  ;;  %v10811_v45 = vcombine.high %v5416_v29, %v5420_v32  ;;  %v5455_v30 = vld [vmem:[#allocation18 + $0x750] sm:$0xff] }
 0xe11   :  { %v5459_v37 = vld [vmem:[#allocation18 + $0x770] sm:$0xff] }
 0xe12   :  { %7019 = vmatpush1.bf16.msra.mxu0 %v10760_v49  ;;  %v5424_v49 = vld [vmem:[#allocation18 + $0x658] sm:$0xff] }
 0xe13   :  { %7105 = vmatpush1.bf16.msra.mxu1 %v10762_v3  ;;  %7020 = vmatprep.subr.bf16.mxu0 %v10769_v0  ;;  %v5428_v3 = vld [vmem:[#allocation18 + $0x678] sm:$0xff]  ;;  %v10808_v0 = vcombine.low %v5415_v44, %v5419_v36  ;;  %v10849_v44 = vcombine.high %v5455_v30, %v5459_v37 }
 0xe14   :  { %7106 = vmatprep.subr.bf16.mxu1 %v10771_v50  ;;  %v10810_v50 = vcombine.low %v5416_v29, %v5420_v32  ;;  %v10819_v51 = vcombine.high %v5424_v49, %v5428_v3  ;;  %v5463_v29 = vld [vmem:[#allocation18 + $0x790] sm:$0xff] }
 0xe15   :  { %v5467_v32 = vld [vmem:[#allocation18 + $0x7b0] sm:$0xff] }
 0xe16   :  { %7021 = vmatpush1.bf16.msra.mxu0 %v10768_v42  ;;  %v5432_v42 = vld [vmem:[#allocation18 + $0x698] sm:$0xff] }
 0xe17   :  { %7107 = vmatpush1.bf16.msra.mxu1 %v10770_v56  ;;  %7022 = vmatprep.subr.bf16.mxu0 %v10777_v25  ;;  %v5436_v56 = vld [vmem:[#allocation18 + $0x6b8] sm:$0xff]  ;;  %v10816_v25 = vcombine.low %v5423_v35, %v5427_v48  ;;  %v10857_v35 = vcombine.high %v5463_v29, %v5467_v32 }
 0xe18   :  { %7108 = vmatprep.subr.bf16.mxu1 %v10779_v40  ;;  %v10818_v40 = vcombine.low %v5424_v49, %v5428_v3  ;;  %v10827_v20 = vcombine.high %v5432_v42, %v5436_v56  ;;  %v5471_v49 = vld [vmem:[#allocation18 + $0x7d0] sm:$0xff] }
 0xe19   :  { %v5475_v3 = vld [vmem:[#allocation18 + $0x7f0] sm:$0xff] }
 0xe1a   :  { %7023 = vmatpush1.bf16.msra.mxu0 %v10776_v52  ;;  %v5440_v52 = vld [vmem:[#allocation18 + $0x6d8] sm:$0xff] }
 0xe1b   :  { %7109 = vmatpush1.bf16.msra.mxu1 %v10778_v41  ;;  %7024 = vmatprep.subr.bf16.mxu0 %v10785_v38  ;;  %v5444_v41 = vld [vmem:[#allocation18 + $0x6f8] sm:$0xff]  ;;  %v10824_v38 = vcombine.low %v5431_v16, %v5435_v14  ;;  %v10865_v16 = vcombine.high %v5471_v49, %v5475_v3 }
 0xe1c   :  { %7110 = vmatprep.subr.bf16.mxu1 %v10787_v8  ;;  %v10826_v8 = vcombine.low %v5432_v42, %v5436_v56  ;;  %v10835_v11 = vcombine.high %v5440_v52, %v5444_v41  ;;  %v10864_v42 = vcombine.low %v5471_v49, %v5475_v3  ;;  %v12345_v49 = vld [vmem:[#allocation21 + $0x12c] ss:$16 sps:$4 sm:$0xff]   ;;  %v12340_v3 = vld [vmem:[#allocation21 + $0x120] ss:$16 sps:$4 sm:$0xff]  }
 0xe1e   :  { %7025 = vmatpush1.bf16.msra.mxu0 %v10784_v19  ;;  %v5448_v19 = vld [vmem:[#allocation18 + $0x718] sm:$0xff] }
 0xe1f   :  { %7111 = vmatpush1.bf16.msra.mxu1 %v10786_v47  ;;  %7026 = vmatprep.subr.bf16.mxu0 %v10793_v18  ;;  %v5452_v47 = vld [vmem:[#allocation18 + $0x738] sm:$0xff]  ;;  %v10832_v18 = vcombine.low %v5439_v17, %v5443_v7  ;;  %v12297_v7 = vld [vmem:[#allocation21 + $0x2c] ss:$16 sps:$4 sm:$0xff]  }
 0xe20   :  { %7112 = vmatprep.subr.bf16.mxu1 %v10795_v27  ;;  %v10834_v27 = vcombine.low %v5440_v52, %v5444_v41  ;;  %v10843_v21 = vcombine.high %v5448_v19, %v5452_v47  ;;  %v12294_v17 = vld [vmem:[#allocation21 + $0x24] ss:$16 sps:$4 sm:$0xff]   ;;  %v12292_v52 = vld [vmem:[#allocation21 + $0x20] ss:$16 sps:$4 sm:$0xff]   ;;  %v12295_v41 = vld [vmem:[#allocation21 + $0x28] ss:$16 sps:$4 sm:$0xff]  }
 0xe22   :  { %7027 = vmatpush1.bf16.msra.mxu0 %v10792_v2  ;;  %v5456_v2 = vld [vmem:[#allocation18 + $0x758] sm:$0xff] }
 0xe23   :  { %7113 = vmatpush1.bf16.msra.mxu1 %v10794_v12  ;;  %7028 = vmatprep.subr.bf16.mxu0 %v10801_v57  ;;  %v5460_v12 = vld [vmem:[#allocation18 + $0x778] sm:$0xff]  ;;  %v10840_v57 = vcombine.low %v5447_v13, %v5451_v22  ;;  %v12309_v22 = vld [vmem:[#allocation21 + $0x6c] ss:$16 sps:$4 sm:$0xff]  }
 0xe24   :  { %7114 = vmatprep.subr.bf16.mxu1 %v10803_v59  ;;  %v10842_v59 = vcombine.low %v5448_v19, %v5452_v47  ;;  %v10851_v36 = vcombine.high %v5456_v2, %v5460_v12  ;;  %v12306_v13 = vld [vmem:[#allocation21 + $0x64] ss:$16 sps:$4 sm:$0xff]   ;;  %v12304_v19 = vld [vmem:[#allocation21 + $0x60] ss:$16 sps:$4 sm:$0xff]  }
 0xe25   :  { %v12312_v47 = vld [vmem:[#allocation21 + $0x84] ss:$16 sps:$4 sm:$0xff]  }
 0xe26   :  { %7029 = vmatpush1.bf16.msra.mxu0 %v10800_v34  ;;  %v5464_v34 = vld [vmem:[#allocation18 + $0x798] sm:$0xff] }
 0xe27   :  { %7115 = vmatpush1.bf16.msra.mxu1 %v10802_v39  ;;  %7030 = vmatprep.subr.bf16.mxu0 %v10809_v55  ;;  %v5468_v39 = vld [vmem:[#allocation18 + $0x7b8] sm:$0xff]  ;;  %v10848_v55 = vcombine.low %v5455_v30, %v5459_v37  ;;  %v12321_v30 = vld [vmem:[#allocation21 + $0xac] ss:$16 sps:$4 sm:$0xff]  }
 0xe28   :  { %7116 = vmatprep.subr.bf16.mxu1 %v10811_v45  ;;  %v10850_v45 = vcombine.low %v5456_v2, %v5460_v12  ;;  %v10859_v48 = vcombine.high %v5464_v34, %v5468_v39  ;;  %v12316_v37 = vld [vmem:[#allocation21 + $0xa0] ss:$16 sps:$4 sm:$0xff]   ;;  %v12319_v2 = vld [vmem:[#allocation21 + $0xa8] ss:$16 sps:$4 sm:$0xff]   ;;  %v12324_v12 = vld [vmem:[#allocation21 + $0xc4] ss:$16 sps:$4 sm:$0xff]  }
 0xe2a   :  { %7031 = vmatpush1.bf16.msra.mxu0 %v10808_v0  ;;  %v5472_v0 = vld [vmem:[#allocation18 + $0x7d8] sm:$0xff] }
 0xe2b   :  { %7117 = vmatpush1.bf16.msra.mxu1 %v10810_v50  ;;  %7032 = vmatprep.subr.bf16.mxu0 %v10817_v15  ;;  %v5476_v50 = vld [vmem:[#allocation18 + $0x7f8] sm:$0xff]  ;;  %v10856_v15 = vcombine.low %v5463_v29, %v5467_v32  ;;  %v12333_v29 = vld [vmem:[#allocation21 + $0xec] ss:$16 sps:$4 sm:$0xff]  }
 0xe2c   :  { %7118 = vmatprep.subr.bf16.mxu1 %v10819_v51  ;;  %v10858_v51 = vcombine.low %v5464_v34, %v5468_v39  ;;  %v10867_v14 = vcombine.high %v5472_v0, %v5476_v50  ;;  %v10866_v56 = vcombine.low %v5472_v0, %v5476_v50  ;;  %v12328_v32 = vld [vmem:[#allocation21 + $0xe0] ss:$16 sps:$4 sm:$0xff]   ;;  %v12331_v34 = vld [vmem:[#allocation21 + $0xe8] ss:$16 sps:$4 sm:$0xff]   ;;  %v12336_v39 = vld [vmem:[#allocation21 + $0x104] ss:$16 sps:$4 sm:$0xff]  }
 0xe2d   :  { %v12343_v0 = vld [vmem:[#allocation21 + $0x128] ss:$16 sps:$4 sm:$0xff]   ;;  %v12348_v50 = vld [vmem:[#allocation21 + $0x144] ss:$16 sps:$4 sm:$0xff]  }
 0xe2e   :  { %7033 = vmatpush1.bf16.msra.mxu0 %v10816_v25  ;;  %v12288_v25 = vld [vmem:[#allocation21 + $0x4] ss:$16 sps:$4 sm:$0xff]  }
 0xe2f   :  { %7119 = vmatpush1.bf16.msra.mxu1 %v10818_v40  ;;  %7034 = vmatprep.subr.bf16.mxu0 %v10825_v33  ;;  %v12291_v40 = vld [vmem:[#allocation21 + $0xc] ss:$16 sps:$4 sm:$0xff]   ;;  %v12286_v33 = vld [vmem:[#allocation21] ss:$16 sps:$4 sm:$0xff]  }
 0xe30   :  { %7120 = vmatprep.subr.bf16.mxu1 %v10827_v20  ;;  %v12289_v20 = vld [vmem:[#allocation21 + $0x8] ss:$16 sps:$4 sm:$0xff]  }
 0xe32   :  { %7035 = vmatpush1.bf16.msra.mxu0 %v10824_v38  ;;  %v12300_v38 = vld [vmem:[#allocation21 + $0x44] ss:$16 sps:$4 sm:$0xff]  }
 0xe33   :  { %7121 = vmatpush1.bf16.msra.mxu1 %v10826_v8  ;;  %7036 = vmatprep.subr.bf16.mxu0 %v10833_v9  ;;  %v12303_v8 = vld [vmem:[#allocation21 + $0x4c] ss:$16 sps:$4 sm:$0xff]   ;;  %v12298_v9 = vld [vmem:[#allocation21 + $0x40] ss:$16 sps:$4 sm:$0xff]  }
 0xe34   :  { %7122 = vmatprep.subr.bf16.mxu1 %v10835_v11  ;;  %v12301_v11 = vld [vmem:[#allocation21 + $0x48] ss:$16 sps:$4 sm:$0xff]  }
 0xe36   :  { %7037 = vmatpush1.bf16.msra.mxu0 %v10832_v18  ;;  %v12315_v18 = vld [vmem:[#allocation21 + $0x8c] ss:$16 sps:$4 sm:$0xff]  }
 0xe37   :  { %7123 = vmatpush1.bf16.msra.mxu1 %v10834_v27  ;;  %7038 = vmatprep.subr.bf16.mxu0 %v10841_v31  ;;  %v12310_v27 = vld [vmem:[#allocation21 + $0x80] ss:$16 sps:$4 sm:$0xff]   ;;  %v12313_v31 = vld [vmem:[#allocation21 + $0x88] ss:$16 sps:$4 sm:$0xff]  }
 0xe38   :  { %7124 = vmatprep.subr.bf16.mxu1 %v10843_v21  ;;  %v12318_v21 = vld [vmem:[#allocation21 + $0xa4] ss:$16 sps:$4 sm:$0xff]  }
 0xe3a   :  { %7039 = vmatpush1.bf16.msra.mxu0 %v10840_v57  ;;  %v12327_v57 = vld [vmem:[#allocation21 + $0xcc] ss:$16 sps:$4 sm:$0xff]  }
 0xe3b   :  { %7125 = vmatpush1.bf16.msra.mxu1 %v10842_v59  ;;  %7040 = vmatprep.subr.bf16.mxu0 %v10849_v44  ;;  %v12322_v59 = vld [vmem:[#allocation21 + $0xc0] ss:$16 sps:$4 sm:$0xff]   ;;  %v12325_v44 = vld [vmem:[#allocation21 + $0xc8] ss:$16 sps:$4 sm:$0xff]  }
 0xe3c   :  { %7126 = vmatprep.subr.bf16.mxu1 %v10851_v36  ;;  %v12330_v36 = vld [vmem:[#allocation21 + $0xe4] ss:$16 sps:$4 sm:$0xff]  }
 0xe3e   :  { %7041 = vmatpush1.bf16.msra.mxu0 %v10848_v55  ;;  %v12339_v55 = vld [vmem:[#allocation21 + $0x10c] ss:$16 sps:$4 sm:$0xff]  }
 0xe3f   :  { %7127 = vmatpush1.bf16.msra.mxu1 %v10850_v45  ;;  %7042 = vmatprep.subr.bf16.mxu0 %v10857_v35  ;;  %v12334_v45 = vld [vmem:[#allocation21 + $0x100] ss:$16 sps:$4 sm:$0xff]   ;;  %v12337_v35 = vld [vmem:[#allocation21 + $0x108] ss:$16 sps:$4 sm:$0xff]  }
 0xe40   :  { %7128 = vmatprep.subr.bf16.mxu1 %v10859_v48  ;;  %v12342_v48 = vld [vmem:[#allocation21 + $0x124] ss:$16 sps:$4 sm:$0xff]  }
 0xe42   :  { %7043 = vmatpush1.bf16.msra.mxu0 %v10856_v15  ;;  %v12351_v15 = vld [vmem:[#allocation21 + $0x14c] ss:$16 sps:$4 sm:$0xff]  }
 0xe43   :  { %7129 = vmatpush1.bf16.msra.mxu1 %v10858_v51  ;;  %7044 = vmatprep.subr.bf16.mxu0 %v10865_v16  ;;  %v12346_v51 = vld [vmem:[#allocation21 + $0x140] ss:$16 sps:$4 sm:$0xff]   ;;  %v12349_v16 = vld [vmem:[#allocation21 + $0x148] ss:$16 sps:$4 sm:$0xff]  }
 0xe44   :  { %7130 = vmatprep.subr.bf16.mxu1 %v10867_v14  ;;  %v12354_v14 = vld [vmem:[#allocation21 + $0x164] ss:$16 sps:$4 sm:$0xff]  }
 0xe46   :  { %7045 = vmatpush1.bf16.msra.mxu0 %v10864_v42  ;;  %v12357_v42 = vld [vmem:[#allocation21 + $0x16c] ss:$16 sps:$4 sm:$0xff]  }
 0xe47   :  { %7131 = vmatpush1.bf16.msra.mxu1 %v10866_v56  ;;  %8853 = vmatprep.subr.bf16.mxu0 %v12288_v25  ;;  %v12352_v56 = vld [vmem:[#allocation21 + $0x160] ss:$16 sps:$4 sm:$0xff]   ;;  %v12355_v25 = vld [vmem:[#allocation21 + $0x168] ss:$16 sps:$4 sm:$0xff]  }
 0xe48   :  { %9025 = vmatprep.subr.bf16.mxu1 %v12291_v40  ;;  %v12360_v40 = vld [vmem:[#allocation21 + $0x184] ss:$16 sps:$4 sm:$0xff]  }
 0xe49   :  { %7047 = vmatmul.mubr.bf16.vlgmr.msra.gmra.mrb[60].mxu0 %v14124_v1 }
 0xe4a   :  { %7133 = vmatmul.mubr.bf16.vlgmr.msra.gmra.mrb[48].mxu1 %v14124_v1  ;;  %8854 = vmatpush1.bf16.msra.mxu0 %v12286_v33  ;;  %v12307_v1 = vld [vmem:[#allocation21 + $0x68] ss:$16 sps:$4 sm:$0xff]   ;;  %v12363_v33 = vld [vmem:[#allocation21 + $0x18c] ss:$16 sps:$4 sm:$0xff]  }
 0xe4b   :  { %9026 = vmatpush1.bf16.msra.mxu1 %v12289_v20  ;;  %8855 = vmatprep.subr.bf16.mxu0 %v12294_v17  ;;  %v12358_v20 = vld [vmem:[#allocation21 + $0x180] ss:$16 sps:$4 sm:$0xff]   ;;  %v12361_v17 = vld [vmem:[#allocation21 + $0x188] ss:$16 sps:$4 sm:$0xff]  }
 0xe4c   :  { %9027 = vmatprep.subr.bf16.mxu1 %v12297_v7  ;;  %v12366_v7 = vld [vmem:[#allocation21 + $0x1a4] ss:$16 sps:$4 sm:$0xff]  }
 0xe4e   :  { %8856 = vmatpush1.bf16.msra.mxu0 %v12292_v52  ;;  %v12369_v52 = vld [vmem:[#allocation21 + $0x1ac] ss:$16 sps:$4 sm:$0xff]  }
 0xe4f   :  { %9028 = vmatpush1.bf16.msra.mxu1 %v12295_v41  ;;  %8857 = vmatprep.subr.bf16.mxu0 %v12300_v38  ;;  %v12364_v41 = vld [vmem:[#allocation21 + $0x1a0] ss:$16 sps:$4 sm:$0xff]   ;;  %v12367_v38 = vld [vmem:[#allocation21 + $0x1a8] ss:$16 sps:$4 sm:$0xff]  }
 0xe50   :  { %9029 = vmatprep.subr.bf16.mxu1 %v12303_v8  ;;  %v12372_v8 = vld [vmem:[#allocation21 + $0x1c4] ss:$16 sps:$4 sm:$0xff]  }
 0xe52   :  { %8858 = vmatpush1.bf16.msra.mxu0 %v12298_v9  ;;  %v12375_v9 = vld [vmem:[#allocation21 + $0x1cc] ss:$16 sps:$4 sm:$0xff]  }
 0xe53   :  { %9030 = vmatpush1.bf16.msra.mxu1 %v12301_v11  ;;  %8859 = vmatprep.subr.bf16.mxu0 %v12306_v13  ;;  %v12370_v11 = vld [vmem:[#allocation21 + $0x1c0] ss:$16 sps:$4 sm:$0xff]   ;;  %v12373_v13 = vld [vmem:[#allocation21 + $0x1c8] ss:$16 sps:$4 sm:$0xff]  }
 0xe54   :  { %9031 = vmatprep.subr.bf16.mxu1 %v12309_v22  ;;  %v12378_v22 = vld [vmem:[#allocation21 + $0x1e4] ss:$16 sps:$4 sm:$0xff]  }
 0xe56   :  { %8860 = vmatpush1.bf16.msra.mxu0 %v12304_v19  ;;  %v12381_v19 = vld [vmem:[#allocation21 + $0x1ec] ss:$16 sps:$4 sm:$0xff]  }
 0xe57   :  { %9032 = vmatpush1.bf16.msra.mxu1 %v12307_v1  ;;  %8861 = vmatprep.subr.bf16.mxu0 %v12312_v47  ;;  %v12376_v1 = vld [vmem:[#allocation21 + $0x1e0] ss:$16 sps:$4 sm:$0xff]   ;;  %v12379_v47 = vld [vmem:[#allocation21 + $0x1e8] ss:$16 sps:$4 sm:$0xff]  }
 0xe58   :  { %9033 = vmatprep.subr.bf16.mxu1 %v12315_v18  ;;  %v12384_v18 = vld [vmem:[#allocation21 + $0x204] ss:$16 sps:$4 sm:$0xff]  }
 0xe5a   :  { %8862 = vmatpush1.bf16.msra.mxu0 %v12310_v27  ;;  %v12387_v27 = vld [vmem:[#allocation21 + $0x20c] ss:$16 sps:$4 sm:$0xff]  }
 0xe5b   :  { %9034 = vmatpush1.bf16.msra.mxu1 %v12313_v31  ;;  %8863 = vmatprep.subr.bf16.mxu0 %v12318_v21  ;;  %v14150_v31 = vld [vmem:[#allocation19] sm:$0xff] }
 0xe5c   :  { %9035 = vmatprep.subr.bf16.mxu1 %v12321_v30  ;;  %v5482_v21 = vrot.slane %v14150_v31, %v13704_v62  ;;  %v5490_v30 = vrot.slane %v14150_v31, %v13707_v63 }
 0xe5e   :  { %8864 = vmatpush1.bf16.msra.mxu0 %v12316_v37  ;;  %v5486_v37 = vrot.slane %v14150_v31, %v13698_v60 }
 0xe5f   :  { %9036 = vmatpush1.bf16.msra.mxu1 %v12319_v2  ;;  %8865 = vmatprep.subr.bf16.mxu0 %v12324_v12  ;;  %v5494_v2 = vrot.slane %v14150_v31, %v13701_v61 }
 0xe60   :  { %9037 = vmatprep.subr.bf16.mxu1 %v12327_v57 }
 0xe62   :  { %8866 = vmatpush1.bf16.msra.mxu0 %v12322_v59 }
 0xe63   :  { %9038 = vmatpush1.bf16.msra.mxu1 %v12325_v44  ;;  %8867 = vmatprep.subr.bf16.mxu0 %v12330_v36 }
 0xe64   :  { %9039 = vmatprep.subr.bf16.mxu1 %v12333_v29 }
 0xe66   :  { %8868 = vmatpush1.bf16.msra.mxu0 %v12328_v32 }
 0xe67   :  { %9040 = vmatpush1.bf16.msra.mxu1 %v12331_v34  ;;  %8869 = vmatprep.subr.bf16.mxu0 %v12336_v39 }
 0xe68   :  { %9041 = vmatprep.subr.bf16.mxu1 %v12339_v55 }
 0xe6a   :  { %8870 = vmatpush1.bf16.msra.mxu0 %v12334_v45 }
 0xe6b   :  { %9042 = vmatpush1.bf16.msra.mxu1 %v12337_v35  ;;  %8871 = vmatprep.subr.bf16.mxu0 %v12342_v48 }
 0xe6c   :  { %9043 = vmatprep.subr.bf16.mxu1 %v12345_v49 }
 0xe6e   :  { %8872 = vmatpush1.bf16.msra.mxu0 %v12340_v3 }
 0xe6f   :  { %9044 = vmatpush1.bf16.msra.mxu1 %v12343_v0  ;;  %8873 = vmatprep.subr.bf16.mxu0 %v12348_v50 }
 0xe70   :  { %9045 = vmatprep.subr.bf16.mxu1 %v12351_v15 }
 0xe72   :  { %8874 = vmatpush1.bf16.msra.mxu0 %v12346_v51 }
 0xe73   :  { %9046 = vmatpush1.bf16.msra.mxu1 %v12349_v16  ;;  %8875 = vmatprep.subr.bf16.mxu0 %v12354_v14 }
 0xe74   :  { %9047 = vmatprep.subr.bf16.mxu1 %v12357_v42 }
 0xe76   :  { %8876 = vmatpush1.bf16.msra.mxu0 %v12352_v56 }
 0xe77   :  { %9048 = vmatpush1.bf16.msra.mxu1 %v12355_v25  ;;  %8877 = vmatprep.subr.bf16.mxu0 %v12360_v40 }
 0xe78   :  { %9049 = vmatprep.subr.bf16.mxu1 %v12363_v33 }
 0xe7a   :  { %8878 = vmatpush1.bf16.msra.mxu0 %v12358_v20 }
 0xe7b   :  { %9050 = vmatpush1.bf16.msra.mxu1 %v12361_v17  ;;  %8879 = vmatprep.subr.bf16.mxu0 %v12366_v7 }
 0xe7c   :  { %9051 = vmatprep.subr.bf16.mxu1 %v12369_v52 }
 0xe7e   :  { %8880 = vmatpush1.bf16.msra.mxu0 %v12364_v41 }
 0xe7f   :  { %9052 = vmatpush1.bf16.msra.mxu1 %v12367_v38  ;;  %8881 = vmatprep.subr.bf16.mxu0 %v12372_v8 }
 0xe80   :  { %9053 = vmatprep.subr.bf16.mxu1 %v12375_v9 }
 0xe82   :  { %8882 = vmatpush1.bf16.msra.mxu0 %v12370_v11 }
 0xe83   :  { %9054 = vmatpush1.bf16.msra.mxu1 %v12373_v13  ;;  %8883 = vmatprep.subr.bf16.mxu0 %v12378_v22 }
 0xe84   :  { %9055 = vmatprep.subr.bf16.mxu1 %v12381_v19 }
 0xe86   :  { %8884 = vmatpush1.bf16.msra.mxu0 %v12376_v1 }
 0xe87   :  { %9056 = vmatpush1.bf16.msra.mxu1 %v12379_v47  ;;  %8896 = vmatprep.subr.bf16.mxu0 %v12384_v18 }
 0xe88   :  { %9068 = vmatprep.subr.bf16.mxu1 %v12387_v27 }
 0xe9c   :  { %v6876_v12 = vpop.f32.mrb[56].mxu0  ;;  %v6962_v57 = vpop.f32.mrb[44].mxu1 }
 0xe9d   :  { %v14160_v59 = vadd.f32 %v6876_v12, %v5482_v21  ;;  %v14162_v44 = vadd.f32 %v6962_v57, %v5490_v30  ;;  %v6878_v36 = vpop.f32.mrb[57].mxu0  ;;  %v6964_v29 = vpop.f32.mrb[45].mxu1 }
 0xe9e   :  { %v14164_v32 = vadd.f32 %v6878_v36, %v5486_v37  ;;  %v14166_v34 = vadd.f32 %v6964_v29, %v5494_v2  ;;  %v6880_v39 = vpop.f32.mrb[58].mxu0  ;;  %v6966_v55 = vpop.f32.mrb[46].mxu1 }
 0xe9f   :  { %v7143_v45 = vmul.f32 %v14160_v59, %v14160_v59  ;;  %v7145_v35 = vmul.f32 %v14162_v44, %v14162_v44  ;;  %v14172_v48 = vadd.f32 %v6880_v39, %v5482_v21  ;;  %v14174_v49 = vadd.f32 %v6966_v55, %v5490_v30  ;;  %v6882_v3 = vpop.f32.mrb[59].mxu0  ;;  %v6968_v0 = vpop.f32.mrb[47].mxu1 }
 0xea0   :  { %v7144_v50 = vmul.f32 %v14164_v32, %v14164_v32  ;;  %v7146_v15 = vmul.f32 %v14166_v34, %v14166_v34  ;;  %v14180_v51 = vadd.f32 %v6882_v3, %v5486_v37  ;;  %v14182_v16 = vadd.f32 %v6968_v0, %v5494_v2 }
 0xea1   :  { %v7159_v14 = vmul.f32 %v14160_v59, %v7143_v45  ;;  %v7161_v42 = vmul.f32 %v14162_v44, %v7145_v35  ;;  %v7151_v56 = vmul.f32 %v14172_v48, %v14172_v48  ;;  %v7153_v25 = vmul.f32 %v14174_v49, %v14174_v49 }
 0xea2   :  { %v7160_v40 = vmul.f32 %v14164_v32, %v7144_v50  ;;  %v7162_v33 = vmul.f32 %v14166_v34, %v7146_v15  ;;  %v7152_v20 = vmul.f32 %v14180_v51, %v14180_v51  ;;  %v7154_v17 = vmul.f32 %v14182_v16, %v14182_v16 }
 0xea3   :  { %v7175_v7 = vmul.f32 0.044715, %v7159_v14  ;;  %v7177_v52 = vmul.f32 0.044715, %v7161_v42  ;;  %v7167_v41 = vmul.f32 %v14172_v48, %v7151_v56  ;;  %v7169_v38 = vmul.f32 %v14174_v49, %v7153_v25 }
 0xea4   :  { %v7176_v8 = vmul.f32 0.044715, %v7160_v40  ;;  %v7178_v9 = vmul.f32 0.044715, %v7162_v33  ;;  %v7168_v11 = vmul.f32 %v14180_v51, %v7152_v20  ;;  %v7170_v13 = vmul.f32 %v14182_v16, %v7154_v17 }
 0xea5   :  { %v7191_v22 = vadd.f32 %v14160_v59, %v7175_v7  ;;  %v7193_v19 = vadd.f32 %v14162_v44, %v7177_v52  ;;  %v7183_v1 = vmul.f32 0.044715, %v7167_v41  ;;  %v7185_v47 = vmul.f32 0.044715, %v7169_v38 }
 0xea6   :  { %v7192_v18 = vadd.f32 %v14164_v32, %v7176_v8  ;;  %v7194_v27 = vadd.f32 %v14166_v34, %v7178_v9  ;;  %v7184_v21 = vmul.f32 0.044715, %v7168_v11  ;;  %v7186_v30 = vmul.f32 0.044715, %v7170_v13 }
 0xea7   :  { %v7207_v37 = vmul.f32 0.7978846, %v7191_v22  ;;  %v7209_v2 = vmul.f32 0.7978846, %v7193_v19  ;;  %v7199_v12 = vadd.f32 %v14172_v48, %v7183_v1  ;;  %v7201_v57 = vadd.f32 %v14174_v49, %v7185_v47 }
 0xea8   :  { %v7208_v36 = vmul.f32 0.7978846, %v7192_v18  ;;  %v7210_v29 = vmul.f32 0.7978846, %v7194_v27  ;;  %v7200_v39 = vadd.f32 %v14180_v51, %v7184_v21  ;;  %v7202_v55 = vadd.f32 %v14182_v16, %v7186_v30 }
 0xea9   :  { %12822 = vtanh.f32 %v7207_v37  ;;  %v7215_v45 = vmul.f32 0.7978846, %v7199_v12  ;;  %v7217_v35 = vmul.f32 0.7978846, %v7201_v57 }
 0xeaa   :  { %12824 = vtanh.f32 %v7209_v2  ;;  %v7216_v3 = vmul.f32 0.7978846, %v7200_v39  ;;  %v7218_v0 = vmul.f32 0.7978846, %v7202_v55 }
 0xeab   :  { %12826 = vtanh.f32 %v7208_v36 }
 0xeac   :  { %12828 = vtanh.f32 %v7210_v29 }
 0xead   :  { %12830 = vtanh.f32 %v7215_v45  ;;  %v12382_v45 = vld [vmem:[#allocation21 + $0x200] ss:$16 sps:$4 sm:$0xff]  }
 0xeae   :  { %12832 = vtanh.f32 %v7217_v35 }
 0xeaf   :  { %12834 = vtanh.f32 %v7216_v3  ;;  %v12394_v3 = vld [vmem:[#allocation21 + $0x240] ss:$16 sps:$4 sm:$0xff]  }
 0xeb0   :  { %12836 = vtanh.f32 %v7218_v0  ;;  %v12397_v0 = vld [vmem:[#allocation21 + $0x248] ss:$16 sps:$4 sm:$0xff]  }
 0xeb3   :  { %v12823_v50 = vpop.eup %12822 }
 0xeb4   :  { %v12825_v15 = vpop.eup %12824  ;;  %v7239_v14 = vadd.f32 1.0, %v12823_v50  ;;  %v12402_v50 = vld [vmem:[#allocation21 + $0x264] ss:$16 sps:$4 sm:$0xff]  }
 0xeb5   :  { %v12827_v42 = vpop.eup %12826  ;;  %v7241_v56 = vadd.f32 1.0, %v12825_v15  ;;  %v12405_v15 = vld [vmem:[#allocation21 + $0x26c] ss:$16 sps:$4 sm:$0xff]  }
 0xeb6   :  { %v12829_v25 = vpop.eup %12828  ;;  %v7240_v40 = vadd.f32 1.0, %v12827_v42  ;;  %v7255_v7 = vmul.f32 0.5, %v7239_v14  ;;  %v12400_v14 = vld [vmem:[#allocation21 + $0x260] ss:$16 sps:$4 sm:$0xff]   ;;  %v12403_v42 = vld [vmem:[#allocation21 + $0x268] ss:$16 sps:$4 sm:$0xff]  }
 0xeb7   :  { %v12831_v33 = vpop.eup %12830  ;;  %v7242_v20 = vadd.f32 1.0, %v12829_v25  ;;  %v7257_v38 = vmul.f32 0.5, %v7241_v56  ;;  %v12408_v56 = vld [vmem:[#allocation21 + $0x284] ss:$16 sps:$4 sm:$0xff]   ;;  %v12411_v25 = vld [vmem:[#allocation21 + $0x28c] ss:$16 sps:$4 sm:$0xff]  }
 0xeb8   :  { %v12833_v17 = vpop.eup %12832  ;;  %v7247_v52 = vadd.f32 1.0, %v12831_v33  ;;  %v7256_v22 = vmul.f32 0.5, %v7240_v40  ;;  %v7271_v18 = vmul.f32 %v14160_v59, %v7255_v7  ;;  %v12406_v40 = vld [vmem:[#allocation21 + $0x280] ss:$16 sps:$4 sm:$0xff]   ;;  %v12409_v33 = vld [vmem:[#allocation21 + $0x288] ss:$16 sps:$4 sm:$0xff]  }
 0xeb9   :  { %v12835_v41 = vpop.eup %12834  ;;  %v7249_v8 = vadd.f32 1.0, %v12833_v17  ;;  %v7258_v47 = vmul.f32 0.5, %v7242_v20  ;;  %v7273_v30 = vmul.f32 %v14162_v44, %v7257_v38  ;;  %v12390_v44 = vld [vmem:[#allocation21 + $0x224] ss:$16 sps:$4 sm:$0xff]   ;;  %v12417_v17 = vld [vmem:[#allocation21 + $0x2ac] ss:$16 sps:$4 sm:$0xff]  }
 0xeba   :  { %v12837_v9 = vpop.eup %12836  ;;  %v7263_v11 = vmul.f32 0.5, %v7247_v52  ;;  %v7248_v13 = vadd.f32 1.0, %v12835_v41  ;;  %v7272_v12 = vmul.f32 %v14164_v32, %v7256_v22  ;;  %v12388_v32 = vld [vmem:[#allocation21 + $0x220] ss:$16 sps:$4 sm:$0xff]   ;;  %v12414_v20 = vld [vmem:[#allocation21 + $0x2a4] ss:$16 sps:$4 sm:$0xff]  }
 0xebb   :  { %v7265_v19 = vmul.f32 0.5, %v7249_v8  ;;  %v7250_v1 = vadd.f32 1.0, %v12837_v9  ;;  %v7274_v29 = vmul.f32 %v14166_v34, %v7258_v47  ;;  %v12396_v34 = vld [vmem:[#allocation21 + $0x244] ss:$16 sps:$4 sm:$0xff]   ;;  %v12412_v7 = vld [vmem:[#allocation21 + $0x2a0] ss:$16 sps:$4 sm:$0xff]  }
 0xebc   :  { %v7279_v27 = vmul.f32 %v14172_v48, %v7263_v11  ;;  %v7264_v21 = vmul.f32 0.5, %v7248_v13  ;;  %v12385_v48 = vld [vmem:[#allocation21 + $0x208] ss:$16 sps:$4 sm:$0xff]   ;;  %v12420_v41 = vld [vmem:[#allocation21 + $0x2c4] ss:$16 sps:$4 sm:$0xff]  }
 0xebd   :  { %v7281_v37 = vmul.f32 %v14174_v49, %v7265_v19  ;;  %v7266_v2 = vmul.f32 0.5, %v7250_v1  ;;  %v12393_v49 = vld [vmem:[#allocation21 + $0x22c] ss:$16 sps:$4 sm:$0xff]   ;;  %v12415_v52 = vld [vmem:[#allocation21 + $0x2a8] ss:$16 sps:$4 sm:$0xff]  }
 0xebe   :  { %v7280_v57 = vmul.f32 %v14180_v51, %v7264_v21  ;;  %v7287_v36 = vpack.c.bf16 %v7279_v27, %v7271_v18  ;;  %v12391_v51 = vld [vmem:[#allocation21 + $0x228] ss:$16 sps:$4 sm:$0xff]   ;;  %v12423_v38 = vld [vmem:[#allocation21 + $0x2cc] ss:$16 sps:$4 sm:$0xff]   ;;  %v12418_v8 = vld [vmem:[#allocation21 + $0x2c0] ss:$16 sps:$4 sm:$0xff]  }
 0xebf   :  { %v7282_v39 = vmul.f32 %v14182_v16, %v7266_v2  ;;  %v14216_v55 = vpack.c.bf16 %v7281_v37, %v7273_v30  ;;  %v12399_v16 = vld [vmem:[#allocation21 + $0x24c] ss:$16 sps:$4 sm:$0xff]   ;;  %v12421_v9 = vld [vmem:[#allocation21 + $0x2c8] ss:$16 sps:$4 sm:$0xff]   ;;  %v12426_v11 = vld [vmem:[#allocation21 + $0x2e4] ss:$16 sps:$4 sm:$0xff]  }
 0xec0   :  { %v7288_v59 = vpack.c.bf16 %v7280_v57, %v7272_v12  ;;  %v12429_v13 = vld [vmem:[#allocation21 + $0x2ec] ss:$16 sps:$4 sm:$0xff]   ;;  %v12424_v22 = vld [vmem:[#allocation21 + $0x2e0] ss:$16 sps:$4 sm:$0xff]   ;;  %v12427_v19 = vld [vmem:[#allocation21 + $0x2e8] ss:$16 sps:$4 sm:$0xff]  }
 0xec1   :  { %v7290_v35 = vpack.c.bf16 %v7282_v39, %v7274_v29  ;;  %v12432_v1 = vld [vmem:[#allocation21 + $0x304] ss:$16 sps:$4 sm:$0xff]   ;;  %v12435_v47 = vld [vmem:[#allocation21 + $0x30c] ss:$16 sps:$4 sm:$0xff]   ;;  %v12430_v18 = vld [vmem:[#allocation21 + $0x300] ss:$16 sps:$4 sm:$0xff]  }
 0xec2   :  { %8885 = vmatprep.mubr.bf16.mxu0 %v7288_v59  ;;  %9057 = vmatprep.mubr.bf16.mxu1 %v7288_v59  ;;  %v12433_v27 = vld [vmem:[#allocation21 + $0x308] ss:$16 sps:$4 sm:$0xff]   ;;  %v12438_v21 = vld [vmem:[#allocation21 + $0x324] ss:$16 sps:$4 sm:$0xff]   ;;  %v12441_v30 = vld [vmem:[#allocation21 + $0x32c] ss:$16 sps:$4 sm:$0xff]  }
 0xec3   :  { %8886 = vmatmul.mubr.bf16.vlgmr.msra.gmra.mrb[64].mxu0 %v7287_v36  ;;  %9058 = vmatmul.mubr.bf16.vlgmr.msra.gmra.mrb[52].mxu1 %v7287_v36  ;;  %v12436_v37 = vld [vmem:[#allocation21 + $0x320] ss:$16 sps:$4 sm:$0xff]   ;;  %v12439_v2 = vld [vmem:[#allocation21 + $0x328] ss:$16 sps:$4 sm:$0xff]   ;;  %v12444_v12 = vld [vmem:[#allocation21 + $0x344] ss:$16 sps:$4 sm:$0xff]  }
 0xec4   :  { %8897 = vmatpush1.bf16.msra.mxu0 %v12382_v45  ;;  %9069 = vmatpush1.bf16.msra.mxu1 %v12385_v48  ;;  %v12447_v57 = vld [vmem:[#allocation21 + $0x34c] ss:$16 sps:$4 sm:$0xff]   ;;  %v12442_v36 = vld [vmem:[#allocation21 + $0x340] ss:$16 sps:$4 sm:$0xff]   ;;  %v12445_v29 = vld [vmem:[#allocation21 + $0x348] ss:$16 sps:$4 sm:$0xff]  }
 0xec5   :  { %8928 = vmatprep.mubr.bf16.mxu0 %v7290_v35  ;;  %9100 = vmatprep.mubr.bf16.mxu1 %v7290_v35  ;;  %v12450_v39 = vld [vmem:[#allocation21 + $0x364] ss:$16 sps:$4 sm:$0xff]   ;;  %v12453_v59 = vld [vmem:[#allocation21 + $0x36c] ss:$16 sps:$4 sm:$0xff]   ;;  %v12448_v45 = vld [vmem:[#allocation21 + $0x360] ss:$16 sps:$4 sm:$0xff]  }
 0xec6   :  { %8898 = vmatprep.subr.bf16.mxu0 %v12390_v44  ;;  %9070 = vmatprep.subr.bf16.mxu1 %v12393_v49  ;;  %v12451_v48 = vld [vmem:[#allocation21 + $0x368] ss:$16 sps:$4 sm:$0xff]   ;;  %v12456_v35 = vld [vmem:[#allocation21 + $0x384] ss:$16 sps:$4 sm:$0xff]   ;;  %v12459_v44 = vld [vmem:[#allocation21 + $0x38c] ss:$16 sps:$4 sm:$0xff]  }
 0xec7   :  { %v12454_v49 = vld [vmem:[#allocation21 + $0x380] ss:$16 sps:$4 sm:$0xff]  }
 0xec8   :  { %8899 = vmatpush1.bf16.msra.mxu0 %v12388_v32  ;;  %9071 = vmatpush1.bf16.msra.mxu1 %v12391_v51  ;;  %v12457_v32 = vld [vmem:[#allocation21 + $0x388] ss:$16 sps:$4 sm:$0xff]   ;;  %v12462_v51 = vld [vmem:[#allocation21 + $0x3a4] ss:$16 sps:$4 sm:$0xff]  }
 0xec9   :  { %8900 = vmatprep.subr.bf16.mxu0 %v12396_v34  ;;  %9072 = vmatprep.subr.bf16.mxu1 %v12399_v16  ;;  %v12465_v34 = vld [vmem:[#allocation21 + $0x3ac] ss:$16 sps:$4 sm:$0xff]   ;;  %v12460_v16 = vld [vmem:[#allocation21 + $0x3a0] ss:$16 sps:$4 sm:$0xff]  }
 0xecc   :  { %8901 = vmatpush1.bf16.msra.mxu0 %v12394_v3  ;;  %9073 = vmatpush1.bf16.msra.mxu1 %v12397_v0  ;;  %v12463_v3 = vld [vmem:[#allocation21 + $0x3a8] ss:$16 sps:$4 sm:$0xff]   ;;  %v12468_v0 = vld [vmem:[#allocation21 + $0x3c4] ss:$16 sps:$4 sm:$0xff]  }
 0xecd   :  { %8902 = vmatprep.subr.bf16.mxu0 %v12402_v50  ;;  %9074 = vmatprep.subr.bf16.mxu1 %v12405_v15  ;;  %v12471_v50 = vld [vmem:[#allocation21 + $0x3cc] ss:$16 sps:$4 sm:$0xff]   ;;  %v12466_v15 = vld [vmem:[#allocation21 + $0x3c0] ss:$16 sps:$4 sm:$0xff]  }
 0xed0   :  { %8903 = vmatpush1.bf16.msra.mxu0 %v12400_v14  ;;  %9075 = vmatpush1.bf16.msra.mxu1 %v12403_v42  ;;  %v12469_v14 = vld [vmem:[#allocation21 + $0x3c8] ss:$16 sps:$4 sm:$0xff]   ;;  %v12474_v42 = vld [vmem:[#allocation21 + $0x3e4] ss:$16 sps:$4 sm:$0xff]  }
 0xed1   :  { %8904 = vmatprep.subr.bf16.mxu0 %v12408_v56  ;;  %9076 = vmatprep.subr.bf16.mxu1 %v12411_v25  ;;  %v12477_v56 = vld [vmem:[#allocation21 + $0x3ec] ss:$16 sps:$4 sm:$0xff]   ;;  %v12472_v25 = vld [vmem:[#allocation21 + $0x3e0] ss:$16 sps:$4 sm:$0xff]  }
 0xed4   :  { %8905 = vmatpush1.bf16.msra.mxu0 %v12406_v40  ;;  %9077 = vmatpush1.bf16.msra.mxu1 %v12409_v33  ;;  %v12475_v40 = vld [vmem:[#allocation21 + $0x3e8] ss:$16 sps:$4 sm:$0xff]   ;;  %v12480_v33 = vld [vmem:[#allocation21 + $0x404] ss:$16 sps:$4 sm:$0xff]  }
 0xed5   :  { %8906 = vmatprep.subr.bf16.mxu0 %v12414_v20  ;;  %9078 = vmatprep.subr.bf16.mxu1 %v12417_v17  ;;  %v12483_v20 = vld [vmem:[#allocation21 + $0x40c] ss:$16 sps:$4 sm:$0xff]   ;;  %v12478_v17 = vld [vmem:[#allocation21 + $0x400] ss:$16 sps:$4 sm:$0xff]  }
 0xed8   :  { %8907 = vmatpush1.bf16.msra.mxu0 %v12412_v7  ;;  %9079 = vmatpush1.bf16.msra.mxu1 %v12415_v52  ;;  %v12481_v7 = vld [vmem:[#allocation21 + $0x408] ss:$16 sps:$4 sm:$0xff]   ;;  %v12486_v52 = vld [vmem:[#allocation21 + $0x424] ss:$16 sps:$4 sm:$0xff]  }
 0xed9   :  { %8908 = vmatprep.subr.bf16.mxu0 %v12420_v41  ;;  %9080 = vmatprep.subr.bf16.mxu1 %v12423_v38  ;;  %v12489_v41 = vld [vmem:[#allocation21 + $0x42c] ss:$16 sps:$4 sm:$0xff]   ;;  %v12484_v38 = vld [vmem:[#allocation21 + $0x420] ss:$16 sps:$4 sm:$0xff]  }
 0xedc   :  { %8909 = vmatpush1.bf16.msra.mxu0 %v12418_v8  ;;  %9081 = vmatpush1.bf16.msra.mxu1 %v12421_v9  ;;  %v12487_v8 = vld [vmem:[#allocation21 + $0x428] ss:$16 sps:$4 sm:$0xff]   ;;  %v12492_v9 = vld [vmem:[#allocation21 + $0x444] ss:$16 sps:$4 sm:$0xff]  }
 0xedd   :  { %8910 = vmatprep.subr.bf16.mxu0 %v12426_v11  ;;  %9082 = vmatprep.subr.bf16.mxu1 %v12429_v13  ;;  %v12495_v11 = vld [vmem:[#allocation21 + $0x44c] ss:$16 sps:$4 sm:$0xff]   ;;  %v12490_v13 = vld [vmem:[#allocation21 + $0x440] ss:$16 sps:$4 sm:$0xff]  }
 0xee0   :  { %8911 = vmatpush1.bf16.msra.mxu0 %v12424_v22  ;;  %9083 = vmatpush1.bf16.msra.mxu1 %v12427_v19  ;;  %v12493_v22 = vld [vmem:[#allocation21 + $0x448] ss:$16 sps:$4 sm:$0xff]   ;;  %v12498_v19 = vld [vmem:[#allocation21 + $0x464] ss:$16 sps:$4 sm:$0xff]  }
 0xee1   :  { %8912 = vmatprep.subr.bf16.mxu0 %v12432_v1  ;;  %9084 = vmatprep.subr.bf16.mxu1 %v12435_v47  ;;  %v12501_v1 = vld [vmem:[#allocation21 + $0x46c] ss:$16 sps:$4 sm:$0xff]   ;;  %v12496_v47 = vld [vmem:[#allocation21 + $0x460] ss:$16 sps:$4 sm:$0xff]  }
 0xee4   :  { %8913 = vmatpush1.bf16.msra.mxu0 %v12430_v18  ;;  %9085 = vmatpush1.bf16.msra.mxu1 %v12433_v27  ;;  %v12504_v18 = vld [vmem:[#allocation21 + $0x484] ss:$16 sps:$4 sm:$0xff]   ;;  %v12507_v27 = vld [vmem:[#allocation21 + $0x48c] ss:$16 sps:$4 sm:$0xff]  }
 0xee5   :  { %8914 = vmatprep.subr.bf16.mxu0 %v12438_v21  ;;  %9086 = vmatprep.subr.bf16.mxu1 %v12441_v30  ;;  %v12502_v21 = vld [vmem:[#allocation21 + $0x480] ss:$16 sps:$4 sm:$0xff]   ;;  %v12505_v30 = vld [vmem:[#allocation21 + $0x488] ss:$16 sps:$4 sm:$0xff]  }
 0xee8   :  { %8915 = vmatpush1.bf16.msra.mxu0 %v12436_v37  ;;  %9087 = vmatpush1.bf16.msra.mxu1 %v12439_v2  ;;  %v12510_v37 = vld [vmem:[#allocation21 + $0x4a4] ss:$16 sps:$4 sm:$0xff]   ;;  %v12513_v2 = vld [vmem:[#allocation21 + $0x4ac] ss:$16 sps:$4 sm:$0xff]  }
 0xee9   :  { %8916 = vmatprep.subr.bf16.mxu0 %v12444_v12  ;;  %9088 = vmatprep.subr.bf16.mxu1 %v12447_v57  ;;  %v12508_v12 = vld [vmem:[#allocation21 + $0x4a0] ss:$16 sps:$4 sm:$0xff]   ;;  %v12511_v57 = vld [vmem:[#allocation21 + $0x4a8] ss:$16 sps:$4 sm:$0xff]  }
 0xeec   :  { %8917 = vmatpush1.bf16.msra.mxu0 %v12442_v36  ;;  %9089 = vmatpush1.bf16.msra.mxu1 %v12445_v29  ;;  %v12516_v36 = vld [vmem:[#allocation21 + $0x4c4] ss:$16 sps:$4 sm:$0xff]   ;;  %v12519_v29 = vld [vmem:[#allocation21 + $0x4cc] ss:$16 sps:$4 sm:$0xff]  }
 0xeed   :  { %8918 = vmatprep.subr.bf16.mxu0 %v12450_v39  ;;  %9090 = vmatprep.subr.bf16.mxu1 %v12453_v59  ;;  %v12514_v39 = vld [vmem:[#allocation21 + $0x4c0] ss:$16 sps:$4 sm:$0xff]   ;;  %v12517_v59 = vld [vmem:[#allocation21 + $0x4c8] ss:$16 sps:$4 sm:$0xff]  }
 0xef0   :  { %8919 = vmatpush1.bf16.msra.mxu0 %v12448_v45  ;;  %9091 = vmatpush1.bf16.msra.mxu1 %v12451_v48  ;;  %v12522_v45 = vld [vmem:[#allocation21 + $0x4e4] ss:$16 sps:$4 sm:$0xff]   ;;  %v12525_v48 = vld [vmem:[#allocation21 + $0x4ec] ss:$16 sps:$4 sm:$0xff]  }
 0xef1   :  { %8920 = vmatprep.subr.bf16.mxu0 %v12456_v35  ;;  %9092 = vmatprep.subr.bf16.mxu1 %v12459_v44  ;;  %v5498_v35 = vrot.slane %v14150_v31, %v797_v26  ;;  %v5506_v44 = vrot.slane %v14150_v31, %v805_v58  ;;  %v12528_v58 = vld [vmem:[#allocation21 + $0x504] ss:$16 sps:$4 sm:$0xff]  }
 0xef4   :  { %8921 = vmatpush1.bf16.msra.mxu0 %v12454_v49  ;;  %9093 = vmatpush1.bf16.msra.mxu1 %v12457_v32  ;;  %v5502_v49 = vrot.slane %v14150_v31, %v801_v28  ;;  %v5510_v32 = vrot.slane %v14150_v31, %v809_v43 }
 0xef5   :  { %8922 = vmatprep.subr.bf16.mxu0 %v12462_v51  ;;  %9094 = vmatprep.subr.bf16.mxu1 %v12465_v34  ;;  %v12520_v51 = vld [vmem:[#allocation21 + $0x4e0] ss:$16 sps:$4 sm:$0xff]   ;;  %v12523_v34 = vld [vmem:[#allocation21 + $0x4e8] ss:$16 sps:$4 sm:$0xff]  }
 0xef8   :  { %8923 = vmatpush1.bf16.msra.mxu0 %v12460_v16  ;;  %9095 = vmatpush1.bf16.msra.mxu1 %v12463_v3 }
 0xef9   :  { %8924 = vmatprep.subr.bf16.mxu0 %v12468_v0  ;;  %9096 = vmatprep.subr.bf16.mxu1 %v12471_v50 }
 0xefc   :  { %8925 = vmatpush1.bf16.msra.mxu0 %v12466_v15  ;;  %9097 = vmatpush1.bf16.msra.mxu1 %v12469_v14 }
 0xefd   :  { %8926 = vmatprep.subr.bf16.mxu0 %v12474_v42  ;;  %9098 = vmatprep.subr.bf16.mxu1 %v12477_v56  ;;  %v12531_v42 = vld [vmem:[#allocation21 + $0x50c] ss:$16 sps:$4 sm:$0xff]  }
 0xf00   :  { %8927 = vmatpush1.bf16.msra.mxu0 %v12472_v25  ;;  %9099 = vmatpush1.bf16.msra.mxu1 %v12475_v40 }
 0xf01   :  { %8939 = vmatprep.subr.bf16.mxu0 %v12480_v33  ;;  %9111 = vmatprep.subr.bf16.mxu1 %v12483_v20 }
 0xf03   :  { %8929 = vmatmul.mubr.bf16.vlgmr.msra.gmra.mrb[64].mxu0 %v14216_v55  ;;  %9101 = vmatmul.mubr.bf16.vlgmr.msra.gmra.mrb[52].mxu1 %v14216_v55  ;;  %v12499_v55 = vld [vmem:[#allocation21 + $0x468] ss:$16 sps:$4 sm:$0xff]  }
 0xf04   :  { %8940 = vmatpush1.bf16.msra.mxu0 %v12478_v17  ;;  %9112 = vmatpush1.bf16.msra.mxu1 %v12481_v7 }
 0xf05   :  { %8941 = vmatprep.subr.bf16.mxu0 %v12486_v52  ;;  %9113 = vmatprep.subr.bf16.mxu1 %v12489_v41  ;;  %v12526_v52 = vld [vmem:[#allocation21 + $0x500] ss:$16 sps:$4 sm:$0xff]   ;;  %v12529_v41 = vld [vmem:[#allocation21 + $0x508] ss:$16 sps:$4 sm:$0xff]  }
 0xf08   :  { %8942 = vmatpush1.bf16.msra.mxu0 %v12484_v38  ;;  %9114 = vmatpush1.bf16.msra.mxu1 %v12487_v8 }
 0xf09   :  { %8943 = vmatprep.subr.bf16.mxu0 %v12492_v9  ;;  %9115 = vmatprep.subr.bf16.mxu1 %v12495_v11 }
 0xf0c   :  { %8944 = vmatpush1.bf16.msra.mxu0 %v12490_v13  ;;  %9116 = vmatpush1.bf16.msra.mxu1 %v12493_v22  ;;  %v12534_v13 = vld [vmem:[#allocation21 + $0x524] ss:$16 sps:$4 sm:$0xff]   ;;  %v12537_v22 = vld [vmem:[#allocation21 + $0x52c] ss:$16 sps:$4 sm:$0xff]  }
 0xf0d   :  { %8945 = vmatprep.subr.bf16.mxu0 %v12498_v19  ;;  %9117 = vmatprep.subr.bf16.mxu1 %v12501_v1 }
 0xf10   :  { %8946 = vmatpush1.bf16.msra.mxu0 %v12496_v47  ;;  %9118 = vmatpush1.bf16.msra.mxu1 %v12499_v55 }
 0xf11   :  { %8947 = vmatprep.subr.bf16.mxu0 %v12504_v18  ;;  %9119 = vmatprep.subr.bf16.mxu1 %v12507_v27 }
 0xf14   :  { %8948 = vmatpush1.bf16.msra.mxu0 %v12502_v21  ;;  %9120 = vmatpush1.bf16.msra.mxu1 %v12505_v30 }
 0xf15   :  { %8949 = vmatprep.subr.bf16.mxu0 %v12510_v37  ;;  %9121 = vmatprep.subr.bf16.mxu1 %v12513_v2  ;;  %v12532_v37 = vld [vmem:[#allocation21 + $0x520] ss:$16 sps:$4 sm:$0xff]   ;;  %v12535_v2 = vld [vmem:[#allocation21 + $0x528] ss:$16 sps:$4 sm:$0xff]  }
 0xf18   :  { %8950 = vmatpush1.bf16.msra.mxu0 %v12508_v12  ;;  %9122 = vmatpush1.bf16.msra.mxu1 %v12511_v57 }
 0xf19   :  { %8951 = vmatprep.subr.bf16.mxu0 %v12516_v36  ;;  %9123 = vmatprep.subr.bf16.mxu1 %v12519_v29 }
 0xf1c   :  { %8952 = vmatpush1.bf16.msra.mxu0 %v12514_v39  ;;  %9124 = vmatpush1.bf16.msra.mxu1 %v12517_v59  ;;  %v7048_v16 = vpop.f32.mrb[60].mxu0  ;;  %v12540_v39 = vld [vmem:[#allocation21 + $0x544] ss:$16 sps:$4 sm:$0xff]  }
 0xf1d   :  { %8953 = vmatprep.subr.bf16.mxu0 %v12522_v45  ;;  %9125 = vmatprep.subr.bf16.mxu1 %v12525_v48  ;;  %v14232_v26 = vadd.f32 %v7048_v16, %v5498_v35  ;;  %v7134_v3 = vpop.f32.mrb[48].mxu1  ;;  %v7050_v0 = vpop.f32.mrb[61].mxu0  ;;  %v12538_v16 = vld [vmem:[#allocation21 + $0x540] ss:$16 sps:$4 sm:$0xff]  }
 0xf1e   :  { %v14234_v50 = vadd.f32 %v7134_v3, %v5506_v44  ;;  %v14236_v15 = vadd.f32 %v7050_v0, %v5502_v49  ;;  %v7136_v28 = vpop.f32.mrb[49].mxu1  ;;  %v7052_v14 = vpop.f32.mrb[62].mxu0  ;;  %v12541_v3 = vld [vmem:[#allocation21 + $0x548] ss:$16 sps:$4 sm:$0xff]  }
 0xf1f   :  { %v7147_v43 = vmul.f32 %v14232_v26, %v14232_v26  ;;  %v14240_v31 = vadd.f32 %v7136_v28, %v5510_v32  ;;  %v14242_v56 = vadd.f32 %v7052_v14, %v5498_v35  ;;  %v7138_v25 = vpop.f32.mrb[50].mxu1  ;;  %v7054_v40 = vpop.f32.mrb[63].mxu0 }
 0xf20   :  { %v7149_v33 = vmul.f32 %v14234_v50, %v14234_v50  ;;  %8954 = vmatpush1.bf16.msra.mxu0 %v12520_v51  ;;  %9126 = vmatpush1.bf16.msra.mxu1 %v12523_v34  ;;  %v7148_v20 = vmul.f32 %v14236_v15, %v14236_v15  ;;  %v14248_v17 = vadd.f32 %v7138_v25, %v5506_v44  ;;  %v7140_v7 = vpop.f32.mrb[51].mxu1  ;;  %v12543_v44 = vld [vmem:[#allocation21 + $0x54c] ss:$16 sps:$4 sm:$0xff]  }
 0xf21   :  { %v7163_v38 = vmul.f32 %v14232_v26, %v7147_v43  ;;  %v7150_v8 = vmul.f32 %v14240_v31, %v14240_v31  ;;  %v7155_v9 = vmul.f32 %v14242_v56, %v14242_v56  ;;  %v14255_v11 = vadd.f32 %v7054_v40, %v5502_v49  ;;  %8955 = vmatprep.subr.bf16.mxu0 %v12528_v58 }
 0xf22   :  { %v7165_v19 = vmul.f32 %v14234_v50, %v7149_v33  ;;  %v7164_v1 = vmul.f32 %v14236_v15, %v7148_v20  ;;  %v7157_v47 = vmul.f32 %v14248_v17, %v14248_v17  ;;  %v14261_v55 = vadd.f32 %v7140_v7, %v5510_v32  ;;  %9127 = vmatprep.subr.bf16.mxu1 %v12531_v42  ;;  %v12546_v42 = vld [vmem:[#allocation21 + $0x564] ss:$16 sps:$4 sm:$0xff]  }
 0xf23   :  { %v7179_v18 = vmul.f32 0.044715, %v7163_v38  ;;  %v7166_v27 = vmul.f32 %v14240_v31, %v7150_v8  ;;  %v7171_v21 = vmul.f32 %v14242_v56, %v7155_v9  ;;  %v7156_v30 = vmul.f32 %v14255_v11, %v14255_v11 }
 0xf24   :  { %v7181_v12 = vmul.f32 0.044715, %v7165_v19  ;;  %v7180_v57 = vmul.f32 0.044715, %v7164_v1  ;;  %v7173_v36 = vmul.f32 %v14248_v17, %v7157_v47  ;;  %v7158_v29 = vmul.f32 %v14261_v55, %v14261_v55  ;;  %8956 = vmatpush1.bf16.msra.mxu0 %v12526_v52  ;;  %9128 = vmatpush1.bf16.msra.mxu1 %v12529_v41  ;;  %v12549_v41 = vld [vmem:[#allocation21 + $0x56c] ss:$16 sps:$4 sm:$0xff]  }
 0xf25   :  { %v7195_v59 = vadd.f32 %v14232_v26, %v7179_v18  ;;  %v7182_v45 = vmul.f32 0.044715, %v7166_v27  ;;  %v7187_v48 = vmul.f32 0.044715, %v7171_v21  ;;  %v7172_v35 = vmul.f32 %v14255_v11, %v7156_v30  ;;  %8957 = vmatprep.subr.bf16.mxu0 %v12534_v13  ;;  %9129 = vmatprep.subr.bf16.mxu1 %v12537_v22  ;;  %v12544_v22 = vld [vmem:[#allocation21 + $0x560] ss:$16 sps:$4 sm:$0xff]  }
 0xf26   :  { %v7197_v49 = vadd.f32 %v14234_v50, %v7181_v12  ;;  %v7196_v32 = vadd.f32 %v14236_v15, %v7180_v57  ;;  %v7189_v51 = vmul.f32 0.044715, %v7173_v36  ;;  %v7174_v34 = vmul.f32 %v14261_v55, %v7158_v29  ;;  %v12547_v19 = vld [vmem:[#allocation21 + $0x568] ss:$16 sps:$4 sm:$0xff]   ;;  %v12552_v1 = vld [vmem:[#allocation21 + $0x584] ss:$16 sps:$4 sm:$0xff]  }
 0xf27   :  { %v7211_v0 = vmul.f32 0.7978846, %v7195_v59  ;;  %v7198_v58 = vadd.f32 %v14240_v31, %v7182_v45  ;;  %v7203_v28 = vadd.f32 %v14242_v56, %v7187_v48  ;;  %v7188_v14 = vmul.f32 0.044715, %v7172_v35  ;;  %v12555_v47 = vld [vmem:[#allocation21 + $0x58c] ss:$16 sps:$4 sm:$0xff]  }
 0xf28   :  { %v7213_v43 = vmul.f32 0.7978846, %v7197_v49  ;;  %v7212_v25 = vmul.f32 0.7978846, %v7196_v32  ;;  %v7205_v40 = vadd.f32 %v14248_v17, %v7189_v51  ;;  %v7190_v33 = vmul.f32 0.044715, %v7174_v34  ;;  %8958 = vmatpush1.bf16.msra.mxu0 %v12532_v37  ;;  %9130 = vmatpush1.bf16.msra.mxu1 %v12535_v2 }
 0xf29   :  { %12838 = vtanh.f32 %v7211_v0  ;;  %v7214_v20 = vmul.f32 0.7978846, %v7198_v58  ;;  %v7219_v7 = vmul.f32 0.7978846, %v7203_v28  ;;  %v7204_v52 = vadd.f32 %v14255_v11, %v7188_v14  ;;  %8959 = vmatprep.subr.bf16.mxu0 %v12540_v39  ;;  %9131 = vmatprep.subr.bf16.mxu1 %v12543_v44  ;;  %v12550_v18 = vld [vmem:[#allocation21 + $0x580] ss:$16 sps:$4 sm:$0xff]  }
 0xf2a   :  { %12840 = vtanh.f32 %v7213_v43  ;;  %v7221_v38 = vmul.f32 0.7978846, %v7205_v40  ;;  %v7206_v8 = vadd.f32 %v14261_v55, %v7190_v33  ;;  %v12553_v27 = vld [vmem:[#allocation21 + $0x588] ss:$16 sps:$4 sm:$0xff]   ;;  %v12558_v21 = vld [vmem:[#allocation21 + $0x5a4] ss:$16 sps:$4 sm:$0xff]  }
 0xf2b   :  { %12842 = vtanh.f32 %v7212_v25  ;;  %v7220_v9 = vmul.f32 0.7978846, %v7204_v52  ;;  %v12561_v30 = vld [vmem:[#allocation21 + $0x5ac] ss:$16 sps:$4 sm:$0xff]   ;;  %v12556_v57 = vld [vmem:[#allocation21 + $0x5a0] ss:$16 sps:$4 sm:$0xff]  }
 0xf2c   :  { %12844 = vtanh.f32 %v7214_v20  ;;  %v7222_v13 = vmul.f32 0.7978846, %v7206_v8  ;;  %8960 = vmatpush1.bf16.msra.mxu0 %v12538_v16  ;;  %9132 = vmatpush1.bf16.msra.mxu1 %v12541_v3  ;;  %v12559_v36 = vld [vmem:[#allocation21 + $0x5a8] ss:$16 sps:$4 sm:$0xff]   ;;  %v12564_v59 = vld [vmem:[#allocation21 + $0x5c4] ss:$16 sps:$4 sm:$0xff]  }
 0xf2d   :  { %12846 = vtanh.f32 %v7219_v7  ;;  %8961 = vmatprep.subr.bf16.mxu0 %v12546_v42  ;;  %9133 = vmatprep.subr.bf16.mxu1 %v12549_v41  ;;  %v12567_v45 = vld [vmem:[#allocation21 + $0x5cc] ss:$16 sps:$4 sm:$0xff]   ;;  %v12562_v16 = vld [vmem:[#allocation21 + $0x5c0] ss:$16 sps:$4 sm:$0xff]   ;;  %v12565_v3 = vld [vmem:[#allocation21 + $0x5c8] ss:$16 sps:$4 sm:$0xff]  }
 0xf2e   :  { %12848 = vtanh.f32 %v7221_v38  ;;  %v12570_v14 = vld [vmem:[#allocation21 + $0x5e4] ss:$16 sps:$4 sm:$0xff]   ;;  %v12573_v42 = vld [vmem:[#allocation21 + $0x5ec] ss:$16 sps:$4 sm:$0xff]   ;;  %v12568_v8 = vld [vmem:[#allocation21 + $0x5e0] ss:$16 sps:$4 sm:$0xff]  }
 0xf2f   :  { %12850 = vtanh.f32 %v7220_v9  ;;  %v12571_v9 = vld [vmem:[#allocation21 + $0x5e8] ss:$16 sps:$4 sm:$0xff]  }
 0xf30   :  { %12852 = vtanh.f32 %v7222_v13  ;;  %8962 = vmatpush1.bf16.msra.mxu0 %v12544_v22  ;;  %9134 = vmatpush1.bf16.msra.mxu1 %v12547_v19 }
 0xf31   :  { %8963 = vmatprep.subr.bf16.mxu0 %v12552_v1  ;;  %9135 = vmatprep.subr.bf16.mxu1 %v12555_v47  ;;  %v12576_v1 = vld [vmem:[#allocation21 + $0x604] ss:$16 sps:$4 sm:$0xff]   ;;  %v12579_v47 = vld [vmem:[#allocation21 + $0x60c] ss:$16 sps:$4 sm:$0xff]  }
 0xf33   :  { %v12839_v37 = vpop.eup %12838 }
 0xf34   :  { %v12841_v2 = vpop.eup %12840  ;;  %v7243_v12 = vadd.f32 1.0, %v12839_v37  ;;  %8964 = vmatpush1.bf16.msra.mxu0 %v12550_v18  ;;  %9136 = vmatpush1.bf16.msra.mxu1 %v12553_v27 }
 0xf35   :  { %v12843_v29 = vpop.eup %12842  ;;  %v7245_v39 = vadd.f32 1.0, %v12841_v2  ;;  %8965 = vmatprep.subr.bf16.mxu0 %v12558_v21  ;;  %9137 = vmatprep.subr.bf16.mxu1 %v12561_v30  ;;  %v12577_v2 = vld [vmem:[#allocation21 + $0x608] ss:$16 sps:$4 sm:$0xff]  }
 0xf36   :  { %v12845_v48 = vpop.eup %12844  ;;  %v7244_v35 = vadd.f32 1.0, %v12843_v29  ;;  %v7259_v51 = vmul.f32 0.5, %v7243_v12  ;;  %v12586_v29 = vld [vmem:[#allocation21 + $0x640] ss:$16 sps:$4 sm:$0xff]  }
 0xf37   :  { %v12847_v44 = vpop.eup %12846  ;;  %v7246_v49 = vadd.f32 1.0, %v12845_v48  ;;  %v7261_v58 = vmul.f32 0.5, %v7245_v39  ;;  %v12589_v39 = vld [vmem:[#allocation21 + $0x648] ss:$16 sps:$4 sm:$0xff]   ;;  %v12592_v48 = vld [vmem:[#allocation21 + $0x660] ss:$16 sps:$4 sm:$0xff]  }
 0xf38   :  { %v12849_v32 = vpop.eup %12848  ;;  %v7251_v34 = vadd.f32 1.0, %v12847_v44  ;;  %8966 = vmatpush1.bf16.msra.mxu0 %v12556_v57  ;;  %9138 = vmatpush1.bf16.msra.mxu1 %v12559_v36  ;;  %v7260_v33 = vmul.f32 0.5, %v7244_v35  ;;  %v7275_v41 = vmul.f32 %v14232_v26, %v7259_v51  ;;  %v12585_v57 = vld [vmem:[#allocation21 + $0x62c] ss:$16 sps:$4 sm:$0xff]   ;;  %v12595_v35 = vld [vmem:[#allocation21 + $0x668] ss:$16 sps:$4 sm:$0xff]  }
 0xf39   :  { %v12851_v0 = vpop.eup %12850  ;;  %v7253_v28 = vadd.f32 1.0, %v12849_v32  ;;  %8967 = vmatprep.subr.bf16.mxu0 %v12564_v59  ;;  %9139 = vmatprep.subr.bf16.mxu1 %v12567_v45  ;;  %v7262_v52 = vmul.f32 0.5, %v7246_v49  ;;  %v7277_v22 = vmul.f32 %v14234_v50, %v7261_v58  ;;  %v12591_v36 = vld [vmem:[#allocation21 + $0x64c] ss:$16 sps:$4 sm:$0xff]   ;;  %v12594_v59 = vld [vmem:[#allocation21 + $0x664] ss:$16 sps:$4 sm:$0xff]  }
 0xf3a   :  { %v12853_v43 = vpop.eup %12852  ;;  %v7267_v25 = vmul.f32 0.5, %v7251_v34  ;;  %v7252_v40 = vadd.f32 1.0, %v12851_v0  ;;  %v7276_v27 = vmul.f32 %v14236_v15, %v7260_v33  ;;  %v12582_v15 = vld [vmem:[#allocation21 + $0x624] ss:$16 sps:$4 sm:$0xff]   ;;  %v12597_v45 = vld [vmem:[#allocation21 + $0x66c] ss:$16 sps:$4 sm:$0xff]  }
 0xf3b   :  { %v7269_v20 = vmul.f32 0.5, %v7253_v28  ;;  %v7254_v7 = vadd.f32 1.0, %v12853_v43  ;;  %v12600_v44 = vld [vmem:[#allocation21 + $0x684] ss:$16 sps:$4 sm:$0xff]   ;;  %v12603_v49 = vld [vmem:[#allocation21 + $0x68c] ss:$16 sps:$4 sm:$0xff]  }
 0xf3c   :  { %v7283_v38 = vmul.f32 %v14242_v56, %v7267_v25  ;;  %8968 = vmatpush1.bf16.msra.mxu0 %v12562_v16  ;;  %9140 = vmatpush1.bf16.msra.mxu1 %v12565_v3  ;;  %v7268_v13 = vmul.f32 0.5, %v7252_v40  ;;  %v7278_v56 = vmul.f32 %v14240_v31, %v7262_v52  ;;  %v12580_v31 = vld [vmem:[#allocation21 + $0x620] ss:$16 sps:$4 sm:$0xff]   ;;  %v12601_v51 = vld [vmem:[#allocation21 + $0x688] ss:$16 sps:$4 sm:$0xff]  }
 0xf3d   :  { %v7285_v19 = vmul.f32 %v14248_v17, %v7269_v20  ;;  %8969 = vmatprep.subr.bf16.mxu0 %v12570_v14  ;;  %9141 = vmatprep.subr.bf16.mxu1 %v12573_v42  ;;  %v7270_v18 = vmul.f32 0.5, %v7254_v7  ;;  %v12574_v17 = vld [vmem:[#allocation21 + $0x600] ss:$16 sps:$4 sm:$0xff]   ;;  %v12606_v34 = vld [vmem:[#allocation21 + $0x6a4] ss:$16 sps:$4 sm:$0xff]  }
 0xf3e   :  { %v7284_v26 = vmul.f32 %v14255_v11, %v7268_v13  ;;  %v7291_v21 = vpack.c.bf16 %v7283_v38, %v7275_v41  ;;  %v12583_v11 = vld [vmem:[#allocation21 + $0x628] ss:$16 sps:$4 sm:$0xff]   ;;  %v12598_v32 = vld [vmem:[#allocation21 + $0x680] ss:$16 sps:$4 sm:$0xff]   ;;  %v12609_v16 = vld [vmem:[#allocation21 + $0x6ac] ss:$16 sps:$4 sm:$0xff]  }
 0xf3f   :  { %v7286_v30 = vmul.f32 %v14261_v55, %v7270_v18  ;;  %v14288_v37 = vpack.c.bf16 %v7285_v19, %v7277_v22  ;;  %v12588_v55 = vld [vmem:[#allocation21 + $0x644] ss:$16 sps:$4 sm:$0xff]   ;;  %v12604_v3 = vld [vmem:[#allocation21 + $0x6a0] ss:$16 sps:$4 sm:$0xff]   ;;  %v12607_v0 = vld [vmem:[#allocation21 + $0x6a8] ss:$16 sps:$4 sm:$0xff]  }
 0xf40   :  { %8970 = vmatpush1.bf16.msra.mxu0 %v12568_v8  ;;  %9142 = vmatpush1.bf16.msra.mxu1 %v12571_v9  ;;  %v7292_v50 = vpack.c.bf16 %v7284_v26, %v7276_v27  ;;  %v12612_v58 = vld [vmem:[#allocation21 + $0x6c4] ss:$16 sps:$4 sm:$0xff]   ;;  %v12615_v28 = vld [vmem:[#allocation21 + $0x6cc] ss:$16 sps:$4 sm:$0xff]   ;;  %v12610_v14 = vld [vmem:[#allocation21 + $0x6c0] ss:$16 sps:$4 sm:$0xff]  }
 0xf41   :  { %8982 = vmatprep.subr.bf16.mxu0 %v12576_v1  ;;  %9154 = vmatprep.subr.bf16.mxu1 %v12579_v47  ;;  %v7294_v12 = vpack.c.bf16 %v7286_v30, %v7278_v56  ;;  %v12613_v42 = vld [vmem:[#allocation21 + $0x6c8] ss:$16 sps:$4 sm:$0xff]   ;;  %v12618_v43 = vld [vmem:[#allocation21 + $0x6e4] ss:$16 sps:$4 sm:$0xff]   ;;  %v12621_v25 = vld [vmem:[#allocation21 + $0x6ec] ss:$16 sps:$4 sm:$0xff]  }
 0xf42   :  { %8971 = vmatprep.mubr.bf16.mxu0 %v7292_v50  ;;  %9143 = vmatprep.mubr.bf16.mxu1 %v7292_v50  ;;  %v12616_v40 = vld [vmem:[#allocation21 + $0x6e0] ss:$16 sps:$4 sm:$0xff]   ;;  %v12619_v33 = vld [vmem:[#allocation21 + $0x6e8] ss:$16 sps:$4 sm:$0xff]   ;;  %v12624_v20 = vld [vmem:[#allocation21 + $0x704] ss:$16 sps:$4 sm:$0xff]  }
 0xf43   :  { %8972 = vmatmul.mubr.bf16.vlgmr.msra.gmra.mrb[64].mxu0 %v7291_v21  ;;  %9144 = vmatmul.mubr.bf16.vlgmr.msra.gmra.mrb[52].mxu1 %v7291_v21  ;;  %v12627_v7 = vld [vmem:[#allocation21 + $0x70c] ss:$16 sps:$4 sm:$0xff]   ;;  %v12622_v52 = vld [vmem:[#allocation21 + $0x700] ss:$16 sps:$4 sm:$0xff]   ;;  %v12625_v41 = vld [vmem:[#allocation21 + $0x708] ss:$16 sps:$4 sm:$0xff]  }
 0xf44   :  { %8983 = vmatpush1.bf16.msra.mxu0 %v12574_v17  ;;  %9155 = vmatpush1.bf16.msra.mxu1 %v12577_v2  ;;  %v12630_v38 = vld [vmem:[#allocation21 + $0x724] ss:$16 sps:$4 sm:$0xff]   ;;  %v12633_v8 = vld [vmem:[#allocation21 + $0x72c] ss:$16 sps:$4 sm:$0xff]   ;;  %v12628_v9 = vld [vmem:[#allocation21 + $0x720] ss:$16 sps:$4 sm:$0xff]  }
 0xf45   :  { %9014 = vmatprep.mubr.bf16.mxu0 %v7294_v12  ;;  %9186 = vmatprep.mubr.bf16.mxu1 %v7294_v12  ;;  %v12631_v13 = vld [vmem:[#allocation21 + $0x728] ss:$16 sps:$4 sm:$0xff]   ;;  %v12636_v22 = vld [vmem:[#allocation21 + $0x744] ss:$16 sps:$4 sm:$0xff]   ;;  %v12639_v19 = vld [vmem:[#allocation21 + $0x74c] ss:$16 sps:$4 sm:$0xff]  }
 0xf46   :  { %8984 = vmatprep.subr.bf16.mxu0 %v12582_v15  ;;  %9156 = vmatprep.subr.bf16.mxu1 %v12585_v57  ;;  %v12634_v1 = vld [vmem:[#allocation21 + $0x740] ss:$16 sps:$4 sm:$0xff]   ;;  %v12637_v47 = vld [vmem:[#allocation21 + $0x748] ss:$16 sps:$4 sm:$0xff]   ;;  %v12642_v18 = vld [vmem:[#allocation21 + $0x764] ss:$16 sps:$4 sm:$0xff]  }
 0xf47   :  { %v12645_v27 = vld [vmem:[#allocation21 + $0x76c] ss:$16 sps:$4 sm:$0xff]   ;;  %v12640_v26 = vld [vmem:[#allocation21 + $0x760] ss:$16 sps:$4 sm:$0xff]   ;;  %v12643_v21 = vld [vmem:[#allocation21 + $0x768] ss:$16 sps:$4 sm:$0xff]  }
 0xf48   :  { %8985 = vmatpush1.bf16.msra.mxu0 %v12580_v31  ;;  %9157 = vmatpush1.bf16.msra.mxu1 %v12583_v11  ;;  %v12648_v56 = vld [vmem:[#allocation21 + $0x784] ss:$16 sps:$4 sm:$0xff]   ;;  %v12651_v30 = vld [vmem:[#allocation21 + $0x78c] ss:$16 sps:$4 sm:$0xff]   ;;  %v12646_v50 = vld [vmem:[#allocation21 + $0x780] ss:$16 sps:$4 sm:$0xff]  }
 0xf49   :  { %8986 = vmatprep.subr.bf16.mxu0 %v12588_v55  ;;  %9158 = vmatprep.subr.bf16.mxu1 %v12591_v36  ;;  %v12649_v17 = vld [vmem:[#allocation21 + $0x788] ss:$16 sps:$4 sm:$0xff]   ;;  %v12654_v2 = vld [vmem:[#allocation21 + $0x7a4] ss:$16 sps:$4 sm:$0xff]   ;;  %v12657_v12 = vld [vmem:[#allocation21 + $0x7ac] ss:$16 sps:$4 sm:$0xff]  }
 0xf4a   :  { %v12652_v15 = vld [vmem:[#allocation21 + $0x7a0] ss:$16 sps:$4 sm:$0xff]   ;;  %v12655_v57 = vld [vmem:[#allocation21 + $0x7a8] ss:$16 sps:$4 sm:$0xff]   ;;  %v12660_v31 = vld [vmem:[#allocation21 + $0x7c4] ss:$16 sps:$4 sm:$0xff]  }
 0xf4b   :  { %v12663_v11 = vld [vmem:[#allocation21 + $0x7cc] ss:$16 sps:$4 sm:$0xff]   ;;  %v12658_v55 = vld [vmem:[#allocation21 + $0x7c0] ss:$16 sps:$4 sm:$0xff]   ;;  %v12661_v36 = vld [vmem:[#allocation21 + $0x7c8] ss:$16 sps:$4 sm:$0xff]  }
 0xf4c   :  { %8987 = vmatpush1.bf16.msra.mxu0 %v12586_v29  ;;  %9159 = vmatpush1.bf16.msra.mxu1 %v12589_v39  ;;  %v12666_v29 = vld [vmem:[#allocation21 + $0x7e4] ss:$16 sps:$4 sm:$0xff]   ;;  %v12669_v39 = vld [vmem:[#allocation21 + $0x7ec] ss:$16 sps:$4 sm:$0xff]  }
 0xf4d   :  { %8988 = vmatprep.subr.bf16.mxu0 %v12594_v59  ;;  %9160 = vmatprep.subr.bf16.mxu1 %v12597_v45  ;;  %v12664_v59 = vld [vmem:[#allocation21 + $0x7e0] ss:$16 sps:$4 sm:$0xff]   ;;  %v12667_v45 = vld [vmem:[#allocation21 + $0x7e8] ss:$16 sps:$4 sm:$0xff]  }
 0xf50   :  { %8989 = vmatpush1.bf16.msra.mxu0 %v12592_v48  ;;  %9161 = vmatpush1.bf16.msra.mxu1 %v12595_v35  ;;  %v7551_v48 = vld [vmem:[#allocation22] sm:$0xf] }
 0xf51   :  { %8990 = vmatprep.subr.bf16.mxu0 %v12600_v44  ;;  %9162 = vmatprep.subr.bf16.mxu1 %v12603_v49  ;;  %v7556_v35 = vrot.slane %v7551_v48, %v13704_v62  ;;  %v7564_v44 = vrot.slane %v7551_v48, %v13707_v63  ;;  %v7560_v49 = vrot.slane %v7551_v48, %v13698_v60 }
 0xf54   :  { %8991 = vmatpush1.bf16.msra.mxu0 %v12598_v32  ;;  %9163 = vmatpush1.bf16.msra.mxu1 %v12601_v51 }
 0xf55   :  { %8992 = vmatprep.subr.bf16.mxu0 %v12606_v34  ;;  %9164 = vmatprep.subr.bf16.mxu1 %v12609_v16  ;;  %v7568_v34 = vrot.slane %v7551_v48, %v13701_v61 }
 0xf58   :  { %8993 = vmatpush1.bf16.msra.mxu0 %v12604_v3  ;;  %9165 = vmatpush1.bf16.msra.mxu1 %v12607_v0 }
 0xf59   :  { %8994 = vmatprep.subr.bf16.mxu0 %v12612_v58  ;;  %9166 = vmatprep.subr.bf16.mxu1 %v12615_v28 }
 0xf5c   :  { %8995 = vmatpush1.bf16.msra.mxu0 %v12610_v14  ;;  %9167 = vmatpush1.bf16.msra.mxu1 %v12613_v42 }
 0xf5d   :  { %8996 = vmatprep.subr.bf16.mxu0 %v12618_v43  ;;  %9168 = vmatprep.subr.bf16.mxu1 %v12621_v25 }
 0xf60   :  { %8997 = vmatpush1.bf16.msra.mxu0 %v12616_v40  ;;  %9169 = vmatpush1.bf16.msra.mxu1 %v12619_v33 }
 0xf61   :  { %8998 = vmatprep.subr.bf16.mxu0 %v12624_v20  ;;  %9170 = vmatprep.subr.bf16.mxu1 %v12627_v7 }
 0xf64   :  { %8999 = vmatpush1.bf16.msra.mxu0 %v12622_v52  ;;  %9171 = vmatpush1.bf16.msra.mxu1 %v12625_v41 }
 0xf65   :  { %9000 = vmatprep.subr.bf16.mxu0 %v12630_v38  ;;  %9172 = vmatprep.subr.bf16.mxu1 %v12633_v8 }
 0xf68   :  { %9001 = vmatpush1.bf16.msra.mxu0 %v12628_v9  ;;  %9173 = vmatpush1.bf16.msra.mxu1 %v12631_v13 }
 0xf69   :  { %9002 = vmatprep.subr.bf16.mxu0 %v12636_v22  ;;  %9174 = vmatprep.subr.bf16.mxu1 %v12639_v19 }
 0xf6c   :  { %9003 = vmatpush1.bf16.msra.mxu0 %v12634_v1  ;;  %9175 = vmatpush1.bf16.msra.mxu1 %v12637_v47 }
 0xf6d   :  { %9004 = vmatprep.subr.bf16.mxu0 %v12642_v18  ;;  %9176 = vmatprep.subr.bf16.mxu1 %v12645_v27 }
 0xf70   :  { %9005 = vmatpush1.bf16.msra.mxu0 %v12640_v26  ;;  %9177 = vmatpush1.bf16.msra.mxu1 %v12643_v21  ;;  %v12672_v26 = vld [vmem:[#allocation27 + $0x4] ss:$8 sps:$4 sm:$0xff]  }
 0xf71   :  { %9006 = vmatprep.subr.bf16.mxu0 %v12648_v56  ;;  %9178 = vmatprep.subr.bf16.mxu1 %v12651_v30  ;;  %v12678_v21 = vld [vmem:[#allocation27 + $0x24] ss:$8 sps:$4 sm:$0xff]   ;;  %v12679_v56 = vld [vmem:[#allocation27 + $0x30] ss:$8 sps:$4 sm:$0xff]   ;;  %v12682_v30 = vld [vmem:[#allocation27 + $0x40] ss:$8 sps:$4 sm:$0xff]  }
 0xf74   :  { %9007 = vmatpush1.bf16.msra.mxu0 %v12646_v50  ;;  %9179 = vmatpush1.bf16.msra.mxu1 %v12649_v17  ;;  %v12687_v50 = vld [vmem:[#allocation27 + $0x54] ss:$8 sps:$4 sm:$0xff]   ;;  %v12685_v17 = vld [vmem:[#allocation27 + $0x50] ss:$8 sps:$4 sm:$0xff]  }
 0xf75   :  { %9008 = vmatprep.subr.bf16.mxu0 %v12654_v2  ;;  %9180 = vmatprep.subr.bf16.mxu1 %v12657_v12 }
 0xf78   :  { %9009 = vmatpush1.bf16.msra.mxu0 %v12652_v15  ;;  %9181 = vmatpush1.bf16.msra.mxu1 %v12655_v57 }
 0xf79   :  { %9010 = vmatprep.subr.bf16.mxu0 %v12660_v31  ;;  %9182 = vmatprep.subr.bf16.mxu1 %v12663_v11 }
 0xf7c   :  { %9011 = vmatpush1.bf16.msra.mxu0 %v12658_v55  ;;  %9183 = vmatpush1.bf16.msra.mxu1 %v12661_v36 }
 0xf7d   :  { %9012 = vmatprep.subr.bf16.mxu0 %v12666_v29  ;;  %9184 = vmatprep.subr.bf16.mxu1 %v12669_v39 }
 0xf80   :  { %9013 = vmatpush1.bf16.msra.mxu0 %v12664_v59  ;;  %9185 = vmatpush1.bf16.msra.mxu1 %v12667_v45 }
 0xf81   :  { %9779 = vmatprep.subr.bf16.mxu0 %v12672_v26  ;;  %v12767_v26 = vld [vmem:[%s14448_s18] sm:$0xff]  }
 0xf83   :  { %9015 = vmatmul.mubr.bf16.vlgmr.msra.gmra.mrb[64].mxu0 %v14288_v37  ;;  %9187 = vmatmul.mubr.bf16.vlgmr.msra.gmra.mrb[52].mxu1 %v14288_v37 }
0x1056   :  { %v9016_v32 = vpop.f32.mrb[64].mxu0  ;;  %v9188_v51 = vpop.f32.mrb[52].mxu1 }
0x1057   :  { %v11407_v16 = vadd.f32 %v9016_v32, %v7556_v35  ;;  %v9018_v3 = vpop.f32.mrb[65].mxu0  ;;  %v9190_v0 = vpop.f32.mrb[53].mxu1  ;;  %v11411_v58 = vadd.f32 %v9188_v51, %v7564_v44 }
0x1058   :  { %v11408_v28 = vadd.f32 %v9018_v3, %v7560_v49  ;;  %v9020_v14 = vpop.f32.mrb[66].mxu0  ;;  %v9192_v42 = vpop.f32.mrb[54].mxu1  ;;  %v11412_v20 = vadd.f32 %v9190_v0, %v7568_v34 }
0x1059   :  { %v9197_v37 = vadd.f32 %v11407_v16, %v14003_v5  ;;  %v11409_v43 = vadd.f32 %v9020_v14, %v7556_v35  ;;  %v9022_v25 = vpop.f32.mrb[67].mxu0  ;;  %v9194_v40 = vpop.f32.mrb[55].mxu1  ;;  %v11413_v7 = vadd.f32 %v9192_v42, %v7564_v44  ;;  %v9199_v38 = vadd.f32 %v11411_v58, %v14018_v23  ;;  %v12675_v23 = vld [vmem:[#allocation27 + $0x14] ss:$8 sps:$4 sm:$0xff]  }
0x105a   :  { %v9198_v33 = vadd.f32 %v11408_v28, %v14008_v24  ;;  %v11410_v52 = vadd.f32 %v9022_v25, %v7560_v49  ;;  %v11414_v13 = vadd.f32 %v9194_v40, %v7568_v34  ;;  %v9200_v22 = vadd.f32 %v11412_v20, %v14030_v53  ;;  %v12676_v53 = vld [vmem:[#allocation27 + $0x20] ss:$8 sps:$4 sm:$0xff]   ;;  %v12693_v25 = vld [vmem:[#allocation27 + $0x74] ss:$8 sps:$4 sm:$0xff]   ;;  %v12691_v40 = vld [vmem:[#allocation27 + $0x70] ss:$8 sps:$4 sm:$0xff]  }
0x105b   :  { %v9201_v41 = vadd.f32 %v11409_v43, %v14013_v4  ;;  %v9203_v5 = vadd.f32 %v11413_v7, %v14035_v6  ;;  %v12670_v4 = vld [vmem:[#allocation27] ss:$8 sps:$4 sm:$0xff]   ;;  %v12681_v6 = vld [vmem:[#allocation27 + $0x34] ss:$8 sps:$4 sm:$0xff]   ;;  %v12696_v20 = vld [vmem:[#allocation27 + $0x84] ss:$8 sps:$4 sm:$0xff]  }
0x105c   :  { %v9205_v8 = vadd.f32 %v9198_v33, %v9197_v37  ;;  %v9202_v9 = vadd.f32 %v11410_v52, %v14023_v46  ;;  %v9204_v47 = vadd.f32 %v11414_v13, %v14043_v10  ;;  %9780 = vmatpush1.bf16.msra.mxu0 %v12670_v4  ;;  %v12673_v46 = vld [vmem:[#allocation27 + $0x10] ss:$8 sps:$4 sm:$0xff]   ;;  %v12684_v10 = vld [vmem:[#allocation27 + $0x44] ss:$8 sps:$4 sm:$0xff]   ;;  %v12688_v43 = vld [vmem:[#allocation27 + $0x60] ss:$8 sps:$4 sm:$0xff]  }
0x105d   :  { %9781 = vmatprep.subr.bf16.mxu0 %v12675_v23  ;;  %v12699_v7 = vld [vmem:[#allocation27 + $0x94] ss:$8 sps:$4 sm:$0xff]   ;;  %v12697_v52 = vld [vmem:[#allocation27 + $0x90] ss:$8 sps:$4 sm:$0xff]   ;;  %v12708_v13 = vld [vmem:[#allocation27 + $0xc4] ss:$8 sps:$4 sm:$0xff]  }
0x105e   :  { %v9210_v19 = vadd.f32 %v9202_v9, %v9201_v41  ;;  %v9206_v1 = vadd.f32 %v9205_v8, %v9199_v38  ;;  %v12705_v8 = vld [vmem:[#allocation27 + $0xb4] ss:$8 sps:$4 sm:$0xff]   ;;  %v12766_v4 = vld [vmem:[%s14448_s18 + $0x40] sm:$0xff]  }
0x105f   :  { %v12768_v23 = vld [vmem:[%s14448_s18 + $0x48] sm:$0xff]   ;;  %11237 = vmatprep.subr.bf16.mxu1 %v12766_v4 }
0x1060   :  { %v9207_v24 = vadd.f32 %v9206_v1, %v9200_v22  ;;  %v9211_v18 = vadd.f32 %v9210_v19, %v9203_v5  ;;  %9782 = vmatpush1.bf16.msra.mxu0 %v12673_v46  ;;  %v12709_v19 = vld [vmem:[#allocation27 + $0xd0] ss:$8 sps:$4 sm:$0xff]   ;;  %v12714_v1 = vld [vmem:[#allocation27 + $0xe4] ss:$8 sps:$4 sm:$0xff]   ;;  %11238 = vmatpush3.bf16.msra.mxu1 %v12767_v26 }
0x1061   :  { %9783 = vmatprep.subr.bf16.mxu0 %v12678_v21  ;;  %v12769_v46 = vld [vmem:[%s14448_s18 + $0x8] sm:$0xff]   ;;  %11239 = vmatprep.subr.bf16.mxu1 %v12768_v23  ;;  %v12770_v21 = vld [vmem:[%s14448_s18 + $0x50] sm:$0xff]  }
0x1062   :  { %9208 = vadd.xlane.f32.xlu0 %v9207_v24  ;;  %v9212_v27 = vadd.f32 %v9211_v18, %v9204_v47  ;;  %v12717_v24 = vld [vmem:[#allocation27 + $0xf4] ss:$8 sps:$4 sm:$0xff]   ;;  %v12715_v18 = vld [vmem:[#allocation27 + $0xf0] ss:$8 sps:$4 sm:$0xff]  }
0x1064   :  { %9213 = vadd.xlane.f32.xlu1 %v9212_v27  ;;  %9784 = vmatpush1.bf16.msra.mxu0 %v12676_v53  ;;  %v12720_v27 = vld [vmem:[#allocation27 + $0x104] ss:$8 sps:$4 sm:$0xff]   ;;  %v12771_v53 = vld [vmem:[%s14448_s18 + $0x10] sm:$0xff]  }
0x1065   :  { %9785 = vmatprep.subr.bf16.mxu0 %v12681_v6  ;;  %11240 = vmatpush3.bf16.msra.mxu1 %v12769_v46  ;;  %v12772_v6 = vld [vmem:[%s14448_s18 + $0x58] sm:$0xff]  }
0x1066   :  { %11241 = vmatprep.subr.bf16.mxu1 %v12770_v21 }
0x1068   :  { %9786 = vmatpush1.bf16.msra.mxu0 %v12679_v56  ;;  %v12773_v56 = vld [vmem:[%s14448_s18 + $0x18] sm:$0xff]  }
0x1069   :  { %9787 = vmatprep.subr.bf16.mxu0 %v12684_v10  ;;  %11242 = vmatpush3.bf16.msra.mxu1 %v12771_v53  ;;  %v12774_v10 = vld [vmem:[%s14448_s18 + $0x60] sm:$0xff]  }
0x106a   :  { %11243 = vmatprep.subr.bf16.mxu1 %v12772_v6 }
0x106c   :  { %9788 = vmatpush1.bf16.msra.mxu0 %v12682_v30  ;;  %v12775_v30 = vld [vmem:[%s14448_s18 + $0x20] sm:$0xff]  }
0x106d   :  { %9789 = vmatprep.subr.bf16.mxu0 %v12687_v50  ;;  %11244 = vmatpush3.bf16.msra.mxu1 %v12773_v56  ;;  %v12776_v50 = vld [vmem:[%s14448_s18 + $0x68] sm:$0xff]  }
0x106e   :  { %11245 = vmatprep.subr.bf16.mxu1 %v12774_v10 }
0x1070   :  { %9790 = vmatpush1.bf16.msra.mxu0 %v12685_v17  ;;  %v12777_v17 = vld [vmem:[%s14448_s18 + $0x28] sm:$0xff]  }
0x1071   :  { %11246 = vmatpush3.bf16.msra.mxu1 %v12775_v30 }
0x1072   :  { %11247 = vmatprep.subr.bf16.mxu1 %v12776_v50 }
0x1075   :  { %11248 = vmatpush3.bf16.msra.mxu1 %v12777_v17 }
0x10ef   :  { %v9209_v2 = vpop.xlane.xlu0 %9208 }
0x10f0   :  { %v9215_v12 = vmul.f32 0.001953125, %v9209_v2 }
0x10f1   :  { %v9214_v15 = vpop.xlane.xlu1 %9213 }
0x10f2   :  { %v14304_v57 = vsub.f32 %v9197_v37, %v9215_v12  ;;  %v14306_v31 = vsub.f32 %v9198_v33, %v9215_v12  ;;  %v9216_v11 = vmul.f32 0.001953125, %v9214_v15  ;;  %v14308_v55 = vsub.f32 %v9199_v38, %v9215_v12  ;;  %v12690_v37 = vld [vmem:[#allocation27 + $0x64] ss:$8 sps:$4 sm:$0xff]   ;;  %v12694_v33 = vld [vmem:[#allocation27 + $0x80] ss:$8 sps:$4 sm:$0xff]  }
0x10f3   :  { %v14310_v36 = vsub.f32 %v9200_v22, %v9215_v12  ;;  %9791 = vmatprep.subr.bf16.mxu0 %v12690_v37  ;;  %v12700_v38 = vld [vmem:[#allocation27 + $0xa0] ss:$8 sps:$4 sm:$0xff]  }
0x10f4   :  { %v14312_v29 = vsub.f32 %v9201_v41, %v9216_v11  ;;  %v14314_v39 = vsub.f32 %v9202_v9, %v9216_v11  ;;  %v9225_v59 = vmul.f32 %v14304_v57, %v14304_v57  ;;  %v9226_v45 = vmul.f32 %v14306_v31, %v14306_v31  ;;  %9792 = vmatpush1.bf16.msra.mxu0 %v12688_v43  ;;  %v12702_v41 = vld [vmem:[#allocation27 + $0xa4] ss:$8 sps:$4 sm:$0xff]   ;;  %v12703_v9 = vld [vmem:[#allocation27 + $0xb0] ss:$8 sps:$4 sm:$0xff]   ;;  %v12706_v22 = vld [vmem:[#allocation27 + $0xc0] ss:$8 sps:$4 sm:$0xff]  }
0x10f5   :  { %v9227_v48 = vmul.f32 %v14308_v55, %v14308_v55  ;;  %v14322_v35 = vsub.f32 %v9203_v5, %v9216_v11  ;;  %v14324_v49 = vsub.f32 %v9204_v47, %v9216_v11  ;;  %v9228_v34 = vmul.f32 %v14310_v36, %v14310_v36  ;;  %9793 = vmatprep.subr.bf16.mxu0 %v12693_v25  ;;  %v12711_v5 = vld [vmem:[#allocation27 + $0xd4] ss:$8 sps:$4 sm:$0xff]   ;;  %v12712_v47 = vld [vmem:[#allocation27 + $0xe0] ss:$8 sps:$4 sm:$0xff]  }
0x10f6   :  { %v9233_v44 = vadd.f32 %v9226_v45, %v9225_v59  ;;  %v9229_v32 = vmul.f32 %v14312_v29, %v14312_v29  ;;  %v9230_v51 = vmul.f32 %v14314_v39, %v14314_v39 }
0x10f7   :  { %v9231_v3 = vmul.f32 %v14322_v35, %v14322_v35  ;;  %v9232_v28 = vmul.f32 %v14324_v49, %v14324_v49 }
0x10f8   :  { %v9234_v16 = vadd.f32 %v9233_v44, %v9227_v48  ;;  %v9238_v0 = vadd.f32 %v9230_v51, %v9229_v32  ;;  %9794 = vmatpush1.bf16.msra.mxu0 %v12691_v40  ;;  %v9257_v48 = vld [vmem:[#allocation24] sm:$0xf]  ;;  %v9287_v44 = vld [vmem:[#allocation25] sm:$0xf] }
0x10f9   :  { %9795 = vmatprep.subr.bf16.mxu0 %v12696_v20  ;;  %v9262_v32 = vrot.slane %v9257_v48, %v13704_v62  ;;  %v9266_v51 = vrot.slane %v9257_v48, %v13698_v60  ;;  %v9300_v25 = vrot.slane %v9287_v44, %v13707_v63  ;;  %v9304_v40 = vrot.slane %v9287_v44, %v13701_v61 }
0x10fa   :  { %v9235_v58 = vadd.f32 %v9234_v16, %v9228_v34  ;;  %v9239_v14 = vadd.f32 %v9238_v0, %v9231_v3  ;;  %v9292_v16 = vrot.slane %v9287_v44, %v13704_v62  ;;  %v9296_v3 = vrot.slane %v9287_v44, %v13698_v60 }
0x10fb   :  { %v9270_v0 = vrot.slane %v9257_v48, %v13707_v63 }
0x10fc   :  { %9236 = vadd.xlane.f32.xlu0 %v9235_v58  ;;  %v9240_v42 = vadd.f32 %v9239_v14, %v9232_v28  ;;  %9796 = vmatpush1.bf16.msra.mxu0 %v12694_v33  ;;  %v9274_v58 = vrot.slane %v9257_v48, %v13701_v61  ;;  %v13291_v33 = vmov 1983009808  }
0x10fd   :  { %9797 = vmatprep.subr.bf16.mxu0 %v12699_v7  ;;  %v14384_v20 = vunpack.c.l.s4 %v13291_v33 }
0x10fe   :  { %9241 = vadd.xlane.f32.xlu1 %v9240_v42 }
0x1100   :  { %9798 = vmatpush1.bf16.msra.mxu0 %v12697_v52 }
0x1101   :  { %9799 = vmatprep.subr.bf16.mxu0 %v12702_v41 }
0x1104   :  { %9800 = vmatpush1.bf16.msra.mxu0 %v12700_v38 }
0x1105   :  { %9801 = vmatprep.subr.bf16.mxu0 %v12705_v8 }
0x1108   :  { %9802 = vmatpush1.bf16.msra.mxu0 %v12703_v9 }
0x1109   :  { %9803 = vmatprep.subr.bf16.mxu0 %v12708_v13 }
0x110c   :  { %9804 = vmatpush1.bf16.msra.mxu0 %v12706_v22 }
0x110d   :  { %9805 = vmatprep.subr.bf16.mxu0 %v12711_v5 }
0x1110   :  { %9806 = vmatpush1.bf16.msra.mxu0 %v12709_v19 }
0x1111   :  { %9807 = vmatprep.subr.bf16.mxu0 %v12714_v1 }
0x1114   :  { %9808 = vmatpush1.bf16.msra.mxu0 %v12712_v47 }
0x1115   :  { %9809 = vmatprep.subr.bf16.mxu0 %v12717_v24 }
0x1118   :  { %9810 = vmatpush1.bf16.msra.mxu0 %v12715_v18 }
0x1119   :  { %9820 = vmatprep.subr.bf16.mxu0 %v12720_v27 }
0x1189   :  { %v9237_v2 = vpop.xlane.xlu0 %9236 }
0x118a   :  { %v9243_v12 = vmul.f32 0.001953125, %v9237_v2 }
0x118b   :  { %v9242_v15 = vpop.xlane.xlu1 %9241 }
0x118c   :  { %v9245_v11 = vadd.f32 1e-05, %v9243_v12  ;;  %v9244_v59 = vmul.f32 0.001953125, %v9242_v15 }
0x118e   :  { %12854 = vrsqrt.f32 %v9245_v11  ;;  %v9246_v45 = vadd.f32 1e-05, %v9244_v59 }
0x1190   :  { %12856 = vrsqrt.f32 %v9246_v45 }
0x1198   :  { %v12855_v34 = vpop.eup %12854 }
0x1199   :  { %v9249_v28 = vmul.f32 %v12855_v34, %v14304_v57  ;;  %v9250_v14 = vmul.f32 %v12855_v34, %v14306_v31  ;;  %v9251_v42 = vmul.f32 %v12855_v34, %v14308_v55  ;;  %v9252_v37 = vmul.f32 %v12855_v34, %v14310_v36 }
0x119a   :  { %v12857_v43 = vpop.eup %12856 }
0x119b   :  { %v9253_v7 = vmul.f32 %v12857_v43, %v14312_v29  ;;  %v9254_v52 = vmul.f32 %v12857_v43, %v14314_v39  ;;  %v9279_v41 = vmul.f32 %v9262_v32, %v9249_v28  ;;  %v9280_v57 = vmul.f32 %v9266_v51, %v9250_v14 }
0x119c   :  { %v9255_v31 = vmul.f32 %v12857_v43, %v14322_v35  ;;  %v9256_v55 = vmul.f32 %v12857_v43, %v14324_v49  ;;  %v9281_v38 = vmul.f32 %v9270_v0, %v9251_v42  ;;  %v9282_v36 = vmul.f32 %v9274_v58, %v9252_v37 }
0x119d   :  { %v9283_v8 = vmul.f32 %v9262_v32, %v9253_v7  ;;  %v9284_v9 = vmul.f32 %v9266_v51, %v9254_v52  ;;  %v9309_v63 = vadd.f32 %v9292_v16, %v9279_v41  ;;  %v9310_v13 = vadd.f32 %v9296_v3, %v9280_v57 }
0x119e   :  { %v9285_v61 = vmul.f32 %v9270_v0, %v9255_v31  ;;  %v9286_v22 = vmul.f32 %v9274_v58, %v9256_v55  ;;  %v9311_v5 = vadd.f32 %v9300_v25, %v9281_v38  ;;  %v9312_v19 = vadd.f32 %v9304_v40, %v9282_v36 }
0x119f   :  { %v9313_v1 = vadd.f32 %v9292_v16, %v9283_v8  ;;  %v9314_v29 = vadd.f32 %v9296_v3, %v9284_v9  ;;  %v9317_v47 = vrot.slane %v9309_v63, 4  ;;  %v9323_v39 = vrot.slane %v9310_v13, 4 }
0x11a0   :  { %v9315_v24 = vadd.f32 %v9300_v25, %v9285_v61  ;;  %v9316_v18 = vadd.f32 %v9304_v40, %v9286_v22  ;;  %v9329_v27 = vrot.slane %v9311_v5, 4  ;;  %v9335_v35 = vrot.slane %v9312_v19, 4 }
0x11a1   :  { %v9318_v4 = vadd.f32 %v9317_v47, %v9309_v63  ;;  %v9324_v49 = vadd.f32 %v9323_v39, %v9310_v13  ;;  %v9346_v26 = vrot.slane %v9313_v1, 4  ;;  %v9352_v23 = vrot.slane %v9314_v29, 4 }
0x11a2   :  { %v9330_v46 = vadd.f32 %v9329_v27, %v9311_v5  ;;  %v9336_v21 = vadd.f32 %v9335_v35, %v9312_v19  ;;  %v9358_v53 = vrot.slane %v9315_v24, 4  ;;  %v9364_v6 = vrot.slane %v9316_v18, 4 }
0x11a3   :  { %v9319_v56 = vrot.slane %v9318_v4, 2  ;;  %v9325_v10 = vrot.slane %v9324_v49, 2  ;;  %v9347_v30 = vadd.f32 %v9346_v26, %v9313_v1  ;;  %v9353_v50 = vadd.f32 %v9352_v23, %v9314_v29 }
0x11a4   :  { %v9331_v17 = vrot.slane %v9330_v46, 2  ;;  %v9337_v2 = vrot.slane %v9336_v21, 2  ;;  %v9359_v12 = vadd.f32 %v9358_v53, %v9315_v24  ;;  %v9365_v15 = vadd.f32 %v9364_v6, %v9316_v18  ;;  %v12718_v18 = vld [vmem:[#allocation27 + $0x100] ss:$8 sps:$4 sm:$0xff]   ;;  %v12726_v53 = vld [vmem:[#allocation27 + $0x124] ss:$8 sps:$4 sm:$0xff]  }
0x11a5   :  { %v9320_v11 = vadd.f32 %v9319_v56, %v9318_v4  ;;  %v9326_v59 = vadd.f32 %v9325_v10, %v9324_v49  ;;  %v9348_v45 = vrot.slane %v9347_v30, 2  ;;  %v9354_v48 = vrot.slane %v9353_v50, 2  ;;  %v12723_v49 = vld [vmem:[#allocation27 + $0x114] ss:$8 sps:$4 sm:$0xff]   ;;  %v12724_v56 = vld [vmem:[#allocation27 + $0x120] ss:$8 sps:$4 sm:$0xff]  }
0x11a6   :  { %v9332_v44 = vadd.f32 %v9331_v17, %v9330_v46  ;;  %v9338_v32 = vadd.f32 %v9337_v2, %v9336_v21  ;;  %v9360_v51 = vrot.slane %v9359_v12, 2  ;;  %v9366_v34 = vrot.slane %v9365_v15, 2  ;;  %v12721_v46 = vld [vmem:[#allocation27 + $0x110] ss:$8 sps:$4 sm:$0xff]   ;;  %v12729_v10 = vld [vmem:[#allocation27 + $0x134] ss:$8 sps:$4 sm:$0xff]  }
0x11a7   :  { %v9321_v16 = vrot.slane %v9320_v11, 1  ;;  %v9327_v3 = vrot.slane %v9326_v59, 1  ;;  %v9349_v0 = vadd.f32 %v9348_v45, %v9347_v30  ;;  %v9355_v58 = vadd.f32 %v9354_v48, %v9353_v50  ;;  %v12727_v30 = vld [vmem:[#allocation27 + $0x130] ss:$8 sps:$4 sm:$0xff]   ;;  %v12732_v50 = vld [vmem:[#allocation27 + $0x144] ss:$8 sps:$4 sm:$0xff]  }
0x11a8   :  { %v9333_v28 = vrot.slane %v9332_v44, 1  ;;  %v9339_v14 = vrot.slane %v9338_v32, 1  ;;  %v9361_v42 = vadd.f32 %v9360_v51, %v9359_v12  ;;  %v9367_v37 = vadd.f32 %v9366_v34, %v9365_v15  ;;  %v12730_v17 = vld [vmem:[#allocation27 + $0x140] ss:$8 sps:$4 sm:$0xff]   ;;  %v12735_v2 = vld [vmem:[#allocation27 + $0x154] ss:$8 sps:$4 sm:$0xff]  }
0x11a9   :  { %v9322_v43 = vadd.f32 %v9321_v16, %v9320_v11  ;;  %v9328_v25 = vadd.f32 %v9327_v3, %v9326_v59  ;;  %v9350_v40 = vrot.slane %v9349_v0, 1  ;;  %v9356_v33 = vrot.slane %v9355_v58, 1  ;;  %v12733_v12 = vld [vmem:[#allocation27 + $0x150] ss:$8 sps:$4 sm:$0xff]   ;;  %v12738_v15 = vld [vmem:[#allocation27 + $0x164] ss:$8 sps:$4 sm:$0xff]  }
0x11aa   :  { %v9334_v7 = vadd.f32 %v9333_v28, %v9332_v44  ;;  %v9362_v52 = vrot.slane %v9361_v42, 1  ;;  %v9368_v41 = vrot.slane %v9367_v37, 1  ;;  %v10050_v57 = vunpack.c.0.s8 %v14384_v20  ;;  %v12736_v11 = vld [vmem:[#allocation27 + $0x160] ss:$8 sps:$4 sm:$0xff]   ;;  %v12741_v59 = vld [vmem:[#allocation27 + $0x174] ss:$8 sps:$4 sm:$0xff]  }
0x11ab   :  { %v9351_v31 = vadd.f32 %v9350_v40, %v9349_v0  ;;  %v9357_v55 = vadd.f32 %v9356_v33, %v9355_v58  ;;  %v9340_v38 = vadd.f32 %v9339_v14, %v9338_v32  ;;  %v9342_v9 = vmul.f32 0.125, %v9322_v43  ;;  %v12739_v45 = vld [vmem:[#allocation27 + $0x170] ss:$8 sps:$4 sm:$0xff]   ;;  %v12744_v48 = vld [vmem:[#allocation27 + $0x184] ss:$8 sps:$4 sm:$0xff]  }
0x11ac   :  { %v9363_v36 = vadd.f32 %v9362_v52, %v9361_v42  ;;  %v9369_v8 = vadd.f32 %v9368_v41, %v9367_v37  ;;  %v9343_v63 = vmul.f32 0.125, %v9328_v25  ;;  %v9344_v22 = vmul.f32 0.125, %v9334_v7  ;;  %v12742_v44 = vld [vmem:[#allocation27 + $0x180] ss:$8 sps:$4 sm:$0xff]   ;;  %v12747_v32 = vld [vmem:[#allocation27 + $0x194] ss:$8 sps:$4 sm:$0xff]  }
0x11ad   :  { %v9370_v13 = vmul.f32 0.125, %v9351_v31  ;;  %v9371_v61 = vmul.f32 0.125, %v9357_v55  ;;  %v10053_v1 = vsub.s32 %v10050_v57, %v13695_v54  ;;  %v9345_v20 = vmul.f32 0.125, %v9340_v38  ;;  %v12745_v51 = vld [vmem:[#allocation27 + $0x190] ss:$8 sps:$4 sm:$0xff]   ;;  %v12780_v41 = vld [vmem:[%s14448_s18 + $0x78] sm:$0xff]  }
0x11ae   :  { %v9372_v5 = vmul.f32 0.125, %v9363_v36  ;;  %v9373_v19 = vmul.f32 0.125, %v9369_v8  ;;  %v12750_v34 = vld [vmem:[#allocation27 + $0x1a4] ss:$8 sps:$4 sm:$0xff]   ;;  %v12748_v16 = vld [vmem:[#allocation27 + $0x1a0] ss:$8 sps:$4 sm:$0xff]  }
0x11af   :  { %v9375_v29 = vsel %vm9374_vm5, %v9342_v9, %v9370_v13  ;;  %v9376_v47 = vsel %vm9374_vm5, %v9343_v63, %v9371_v61  ;;  %v12753_v3 = vld [vmem:[#allocation27 + $0x1b4] ss:$8 sps:$4 sm:$0xff]   ;;  %v12751_v0 = vld [vmem:[#allocation27 + $0x1b0] ss:$8 sps:$4 sm:$0xff]   ;;  %v12756_v58 = vld [vmem:[#allocation27 + $0x1c4] ss:$8 sps:$4 sm:$0xff]  }
0x11b0   :  { %v9380_v39 = vpack.c.bf16 %v9376_v47, %v9376_v47  ;;  %v10046_v24 = vcombine.low %v9375_v29, %v9376_v47  ;;  %v9379_v27 = vpack.c.bf16 %v9375_v29, %v9375_v29  ;;  %v14395_v35 = vsel %vm9374_vm5, %v9344_v22, %v9372_v5  ;;  %v12754_v28 = vld [vmem:[#allocation27 + $0x1c0] ss:$8 sps:$4 sm:$0xff]   ;;  %v12759_v14 = vld [vmem:[#allocation27 + $0x1d4] ss:$8 sps:$4 sm:$0xff]   ;;  %v12757_v42 = vld [vmem:[#allocation27 + $0x1d0] ss:$8 sps:$4 sm:$0xff]  }
0x11b1   :  { %v9378_v4 = vsel %vm9374_vm5, %v9345_v20, %v9373_v19  ;;  %v12762_v37 = vld [vmem:[#allocation27 + $0x1e4] ss:$8 sps:$4 sm:$0xff]   ;;  %v12760_v43 = vld [vmem:[#allocation27 + $0x1e0] ss:$8 sps:$4 sm:$0xff]   ;;  %v12765_v25 = vld [vmem:[#allocation27 + $0x1f4] ss:$8 sps:$4 sm:$0xff]   ;;  %v9381_v33 = vpack.c.bf16 %v14395_v35, %v14395_v35 }
0x11b2   :  { %9811 = vmatprep.mubr.bf16.mxu0 %v9380_v39  ;;  %v9382_v26 = vpack.c.bf16 %v9378_v4, %v9378_v4  ;;  %v10047_v23 = vcombine.low %v14395_v35, %v9378_v4  ;;  %v10054_v54 = vrot.slane %v10046_v24, %v10053_v1  ;;  %v12763_v40 = vld [vmem:[#allocation27 + $0x1f0] ss:$8 sps:$4 sm:$0xff]   ;;  %v12781_v57 = vld [vmem:[%s14448_s18 + $0x38] sm:$0xff]   ;;  %v9447_v31 = vld [vmem:[#allocation28] sm:$0x3] }
0x11b3   :  { %9812 = vmatmul.mubr.bf16.vlgmr.msra.gmra.mrb[68].mxu0 %v9379_v27  ;;  %v12778_v7 = vld [vmem:[%s14448_s18 + $0x70] sm:$0xff]   ;;  %v9452_v55 = vrot.slane %v9447_v31, %v13704_v62  ;;  %v9456_v38 = vrot.slane %v9447_v31, %v13698_v60 }
0x11b4   :  { %9821 = vmatpush1.bf16.msra.mxu0 %v12718_v18  ;;  %9852 = vmatprep.mubr.bf16.mxu0 %v9382_v26  ;;  %v10061_v21 = vrot.slane %v10047_v23, %v10053_v1  ;;  %v12779_v52 = vld [vmem:[%s14448_s18 + $0x30] sm:$0xff]   ;;  %s13292_s18 = smov [#allocation30]  }
0x11b5   :  { %9822 = vmatprep.subr.bf16.mxu0 %v12723_v49  ;;  %11249 = vmatprep.subr.bf16.mxu1 %v12778_v7  ;;  %s10073_s8 = sshll.u32 %s13292_s18, 4  ;;  %s10074_s8 = int_to_ptr.vmem [resolvable:$true] %s10073_s8 }
0x11b6   :  { %v10062_v6 = vcombine.low %v10054_v54, %v10061_v21  ;;  %11250 = vmatpush3.bf16.msra.mxu1 %v12779_v52  ;;  %s13222_s30 = scalar_lea.vmem %s10074_s8, 128  ;;  %p13227_p3 = scmp.lt.s32.totalorder %s10074_s8, %s10074_s8 }
0x11b7   :  { %11251 = vmatprep.subr.bf16.mxu1 %v12780_v41  ;;  %p13223_p2 = scmp.ne.s32.totalorder %s10074_s8, %s13222_s30  ;;  %p13228_p4 = scmp.lt.s32.totalorder %s13222_s30, %s13222_s30 }
0x11b8   :  { %9823 = vmatpush1.bf16.msra.mxu0 %v12721_v46  ;;  %10064 = vst [vmem:[#allocation30] sm:$0xff] %v10062_v6 }
0x11b9   :  { %9824 = vmatprep.subr.bf16.mxu0 %v12726_v53  ;;  %p13229_p5 = por %p13228_p4, %p13227_p3 }
0x11ba   :  { %11252 = vmatpush3.bf16.msra.mxu1 %v12781_v57 }
0x11bb   :  { %p13230_p6 = pnand %p13229_p5, %p13223_p2 }
0x11bc   :  { %9825 = vmatpush1.bf16.msra.mxu0 %v12724_v56 }
0x11bd   :  { %9826 = vmatprep.subr.bf16.mxu0 %v12729_v10 }
0x11c0   :  { %9827 = vmatpush1.bf16.msra.mxu0 %v12727_v30 }
0x11c1   :  { %9828 = vmatprep.subr.bf16.mxu0 %v12732_v50 }
0x11c4   :  { %9829 = vmatpush1.bf16.msra.mxu0 %v12730_v17 }
0x11c5   :  { %9830 = vmatprep.subr.bf16.mxu0 %v12735_v2 }
0x11c8   :  { %9831 = vmatpush1.bf16.msra.mxu0 %v12733_v12 }
0x11c9   :  { %9832 = vmatprep.subr.bf16.mxu0 %v12738_v15 }
0x11cc   :  { %9833 = vmatpush1.bf16.msra.mxu0 %v12736_v11 }
0x11cd   :  { %9834 = vmatprep.subr.bf16.mxu0 %v12741_v59 }
0x11d0   :  { %9835 = vmatpush1.bf16.msra.mxu0 %v12739_v45 }
0x11d1   :  { %9836 = vmatprep.subr.bf16.mxu0 %v12744_v48 }
0x11d4   :  { %9837 = vmatpush1.bf16.msra.mxu0 %v12742_v44 }
0x11d5   :  { %9838 = vmatprep.subr.bf16.mxu0 %v12747_v32 }
0x11d8   :  { %9839 = vmatpush1.bf16.msra.mxu0 %v12745_v51 }
0x11d9   :  { %9840 = vmatprep.subr.bf16.mxu0 %v12750_v34 }
0x11dc   :  { %9841 = vmatpush1.bf16.msra.mxu0 %v12748_v16 }
0x11dd   :  { %9842 = vmatprep.subr.bf16.mxu0 %v12753_v3 }
0x11e0   :  { %9843 = vmatpush1.bf16.msra.mxu0 %v12751_v0 }
0x11e1   :  { %9844 = vmatprep.subr.bf16.mxu0 %v12756_v58 }
0x11e4   :  { %9845 = vmatpush1.bf16.msra.mxu0 %v12754_v28 }
0x11e5   :  { %9846 = vmatprep.subr.bf16.mxu0 %v12759_v14 }
0x11e8   :  { %9847 = vmatpush1.bf16.msra.mxu0 %v12757_v42 }
0x11e9   :  { %9848 = vmatprep.subr.bf16.mxu0 %v12762_v37 }
0x11ec   :  { %9849 = vmatpush1.bf16.msra.mxu0 %v12760_v43 }
0x11ed   :  { %9850 = vmatprep.subr.bf16.mxu0 %v12765_v25 }
0x11f0   :  { %9851 = vmatpush1.bf16.msra.mxu0 %v12763_v40 }
0x11f3   :  { %9853 = vmatmul.mubr.bf16.vlgmr.msra.gmra.mrb[68].mxu0 %v9381_v33 }
0x12c6   :  { %v9854_v36 = vpop.f32.mrb[68].mxu0 }
0x12c7   :  { %v11415_v8 = vadd.f32 %v9854_v36, %v9452_v55  ;;  %v9856_v9 = vpop.f32.mrb[69].mxu0 }
0x12c8   :  { %v11416_v63 = vadd.f32 %v9856_v9, %v9456_v38  ;;  %v9858_v13 = vpop.f32.mrb[70].mxu0 }
0x12c9   :  { %v9861_v61 = vmax.f32 %v11415_v8, 0.0  ;;  %v9859_v22 = vpop.f32.mrb[71].mxu0 }
0x12ca   :  { %v9862_v5 = vmax.f32 %v11416_v63, 0.0 }
0x12cb   :  { %v9863_v1 = vpack.c.bf16 %v9861_v61, %v9861_v61 }
0x12cc   :  { %v9864_v19 = vpack.c.bf16 %v9862_v5, %v9862_v5 }
0x12ce   :  { %10032 = vmatprep.mubr.bf16.mxu1 %v9864_v19 }
0x12cf   :  { %10033 = vmatmul.mubr.bf16.vlgmr.msra.gmra.mrb[56].mxu1 %v9863_v1 }
0x12d0   :  { %13233 = shalt.err (!%p13230_p6)
}
0x12d1   :  { %s13234_s16 = scalar_lea.hbm %s14451_s21, 128 }
0x12d2   :  { %p13235_p7 = scmp.ne.s32.totalorder %s14451_s21, %s13234_s16  ;;  %p13238_p8 = scmp.lt.u32.totalorder %s13234_s16, %s14451_s21 }
0x12d4   :  { %p13240_p9 = pnand %p13238_p8, %p13235_p7 }
0x12d6   :  { %13243 = shalt.err (!%p13240_p9)
}
0x12d7   :  { %10076 = dma.vmem_to_hbm [thread:$0]  %s10074_s8, 128, %s14451_s21, [#allocation6]   ;;  %v11188_v62 = vld [vmem:[#allocation3] ss:$0 sm:$0xff]  ;;  %vm10040_vm6 = vcmask 1024  }
0x13a2   :  { %v11253_v60 = vpop.f32.mrb[56].mxu1 }
0x13a3   :  { %v11254_v29 = vpop.f32.mrb[57].mxu1 }
0x13a4   :  { %v11255_v47 = vadd.f32 %v11254_v29, %v11253_v60  ;;  %v11256_v20 = vpop.f32.mrb[58].mxu1 }
0x13a5   :  { %v11257_v39 = vpop.f32.mrb[59].mxu1 }
0x13a6   :  { %v10035_v24 = vadd.f32 %v11255_v47, %v11188_v62 }
0x13a8   :  { %10041 = vst.msk [vmem:[%s14450_s20] sm:$0x3] %vm10040_vm6, %v10035_v24 }
0x13a9   :  { %13262 = dma.done.wait [#allocation6], 128  }
0x13aa   :  { %13263 = vsyncadd [#allocation6], 4294967168 }
0x13ab   :  { %10082 = vsyncpa [#allocation5], 1 }
0x13ac   :  { %10083 = vsyncpa [#allocation8], 1 }
0x13ad   :  { %10084 = vsyncpa [#allocation11], 1 }
0x13ae   :  { %10085 = vsyncpa [#allocation14], 1 }
0x13af   :  { %10086 = vsyncpa [#allocation17], 1 }
0x13b0   :  { %10087 = vsyncpa [#allocation20], 1 }
0x13b1   :  { %10088 = vsyncpa [#allocation23], 1 }
0x13b2   :  { %10089 = vsyncpa [#allocation26], 1 }
0x13b3   :  { %10090 = vsyncpa [#allocation29], 1 }
0x13b4   :  { %10091 = vsyncpa [#allocation6], 1 }

</bundles_post_ra>
